<compile_context>
chip_gen: v5e
topology: v5e:2x2
jax: 0.10.0
libtpu: 0.0.40
codegen_flags: <defaults>
</compile_context>

<pallas_src>
import functools
import numpy as np
import jax
import jax.numpy as jnp
from jax import lax
from jax.experimental import pallas as pl
from jax.experimental.pallas import tpu as pltpu

# ----------------- small, forward-consistent hyperparameters -----------------
SRC_VOCAB = 64
TGT_VOCAB = 48
EMBED_DIM = 32
HIDDEN_DIM = 32
N_LAYERS = 2
PAD_IDX = 1
EOS_IDX = 2
SEQ_LEN = 8
BATCH = 1
MAX_LEN = 5
V_PAD = 128          # lane-dense padded target-vocab width for the logits slab
A_PAD = 128          # lane-dense padded width for the alphas slab

_VMEM = pl.BlockSpec(memory_space=pltpu.MemorySpace.VMEM)
_SMEM = pl.BlockSpec(memory_space=pltpu.MemorySpace.SMEM)
_dot = functools.partial(jnp.dot, preferred_element_type=jnp.float32)
_BF = jnp.bfloat16

PACKED_NAMES = (
    'enc_emb',
    'enc0_wih_f', 'enc0_wih_b', 'enc0_bih', 'enc0_whh', 'enc0_bhh',
    'enc1_wih_f', 'enc1_wih_b', 'enc1_bih', 'enc1_whh', 'enc1_bhh',
    'dec_emb',
    'd0_wih_e', 'd0_wih_c', 'd0_whh', 'd0_bih', 'd0_bhh',
    'd1_wih', 'd1_whh', 'd1_bih', 'd1_bhh',
    'attn_wenc', 'attn_wdec', 'attn_v',
    'out_w_h', 'out_w_c', 'out_b',
)


def _sigmoid(x):
    # single-EUP sigmoid (== 1/(1+exp(-x))), cheaper and safer on the
    # recurrence critical path than exp + divide.
    return 0.5 * (jnp.tanh(0.5 * x) + 1.0)


def _gru_step(gi, h, whh, bhh):
    """Unidirectional PyTorch GRU cell, gate layout [r|z|n].
    gi already holds x @ W_ih + b_ih (f32)."""
    H = HIDDEN_DIM
    gh = _dot(h.astype(_BF), whh) + bhh                          # (1, 3H)
    rz = _sigmoid(gi[:, :2 * H] + gh[:, :2 * H])
    r, z = rz[:, :H], rz[:, H:2 * H]
    n = jnp.tanh(gi[:, 2 * H:] + r * gh[:, 2 * H:])
    return (1.0 - z) * n + z * h


def _bigru_step(gi, h_cat, whh, bhh):
    """Fused forward+backward GRU step.  Lane layout of the 6H gate row is
    [r_f r_b z_f z_b n_f n_b]; h_cat is [h_f | h_b] of shape (1, 2H); whh is
    the (2H, 6H) block-diagonal recurrent weight."""
    H = HIDDEN_DIM
    gh = _dot(h_cat.astype(_BF), whh) + bhh                      # one MXU push
    rz = _sigmoid(gi[:, :4 * H] + gh[:, :4 * H])                 # one (1,128) EUP call
    r, z = rz[:, :2 * H], rz[:, 2 * H:4 * H]
    n = jnp.tanh(gi[:, 4 * H:] + r * gh[:, 4 * H:])              # (1, 2H)
    return (1.0 - z) * n + z * h_cat


# ------------------------ the single fused forward kernel --------------------
def _seq2seq_kernel(
        src_ref,
        enc_emb_ref,
        enc0_wih_f, enc0_wih_b, enc0_bih, enc0_whh, enc0_bhh,
        enc1_wih_f, enc1_wih_b, enc1_bih, enc1_whh, enc1_bhh,
        dec_emb_ref,
        d0_wih_e, d0_wih_c, d0_whh, d0_bih, d0_bhh,
        d1_wih, d1_whh, d1_bih, d1_bhh,
        attn_wenc, attn_wdec, attn_v,
        out_w_h, out_w_c, out_b,
        logits_ref, alphas_ref,
        x0_scr, l0_scr, l1_scr):
    S, H, E = SEQ_LEN, HIDDEN_DIM, EMBED_DIM

    alphas_ref[...] = jnp.zeros_like(alphas_ref)

    # -------- source embedding: SMEM token ids -> dynamic row gather ---------
    for t in range(S):
        x0_scr[t:t + 1, :] = enc_emb_ref[pl.ds(src_ref[t], 1), :]
    x0 = x0_scr[...].astype(_BF)                                 # (S, E)

    # -------- encoder layer 0: fwd+bwd fused, input gates hoisted -------------
    gi0f = _dot(x0, enc0_wih_f[...]) + enc0_bih[...]             # (S, 6H)
    gi0b = _dot(x0, enc0_wih_b[...])                             # (S, 6H)
    whh0, bhh0 = enc0_whh[...], enc0_bhh[...]
    h = jnp.zeros((1, 2 * H), jnp.float32)
    for t in range(S):
        tb = S - 1 - t
        h = _bigru_step(gi0f[t:t + 1, :] + gi0b[tb:tb + 1, :], h, whh0, bhh0)
        l0_scr[t:t + 1, 0:H] = h[:, 0:H]                 # fwd output at time t
        l0_scr[tb:tb + 1, H:2 * H] = h[:, H:2 * H]       # bwd output at time tb

    # -------- encoder layer 1: input = [l0_fwd | l0_bwd], gates hoisted -------
    l0 = l0_scr[...].astype(_BF)                                 # (S, 2H)
    gi1f = _dot(l0, enc1_wih_f[...]) + enc1_bih[...]
    gi1b = _dot(l0, enc1_wih_b[...])
    whh1, bhh1 = enc1_whh[...], enc1_bhh[...]
    h = jnp.zeros((1, 2 * H), jnp.float32)
    for t in range(S):
        tb = S - 1 - t
        h = _bigru_step(gi1f[t:t + 1, :] + gi1b[tb:tb + 1, :], h, whh1, bhh1)
        l1_scr[t:t + 1, 0:H] = h[:, 0:H]
        l1_scr[tb:tb + 1, H:2 * H] = h[:, H:2 * H]
    h_dec0 = h[:, 0:H]          # encoder_hidden[-2] (layer-1 fwd final hidden)
    h_dec1 = h[:, H:2 * H]      # encoder_hidden[-1] (layer-1 bwd final hidden)

    l1 = l1_scr[...]
    encfin = l1[:, 0:H] + l1[:, H:2 * H]     # (S, H): fwd + bwd summed (torch)
    encfin_bf = encfin.astype(_BF)

    # -------- greedy attention decoder (loop-invariant weights hoisted) -------
    enc_w = _dot(encfin_bf, attn_wenc[...])                      # loop-invariant
    wdec, v_row = attn_wdec[...], attn_v[...]
    dec_emb = dec_emb_ref[...]                                   # (V_PAD, E) bf16
    d0we, d0wc = d0_wih_e[...], d0_wih_c[...]
    d0u, d0bi, d0bh = d0_whh[...], d0_bih[...], d0_bhh[...]
    d1w, d1u, d1bi, d1bh = d1_wih[...], d1_whh[...], d1_bih[...], d1_bhh[...]
    owh, owc, ob = out_w_h[...], out_w_c[...], out_b[...]

    vid = lax.broadcasted_iota(jnp.int32, (1, V_PAD), 1).astype(jnp.float32)
    onehot = (vid == float(EOS_IDX)).astype(jnp.float32)
    emb = _dot(onehot.astype(_BF), dec_emb)                      # <eos> embedding
    h0, h1 = h_dec0, h_dec1
    done = jnp.zeros((1, 1), jnp.float32)

    for t in range(MAX_LEN):
        # additive attention with the previous top-layer hidden (torch order)
        scores = jnp.tanh(enc_w + _dot(h1.astype(_BF), wdec))    # (S, H)
        e = lax.dot_general(v_row, scores.astype(_BF),
                            (((1,), (1,)), ((), ())),
                            preferred_element_type=jnp.float32)  # (1, S)
        e = e - jnp.max(e, axis=-1, keepdims=True)
        p = jnp.exp(e)
        alpha = p / jnp.sum(p, axis=-1, keepdims=True)           # (1, S)
        ctx = _dot(alpha.astype(_BF), encfin_bf)                 # (1, H)

        # 2-layer decoder GRU; rnn_in = [embedded | ctx] via split weights
        gi0 = (_dot(emb.astype(_BF), d0we) + _dot(ctx.astype(_BF), d0wc) + d0bi)
        h0 = _gru_step(gi0, h0, d0u, d0bh)
        gi1 = _dot(h0.astype(_BF), d1w) + d1bi
        h1 = _gru_step(gi1, h1, d1u, d1bh)

        # output projection onto the lane-dense 128-wide padded vocab slab
        logits = (_dot(h1.astype(_BF), owh) + _dot(ctx.astype(_BF), owc) + ob)

        not_done = 1.0 - done
        logits_ref[t:t + 1, :] = logits * not_done
        alphas_ref[t:t + 1, 0:S] = alpha * not_done

        # in-kernel greedy argmax -> one-hot -> next-token embedding (no host)
        m = jnp.max(logits, axis=-1, keepdims=True)
        cand = jnp.where(logits >= m, vid, float(V_PAD))
        tok = jnp.min(cand, axis=-1, keepdims=True)              # (1, 1)
        onehot = (vid == tok).astype(jnp.float32)
        emb = _dot(onehot.astype(_BF), dec_emb)                  # (1, E)
        done = jnp.maximum(done, (tok == float(EOS_IDX)).astype(jnp.float32))


# ------------------------------- wrapper --------------------------------------
@jax.jit
def seq2seq_forward(source, packed):
    """source: (SEQ_LEN, BATCH=1) int32.  Returns (outputs, alphas) like torch:
    outputs (maxLen, B, tgt_vocab), alphas (B, seq_len, maxLen)."""
    args = ([source.reshape(SEQ_LEN).astype(jnp.int32)] +
            [packed[k] for k in PACKED_NAMES])
    logits_pad, alphas_pad = pl.pallas_call(
        _seq2seq_kernel,
        out_shape=(jax.ShapeDtypeStruct((MAX_LEN, V_PAD), jnp.float32),
                   jax.ShapeDtypeStruct((MAX_LEN, A_PAD), jnp.float32)),
        in_specs=[_SMEM] + [_VMEM] * (len(PACKED_NAMES)),
        out_specs=(_VMEM, _VMEM),
        scratch_shapes=[pltpu.VMEM((SEQ_LEN, EMBED_DIM), jnp.float32),
                        pltpu.VMEM((SEQ_LEN, 2 * HIDDEN_DIM), jnp.float32),
                        pltpu.VMEM((SEQ_LEN, 2 * HIDDEN_DIM), jnp.float32)],
    )(*args)
    outputs = logits_pad[:, :TGT_VOCAB].reshape(MAX_LEN, BATCH, TGT_VOCAB)
    alphas = jnp.transpose(alphas_pad[:, :SEQ_LEN]).reshape(BATCH, SEQ_LEN, MAX_LEN)
    return outputs, alphas


# ------------------------- parameter initialization --------------------------
def _uniform(key, shape, k):
    return jax.random.uniform(key, shape, jnp.float32, -k, k)


def init_params(key):
    """PyTorch-like per-direction parameters (gate order r|z|n)."""
    H, E = HIDDEN_DIM, EMBED_DIM
    keys = iter(jax.random.split(key, 32))
    p = {}

    p['enc_emb'] = jax.random.normal(next(keys), (SRC_VOCAB, E),
                                     jnp.float32).at[PAD_IDX].set(0.0)

    k_h = 1.0 / np.sqrt(H)
    gru_cells = (('e0f', E), ('e0b', E), ('e1f', 2 * H), ('e1b', 2 * H),
                 ('d0', E + H), ('d1', H))
    for name, in_dim in gru_cells:                 # fused [r|z|n] gate weights
        p[f'{name}_wih'] = _uniform(next(keys), (in_dim, 3 * H), k_h)
        p[f'{name}_whh'] = _uniform(next(keys), (H, 3 * H), k_h)
        p[f'{name}_bih'] = _uniform(next(keys), (1, 3 * H), k_h)
        p[f'{name}_bhh'] = _uniform(next(keys), (1, 3 * H), k_h)

    p['dec_emb'] = jax.random.normal(next(keys), (TGT_VOCAB, E),
                                     jnp.float32).at[PAD_IDX].set(0.0)

    p['attn_wenc'] = _uniform(next(keys), (H, H), k_h)
    p['attn_wdec'] = _uniform(next(keys), (H, H), k_h)
    p['attn_v'] = _uniform(next(keys), (1, H), k_h)

    k_2h = 1.0 / np.sqrt(2 * H)
    p['out_w'] = _uniform(next(keys), (2 * H, TGT_VOCAB), k_2h)
    p['out_b'] = _uniform(next(keys), (1, TGT_VOCAB), k_2h)
    return p


def pack_params(p):
    """Host-side repack into the fused kernel layout (bf16 matmul weights,
    block-diagonal fwd+bwd recurrent weights, lane-dense padded vocab)."""
    H, E = HIDDEN_DIM, EMBED_DIM

    def scatter_cols(w, d):
        # place per-direction [r|z|n] columns into the fused 6H layout
        # [r_f r_b z_f z_b n_f n_b] for direction d (0=fwd, 1=bwd).
        out = jnp.zeros((w.shape[0], 6 * H), jnp.float32)
        out = out.at[:, d * H:(d + 1) * H].set(w[:, 0:H])
        out = out.at[:, 2 * H + d * H:2 * H + (d + 1) * H].set(w[:, H:2 * H])
        out = out.at[:, 4 * H + d * H:4 * H + (d + 1) * H].set(w[:, 2 * H:3 * H])
        return out

    q = {'enc_emb': p['enc_emb']}
    for layer, (f, b) in (('enc0', ('e0f', 'e0b')), ('enc1', ('e1f', 'e1b'))):
        q[f'{layer}_wih_f'] = scatter_cols(p[f'{f}_wih'], 0).astype(_BF)
        q[f'{layer}_wih_b'] = scatter_cols(p[f'{b}_wih'], 1).astype(_BF)
        q[f'{layer}_bih'] = (scatter_cols(p[f'{f}_bih'], 0) +
                             scatter_cols(p[f'{b}_bih'], 1))
        whh = jnp.zeros((2 * H, 6 * H), jnp.float32)
        whh = whh.at[0:H, :].set(scatter_cols(p[f'{f}_whh'], 0))
        whh = whh.at[H:2 * H, :].set(scatter_cols(p[f'{b}_whh'], 1))
        q[f'{layer}_whh'] = whh.astype(_BF)
        q[f'{layer}_bhh'] = (scatter_cols(p[f'{f}_bhh'], 0) +
                             scatter_cols(p[f'{b}_bhh'], 1))

    q['dec_emb'] = (jnp.zeros((V_PAD, E), jnp.float32)
                    .at[:TGT_VOCAB, :].set(p['dec_emb'])).astype(_BF)

    q['d0_wih_e'] = p['d0_wih'][0:E, :].astype(_BF)
    q['d0_wih_c'] = p['d0_wih'][E:E + H, :].astype(_BF)
    q['d0_whh'] = p['d0_whh'].astype(_BF)
    q['d0_bih'], q['d0_bhh'] = p['d0_bih'], p['d0_bhh']
    q['d1_wih'] = p['d1_wih'].astype(_BF)
    q['d1_whh'] = p['d1_whh'].astype(_BF)
    q['d1_bih'], q['d1_bhh'] = p['d1_bih'], p['d1_bhh']

    q['attn_wenc'] = p['attn_wenc'].astype(_BF)
    q['attn_wdec'] = p['attn_wdec'].astype(_BF)
    q['attn_v'] = p['attn_v'].astype(_BF)

    out_w_pad = (jnp.zeros((2 * H, V_PAD), jnp.float32)
                 .at[:, :TGT_VOCAB].set(p['out_w']))
    q['out_w_h'] = out_w_pad[0:H, :].astype(_BF)
    q['out_w_c'] = out_w_pad[H:2 * H, :].astype(_BF)
    # padded vocab lanes get a -1e30 bias so the in-kernel argmax ignores them
    q['out_b'] = (jnp.full((1, V_PAD), -1e30, jnp.float32)
                  .at[:, :TGT_VOCAB].set(p['out_b']))
    return q


# ----------------------------------- main -------------------------------------
if __name__ == "__main__":
    key = jax.random.PRNGKey(0)
    pkey, skey = jax.random.split(key)
    params = init_params(pkey)
    packed = pack_params(params)
    source = jax.random.randint(skey, (SEQ_LEN, BATCH), 0, SRC_VOCAB,
                                dtype=jnp.int32)
    outputs, alphas = seq2seq_forward(source, packed)
    jax.block_until_ready(outputs)
    jax.block_until_ready(alphas)
    assert outputs.shape == (MAX_LEN, BATCH, TGT_VOCAB)
    assert alphas.shape == (BATCH, SEQ_LEN, MAX_LEN)
    assert bool(jnp.all(jnp.isfinite(outputs)))
    assert bool(jnp.all(jnp.isfinite(alphas)))
    print("KERNEL_OK")
</pallas_src>

<mosaic_0001>
module attributes {stable_mosaic.version = 11 : i64} {
  func.func @_seq2seq_kernel(%arg0: memref<8xi32, #tpu.memory_space<smem>>, %arg1: memref<64x32xf32, #tpu.memory_space<vmem>>, %arg2: memref<32x192xbf16, #tpu.memory_space<vmem>>, %arg3: memref<32x192xbf16, #tpu.memory_space<vmem>>, %arg4: memref<1x192xf32, #tpu.memory_space<vmem>>, %arg5: memref<64x192xbf16, #tpu.memory_space<vmem>>, %arg6: memref<1x192xf32, #tpu.memory_space<vmem>>, %arg7: memref<64x192xbf16, #tpu.memory_space<vmem>>, %arg8: memref<64x192xbf16, #tpu.memory_space<vmem>>, %arg9: memref<1x192xf32, #tpu.memory_space<vmem>>, %arg10: memref<64x192xbf16, #tpu.memory_space<vmem>>, %arg11: memref<1x192xf32, #tpu.memory_space<vmem>>, %arg12: memref<128x32xbf16, #tpu.memory_space<vmem>>, %arg13: memref<32x96xbf16, #tpu.memory_space<vmem>>, %arg14: memref<32x96xbf16, #tpu.memory_space<vmem>>, %arg15: memref<32x96xbf16, #tpu.memory_space<vmem>>, %arg16: memref<1x96xf32, #tpu.memory_space<vmem>>, %arg17: memref<1x96xf32, #tpu.memory_space<vmem>>, %arg18: memref<32x96xbf16, #tpu.memory_space<vmem>>, %arg19: memref<32x96xbf16, #tpu.memory_space<vmem>>, %arg20: memref<1x96xf32, #tpu.memory_space<vmem>>, %arg21: memref<1x96xf32, #tpu.memory_space<vmem>>, %arg22: memref<32x32xbf16, #tpu.memory_space<vmem>>, %arg23: memref<32x32xbf16, #tpu.memory_space<vmem>>, %arg24: memref<1x32xbf16, #tpu.memory_space<vmem>>, %arg25: memref<32x128xbf16, #tpu.memory_space<vmem>>, %arg26: memref<32x128xbf16, #tpu.memory_space<vmem>>, %arg27: memref<1x128xf32, #tpu.memory_space<vmem>>, %arg28: memref<5x128xf32, #tpu.memory_space<vmem>>, %arg29: memref<5x128xf32, #tpu.memory_space<vmem>>, %arg30: memref<8x32xf32, #tpu.memory_space<vmem>>, %arg31: memref<8x64xf32, #tpu.memory_space<vmem>>, %arg32: memref<8x64xf32, #tpu.memory_space<vmem>>) attributes {dimension_semantics = [], scalar_prefetch = 0 : i64, scratch_operands = 3 : i64, tpu.core_type = #tpu.core_type<tc>} {
    %cst = arith.constant 0.000000e+00 : f32
    %0 = vector.broadcast %cst : f32 to vector<5x128xf32>
    %c0 = arith.constant 0 : index
    %c0_0 = arith.constant 0 : index
    %1 = vector.load %arg29[%c0, %c0_0] : memref<5x128xf32, #tpu.memory_space<vmem>>, vector<5x128xf32>
    tpu.vector_store %arg29[%c0, %c0_0], %0 {strides = array<i32>} : memref<5x128xf32, #tpu.memory_space<vmem>>, vector<5x128xf32>,
    %c0_1 = arith.constant 0 : index
    %2 = memref.load %arg0[%c0_1] : memref<8xi32, #tpu.memory_space<smem>>
    %3 = arith.index_cast %2 : i32 to index
    %c0_2 = arith.constant 0 : index
    %4 = vector.load %arg1[%3, %c0_2] : memref<64x32xf32, #tpu.memory_space<vmem>>, vector<1x32xf32>
    %c0_3 = arith.constant 0 : index
    %c0_4 = arith.constant 0 : index
    %5 = vector.load %arg30[%c0_3, %c0_4] : memref<8x32xf32, #tpu.memory_space<vmem>>, vector<1x32xf32>
    tpu.vector_store %arg30[%c0_3, %c0_4], %4 {strides = array<i32>} : memref<8x32xf32, #tpu.memory_space<vmem>>, vector<1x32xf32>,
    %c1 = arith.constant 1 : index
    %6 = memref.load %arg0[%c1] : memref<8xi32, #tpu.memory_space<smem>>
    %7 = arith.index_cast %6 : i32 to index
    %c0_5 = arith.constant 0 : index
    %8 = vector.load %arg1[%7, %c0_5] : memref<64x32xf32, #tpu.memory_space<vmem>>, vector<1x32xf32>
    %c1_6 = arith.constant 1 : index
    %c0_7 = arith.constant 0 : index
    %9 = vector.load %arg30[%c1_6, %c0_7] : memref<8x32xf32, #tpu.memory_space<vmem>>, vector<1x32xf32>
    tpu.vector_store %arg30[%c1_6, %c0_7], %8 {strides = array<i32>} : memref<8x32xf32, #tpu.memory_space<vmem>>, vector<1x32xf32>,
    %c2 = arith.constant 2 : index
    %10 = memref.load %arg0[%c2] : memref<8xi32, #tpu.memory_space<smem>>
    %11 = arith.index_cast %10 : i32 to index
    %c0_8 = arith.constant 0 : index
    %12 = vector.load %arg1[%11, %c0_8] : memref<64x32xf32, #tpu.memory_space<vmem>>, vector<1x32xf32>
    %c2_9 = arith.constant 2 : index
    %c0_10 = arith.constant 0 : index
    %13 = vector.load %arg30[%c2_9, %c0_10] : memref<8x32xf32, #tpu.memory_space<vmem>>, vector<1x32xf32>
    tpu.vector_store %arg30[%c2_9, %c0_10], %12 {strides = array<i32>} : memref<8x32xf32, #tpu.memory_space<vmem>>, vector<1x32xf32>,
    %c3 = arith.constant 3 : index
    %14 = memref.load %arg0[%c3] : memref<8xi32, #tpu.memory_space<smem>>
    %15 = arith.index_cast %14 : i32 to index
    %c0_11 = arith.constant 0 : index
    %16 = vector.load %arg1[%15, %c0_11] : memref<64x32xf32, #tpu.memory_space<vmem>>, vector<1x32xf32>
    %c3_12 = arith.constant 3 : index
    %c0_13 = arith.constant 0 : index
    %17 = vector.load %arg30[%c3_12, %c0_13] : memref<8x32xf32, #tpu.memory_space<vmem>>, vector<1x32xf32>
    tpu.vector_store %arg30[%c3_12, %c0_13], %16 {strides = array<i32>} : memref<8x32xf32, #tpu.memory_space<vmem>>, vector<1x32xf32>,
    %c4 = arith.constant 4 : index
    %18 = memref.load %arg0[%c4] : memref<8xi32, #tpu.memory_space<smem>>
    %19 = arith.index_cast %18 : i32 to index
    %c0_14 = arith.constant 0 : index
    %20 = vector.load %arg1[%19, %c0_14] : memref<64x32xf32, #tpu.memory_space<vmem>>, vector<1x32xf32>
    %c4_15 = arith.constant 4 : index
    %c0_16 = arith.constant 0 : index
    %21 = vector.load %arg30[%c4_15, %c0_16] : memref<8x32xf32, #tpu.memory_space<vmem>>, vector<1x32xf32>
    tpu.vector_store %arg30[%c4_15, %c0_16], %20 {strides = array<i32>} : memref<8x32xf32, #tpu.memory_space<vmem>>, vector<1x32xf32>,
    %c5 = arith.constant 5 : index
    %22 = memref.load %arg0[%c5] : memref<8xi32, #tpu.memory_space<smem>>
    %23 = arith.index_cast %22 : i32 to index
    %c0_17 = arith.constant 0 : index
    %24 = vector.load %arg1[%23, %c0_17] : memref<64x32xf32, #tpu.memory_space<vmem>>, vector<1x32xf32>
    %c5_18 = arith.constant 5 : index
    %c0_19 = arith.constant 0 : index
    %25 = vector.load %arg30[%c5_18, %c0_19] : memref<8x32xf32, #tpu.memory_space<vmem>>, vector<1x32xf32>
    tpu.vector_store %arg30[%c5_18, %c0_19], %24 {strides = array<i32>} : memref<8x32xf32, #tpu.memory_space<vmem>>, vector<1x32xf32>,
    %c6 = arith.constant 6 : index
    %26 = memref.load %arg0[%c6] : memref<8xi32, #tpu.memory_space<smem>>
    %27 = arith.index_cast %26 : i32 to index
    %c0_20 = arith.constant 0 : index
    %28 = vector.load %arg1[%27, %c0_20] : memref<64x32xf32, #tpu.memory_space<vmem>>, vector<1x32xf32>
    %c6_21 = arith.constant 6 : index
    %c0_22 = arith.constant 0 : index
    %29 = vector.load %arg30[%c6_21, %c0_22] : memref<8x32xf32, #tpu.memory_space<vmem>>, vector<1x32xf32>
    tpu.vector_store %arg30[%c6_21, %c0_22], %28 {strides = array<i32>} : memref<8x32xf32, #tpu.memory_space<vmem>>, vector<1x32xf32>,
    %c7 = arith.constant 7 : index
    %30 = memref.load %arg0[%c7] : memref<8xi32, #tpu.memory_space<smem>>
    %31 = arith.index_cast %30 : i32 to index
    %c0_23 = arith.constant 0 : index
    %32 = vector.load %arg1[%31, %c0_23] : memref<64x32xf32, #tpu.memory_space<vmem>>, vector<1x32xf32>
    %c7_24 = arith.constant 7 : index
    %c0_25 = arith.constant 0 : index
    %33 = vector.load %arg30[%c7_24, %c0_25] : memref<8x32xf32, #tpu.memory_space<vmem>>, vector<1x32xf32>
    tpu.vector_store %arg30[%c7_24, %c0_25], %32 {strides = array<i32>} : memref<8x32xf32, #tpu.memory_space<vmem>>, vector<1x32xf32>,
    %c0_26 = arith.constant 0 : index
    %c0_27 = arith.constant 0 : index
    %34 = vector.load %arg30[%c0_26, %c0_27] : memref<8x32xf32, #tpu.memory_space<vmem>>, vector<8x32xf32>
    %35 = arith.truncf %34 : vector<8x32xf32> to vector<8x32xbf16>
    %c0_28 = arith.constant 0 : index
    %c0_29 = arith.constant 0 : index
    %36 = vector.load %arg2[%c0_28, %c0_29] : memref<32x192xbf16, #tpu.memory_space<vmem>>, vector<32x192xbf16>
    %cst_30 = arith.constant dense<0.000000e+00> : vector<8x192xf32>
    %37 = tpu.matmul %35, %36, %cst_30 {dimension_numbers = #tpu.dot_dimension_numbers<[1], [0], [0], [1], [0, 0, 1, 1], [], []>} : vector<8x32xbf16>, vector<32x192xbf16>, vector<8x192xf32> -> vector<8x192xf32>
    %c0_31 = arith.constant 0 : index
    %c0_32 = arith.constant 0 : index
    %38 = vector.load %arg4[%c0_31, %c0_32] : memref<1x192xf32, #tpu.memory_space<vmem>>, vector<1x192xf32>
    %39 = vector.broadcast %38 : vector<1x192xf32> to vector<8x192xf32>
    %40 = arith.addf %37, %39 : vector<8x192xf32>
    %c0_33 = arith.constant 0 : index
    %c0_34 = arith.constant 0 : index
    %41 = vector.load %arg3[%c0_33, %c0_34] : memref<32x192xbf16, #tpu.memory_space<vmem>>, vector<32x192xbf16>
    %cst_35 = arith.constant dense<0.000000e+00> : vector<8x192xf32>
    %42 = tpu.matmul %35, %41, %cst_35 {dimension_numbers = #tpu.dot_dimension_numbers<[1], [0], [0], [1], [0, 0, 1, 1], [], []>} : vector<8x32xbf16>, vector<32x192xbf16>, vector<8x192xf32> -> vector<8x192xf32>
    %c0_36 = arith.constant 0 : index
    %c0_37 = arith.constant 0 : index
    %43 = vector.load %arg5[%c0_36, %c0_37] : memref<64x192xbf16, #tpu.memory_space<vmem>>, vector<64x192xbf16>
    %c0_38 = arith.constant 0 : index
    %c0_39 = arith.constant 0 : index
    %44 = vector.load %arg6[%c0_38, %c0_39] : memref<1x192xf32, #tpu.memory_space<vmem>>, vector<1x192xf32>
    %cst_40 = arith.constant 0.000000e+00 : f32
    %45 = vector.broadcast %cst_40 : f32 to vector<1x64xf32>
    %46 = vector.extract_strided_slice %40 {offsets = [0, 0], sizes = [1, 192], strides = [1, 1]} : vector<8x192xf32> to vector<1x192xf32>
    %47 = vector.extract_strided_slice %42 {offsets = [7, 0], sizes = [1, 192], strides = [1, 1]} : vector<8x192xf32> to vector<1x192xf32>
    %48 = arith.addf %46, %47 : vector<1x192xf32>
    %49 = arith.truncf %45 : vector<1x64xf32> to vector<1x64xbf16>
    %cst_41 = arith.constant dense<0.000000e+00> : vector<1x192xf32>
    %50 = tpu.matmul %49, %43, %cst_41 {dimension_numbers = #tpu.dot_dimension_numbers<[1], [0], [0], [1], [0, 0, 1, 1], [], []>} : vector<1x64xbf16>, vector<64x192xbf16>, vector<1x192xf32> -> vector<1x192xf32>
    %51 = arith.addf %50, %44 : vector<1x192xf32>
    %52 = vector.extract_strided_slice %48 {offsets = [0, 0], sizes = [1, 128], strides = [1, 1]} : vector<1x192xf32> to vector<1x128xf32>
    %53 = vector.extract_strided_slice %51 {offsets = [0, 0], sizes = [1, 128], strides = [1, 1]} : vector<1x192xf32> to vector<1x128xf32>
    %54 = arith.addf %52, %53 : vector<1x128xf32>
    %cst_42 = arith.constant 5.000000e-01 : f32
    %55 = vector.broadcast %cst_42 : f32 to vector<1x128xf32>
    %56 = arith.mulf %55, %54 : vector<1x128xf32>
    %57 = math.tanh %56 : vector<1x128xf32>
    %cst_43 = arith.constant 1.000000e+00 : f32
    %58 = vector.broadcast %cst_43 : f32 to vector<1x128xf32>
    %59 = arith.addf %57, %58 : vector<1x128xf32>
    %cst_44 = arith.constant 5.000000e-01 : f32
    %60 = vector.broadcast %cst_44 : f32 to vector<1x128xf32>
    %61 = arith.mulf %60, %59 : vector<1x128xf32>
    %62 = vector.extract_strided_slice %61 {offsets = [0, 0], sizes = [1, 64], strides = [1, 1]} : vector<1x128xf32> to vector<1x64xf32>
    %63 = vector.extract_strided_slice %61 {offsets = [0, 64], sizes = [1, 64], strides = [1, 1]} : vector<1x128xf32> to vector<1x64xf32>
    %64 = vector.extract_strided_slice %48 {offsets = [0, 128], sizes = [1, 64], strides = [1, 1]} : vector<1x192xf32> to vector<1x64xf32>
    %65 = vector.extract_strided_slice %51 {offsets = [0, 128], sizes = [1, 64], strides = [1, 1]} : vector<1x192xf32> to vector<1x64xf32>
    %66 = arith.mulf %62, %65 : vector<1x64xf32>
    %67 = arith.addf %64, %66 : vector<1x64xf32>
    %68 = math.tanh %67 : vector<1x64xf32>
    %cst_45 = arith.constant 1.000000e+00 : f32
    %69 = vector.broadcast %cst_45 : f32 to vector<1x64xf32>
    %70 = arith.subf %69, %63 : vector<1x64xf32>
    %71 = arith.mulf %70, %68 : vector<1x64xf32>
    %72 = arith.mulf %63, %45 : vector<1x64xf32>
    %73 = arith.addf %71, %72 : vector<1x64xf32>
    %74 = vector.extract_strided_slice %73 {offsets = [0, 0], sizes = [1, 32], strides = [1, 1]} : vector<1x64xf32> to vector<1x32xf32>
    %c0_46 = arith.constant 0 : index
    %c0_47 = arith.constant 0 : index
    %75 = vector.load %arg31[%c0_46, %c0_47] : memref<8x64xf32, #tpu.memory_space<vmem>>, vector<1x32xf32>
    tpu.vector_store %arg31[%c0_46, %c0_47], %74 {strides = array<i32>} : memref<8x64xf32, #tpu.memory_space<vmem>>, vector<1x32xf32>,
    %76 = vector.extract_strided_slice %73 {offsets = [0, 32], sizes = [1, 32], strides = [1, 1]} : vector<1x64xf32> to vector<1x32xf32>
    %c7_48 = arith.constant 7 : index
    %c32 = arith.constant 32 : index
    %77 = vector.load %arg31[%c7_48, %c32] : memref<8x64xf32, #tpu.memory_space<vmem>>, vector<1x32xf32>
    tpu.vector_store %arg31[%c7_48, %c32], %76 {strides = array<i32>} : memref<8x64xf32, #tpu.memory_space<vmem>>, vector<1x32xf32>,
    %78 = vector.extract_strided_slice %40 {offsets = [1, 0], sizes = [1, 192], strides = [1, 1]} : vector<8x192xf32> to vector<1x192xf32>
    %79 = vector.extract_strided_slice %42 {offsets = [6, 0], sizes = [1, 192], strides = [1, 1]} : vector<8x192xf32> to vector<1x192xf32>
    %80 = arith.addf %78, %79 : vector<1x192xf32>
    %81 = arith.truncf %73 : vector<1x64xf32> to vector<1x64xbf16>
    %cst_49 = arith.constant dense<0.000000e+00> : vector<1x192xf32>
    %82 = tpu.matmul %81, %43, %cst_49 {dimension_numbers = #tpu.dot_dimension_numbers<[1], [0], [0], [1], [0, 0, 1, 1], [], []>} : vector<1x64xbf16>, vector<64x192xbf16>, vector<1x192xf32> -> vector<1x192xf32>
    %83 = arith.addf %82, %44 : vector<1x192xf32>
    %84 = vector.extract_strided_slice %80 {offsets = [0, 0], sizes = [1, 128], strides = [1, 1]} : vector<1x192xf32> to vector<1x128xf32>
    %85 = vector.extract_strided_slice %83 {offsets = [0, 0], sizes = [1, 128], strides = [1, 1]} : vector<1x192xf32> to vector<1x128xf32>
    %86 = arith.addf %84, %85 : vector<1x128xf32>
    %cst_50 = arith.constant 5.000000e-01 : f32
    %87 = vector.broadcast %cst_50 : f32 to vector<1x128xf32>
    %88 = arith.mulf %87, %86 : vector<1x128xf32>
    %89 = math.tanh %88 : vector<1x128xf32>
    %cst_51 = arith.constant 1.000000e+00 : f32
    %90 = vector.broadcast %cst_51 : f32 to vector<1x128xf32>
    %91 = arith.addf %89, %90 : vector<1x128xf32>
    %cst_52 = arith.constant 5.000000e-01 : f32
    %92 = vector.broadcast %cst_52 : f32 to vector<1x128xf32>
    %93 = arith.mulf %92, %91 : vector<1x128xf32>
    %94 = vector.extract_strided_slice %93 {offsets = [0, 0], sizes = [1, 64], strides = [1, 1]} : vector<1x128xf32> to vector<1x64xf32>
    %95 = vector.extract_strided_slice %93 {offsets = [0, 64], sizes = [1, 64], strides = [1, 1]} : vector<1x128xf32> to vector<1x64xf32>
    %96 = vector.extract_strided_slice %80 {offsets = [0, 128], sizes = [1, 64], strides = [1, 1]} : vector<1x192xf32> to vector<1x64xf32>
    %97 = vector.extract_strided_slice %83 {offsets = [0, 128], sizes = [1, 64], strides = [1, 1]} : vector<1x192xf32> to vector<1x64xf32>
    %98 = arith.mulf %94, %97 : vector<1x64xf32>
    %99 = arith.addf %96, %98 : vector<1x64xf32>
    %100 = math.tanh %99 : vector<1x64xf32>
    %cst_53 = arith.constant 1.000000e+00 : f32
    %101 = vector.broadcast %cst_53 : f32 to vector<1x64xf32>
    %102 = arith.subf %101, %95 : vector<1x64xf32>
    %103 = arith.mulf %102, %100 : vector<1x64xf32>
    %104 = arith.mulf %95, %73 : vector<1x64xf32>
    %105 = arith.addf %103, %104 : vector<1x64xf32>
    %106 = vector.extract_strided_slice %105 {offsets = [0, 0], sizes = [1, 32], strides = [1, 1]} : vector<1x64xf32> to vector<1x32xf32>
    %c1_54 = arith.constant 1 : index
    %c0_55 = arith.constant 0 : index
    %107 = vector.load %arg31[%c1_54, %c0_55] : memref<8x64xf32, #tpu.memory_space<vmem>>, vector<1x32xf32>
    tpu.vector_store %arg31[%c1_54, %c0_55], %106 {strides = array<i32>} : memref<8x64xf32, #tpu.memory_space<vmem>>, vector<1x32xf32>,
    %108 = vector.extract_strided_slice %105 {offsets = [0, 32], sizes = [1, 32], strides = [1, 1]} : vector<1x64xf32> to vector<1x32xf32>
    %c6_56 = arith.constant 6 : index
    %c32_57 = arith.constant 32 : index
    %109 = vector.load %arg31[%c6_56, %c32_57] : memref<8x64xf32, #tpu.memory_space<vmem>>, vector<1x32xf32>
    tpu.vector_store %arg31[%c6_56, %c32_57], %108 {strides = array<i32>} : memref<8x64xf32, #tpu.memory_space<vmem>>, vector<1x32xf32>,
    %110 = vector.extract_strided_slice %40 {offsets = [2, 0], sizes = [1, 192], strides = [1, 1]} : vector<8x192xf32> to vector<1x192xf32>
    %111 = vector.extract_strided_slice %42 {offsets = [5, 0], sizes = [1, 192], strides = [1, 1]} : vector<8x192xf32> to vector<1x192xf32>
    %112 = arith.addf %110, %111 : vector<1x192xf32>
    %113 = arith.truncf %105 : vector<1x64xf32> to vector<1x64xbf16>
    %cst_58 = arith.constant dense<0.000000e+00> : vector<1x192xf32>
    %114 = tpu.matmul %113, %43, %cst_58 {dimension_numbers = #tpu.dot_dimension_numbers<[1], [0], [0], [1], [0, 0, 1, 1], [], []>} : vector<1x64xbf16>, vector<64x192xbf16>, vector<1x192xf32> -> vector<1x192xf32>
    %115 = arith.addf %114, %44 : vector<1x192xf32>
    %116 = vector.extract_strided_slice %112 {offsets = [0, 0], sizes = [1, 128], strides = [1, 1]} : vector<1x192xf32> to vector<1x128xf32>
    %117 = vector.extract_strided_slice %115 {offsets = [0, 0], sizes = [1, 128], strides = [1, 1]} : vector<1x192xf32> to vector<1x128xf32>
    %118 = arith.addf %116, %117 : vector<1x128xf32>
    %cst_59 = arith.constant 5.000000e-01 : f32
    %119 = vector.broadcast %cst_59 : f32 to vector<1x128xf32>
    %120 = arith.mulf %119, %118 : vector<1x128xf32>
    %121 = math.tanh %120 : vector<1x128xf32>
    %cst_60 = arith.constant 1.000000e+00 : f32
    %122 = vector.broadcast %cst_60 : f32 to vector<1x128xf32>
    %123 = arith.addf %121, %122 : vector<1x128xf32>
    %cst_61 = arith.constant 5.000000e-01 : f32
    %124 = vector.broadcast %cst_61 : f32 to vector<1x128xf32>
    %125 = arith.mulf %124, %123 : vector<1x128xf32>
    %126 = vector.extract_strided_slice %125 {offsets = [0, 0], sizes = [1, 64], strides = [1, 1]} : vector<1x128xf32> to vector<1x64xf32>
    %127 = vector.extract_strided_slice %125 {offsets = [0, 64], sizes = [1, 64], strides = [1, 1]} : vector<1x128xf32> to vector<1x64xf32>
    %128 = vector.extract_strided_slice %112 {offsets = [0, 128], sizes = [1, 64], strides = [1, 1]} : vector<1x192xf32> to vector<1x64xf32>
    %129 = vector.extract_strided_slice %115 {offsets = [0, 128], sizes = [1, 64], strides = [1, 1]} : vector<1x192xf32> to vector<1x64xf32>
    %130 = arith.mulf %126, %129 : vector<1x64xf32>
    %131 = arith.addf %128, %130 : vector<1x64xf32>
    %132 = math.tanh %131 : vector<1x64xf32>
    %cst_62 = arith.constant 1.000000e+00 : f32
    %133 = vector.broadcast %cst_62 : f32 to vector<1x64xf32>
    %134 = arith.subf %133, %127 : vector<1x64xf32>
    %135 = arith.mulf %134, %132 : vector<1x64xf32>
    %136 = arith.mulf %127, %105 : vector<1x64xf32>
    %137 = arith.addf %135, %136 : vector<1x64xf32>
    %138 = vector.extract_strided_slice %137 {offsets = [0, 0], sizes = [1, 32], strides = [1, 1]} : vector<1x64xf32> to vector<1x32xf32>
    %c2_63 = arith.constant 2 : index
    %c0_64 = arith.constant 0 : index
    %139 = vector.load %arg31[%c2_63, %c0_64] : memref<8x64xf32, #tpu.memory_space<vmem>>, vector<1x32xf32>
    tpu.vector_store %arg31[%c2_63, %c0_64], %138 {strides = array<i32>} : memref<8x64xf32, #tpu.memory_space<vmem>>, vector<1x32xf32>,
    %140 = vector.extract_strided_slice %137 {offsets = [0, 32], sizes = [1, 32], strides = [1, 1]} : vector<1x64xf32> to vector<1x32xf32>
    %c5_65 = arith.constant 5 : index
    %c32_66 = arith.constant 32 : index
    %141 = vector.load %arg31[%c5_65, %c32_66] : memref<8x64xf32, #tpu.memory_space<vmem>>, vector<1x32xf32>
    tpu.vector_store %arg31[%c5_65, %c32_66], %140 {strides = array<i32>} : memref<8x64xf32, #tpu.memory_space<vmem>>, vector<1x32xf32>,
    %142 = vector.extract_strided_slice %40 {offsets = [3, 0], sizes = [1, 192], strides = [1, 1]} : vector<8x192xf32> to vector<1x192xf32>
    %143 = vector.extract_strided_slice %42 {offsets = [4, 0], sizes = [1, 192], strides = [1, 1]} : vector<8x192xf32> to vector<1x192xf32>
    %144 = arith.addf %142, %143 : vector<1x192xf32>
    %145 = arith.truncf %137 : vector<1x64xf32> to vector<1x64xbf16>
    %cst_67 = arith.constant dense<0.000000e+00> : vector<1x192xf32>
    %146 = tpu.matmul %145, %43, %cst_67 {dimension_numbers = #tpu.dot_dimension_numbers<[1], [0], [0], [1], [0, 0, 1, 1], [], []>} : vector<1x64xbf16>, vector<64x192xbf16>, vector<1x192xf32> -> vector<1x192xf32>
    %147 = arith.addf %146, %44 : vector<1x192xf32>
    %148 = vector.extract_strided_slice %144 {offsets = [0, 0], sizes = [1, 128], strides = [1, 1]} : vector<1x192xf32> to vector<1x128xf32>
    %149 = vector.extract_strided_slice %147 {offsets = [0, 0], sizes = [1, 128], strides = [1, 1]} : vector<1x192xf32> to vector<1x128xf32>
    %150 = arith.addf %148, %149 : vector<1x128xf32>
    %cst_68 = arith.constant 5.000000e-01 : f32
    %151 = vector.broadcast %cst_68 : f32 to vector<1x128xf32>
    %152 = arith.mulf %151, %150 : vector<1x128xf32>
    %153 = math.tanh %152 : vector<1x128xf32>
    %cst_69 = arith.constant 1.000000e+00 : f32
    %154 = vector.broadcast %cst_69 : f32 to vector<1x128xf32>
    %155 = arith.addf %153, %154 : vector<1x128xf32>
    %cst_70 = arith.constant 5.000000e-01 : f32
    %156 = vector.broadcast %cst_70 : f32 to vector<1x128xf32>
    %157 = arith.mulf %156, %155 : vector<1x128xf32>
    %158 = vector.extract_strided_slice %157 {offsets = [0, 0], sizes = [1, 64], strides = [1, 1]} : vector<1x128xf32> to vector<1x64xf32>
    %159 = vector.extract_strided_slice %157 {offsets = [0, 64], sizes = [1, 64], strides = [1, 1]} : vector<1x128xf32> to vector<1x64xf32>
    %160 = vector.extract_strided_slice %144 {offsets = [0, 128], sizes = [1, 64], strides = [1, 1]} : vector<1x192xf32> to vector<1x64xf32>
    %161 = vector.extract_strided_slice %147 {offsets = [0, 128], sizes = [1, 64], strides = [1, 1]} : vector<1x192xf32> to vector<1x64xf32>
    %162 = arith.mulf %158, %161 : vector<1x64xf32>
    %163 = arith.addf %160, %162 : vector<1x64xf32>
    %164 = math.tanh %163 : vector<1x64xf32>
    %cst_71 = arith.constant 1.000000e+00 : f32
    %165 = vector.broadcast %cst_71 : f32 to vector<1x64xf32>
    %166 = arith.subf %165, %159 : vector<1x64xf32>
    %167 = arith.mulf %166, %164 : vector<1x64xf32>
    %168 = arith.mulf %159, %137 : vector<1x64xf32>
    %169 = arith.addf %167, %168 : vector<1x64xf32>
    %170 = vector.extract_strided_slice %169 {offsets = [0, 0], sizes = [1, 32], strides = [1, 1]} : vector<1x64xf32> to vector<1x32xf32>
    %c3_72 = arith.constant 3 : index
    %c0_73 = arith.constant 0 : index
    %171 = vector.load %arg31[%c3_72, %c0_73] : memref<8x64xf32, #tpu.memory_space<vmem>>, vector<1x32xf32>
    tpu.vector_store %arg31[%c3_72, %c0_73], %170 {strides = array<i32>} : memref<8x64xf32, #tpu.memory_space<vmem>>, vector<1x32xf32>,
    %172 = vector.extract_strided_slice %169 {offsets = [0, 32], sizes = [1, 32], strides = [1, 1]} : vector<1x64xf32> to vector<1x32xf32>
    %c4_74 = arith.constant 4 : index
    %c32_75 = arith.constant 32 : index
    %173 = vector.load %arg31[%c4_74, %c32_75] : memref<8x64xf32, #tpu.memory_space<vmem>>, vector<1x32xf32>
    tpu.vector_store %arg31[%c4_74, %c32_75], %172 {strides = array<i32>} : memref<8x64xf32, #tpu.memory_space<vmem>>, vector<1x32xf32>,
    %174 = vector.extract_strided_slice %40 {offsets = [4, 0], sizes = [1, 192], strides = [1, 1]} : vector<8x192xf32> to vector<1x192xf32>
    %175 = vector.extract_strided_slice %42 {offsets = [3, 0], sizes = [1, 192], strides = [1, 1]} : vector<8x192xf32> to vector<1x192xf32>
    %176 = arith.addf %174, %175 : vector<1x192xf32>
    %177 = arith.truncf %169 : vector<1x64xf32> to vector<1x64xbf16>
    %cst_76 = arith.constant dense<0.000000e+00> : vector<1x192xf32>
    %178 = tpu.matmul %177, %43, %cst_76 {dimension_numbers = #tpu.dot_dimension_numbers<[1], [0], [0], [1], [0, 0, 1, 1], [], []>} : vector<1x64xbf16>, vector<64x192xbf16>, vector<1x192xf32> -> vector<1x192xf32>
    %179 = arith.addf %178, %44 : vector<1x192xf32>
    %180 = vector.extract_strided_slice %176 {offsets = [0, 0], sizes = [1, 128], strides = [1, 1]} : vector<1x192xf32> to vector<1x128xf32>
    %181 = vector.extract_strided_slice %179 {offsets = [0, 0], sizes = [1, 128], strides = [1, 1]} : vector<1x192xf32> to vector<1x128xf32>
    %182 = arith.addf %180, %181 : vector<1x128xf32>
    %cst_77 = arith.constant 5.000000e-01 : f32
    %183 = vector.broadcast %cst_77 : f32 to vector<1x128xf32>
    %184 = arith.mulf %183, %182 : vector<1x128xf32>
    %185 = math.tanh %184 : vector<1x128xf32>
    %cst_78 = arith.constant 1.000000e+00 : f32
    %186 = vector.broadcast %cst_78 : f32 to vector<1x128xf32>
    %187 = arith.addf %185, %186 : vector<1x128xf32>
    %cst_79 = arith.constant 5.000000e-01 : f32
    %188 = vector.broadcast %cst_79 : f32 to vector<1x128xf32>
    %189 = arith.mulf %188, %187 : vector<1x128xf32>
    %190 = vector.extract_strided_slice %189 {offsets = [0, 0], sizes = [1, 64], strides = [1, 1]} : vector<1x128xf32> to vector<1x64xf32>
    %191 = vector.extract_strided_slice %189 {offsets = [0, 64], sizes = [1, 64], strides = [1, 1]} : vector<1x128xf32> to vector<1x64xf32>
    %192 = vector.extract_strided_slice %176 {offsets = [0, 128], sizes = [1, 64], strides = [1, 1]} : vector<1x192xf32> to vector<1x64xf32>
    %193 = vector.extract_strided_slice %179 {offsets = [0, 128], sizes = [1, 64], strides = [1, 1]} : vector<1x192xf32> to vector<1x64xf32>
    %194 = arith.mulf %190, %193 : vector<1x64xf32>
    %195 = arith.addf %192, %194 : vector<1x64xf32>
    %196 = math.tanh %195 : vector<1x64xf32>
    %cst_80 = arith.constant 1.000000e+00 : f32
    %197 = vector.broadcast %cst_80 : f32 to vector<1x64xf32>
    %198 = arith.subf %197, %191 : vector<1x64xf32>
    %199 = arith.mulf %198, %196 : vector<1x64xf32>
    %200 = arith.mulf %191, %169 : vector<1x64xf32>
    %201 = arith.addf %199, %200 : vector<1x64xf32>
    %202 = vector.extract_strided_slice %201 {offsets = [0, 0], sizes = [1, 32], strides = [1, 1]} : vector<1x64xf32> to vector<1x32xf32>
    %c4_81 = arith.constant 4 : index
    %c0_82 = arith.constant 0 : index
    %203 = vector.load %arg31[%c4_81, %c0_82] : memref<8x64xf32, #tpu.memory_space<vmem>>, vector<1x32xf32>
    tpu.vector_store %arg31[%c4_81, %c0_82], %202 {strides = array<i32>} : memref<8x64xf32, #tpu.memory_space<vmem>>, vector<1x32xf32>,
    %204 = vector.extract_strided_slice %201 {offsets = [0, 32], sizes = [1, 32], strides = [1, 1]} : vector<1x64xf32> to vector<1x32xf32>
    %c3_83 = arith.constant 3 : index
    %c32_84 = arith.constant 32 : index
    %205 = vector.load %arg31[%c3_83, %c32_84] : memref<8x64xf32, #tpu.memory_space<vmem>>, vector<1x32xf32>
    tpu.vector_store %arg31[%c3_83, %c32_84], %204 {strides = array<i32>} : memref<8x64xf32, #tpu.memory_space<vmem>>, vector<1x32xf32>,
    %206 = vector.extract_strided_slice %40 {offsets = [5, 0], sizes = [1, 192], strides = [1, 1]} : vector<8x192xf32> to vector<1x192xf32>
    %207 = vector.extract_strided_slice %42 {offsets = [2, 0], sizes = [1, 192], strides = [1, 1]} : vector<8x192xf32> to vector<1x192xf32>
    %208 = arith.addf %206, %207 : vector<1x192xf32>
    %209 = arith.truncf %201 : vector<1x64xf32> to vector<1x64xbf16>
    %cst_85 = arith.constant dense<0.000000e+00> : vector<1x192xf32>
    %210 = tpu.matmul %209, %43, %cst_85 {dimension_numbers = #tpu.dot_dimension_numbers<[1], [0], [0], [1], [0, 0, 1, 1], [], []>} : vector<1x64xbf16>, vector<64x192xbf16>, vector<1x192xf32> -> vector<1x192xf32>
    %211 = arith.addf %210, %44 : vector<1x192xf32>
    %212 = vector.extract_strided_slice %208 {offsets = [0, 0], sizes = [1, 128], strides = [1, 1]} : vector<1x192xf32> to vector<1x128xf32>
    %213 = vector.extract_strided_slice %211 {offsets = [0, 0], sizes = [1, 128], strides = [1, 1]} : vector<1x192xf32> to vector<1x128xf32>
    %214 = arith.addf %212, %213 : vector<1x128xf32>
    %cst_86 = arith.constant 5.000000e-01 : f32
    %215 = vector.broadcast %cst_86 : f32 to vector<1x128xf32>
    %216 = arith.mulf %215, %214 : vector<1x128xf32>
    %217 = math.tanh %216 : vector<1x128xf32>
    %cst_87 = arith.constant 1.000000e+00 : f32
    %218 = vector.broadcast %cst_87 : f32 to vector<1x128xf32>
    %219 = arith.addf %217, %218 : vector<1x128xf32>
    %cst_88 = arith.constant 5.000000e-01 : f32
    %220 = vector.broadcast %cst_88 : f32 to vector<1x128xf32>
    %221 = arith.mulf %220, %219 : vector<1x128xf32>
    %222 = vector.extract_strided_slice %221 {offsets = [0, 0], sizes = [1, 64], strides = [1, 1]} : vector<1x128xf32> to vector<1x64xf32>
    %223 = vector.extract_strided_slice %221 {offsets = [0, 64], sizes = [1, 64], strides = [1, 1]} : vector<1x128xf32> to vector<1x64xf32>
    %224 = vector.extract_strided_slice %208 {offsets = [0, 128], sizes = [1, 64], strides = [1, 1]} : vector<1x192xf32> to vector<1x64xf32>
    %225 = vector.extract_strided_slice %211 {offsets = [0, 128], sizes = [1, 64], strides = [1, 1]} : vector<1x192xf32> to vector<1x64xf32>
    %226 = arith.mulf %222, %225 : vector<1x64xf32>
    %227 = arith.addf %224, %226 : vector<1x64xf32>
    %228 = math.tanh %227 : vector<1x64xf32>
    %cst_89 = arith.constant 1.000000e+00 : f32
    %229 = vector.broadcast %cst_89 : f32 to vector<1x64xf32>
    %230 = arith.subf %229, %223 : vector<1x64xf32>
    %231 = arith.mulf %230, %228 : vector<1x64xf32>
    %232 = arith.mulf %223, %201 : vector<1x64xf32>
    %233 = arith.addf %231, %232 : vector<1x64xf32>
    %234 = vector.extract_strided_slice %233 {offsets = [0, 0], sizes = [1, 32], strides = [1, 1]} : vector<1x64xf32> to vector<1x32xf32>
    %c5_90 = arith.constant 5 : index
    %c0_91 = arith.constant 0 : index
    %235 = vector.load %arg31[%c5_90, %c0_91] : memref<8x64xf32, #tpu.memory_space<vmem>>, vector<1x32xf32>
    tpu.vector_store %arg31[%c5_90, %c0_91], %234 {strides = array<i32>} : memref<8x64xf32, #tpu.memory_space<vmem>>, vector<1x32xf32>,
    %236 = vector.extract_strided_slice %233 {offsets = [0, 32], sizes = [1, 32], strides = [1, 1]} : vector<1x64xf32> to vector<1x32xf32>
    %c2_92 = arith.constant 2 : index
    %c32_93 = arith.constant 32 : index
    %237 = vector.load %arg31[%c2_92, %c32_93] : memref<8x64xf32, #tpu.memory_space<vmem>>, vector<1x32xf32>
    tpu.vector_store %arg31[%c2_92, %c32_93], %236 {strides = array<i32>} : memref<8x64xf32, #tpu.memory_space<vmem>>, vector<1x32xf32>,
    %238 = vector.extract_strided_slice %40 {offsets = [6, 0], sizes = [1, 192], strides = [1, 1]} : vector<8x192xf32> to vector<1x192xf32>
    %239 = vector.extract_strided_slice %42 {offsets = [1, 0], sizes = [1, 192], strides = [1, 1]} : vector<8x192xf32> to vector<1x192xf32>
    %240 = arith.addf %238, %239 : vector<1x192xf32>
    %241 = arith.truncf %233 : vector<1x64xf32> to vector<1x64xbf16>
    %cst_94 = arith.constant dense<0.000000e+00> : vector<1x192xf32>
    %242 = tpu.matmul %241, %43, %cst_94 {dimension_numbers = #tpu.dot_dimension_numbers<[1], [0], [0], [1], [0, 0, 1, 1], [], []>} : vector<1x64xbf16>, vector<64x192xbf16>, vector<1x192xf32> -> vector<1x192xf32>
    %243 = arith.addf %242, %44 : vector<1x192xf32>
    %244 = vector.extract_strided_slice %240 {offsets = [0, 0], sizes = [1, 128], strides = [1, 1]} : vector<1x192xf32> to vector<1x128xf32>
    %245 = vector.extract_strided_slice %243 {offsets = [0, 0], sizes = [1, 128], strides = [1, 1]} : vector<1x192xf32> to vector<1x128xf32>
    %246 = arith.addf %244, %245 : vector<1x128xf32>
    %cst_95 = arith.constant 5.000000e-01 : f32
    %247 = vector.broadcast %cst_95 : f32 to vector<1x128xf32>
    %248 = arith.mulf %247, %246 : vector<1x128xf32>
    %249 = math.tanh %248 : vector<1x128xf32>
    %cst_96 = arith.constant 1.000000e+00 : f32
    %250 = vector.broadcast %cst_96 : f32 to vector<1x128xf32>
    %251 = arith.addf %249, %250 : vector<1x128xf32>
    %cst_97 = arith.constant 5.000000e-01 : f32
    %252 = vector.broadcast %cst_97 : f32 to vector<1x128xf32>
    %253 = arith.mulf %252, %251 : vector<1x128xf32>
    %254 = vector.extract_strided_slice %253 {offsets = [0, 0], sizes = [1, 64], strides = [1, 1]} : vector<1x128xf32> to vector<1x64xf32>
    %255 = vector.extract_strided_slice %253 {offsets = [0, 64], sizes = [1, 64], strides = [1, 1]} : vector<1x128xf32> to vector<1x64xf32>
    %256 = vector.extract_strided_slice %240 {offsets = [0, 128], sizes = [1, 64], strides = [1, 1]} : vector<1x192xf32> to vector<1x64xf32>
    %257 = vector.extract_strided_slice %243 {offsets = [0, 128], sizes = [1, 64], strides = [1, 1]} : vector<1x192xf32> to vector<1x64xf32>
    %258 = arith.mulf %254, %257 : vector<1x64xf32>
    %259 = arith.addf %256, %258 : vector<1x64xf32>
    %260 = math.tanh %259 : vector<1x64xf32>
    %cst_98 = arith.constant 1.000000e+00 : f32
    %261 = vector.broadcast %cst_98 : f32 to vector<1x64xf32>
    %262 = arith.subf %261, %255 : vector<1x64xf32>
    %263 = arith.mulf %262, %260 : vector<1x64xf32>
    %264 = arith.mulf %255, %233 : vector<1x64xf32>
    %265 = arith.addf %263, %264 : vector<1x64xf32>
    %266 = vector.extract_strided_slice %265 {offsets = [0, 0], sizes = [1, 32], strides = [1, 1]} : vector<1x64xf32> to vector<1x32xf32>
    %c6_99 = arith.constant 6 : index
    %c0_100 = arith.constant 0 : index
    %267 = vector.load %arg31[%c6_99, %c0_100] : memref<8x64xf32, #tpu.memory_space<vmem>>, vector<1x32xf32>
    tpu.vector_store %arg31[%c6_99, %c0_100], %266 {strides = array<i32>} : memref<8x64xf32, #tpu.memory_space<vmem>>, vector<1x32xf32>,
    %268 = vector.extract_strided_slice %265 {offsets = [0, 32], sizes = [1, 32], strides = [1, 1]} : vector<1x64xf32> to vector<1x32xf32>
    %c1_101 = arith.constant 1 : index
    %c32_102 = arith.constant 32 : index
    %269 = vector.load %arg31[%c1_101, %c32_102] : memref<8x64xf32, #tpu.memory_space<vmem>>, vector<1x32xf32>
    tpu.vector_store %arg31[%c1_101, %c32_102], %268 {strides = array<i32>} : memref<8x64xf32, #tpu.memory_space<vmem>>, vector<1x32xf32>,
    %270 = vector.extract_strided_slice %40 {offsets = [7, 0], sizes = [1, 192], strides = [1, 1]} : vector<8x192xf32> to vector<1x192xf32>
    %271 = vector.extract_strided_slice %42 {offsets = [0, 0], sizes = [1, 192], strides = [1, 1]} : vector<8x192xf32> to vector<1x192xf32>
    %272 = arith.addf %270, %271 : vector<1x192xf32>
    %273 = arith.truncf %265 : vector<1x64xf32> to vector<1x64xbf16>
    %cst_103 = arith.constant dense<0.000000e+00> : vector<1x192xf32>
    %274 = tpu.matmul %273, %43, %cst_103 {dimension_numbers = #tpu.dot_dimension_numbers<[1], [0], [0], [1], [0, 0, 1, 1], [], []>} : vector<1x64xbf16>, vector<64x192xbf16>, vector<1x192xf32> -> vector<1x192xf32>
    %275 = arith.addf %274, %44 : vector<1x192xf32>
    %276 = vector.extract_strided_slice %272 {offsets = [0, 0], sizes = [1, 128], strides = [1, 1]} : vector<1x192xf32> to vector<1x128xf32>
    %277 = vector.extract_strided_slice %275 {offsets = [0, 0], sizes = [1, 128], strides = [1, 1]} : vector<1x192xf32> to vector<1x128xf32>
    %278 = arith.addf %276, %277 : vector<1x128xf32>
    %cst_104 = arith.constant 5.000000e-01 : f32
    %279 = vector.broadcast %cst_104 : f32 to vector<1x128xf32>
    %280 = arith.mulf %279, %278 : vector<1x128xf32>
    %281 = math.tanh %280 : vector<1x128xf32>
    %cst_105 = arith.constant 1.000000e+00 : f32
    %282 = vector.broadcast %cst_105 : f32 to vector<1x128xf32>
    %283 = arith.addf %281, %282 : vector<1x128xf32>
    %cst_106 = arith.constant 5.000000e-01 : f32
    %284 = vector.broadcast %cst_106 : f32 to vector<1x128xf32>
    %285 = arith.mulf %284, %283 : vector<1x128xf32>
    %286 = vector.extract_strided_slice %285 {offsets = [0, 0], sizes = [1, 64], strides = [1, 1]} : vector<1x128xf32> to vector<1x64xf32>
    %287 = vector.extract_strided_slice %285 {offsets = [0, 64], sizes = [1, 64], strides = [1, 1]} : vector<1x128xf32> to vector<1x64xf32>
    %288 = vector.extract_strided_slice %272 {offsets = [0, 128], sizes = [1, 64], strides = [1, 1]} : vector<1x192xf32> to vector<1x64xf32>
    %289 = vector.extract_strided_slice %275 {offsets = [0, 128], sizes = [1, 64], strides = [1, 1]} : vector<1x192xf32> to vector<1x64xf32>
    %290 = arith.mulf %286, %289 : vector<1x64xf32>
    %291 = arith.addf %288, %290 : vector<1x64xf32>
    %292 = math.tanh %291 : vector<1x64xf32>
    %cst_107 = arith.constant 1.000000e+00 : f32
    %293 = vector.broadcast %cst_107 : f32 to vector<1x64xf32>
    %294 = arith.subf %293, %287 : vector<1x64xf32>
    %295 = arith.mulf %294, %292 : vector<1x64xf32>
    %296 = arith.mulf %287, %265 : vector<1x64xf32>
    %297 = arith.addf %295, %296 : vector<1x64xf32>
    %298 = vector.extract_strided_slice %297 {offsets = [0, 0], sizes = [1, 32], strides = [1, 1]} : vector<1x64xf32> to vector<1x32xf32>
    %c7_108 = arith.constant 7 : index
    %c0_109 = arith.constant 0 : index
    %299 = vector.load %arg31[%c7_108, %c0_109] : memref<8x64xf32, #tpu.memory_space<vmem>>, vector<1x32xf32>
    tpu.vector_store %arg31[%c7_108, %c0_109], %298 {strides = array<i32>} : memref<8x64xf32, #tpu.memory_space<vmem>>, vector<1x32xf32>,
    %300 = vector.extract_strided_slice %297 {offsets = [0, 32], sizes = [1, 32], strides = [1, 1]} : vector<1x64xf32> to vector<1x32xf32>
    %c0_110 = arith.constant 0 : index
    %c32_111 = arith.constant 32 : index
    %301 = vector.load %arg31[%c0_110, %c32_111] : memref<8x64xf32, #tpu.memory_space<vmem>>, vector<1x32xf32>
    tpu.vector_store %arg31[%c0_110, %c32_111], %300 {strides = array<i32>} : memref<8x64xf32, #tpu.memory_space<vmem>>, vector<1x32xf32>,
    %c0_112 = arith.constant 0 : index
    %c0_113 = arith.constant 0 : index
    %302 = vector.load %arg31[%c0_112, %c0_113] : memref<8x64xf32, #tpu.memory_space<vmem>>, vector<8x64xf32>
    %303 = arith.truncf %302 : vector<8x64xf32> to vector<8x64xbf16>
    %c0_114 = arith.constant 0 : index
    %c0_115 = arith.constant 0 : index
    %304 = vector.load %arg7[%c0_114, %c0_115] : memref<64x192xbf16, #tpu.memory_space<vmem>>, vector<64x192xbf16>
    %cst_116 = arith.constant dense<0.000000e+00> : vector<8x192xf32>
    %305 = tpu.matmul %303, %304, %cst_116 {dimension_numbers = #tpu.dot_dimension_numbers<[1], [0], [0], [1], [0, 0, 1, 1], [], []>} : vector<8x64xbf16>, vector<64x192xbf16>, vector<8x192xf32> -> vector<8x192xf32>
    %c0_117 = arith.constant 0 : index
    %c0_118 = arith.constant 0 : index
    %306 = vector.load %arg9[%c0_117, %c0_118] : memref<1x192xf32, #tpu.memory_space<vmem>>, vector<1x192xf32>
    %307 = vector.broadcast %306 : vector<1x192xf32> to vector<8x192xf32>
    %308 = arith.addf %305, %307 : vector<8x192xf32>
    %c0_119 = arith.constant 0 : index
    %c0_120 = arith.constant 0 : index
    %309 = vector.load %arg8[%c0_119, %c0_120] : memref<64x192xbf16, #tpu.memory_space<vmem>>, vector<64x192xbf16>
    %cst_121 = arith.constant dense<0.000000e+00> : vector<8x192xf32>
    %310 = tpu.matmul %303, %309, %cst_121 {dimension_numbers = #tpu.dot_dimension_numbers<[1], [0], [0], [1], [0, 0, 1, 1], [], []>} : vector<8x64xbf16>, vector<64x192xbf16>, vector<8x192xf32> -> vector<8x192xf32>
    %c0_122 = arith.constant 0 : index
    %c0_123 = arith.constant 0 : index
    %311 = vector.load %arg10[%c0_122, %c0_123] : memref<64x192xbf16, #tpu.memory_space<vmem>>, vector<64x192xbf16>
    %c0_124 = arith.constant 0 : index
    %c0_125 = arith.constant 0 : index
    %312 = vector.load %arg11[%c0_124, %c0_125] : memref<1x192xf32, #tpu.memory_space<vmem>>, vector<1x192xf32>
    %cst_126 = arith.constant 0.000000e+00 : f32
    %313 = vector.broadcast %cst_126 : f32 to vector<1x64xf32>
    %314 = vector.extract_strided_slice %308 {offsets = [0, 0], sizes = [1, 192], strides = [1, 1]} : vector<8x192xf32> to vector<1x192xf32>
    %315 = vector.extract_strided_slice %310 {offsets = [7, 0], sizes = [1, 192], strides = [1, 1]} : vector<8x192xf32> to vector<1x192xf32>
    %316 = arith.addf %314, %315 : vector<1x192xf32>
    %317 = arith.truncf %313 : vector<1x64xf32> to vector<1x64xbf16>
    %cst_127 = arith.constant dense<0.000000e+00> : vector<1x192xf32>
    %318 = tpu.matmul %317, %311, %cst_127 {dimension_numbers = #tpu.dot_dimension_numbers<[1], [0], [0], [1], [0, 0, 1, 1], [], []>} : vector<1x64xbf16>, vector<64x192xbf16>, vector<1x192xf32> -> vector<1x192xf32>
    %319 = arith.addf %318, %312 : vector<1x192xf32>
    %320 = vector.extract_strided_slice %316 {offsets = [0, 0], sizes = [1, 128], strides = [1, 1]} : vector<1x192xf32> to vector<1x128xf32>
    %321 = vector.extract_strided_slice %319 {offsets = [0, 0], sizes = [1, 128], strides = [1, 1]} : vector<1x192xf32> to vector<1x128xf32>
    %322 = arith.addf %320, %321 : vector<1x128xf32>
    %cst_128 = arith.constant 5.000000e-01 : f32
    %323 = vector.broadcast %cst_128 : f32 to vector<1x128xf32>
    %324 = arith.mulf %323, %322 : vector<1x128xf32>
    %325 = math.tanh %324 : vector<1x128xf32>
    %cst_129 = arith.constant 1.000000e+00 : f32
    %326 = vector.broadcast %cst_129 : f32 to vector<1x128xf32>
    %327 = arith.addf %325, %326 : vector<1x128xf32>
    %cst_130 = arith.constant 5.000000e-01 : f32
    %328 = vector.broadcast %cst_130 : f32 to vector<1x128xf32>
    %329 = arith.mulf %328, %327 : vector<1x128xf32>
    %330 = vector.extract_strided_slice %329 {offsets = [0, 0], sizes = [1, 64], strides = [1, 1]} : vector<1x128xf32> to vector<1x64xf32>
    %331 = vector.extract_strided_slice %329 {offsets = [0, 64], sizes = [1, 64], strides = [1, 1]} : vector<1x128xf32> to vector<1x64xf32>
    %332 = vector.extract_strided_slice %316 {offsets = [0, 128], sizes = [1, 64], strides = [1, 1]} : vector<1x192xf32> to vector<1x64xf32>
    %333 = vector.extract_strided_slice %319 {offsets = [0, 128], sizes = [1, 64], strides = [1, 1]} : vector<1x192xf32> to vector<1x64xf32>
    %334 = arith.mulf %330, %333 : vector<1x64xf32>
    %335 = arith.addf %332, %334 : vector<1x64xf32>
    %336 = math.tanh %335 : vector<1x64xf32>
    %cst_131 = arith.constant 1.000000e+00 : f32
    %337 = vector.broadcast %cst_131 : f32 to vector<1x64xf32>
    %338 = arith.subf %337, %331 : vector<1x64xf32>
    %339 = arith.mulf %338, %336 : vector<1x64xf32>
    %340 = arith.mulf %331, %313 : vector<1x64xf32>
    %341 = arith.addf %339, %340 : vector<1x64xf32>
    %342 = vector.extract_strided_slice %341 {offsets = [0, 0], sizes = [1, 32], strides = [1, 1]} : vector<1x64xf32> to vector<1x32xf32>
    %c0_132 = arith.constant 0 : index
    %c0_133 = arith.constant 0 : index
    %343 = vector.load %arg32[%c0_132, %c0_133] : memref<8x64xf32, #tpu.memory_space<vmem>>, vector<1x32xf32>
    tpu.vector_store %arg32[%c0_132, %c0_133], %342 {strides = array<i32>} : memref<8x64xf32, #tpu.memory_space<vmem>>, vector<1x32xf32>,
    %344 = vector.extract_strided_slice %341 {offsets = [0, 32], sizes = [1, 32], strides = [1, 1]} : vector<1x64xf32> to vector<1x32xf32>
    %c7_134 = arith.constant 7 : index
    %c32_135 = arith.constant 32 : index
    %345 = vector.load %arg32[%c7_134, %c32_135] : memref<8x64xf32, #tpu.memory_space<vmem>>, vector<1x32xf32>
    tpu.vector_store %arg32[%c7_134, %c32_135], %344 {strides = array<i32>} : memref<8x64xf32, #tpu.memory_space<vmem>>, vector<1x32xf32>,
    %346 = vector.extract_strided_slice %308 {offsets = [1, 0], sizes = [1, 192], strides = [1, 1]} : vector<8x192xf32> to vector<1x192xf32>
    %347 = vector.extract_strided_slice %310 {offsets = [6, 0], sizes = [1, 192], strides = [1, 1]} : vector<8x192xf32> to vector<1x192xf32>
    %348 = arith.addf %346, %347 : vector<1x192xf32>
    %349 = arith.truncf %341 : vector<1x64xf32> to vector<1x64xbf16>
    %cst_136 = arith.constant dense<0.000000e+00> : vector<1x192xf32>
    %350 = tpu.matmul %349, %311, %cst_136 {dimension_numbers = #tpu.dot_dimension_numbers<[1], [0], [0], [1], [0, 0, 1, 1], [], []>} : vector<1x64xbf16>, vector<64x192xbf16>, vector<1x192xf32> -> vector<1x192xf32>
    %351 = arith.addf %350, %312 : vector<1x192xf32>
    %352 = vector.extract_strided_slice %348 {offsets = [0, 0], sizes = [1, 128], strides = [1, 1]} : vector<1x192xf32> to vector<1x128xf32>
    %353 = vector.extract_strided_slice %351 {offsets = [0, 0], sizes = [1, 128], strides = [1, 1]} : vector<1x192xf32> to vector<1x128xf32>
    %354 = arith.addf %352, %353 : vector<1x128xf32>
    %cst_137 = arith.constant 5.000000e-01 : f32
    %355 = vector.broadcast %cst_137 : f32 to vector<1x128xf32>
    %356 = arith.mulf %355, %354 : vector<1x128xf32>
    %357 = math.tanh %356 : vector<1x128xf32>
    %cst_138 = arith.constant 1.000000e+00 : f32
    %358 = vector.broadcast %cst_138 : f32 to vector<1x128xf32>
    %359 = arith.addf %357, %358 : vector<1x128xf32>
    %cst_139 = arith.constant 5.000000e-01 : f32
    %360 = vector.broadcast %cst_139 : f32 to vector<1x128xf32>
    %361 = arith.mulf %360, %359 : vector<1x128xf32>
    %362 = vector.extract_strided_slice %361 {offsets = [0, 0], sizes = [1, 64], strides = [1, 1]} : vector<1x128xf32> to vector<1x64xf32>
    %363 = vector.extract_strided_slice %361 {offsets = [0, 64], sizes = [1, 64], strides = [1, 1]} : vector<1x128xf32> to vector<1x64xf32>
    %364 = vector.extract_strided_slice %348 {offsets = [0, 128], sizes = [1, 64], strides = [1, 1]} : vector<1x192xf32> to vector<1x64xf32>
    %365 = vector.extract_strided_slice %351 {offsets = [0, 128], sizes = [1, 64], strides = [1, 1]} : vector<1x192xf32> to vector<1x64xf32>
    %366 = arith.mulf %362, %365 : vector<1x64xf32>
    %367 = arith.addf %364, %366 : vector<1x64xf32>
    %368 = math.tanh %367 : vector<1x64xf32>
    %cst_140 = arith.constant 1.000000e+00 : f32
    %369 = vector.broadcast %cst_140 : f32 to vector<1x64xf32>
    %370 = arith.subf %369, %363 : vector<1x64xf32>
    %371 = arith.mulf %370, %368 : vector<1x64xf32>
    %372 = arith.mulf %363, %341 : vector<1x64xf32>
    %373 = arith.addf %371, %372 : vector<1x64xf32>
    %374 = vector.extract_strided_slice %373 {offsets = [0, 0], sizes = [1, 32], strides = [1, 1]} : vector<1x64xf32> to vector<1x32xf32>
    %c1_141 = arith.constant 1 : index
    %c0_142 = arith.constant 0 : index
    %375 = vector.load %arg32[%c1_141, %c0_142] : memref<8x64xf32, #tpu.memory_space<vmem>>, vector<1x32xf32>
    tpu.vector_store %arg32[%c1_141, %c0_142], %374 {strides = array<i32>} : memref<8x64xf32, #tpu.memory_space<vmem>>, vector<1x32xf32>,
    %376 = vector.extract_strided_slice %373 {offsets = [0, 32], sizes = [1, 32], strides = [1, 1]} : vector<1x64xf32> to vector<1x32xf32>
    %c6_143 = arith.constant 6 : index
    %c32_144 = arith.constant 32 : index
    %377 = vector.load %arg32[%c6_143, %c32_144] : memref<8x64xf32, #tpu.memory_space<vmem>>, vector<1x32xf32>
    tpu.vector_store %arg32[%c6_143, %c32_144], %376 {strides = array<i32>} : memref<8x64xf32, #tpu.memory_space<vmem>>, vector<1x32xf32>,
    %378 = vector.extract_strided_slice %308 {offsets = [2, 0], sizes = [1, 192], strides = [1, 1]} : vector<8x192xf32> to vector<1x192xf32>
    %379 = vector.extract_strided_slice %310 {offsets = [5, 0], sizes = [1, 192], strides = [1, 1]} : vector<8x192xf32> to vector<1x192xf32>
    %380 = arith.addf %378, %379 : vector<1x192xf32>
    %381 = arith.truncf %373 : vector<1x64xf32> to vector<1x64xbf16>
    %cst_145 = arith.constant dense<0.000000e+00> : vector<1x192xf32>
    %382 = tpu.matmul %381, %311, %cst_145 {dimension_numbers = #tpu.dot_dimension_numbers<[1], [0], [0], [1], [0, 0, 1, 1], [], []>} : vector<1x64xbf16>, vector<64x192xbf16>, vector<1x192xf32> -> vector<1x192xf32>
    %383 = arith.addf %382, %312 : vector<1x192xf32>
    %384 = vector.extract_strided_slice %380 {offsets = [0, 0], sizes = [1, 128], strides = [1, 1]} : vector<1x192xf32> to vector<1x128xf32>
    %385 = vector.extract_strided_slice %383 {offsets = [0, 0], sizes = [1, 128], strides = [1, 1]} : vector<1x192xf32> to vector<1x128xf32>
    %386 = arith.addf %384, %385 : vector<1x128xf32>
    %cst_146 = arith.constant 5.000000e-01 : f32
    %387 = vector.broadcast %cst_146 : f32 to vector<1x128xf32>
    %388 = arith.mulf %387, %386 : vector<1x128xf32>
    %389 = math.tanh %388 : vector<1x128xf32>
    %cst_147 = arith.constant 1.000000e+00 : f32
    %390 = vector.broadcast %cst_147 : f32 to vector<1x128xf32>
    %391 = arith.addf %389, %390 : vector<1x128xf32>
    %cst_148 = arith.constant 5.000000e-01 : f32
    %392 = vector.broadcast %cst_148 : f32 to vector<1x128xf32>
    %393 = arith.mulf %392, %391 : vector<1x128xf32>
    %394 = vector.extract_strided_slice %393 {offsets = [0, 0], sizes = [1, 64], strides = [1, 1]} : vector<1x128xf32> to vector<1x64xf32>
    %395 = vector.extract_strided_slice %393 {offsets = [0, 64], sizes = [1, 64], strides = [1, 1]} : vector<1x128xf32> to vector<1x64xf32>
    %396 = vector.extract_strided_slice %380 {offsets = [0, 128], sizes = [1, 64], strides = [1, 1]} : vector<1x192xf32> to vector<1x64xf32>
    %397 = vector.extract_strided_slice %383 {offsets = [0, 128], sizes = [1, 64], strides = [1, 1]} : vector<1x192xf32> to vector<1x64xf32>
    %398 = arith.mulf %394, %397 : vector<1x64xf32>
    %399 = arith.addf %396, %398 : vector<1x64xf32>
    %400 = math.tanh %399 : vector<1x64xf32>
    %cst_149 = arith.constant 1.000000e+00 : f32
    %401 = vector.broadcast %cst_149 : f32 to vector<1x64xf32>
    %402 = arith.subf %401, %395 : vector<1x64xf32>
    %403 = arith.mulf %402, %400 : vector<1x64xf32>
    %404 = arith.mulf %395, %373 : vector<1x64xf32>
    %405 = arith.addf %403, %404 : vector<1x64xf32>
    %406 = vector.extract_strided_slice %405 {offsets = [0, 0], sizes = [1, 32], strides = [1, 1]} : vector<1x64xf32> to vector<1x32xf32>
    %c2_150 = arith.constant 2 : index
    %c0_151 = arith.constant 0 : index
    %407 = vector.load %arg32[%c2_150, %c0_151] : memref<8x64xf32, #tpu.memory_space<vmem>>, vector<1x32xf32>
    tpu.vector_store %arg32[%c2_150, %c0_151], %406 {strides = array<i32>} : memref<8x64xf32, #tpu.memory_space<vmem>>, vector<1x32xf32>,
    %408 = vector.extract_strided_slice %405 {offsets = [0, 32], sizes = [1, 32], strides = [1, 1]} : vector<1x64xf32> to vector<1x32xf32>
    %c5_152 = arith.constant 5 : index
    %c32_153 = arith.constant 32 : index
    %409 = vector.load %arg32[%c5_152, %c32_153] : memref<8x64xf32, #tpu.memory_space<vmem>>, vector<1x32xf32>
    tpu.vector_store %arg32[%c5_152, %c32_153], %408 {strides = array<i32>} : memref<8x64xf32, #tpu.memory_space<vmem>>, vector<1x32xf32>,
    %410 = vector.extract_strided_slice %308 {offsets = [3, 0], sizes = [1, 192], strides = [1, 1]} : vector<8x192xf32> to vector<1x192xf32>
    %411 = vector.extract_strided_slice %310 {offsets = [4, 0], sizes = [1, 192], strides = [1, 1]} : vector<8x192xf32> to vector<1x192xf32>
    %412 = arith.addf %410, %411 : vector<1x192xf32>
    %413 = arith.truncf %405 : vector<1x64xf32> to vector<1x64xbf16>
    %cst_154 = arith.constant dense<0.000000e+00> : vector<1x192xf32>
    %414 = tpu.matmul %413, %311, %cst_154 {dimension_numbers = #tpu.dot_dimension_numbers<[1], [0], [0], [1], [0, 0, 1, 1], [], []>} : vector<1x64xbf16>, vector<64x192xbf16>, vector<1x192xf32> -> vector<1x192xf32>
    %415 = arith.addf %414, %312 : vector<1x192xf32>
    %416 = vector.extract_strided_slice %412 {offsets = [0, 0], sizes = [1, 128], strides = [1, 1]} : vector<1x192xf32> to vector<1x128xf32>
    %417 = vector.extract_strided_slice %415 {offsets = [0, 0], sizes = [1, 128], strides = [1, 1]} : vector<1x192xf32> to vector<1x128xf32>
    %418 = arith.addf %416, %417 : vector<1x128xf32>
    %cst_155 = arith.constant 5.000000e-01 : f32
    %419 = vector.broadcast %cst_155 : f32 to vector<1x128xf32>
    %420 = arith.mulf %419, %418 : vector<1x128xf32>
    %421 = math.tanh %420 : vector<1x128xf32>
    %cst_156 = arith.constant 1.000000e+00 : f32
    %422 = vector.broadcast %cst_156 : f32 to vector<1x128xf32>
    %423 = arith.addf %421, %422 : vector<1x128xf32>
    %cst_157 = arith.constant 5.000000e-01 : f32
    %424 = vector.broadcast %cst_157 : f32 to vector<1x128xf32>
    %425 = arith.mulf %424, %423 : vector<1x128xf32>
    %426 = vector.extract_strided_slice %425 {offsets = [0, 0], sizes = [1, 64], strides = [1, 1]} : vector<1x128xf32> to vector<1x64xf32>
    %427 = vector.extract_strided_slice %425 {offsets = [0, 64], sizes = [1, 64], strides = [1, 1]} : vector<1x128xf32> to vector<1x64xf32>
    %428 = vector.extract_strided_slice %412 {offsets = [0, 128], sizes = [1, 64], strides = [1, 1]} : vector<1x192xf32> to vector<1x64xf32>
    %429 = vector.extract_strided_slice %415 {offsets = [0, 128], sizes = [1, 64], strides = [1, 1]} : vector<1x192xf32> to vector<1x64xf32>
    %430 = arith.mulf %426, %429 : vector<1x64xf32>
    %431 = arith.addf %428, %430 : vector<1x64xf32>
    %432 = math.tanh %431 : vector<1x64xf32>
    %cst_158 = arith.constant 1.000000e+00 : f32
    %433 = vector.broadcast %cst_158 : f32 to vector<1x64xf32>
    %434 = arith.subf %433, %427 : vector<1x64xf32>
    %435 = arith.mulf %434, %432 : vector<1x64xf32>
    %436 = arith.mulf %427, %405 : vector<1x64xf32>
    %437 = arith.addf %435, %436 : vector<1x64xf32>
    %438 = vector.extract_strided_slice %437 {offsets = [0, 0], sizes = [1, 32], strides = [1, 1]} : vector<1x64xf32> to vector<1x32xf32>
    %c3_159 = arith.constant 3 : index
    %c0_160 = arith.constant 0 : index
    %439 = vector.load %arg32[%c3_159, %c0_160] : memref<8x64xf32, #tpu.memory_space<vmem>>, vector<1x32xf32>
    tpu.vector_store %arg32[%c3_159, %c0_160], %438 {strides = array<i32>} : memref<8x64xf32, #tpu.memory_space<vmem>>, vector<1x32xf32>,
    %440 = vector.extract_strided_slice %437 {offsets = [0, 32], sizes = [1, 32], strides = [1, 1]} : vector<1x64xf32> to vector<1x32xf32>
    %c4_161 = arith.constant 4 : index
    %c32_162 = arith.constant 32 : index
    %441 = vector.load %arg32[%c4_161, %c32_162] : memref<8x64xf32, #tpu.memory_space<vmem>>, vector<1x32xf32>
    tpu.vector_store %arg32[%c4_161, %c32_162], %440 {strides = array<i32>} : memref<8x64xf32, #tpu.memory_space<vmem>>, vector<1x32xf32>,
    %442 = vector.extract_strided_slice %308 {offsets = [4, 0], sizes = [1, 192], strides = [1, 1]} : vector<8x192xf32> to vector<1x192xf32>
    %443 = vector.extract_strided_slice %310 {offsets = [3, 0], sizes = [1, 192], strides = [1, 1]} : vector<8x192xf32> to vector<1x192xf32>
    %444 = arith.addf %442, %443 : vector<1x192xf32>
    %445 = arith.truncf %437 : vector<1x64xf32> to vector<1x64xbf16>
    %cst_163 = arith.constant dense<0.000000e+00> : vector<1x192xf32>
    %446 = tpu.matmul %445, %311, %cst_163 {dimension_numbers = #tpu.dot_dimension_numbers<[1], [0], [0], [1], [0, 0, 1, 1], [], []>} : vector<1x64xbf16>, vector<64x192xbf16>, vector<1x192xf32> -> vector<1x192xf32>
    %447 = arith.addf %446, %312 : vector<1x192xf32>
    %448 = vector.extract_strided_slice %444 {offsets = [0, 0], sizes = [1, 128], strides = [1, 1]} : vector<1x192xf32> to vector<1x128xf32>
    %449 = vector.extract_strided_slice %447 {offsets = [0, 0], sizes = [1, 128], strides = [1, 1]} : vector<1x192xf32> to vector<1x128xf32>
    %450 = arith.addf %448, %449 : vector<1x128xf32>
    %cst_164 = arith.constant 5.000000e-01 : f32
    %451 = vector.broadcast %cst_164 : f32 to vector<1x128xf32>
    %452 = arith.mulf %451, %450 : vector<1x128xf32>
    %453 = math.tanh %452 : vector<1x128xf32>
    %cst_165 = arith.constant 1.000000e+00 : f32
    %454 = vector.broadcast %cst_165 : f32 to vector<1x128xf32>
    %455 = arith.addf %453, %454 : vector<1x128xf32>
    %cst_166 = arith.constant 5.000000e-01 : f32
    %456 = vector.broadcast %cst_166 : f32 to vector<1x128xf32>
    %457 = arith.mulf %456, %455 : vector<1x128xf32>
    %458 = vector.extract_strided_slice %457 {offsets = [0, 0], sizes = [1, 64], strides = [1, 1]} : vector<1x128xf32> to vector<1x64xf32>
    %459 = vector.extract_strided_slice %457 {offsets = [0, 64], sizes = [1, 64], strides = [1, 1]} : vector<1x128xf32> to vector<1x64xf32>
    %460 = vector.extract_strided_slice %444 {offsets = [0, 128], sizes = [1, 64], strides = [1, 1]} : vector<1x192xf32> to vector<1x64xf32>
    %461 = vector.extract_strided_slice %447 {offsets = [0, 128], sizes = [1, 64], strides = [1, 1]} : vector<1x192xf32> to vector<1x64xf32>
    %462 = arith.mulf %458, %461 : vector<1x64xf32>
    %463 = arith.addf %460, %462 : vector<1x64xf32>
    %464 = math.tanh %463 : vector<1x64xf32>
    %cst_167 = arith.constant 1.000000e+00 : f32
    %465 = vector.broadcast %cst_167 : f32 to vector<1x64xf32>
    %466 = arith.subf %465, %459 : vector<1x64xf32>
    %467 = arith.mulf %466, %464 : vector<1x64xf32>
    %468 = arith.mulf %459, %437 : vector<1x64xf32>
    %469 = arith.addf %467, %468 : vector<1x64xf32>
    %470 = vector.extract_strided_slice %469 {offsets = [0, 0], sizes = [1, 32], strides = [1, 1]} : vector<1x64xf32> to vector<1x32xf32>
    %c4_168 = arith.constant 4 : index
    %c0_169 = arith.constant 0 : index
    %471 = vector.load %arg32[%c4_168, %c0_169] : memref<8x64xf32, #tpu.memory_space<vmem>>, vector<1x32xf32>
    tpu.vector_store %arg32[%c4_168, %c0_169], %470 {strides = array<i32>} : memref<8x64xf32, #tpu.memory_space<vmem>>, vector<1x32xf32>,
    %472 = vector.extract_strided_slice %469 {offsets = [0, 32], sizes = [1, 32], strides = [1, 1]} : vector<1x64xf32> to vector<1x32xf32>
    %c3_170 = arith.constant 3 : index
    %c32_171 = arith.constant 32 : index
    %473 = vector.load %arg32[%c3_170, %c32_171] : memref<8x64xf32, #tpu.memory_space<vmem>>, vector<1x32xf32>
    tpu.vector_store %arg32[%c3_170, %c32_171], %472 {strides = array<i32>} : memref<8x64xf32, #tpu.memory_space<vmem>>, vector<1x32xf32>,
    %474 = vector.extract_strided_slice %308 {offsets = [5, 0], sizes = [1, 192], strides = [1, 1]} : vector<8x192xf32> to vector<1x192xf32>
    %475 = vector.extract_strided_slice %310 {offsets = [2, 0], sizes = [1, 192], strides = [1, 1]} : vector<8x192xf32> to vector<1x192xf32>
    %476 = arith.addf %474, %475 : vector<1x192xf32>
    %477 = arith.truncf %469 : vector<1x64xf32> to vector<1x64xbf16>
    %cst_172 = arith.constant dense<0.000000e+00> : vector<1x192xf32>
    %478 = tpu.matmul %477, %311, %cst_172 {dimension_numbers = #tpu.dot_dimension_numbers<[1], [0], [0], [1], [0, 0, 1, 1], [], []>} : vector<1x64xbf16>, vector<64x192xbf16>, vector<1x192xf32> -> vector<1x192xf32>
    %479 = arith.addf %478, %312 : vector<1x192xf32>
    %480 = vector.extract_strided_slice %476 {offsets = [0, 0], sizes = [1, 128], strides = [1, 1]} : vector<1x192xf32> to vector<1x128xf32>
    %481 = vector.extract_strided_slice %479 {offsets = [0, 0], sizes = [1, 128], strides = [1, 1]} : vector<1x192xf32> to vector<1x128xf32>
    %482 = arith.addf %480, %481 : vector<1x128xf32>
    %cst_173 = arith.constant 5.000000e-01 : f32
    %483 = vector.broadcast %cst_173 : f32 to vector<1x128xf32>
    %484 = arith.mulf %483, %482 : vector<1x128xf32>
    %485 = math.tanh %484 : vector<1x128xf32>
    %cst_174 = arith.constant 1.000000e+00 : f32
    %486 = vector.broadcast %cst_174 : f32 to vector<1x128xf32>
    %487 = arith.addf %485, %486 : vector<1x128xf32>
    %cst_175 = arith.constant 5.000000e-01 : f32
    %488 = vector.broadcast %cst_175 : f32 to vector<1x128xf32>
    %489 = arith.mulf %488, %487 : vector<1x128xf32>
    %490 = vector.extract_strided_slice %489 {offsets = [0, 0], sizes = [1, 64], strides = [1, 1]} : vector<1x128xf32> to vector<1x64xf32>
    %491 = vector.extract_strided_slice %489 {offsets = [0, 64], sizes = [1, 64], strides = [1, 1]} : vector<1x128xf32> to vector<1x64xf32>
    %492 = vector.extract_strided_slice %476 {offsets = [0, 128], sizes = [1, 64], strides = [1, 1]} : vector<1x192xf32> to vector<1x64xf32>
    %493 = vector.extract_strided_slice %479 {offsets = [0, 128], sizes = [1, 64], strides = [1, 1]} : vector<1x192xf32> to vector<1x64xf32>
    %494 = arith.mulf %490, %493 : vector<1x64xf32>
    %495 = arith.addf %492, %494 : vector<1x64xf32>
    %496 = math.tanh %495 : vector<1x64xf32>
    %cst_176 = arith.constant 1.000000e+00 : f32
    %497 = vector.broadcast %cst_176 : f32 to vector<1x64xf32>
    %498 = arith.subf %497, %491 : vector<1x64xf32>
    %499 = arith.mulf %498, %496 : vector<1x64xf32>
    %500 = arith.mulf %491, %469 : vector<1x64xf32>
    %501 = arith.addf %499, %500 : vector<1x64xf32>
    %502 = vector.extract_strided_slice %501 {offsets = [0, 0], sizes = [1, 32], strides = [1, 1]} : vector<1x64xf32> to vector<1x32xf32>
    %c5_177 = arith.constant 5 : index
    %c0_178 = arith.constant 0 : index
    %503 = vector.load %arg32[%c5_177, %c0_178] : memref<8x64xf32, #tpu.memory_space<vmem>>, vector<1x32xf32>
    tpu.vector_store %arg32[%c5_177, %c0_178], %502 {strides = array<i32>} : memref<8x64xf32, #tpu.memory_space<vmem>>, vector<1x32xf32>,
    %504 = vector.extract_strided_slice %501 {offsets = [0, 32], sizes = [1, 32], strides = [1, 1]} : vector<1x64xf32> to vector<1x32xf32>
    %c2_179 = arith.constant 2 : index
    %c32_180 = arith.constant 32 : index
    %505 = vector.load %arg32[%c2_179, %c32_180] : memref<8x64xf32, #tpu.memory_space<vmem>>, vector<1x32xf32>
    tpu.vector_store %arg32[%c2_179, %c32_180], %504 {strides = array<i32>} : memref<8x64xf32, #tpu.memory_space<vmem>>, vector<1x32xf32>,
    %506 = vector.extract_strided_slice %308 {offsets = [6, 0], sizes = [1, 192], strides = [1, 1]} : vector<8x192xf32> to vector<1x192xf32>
    %507 = vector.extract_strided_slice %310 {offsets = [1, 0], sizes = [1, 192], strides = [1, 1]} : vector<8x192xf32> to vector<1x192xf32>
    %508 = arith.addf %506, %507 : vector<1x192xf32>
    %509 = arith.truncf %501 : vector<1x64xf32> to vector<1x64xbf16>
    %cst_181 = arith.constant dense<0.000000e+00> : vector<1x192xf32>
    %510 = tpu.matmul %509, %311, %cst_181 {dimension_numbers = #tpu.dot_dimension_numbers<[1], [0], [0], [1], [0, 0, 1, 1], [], []>} : vector<1x64xbf16>, vector<64x192xbf16>, vector<1x192xf32> -> vector<1x192xf32>
    %511 = arith.addf %510, %312 : vector<1x192xf32>
    %512 = vector.extract_strided_slice %508 {offsets = [0, 0], sizes = [1, 128], strides = [1, 1]} : vector<1x192xf32> to vector<1x128xf32>
    %513 = vector.extract_strided_slice %511 {offsets = [0, 0], sizes = [1, 128], strides = [1, 1]} : vector<1x192xf32> to vector<1x128xf32>
    %514 = arith.addf %512, %513 : vector<1x128xf32>
    %cst_182 = arith.constant 5.000000e-01 : f32
    %515 = vector.broadcast %cst_182 : f32 to vector<1x128xf32>
    %516 = arith.mulf %515, %514 : vector<1x128xf32>
    %517 = math.tanh %516 : vector<1x128xf32>
    %cst_183 = arith.constant 1.000000e+00 : f32
    %518 = vector.broadcast %cst_183 : f32 to vector<1x128xf32>
    %519 = arith.addf %517, %518 : vector<1x128xf32>
    %cst_184 = arith.constant 5.000000e-01 : f32
    %520 = vector.broadcast %cst_184 : f32 to vector<1x128xf32>
    %521 = arith.mulf %520, %519 : vector<1x128xf32>
    %522 = vector.extract_strided_slice %521 {offsets = [0, 0], sizes = [1, 64], strides = [1, 1]} : vector<1x128xf32> to vector<1x64xf32>
    %523 = vector.extract_strided_slice %521 {offsets = [0, 64], sizes = [1, 64], strides = [1, 1]} : vector<1x128xf32> to vector<1x64xf32>
    %524 = vector.extract_strided_slice %508 {offsets = [0, 128], sizes = [1, 64], strides = [1, 1]} : vector<1x192xf32> to vector<1x64xf32>
    %525 = vector.extract_strided_slice %511 {offsets = [0, 128], sizes = [1, 64], strides = [1, 1]} : vector<1x192xf32> to vector<1x64xf32>
    %526 = arith.mulf %522, %525 : vector<1x64xf32>
    %527 = arith.addf %524, %526 : vector<1x64xf32>
    %528 = math.tanh %527 : vector<1x64xf32>
    %cst_185 = arith.constant 1.000000e+00 : f32
    %529 = vector.broadcast %cst_185 : f32 to vector<1x64xf32>
    %530 = arith.subf %529, %523 : vector<1x64xf32>
    %531 = arith.mulf %530, %528 : vector<1x64xf32>
    %532 = arith.mulf %523, %501 : vector<1x64xf32>
    %533 = arith.addf %531, %532 : vector<1x64xf32>
    %534 = vector.extract_strided_slice %533 {offsets = [0, 0], sizes = [1, 32], strides = [1, 1]} : vector<1x64xf32> to vector<1x32xf32>
    %c6_186 = arith.constant 6 : index
    %c0_187 = arith.constant 0 : index
    %535 = vector.load %arg32[%c6_186, %c0_187] : memref<8x64xf32, #tpu.memory_space<vmem>>, vector<1x32xf32>
    tpu.vector_store %arg32[%c6_186, %c0_187], %534 {strides = array<i32>} : memref<8x64xf32, #tpu.memory_space<vmem>>, vector<1x32xf32>,
    %536 = vector.extract_strided_slice %533 {offsets = [0, 32], sizes = [1, 32], strides = [1, 1]} : vector<1x64xf32> to vector<1x32xf32>
    %c1_188 = arith.constant 1 : index
    %c32_189 = arith.constant 32 : index
    %537 = vector.load %arg32[%c1_188, %c32_189] : memref<8x64xf32, #tpu.memory_space<vmem>>, vector<1x32xf32>
    tpu.vector_store %arg32[%c1_188, %c32_189], %536 {strides = array<i32>} : memref<8x64xf32, #tpu.memory_space<vmem>>, vector<1x32xf32>,
    %538 = vector.extract_strided_slice %308 {offsets = [7, 0], sizes = [1, 192], strides = [1, 1]} : vector<8x192xf32> to vector<1x192xf32>
    %539 = vector.extract_strided_slice %310 {offsets = [0, 0], sizes = [1, 192], strides = [1, 1]} : vector<8x192xf32> to vector<1x192xf32>
    %540 = arith.addf %538, %539 : vector<1x192xf32>
    %541 = arith.truncf %533 : vector<1x64xf32> to vector<1x64xbf16>
    %cst_190 = arith.constant dense<0.000000e+00> : vector<1x192xf32>
    %542 = tpu.matmul %541, %311, %cst_190 {dimension_numbers = #tpu.dot_dimension_numbers<[1], [0], [0], [1], [0, 0, 1, 1], [], []>} : vector<1x64xbf16>, vector<64x192xbf16>, vector<1x192xf32> -> vector<1x192xf32>
    %543 = arith.addf %542, %312 : vector<1x192xf32>
    %544 = vector.extract_strided_slice %540 {offsets = [0, 0], sizes = [1, 128], strides = [1, 1]} : vector<1x192xf32> to vector<1x128xf32>
    %545 = vector.extract_strided_slice %543 {offsets = [0, 0], sizes = [1, 128], strides = [1, 1]} : vector<1x192xf32> to vector<1x128xf32>
    %546 = arith.addf %544, %545 : vector<1x128xf32>
    %cst_191 = arith.constant 5.000000e-01 : f32
    %547 = vector.broadcast %cst_191 : f32 to vector<1x128xf32>
    %548 = arith.mulf %547, %546 : vector<1x128xf32>
    %549 = math.tanh %548 : vector<1x128xf32>
    %cst_192 = arith.constant 1.000000e+00 : f32
    %550 = vector.broadcast %cst_192 : f32 to vector<1x128xf32>
    %551 = arith.addf %549, %550 : vector<1x128xf32>
    %cst_193 = arith.constant 5.000000e-01 : f32
    %552 = vector.broadcast %cst_193 : f32 to vector<1x128xf32>
    %553 = arith.mulf %552, %551 : vector<1x128xf32>
    %554 = vector.extract_strided_slice %553 {offsets = [0, 0], sizes = [1, 64], strides = [1, 1]} : vector<1x128xf32> to vector<1x64xf32>
    %555 = vector.extract_strided_slice %553 {offsets = [0, 64], sizes = [1, 64], strides = [1, 1]} : vector<1x128xf32> to vector<1x64xf32>
    %556 = vector.extract_strided_slice %540 {offsets = [0, 128], sizes = [1, 64], strides = [1, 1]} : vector<1x192xf32> to vector<1x64xf32>
    %557 = vector.extract_strided_slice %543 {offsets = [0, 128], sizes = [1, 64], strides = [1, 1]} : vector<1x192xf32> to vector<1x64xf32>
    %558 = arith.mulf %554, %557 : vector<1x64xf32>
    %559 = arith.addf %556, %558 : vector<1x64xf32>
    %560 = math.tanh %559 : vector<1x64xf32>
    %cst_194 = arith.constant 1.000000e+00 : f32
    %561 = vector.broadcast %cst_194 : f32 to vector<1x64xf32>
    %562 = arith.subf %561, %555 : vector<1x64xf32>
    %563 = arith.mulf %562, %560 : vector<1x64xf32>
    %564 = arith.mulf %555, %533 : vector<1x64xf32>
    %565 = arith.addf %563, %564 : vector<1x64xf32>
    %566 = vector.extract_strided_slice %565 {offsets = [0, 0], sizes = [1, 32], strides = [1, 1]} : vector<1x64xf32> to vector<1x32xf32>
    %c7_195 = arith.constant 7 : index
    %c0_196 = arith.constant 0 : index
    %567 = vector.load %arg32[%c7_195, %c0_196] : memref<8x64xf32, #tpu.memory_space<vmem>>, vector<1x32xf32>
    tpu.vector_store %arg32[%c7_195, %c0_196], %566 {strides = array<i32>} : memref<8x64xf32, #tpu.memory_space<vmem>>, vector<1x32xf32>,
    %568 = vector.extract_strided_slice %565 {offsets = [0, 32], sizes = [1, 32], strides = [1, 1]} : vector<1x64xf32> to vector<1x32xf32>
    %c0_197 = arith.constant 0 : index
    %c32_198 = arith.constant 32 : index
    %569 = vector.load %arg32[%c0_197, %c32_198] : memref<8x64xf32, #tpu.memory_space<vmem>>, vector<1x32xf32>
    tpu.vector_store %arg32[%c0_197, %c32_198], %568 {strides = array<i32>} : memref<8x64xf32, #tpu.memory_space<vmem>>, vector<1x32xf32>,
    %570 = vector.extract_strided_slice %565 {offsets = [0, 0], sizes = [1, 32], strides = [1, 1]} : vector<1x64xf32> to vector<1x32xf32>
    %571 = vector.extract_strided_slice %565 {offsets = [0, 32], sizes = [1, 32], strides = [1, 1]} : vector<1x64xf32> to vector<1x32xf32>
    %c0_199 = arith.constant 0 : index
    %c0_200 = arith.constant 0 : index
    %572 = vector.load %arg32[%c0_199, %c0_200] : memref<8x64xf32, #tpu.memory_space<vmem>>, vector<8x64xf32>
    %573 = vector.extract_strided_slice %572 {offsets = [0, 0], sizes = [8, 32], strides = [1, 1]} : vector<8x64xf32> to vector<8x32xf32>
    %574 = vector.extract_strided_slice %572 {offsets = [0, 32], sizes = [8, 32], strides = [1, 1]} : vector<8x64xf32> to vector<8x32xf32>
    %575 = arith.addf %573, %574 : vector<8x32xf32>
    %576 = arith.truncf %575 : vector<8x32xf32> to vector<8x32xbf16>
    %c0_201 = arith.constant 0 : index
    %c0_202 = arith.constant 0 : index
    %577 = vector.load %arg22[%c0_201, %c0_202] : memref<32x32xbf16, #tpu.memory_space<vmem>>, vector<32x32xbf16>
    %cst_203 = arith.constant dense<0.000000e+00> : vector<8x32xf32>
    %578 = tpu.matmul %576, %577, %cst_203 {dimension_numbers = #tpu.dot_dimension_numbers<[1], [0], [0], [1], [0, 0, 1, 1], [], []>} : vector<8x32xbf16>, vector<32x32xbf16>, vector<8x32xf32> -> vector<8x32xf32>
    %c0_204 = arith.constant 0 : index
    %c0_205 = arith.constant 0 : index
    %579 = vector.load %arg23[%c0_204, %c0_205] : memref<32x32xbf16, #tpu.memory_space<vmem>>, vector<32x32xbf16>
    %c0_206 = arith.constant 0 : index
    %c0_207 = arith.constant 0 : index
    %580 = vector.load %arg24[%c0_206, %c0_207] : memref<1x32xbf16, #tpu.memory_space<vmem>>, vector<1x32xbf16>
    %c0_208 = arith.constant 0 : index
    %c0_209 = arith.constant 0 : index
    %581 = vector.load %arg12[%c0_208, %c0_209] : memref<128x32xbf16, #tpu.memory_space<vmem>>, vector<128x32xbf16>
    %c0_210 = arith.constant 0 : index
    %c0_211 = arith.constant 0 : index
    %582 = vector.load %arg13[%c0_210, %c0_211] : memref<32x96xbf16, #tpu.memory_space<vmem>>, vector<32x96xbf16>
    %c0_212 = arith.constant 0 : index
    %c0_213 = arith.constant 0 : index
    %583 = vector.load %arg14[%c0_212, %c0_213] : memref<32x96xbf16, #tpu.memory_space<vmem>>, vector<32x96xbf16>
    %c0_214 = arith.constant 0 : index
    %c0_215 = arith.constant 0 : index
    %584 = vector.load %arg15[%c0_214, %c0_215] : memref<32x96xbf16, #tpu.memory_space<vmem>>, vector<32x96xbf16>
    %c0_216 = arith.constant 0 : index
    %c0_217 = arith.constant 0 : index
    %585 = vector.load %arg16[%c0_216, %c0_217] : memref<1x96xf32, #tpu.memory_space<vmem>>, vector<1x96xf32>
    %c0_218 = arith.constant 0 : index
    %c0_219 = arith.constant 0 : index
    %586 = vector.load %arg17[%c0_218, %c0_219] : memref<1x96xf32, #tpu.memory_space<vmem>>, vector<1x96xf32>
    %c0_220 = arith.constant 0 : index
    %c0_221 = arith.constant 0 : index
    %587 = vector.load %arg18[%c0_220, %c0_221] : memref<32x96xbf16, #tpu.memory_space<vmem>>, vector<32x96xbf16>
    %c0_222 = arith.constant 0 : index
    %c0_223 = arith.constant 0 : index
    %588 = vector.load %arg19[%c0_222, %c0_223] : memref<32x96xbf16, #tpu.memory_space<vmem>>, vector<32x96xbf16>
    %c0_224 = arith.constant 0 : index
    %c0_225 = arith.constant 0 : index
    %589 = vector.load %arg20[%c0_224, %c0_225] : memref<1x96xf32, #tpu.memory_space<vmem>>, vector<1x96xf32>
    %c0_226 = arith.constant 0 : index
    %c0_227 = arith.constant 0 : index
    %590 = vector.load %arg21[%c0_226, %c0_227] : memref<1x96xf32, #tpu.memory_space<vmem>>, vector<1x96xf32>
    %c0_228 = arith.constant 0 : index
    %c0_229 = arith.constant 0 : index
    %591 = vector.load %arg25[%c0_228, %c0_229] : memref<32x128xbf16, #tpu.memory_space<vmem>>, vector<32x128xbf16>
    %c0_230 = arith.constant 0 : index
    %c0_231 = arith.constant 0 : index
    %592 = vector.load %arg26[%c0_230, %c0_231] : memref<32x128xbf16, #tpu.memory_space<vmem>>, vector<32x128xbf16>
    %c0_232 = arith.constant 0 : index
    %c0_233 = arith.constant 0 : index
    %593 = vector.load %arg27[%c0_232, %c0_233] : memref<1x128xf32, #tpu.memory_space<vmem>>, vector<1x128xf32>
    %594 = tpu.iota {dimensions = array<i32: 1>} : vector<1x128xi32>
    %595 = arith.sitofp %594 : vector<1x128xi32> to vector<1x128xf32>
    %cst_234 = arith.constant 2.000000e+00 : f32
    %596 = vector.broadcast %cst_234 : f32 to vector<1x128xf32>
    %597 = arith.cmpf oeq, %595, %596 : vector<1x128xf32>
    %598 = arith.extui %597 : vector<1x128xi1> to vector<1x128xi32>
    %599 = arith.sitofp %598 : vector<1x128xi32> to vector<1x128xf32>
    %600 = arith.truncf %599 : vector<1x128xf32> to vector<1x128xbf16>
    %cst_235 = arith.constant dense<0.000000e+00> : vector<1x32xf32>
    %601 = tpu.matmul %600, %581, %cst_235 {dimension_numbers = #tpu.dot_dimension_numbers<[1], [0], [0], [1], [0, 0, 1, 1], [], []>} : vector<1x128xbf16>, vector<128x32xbf16>, vector<1x32xf32> -> vector<1x32xf32>
    %cst_236 = arith.constant 0.000000e+00 : f32
    %602 = vector.broadcast %cst_236 : f32 to vector<1x1xf32>
    %603 = arith.truncf %571 : vector<1x32xf32> to vector<1x32xbf16>
    %cst_237 = arith.constant dense<0.000000e+00> : vector<1x32xf32>
    %604 = tpu.matmul %603, %579, %cst_237 {dimension_numbers = #tpu.dot_dimension_numbers<[1], [0], [0], [1], [0, 0, 1, 1], [], []>} : vector<1x32xbf16>, vector<32x32xbf16>, vector<1x32xf32> -> vector<1x32xf32>
    %605 = vector.broadcast %604 : vector<1x32xf32> to vector<8x32xf32>
    %606 = arith.addf %578, %605 : vector<8x32xf32>
    %607 = math.tanh %606 : vector<8x32xf32>
    %608 = arith.truncf %607 : vector<8x32xf32> to vector<8x32xbf16>
    %cst_238 = arith.constant dense<0.000000e+00> : vector<1x8xf32>
    %609 = tpu.matmul %580, %608, %cst_238 {dimension_numbers = #tpu.dot_dimension_numbers<[1], [1], [0], [0], [0, 0, 1, 0], [], []>} : vector<1x32xbf16>, vector<8x32xbf16>, vector<1x8xf32> -> vector<1x8xf32>
    %cst_239 = arith.constant dense<0xFF800000> : vector<1xf32>
    %610 = vector.multi_reduction <maximumf>, %609, %cst_239 [1] : vector<1x8xf32> to vector<1xf32>
    %611 = vector.shape_cast %610 : vector<1xf32> to vector<1x1xf32>
    %612 = vector.broadcast %611 : vector<1x1xf32> to vector<1x8xf32>
    %613 = arith.subf %609, %612 : vector<1x8xf32>
    %614 = math.exp %613 : vector<1x8xf32>
    %cst_240 = arith.constant dense<0.000000e+00> : vector<1xf32>
    %615 = vector.multi_reduction <add>, %614, %cst_240 [1] : vector<1x8xf32> to vector<1xf32>
    %616 = vector.shape_cast %615 : vector<1xf32> to vector<1x1xf32>
    %617 = vector.broadcast %616 : vector<1x1xf32> to vector<1x8xf32>
    %618 = arith.divf %614, %617 : vector<1x8xf32>
    %619 = arith.truncf %618 : vector<1x8xf32> to vector<1x8xbf16>
    %cst_241 = arith.constant dense<0.000000e+00> : vector<1x32xf32>
    %620 = tpu.matmul %619, %576, %cst_241 {dimension_numbers = #tpu.dot_dimension_numbers<[1], [0], [0], [1], [0, 0, 1, 1], [], []>} : vector<1x8xbf16>, vector<8x32xbf16>, vector<1x32xf32> -> vector<1x32xf32>
    %621 = arith.truncf %601 : vector<1x32xf32> to vector<1x32xbf16>
    %cst_242 = arith.constant dense<0.000000e+00> : vector<1x96xf32>
    %622 = tpu.matmul %621, %582, %cst_242 {dimension_numbers = #tpu.dot_dimension_numbers<[1], [0], [0], [1], [0, 0, 1, 1], [], []>} : vector<1x32xbf16>, vector<32x96xbf16>, vector<1x96xf32> -> vector<1x96xf32>
    %623 = arith.truncf %620 : vector<1x32xf32> to vector<1x32xbf16>
    %cst_243 = arith.constant dense<0.000000e+00> : vector<1x96xf32>
    %624 = tpu.matmul %623, %583, %cst_243 {dimension_numbers = #tpu.dot_dimension_numbers<[1], [0], [0], [1], [0, 0, 1, 1], [], []>} : vector<1x32xbf16>, vector<32x96xbf16>, vector<1x96xf32> -> vector<1x96xf32>
    %625 = arith.addf %622, %624 : vector<1x96xf32>
    %626 = arith.addf %625, %585 : vector<1x96xf32>
    %627 = arith.truncf %570 : vector<1x32xf32> to vector<1x32xbf16>
    %cst_244 = arith.constant dense<0.000000e+00> : vector<1x96xf32>
    %628 = tpu.matmul %627, %584, %cst_244 {dimension_numbers = #tpu.dot_dimension_numbers<[1], [0], [0], [1], [0, 0, 1, 1], [], []>} : vector<1x32xbf16>, vector<32x96xbf16>, vector<1x96xf32> -> vector<1x96xf32>
    %629 = arith.addf %628, %586 : vector<1x96xf32>
    %630 = vector.extract_strided_slice %626 {offsets = [0, 0], sizes = [1, 64], strides = [1, 1]} : vector<1x96xf32> to vector<1x64xf32>
    %631 = vector.extract_strided_slice %629 {offsets = [0, 0], sizes = [1, 64], strides = [1, 1]} : vector<1x96xf32> to vector<1x64xf32>
    %632 = arith.addf %630, %631 : vector<1x64xf32>
    %cst_245 = arith.constant 5.000000e-01 : f32
    %633 = vector.broadcast %cst_245 : f32 to vector<1x64xf32>
    %634 = arith.mulf %633, %632 : vector<1x64xf32>
    %635 = math.tanh %634 : vector<1x64xf32>
    %cst_246 = arith.constant 1.000000e+00 : f32
    %636 = vector.broadcast %cst_246 : f32 to vector<1x64xf32>
    %637 = arith.addf %635, %636 : vector<1x64xf32>
    %cst_247 = arith.constant 5.000000e-01 : f32
    %638 = vector.broadcast %cst_247 : f32 to vector<1x64xf32>
    %639 = arith.mulf %638, %637 : vector<1x64xf32>
    %640 = vector.extract_strided_slice %639 {offsets = [0, 0], sizes = [1, 32], strides = [1, 1]} : vector<1x64xf32> to vector<1x32xf32>
    %641 = vector.extract_strided_slice %639 {offsets = [0, 32], sizes = [1, 32], strides = [1, 1]} : vector<1x64xf32> to vector<1x32xf32>
    %642 = vector.extract_strided_slice %626 {offsets = [0, 64], sizes = [1, 32], strides = [1, 1]} : vector<1x96xf32> to vector<1x32xf32>
    %643 = vector.extract_strided_slice %629 {offsets = [0, 64], sizes = [1, 32], strides = [1, 1]} : vector<1x96xf32> to vector<1x32xf32>
    %644 = arith.mulf %640, %643 : vector<1x32xf32>
    %645 = arith.addf %642, %644 : vector<1x32xf32>
    %646 = math.tanh %645 : vector<1x32xf32>
    %cst_248 = arith.constant 1.000000e+00 : f32
    %647 = vector.broadcast %cst_248 : f32 to vector<1x32xf32>
    %648 = arith.subf %647, %641 : vector<1x32xf32>
    %649 = arith.mulf %648, %646 : vector<1x32xf32>
    %650 = arith.mulf %641, %570 : vector<1x32xf32>
    %651 = arith.addf %649, %650 : vector<1x32xf32>
    %652 = arith.truncf %651 : vector<1x32xf32> to vector<1x32xbf16>
    %cst_249 = arith.constant dense<0.000000e+00> : vector<1x96xf32>
    %653 = tpu.matmul %652, %587, %cst_249 {dimension_numbers = #tpu.dot_dimension_numbers<[1], [0], [0], [1], [0, 0, 1, 1], [], []>} : vector<1x32xbf16>, vector<32x96xbf16>, vector<1x96xf32> -> vector<1x96xf32>
    %654 = arith.addf %653, %589 : vector<1x96xf32>
    %655 = arith.truncf %571 : vector<1x32xf32> to vector<1x32xbf16>
    %cst_250 = arith.constant dense<0.000000e+00> : vector<1x96xf32>
    %656 = tpu.matmul %655, %588, %cst_250 {dimension_numbers = #tpu.dot_dimension_numbers<[1], [0], [0], [1], [0, 0, 1, 1], [], []>} : vector<1x32xbf16>, vector<32x96xbf16>, vector<1x96xf32> -> vector<1x96xf32>
    %657 = arith.addf %656, %590 : vector<1x96xf32>
    %658 = vector.extract_strided_slice %654 {offsets = [0, 0], sizes = [1, 64], strides = [1, 1]} : vector<1x96xf32> to vector<1x64xf32>
    %659 = vector.extract_strided_slice %657 {offsets = [0, 0], sizes = [1, 64], strides = [1, 1]} : vector<1x96xf32> to vector<1x64xf32>
    %660 = arith.addf %658, %659 : vector<1x64xf32>
    %cst_251 = arith.constant 5.000000e-01 : f32
    %661 = vector.broadcast %cst_251 : f32 to vector<1x64xf32>
    %662 = arith.mulf %661, %660 : vector<1x64xf32>
    %663 = math.tanh %662 : vector<1x64xf32>
    %cst_252 = arith.constant 1.000000e+00 : f32
    %664 = vector.broadcast %cst_252 : f32 to vector<1x64xf32>
    %665 = arith.addf %663, %664 : vector<1x64xf32>
    %cst_253 = arith.constant 5.000000e-01 : f32
    %666 = vector.broadcast %cst_253 : f32 to vector<1x64xf32>
    %667 = arith.mulf %666, %665 : vector<1x64xf32>
    %668 = vector.extract_strided_slice %667 {offsets = [0, 0], sizes = [1, 32], strides = [1, 1]} : vector<1x64xf32> to vector<1x32xf32>
    %669 = vector.extract_strided_slice %667 {offsets = [0, 32], sizes = [1, 32], strides = [1, 1]} : vector<1x64xf32> to vector<1x32xf32>
    %670 = vector.extract_strided_slice %654 {offsets = [0, 64], sizes = [1, 32], strides = [1, 1]} : vector<1x96xf32> to vector<1x32xf32>
    %671 = vector.extract_strided_slice %657 {offsets = [0, 64], sizes = [1, 32], strides = [1, 1]} : vector<1x96xf32> to vector<1x32xf32>
    %672 = arith.mulf %668, %671 : vector<1x32xf32>
    %673 = arith.addf %670, %672 : vector<1x32xf32>
    %674 = math.tanh %673 : vector<1x32xf32>
    %cst_254 = arith.constant 1.000000e+00 : f32
    %675 = vector.broadcast %cst_254 : f32 to vector<1x32xf32>
    %676 = arith.subf %675, %669 : vector<1x32xf32>
    %677 = arith.mulf %676, %674 : vector<1x32xf32>
    %678 = arith.mulf %669, %571 : vector<1x32xf32>
    %679 = arith.addf %677, %678 : vector<1x32xf32>
    %680 = arith.truncf %679 : vector<1x32xf32> to vector<1x32xbf16>
    %cst_255 = arith.constant dense<0.000000e+00> : vector<1x128xf32>
    %681 = tpu.matmul %680, %591, %cst_255 {dimension_numbers = #tpu.dot_dimension_numbers<[1], [0], [0], [1], [0, 0, 1, 1], [], []>} : vector<1x32xbf16>, vector<32x128xbf16>, vector<1x128xf32> -> vector<1x128xf32>
    %682 = arith.truncf %620 : vector<1x32xf32> to vector<1x32xbf16>
    %cst_256 = arith.constant dense<0.000000e+00> : vector<1x128xf32>
    %683 = tpu.matmul %682, %592, %cst_256 {dimension_numbers = #tpu.dot_dimension_numbers<[1], [0], [0], [1], [0, 0, 1, 1], [], []>} : vector<1x32xbf16>, vector<32x128xbf16>, vector<1x128xf32> -> vector<1x128xf32>
    %684 = arith.addf %681, %683 : vector<1x128xf32>
    %685 = arith.addf %684, %593 : vector<1x128xf32>
    %cst_257 = arith.constant 1.000000e+00 : f32
    %686 = vector.broadcast %cst_257 : f32 to vector<1x1xf32>
    %687 = arith.subf %686, %602 : vector<1x1xf32>
    %688 = vector.broadcast %687 : vector<1x1xf32> to vector<1x128xf32>
    %689 = arith.mulf %685, %688 : vector<1x128xf32>
    %c0_258 = arith.constant 0 : index
    %c0_259 = arith.constant 0 : index
    %690 = vector.load %arg28[%c0_258, %c0_259] : memref<5x128xf32, #tpu.memory_space<vmem>>, vector<1x128xf32>
    tpu.vector_store %arg28[%c0_258, %c0_259], %689 {strides = array<i32>} : memref<5x128xf32, #tpu.memory_space<vmem>>, vector<1x128xf32>,
    %691 = vector.broadcast %687 : vector<1x1xf32> to vector<1x8xf32>
    %692 = arith.mulf %618, %691 : vector<1x8xf32>
    %c0_260 = arith.constant 0 : index
    %c0_261 = arith.constant 0 : index
    %693 = vector.load %arg29[%c0_260, %c0_261] : memref<5x128xf32, #tpu.memory_space<vmem>>, vector<1x8xf32>
    tpu.vector_store %arg29[%c0_260, %c0_261], %692 {strides = array<i32>} : memref<5x128xf32, #tpu.memory_space<vmem>>, vector<1x8xf32>,
    %cst_262 = arith.constant dense<0xFF800000> : vector<1xf32>
    %694 = vector.multi_reduction <maximumf>, %685, %cst_262 [1] : vector<1x128xf32> to vector<1xf32>
    %695 = vector.shape_cast %694 : vector<1xf32> to vector<1x1xf32>
    %696 = vector.broadcast %695 : vector<1x1xf32> to vector<1x128xf32>
    %697 = arith.cmpf oge, %685, %696 : vector<1x128xf32>
    %cst_263 = arith.constant 1.280000e+02 : f32
    %698 = vector.broadcast %cst_263 : f32 to vector<1x128xf32>
    %699 = arith.select %697, %595, %698 : vector<1x128xi1>, vector<1x128xf32>
    %cst_264 = arith.constant dense<0x7F800000> : vector<1xf32>
    %700 = vector.multi_reduction <minimumf>, %699, %cst_264 [1] : vector<1x128xf32> to vector<1xf32>
    %701 = vector.shape_cast %700 : vector<1xf32> to vector<1x1xf32>
    %702 = vector.broadcast %701 : vector<1x1xf32> to vector<1x128xf32>
    %703 = arith.cmpf oeq, %595, %702 : vector<1x128xf32>
    %704 = arith.extui %703 : vector<1x128xi1> to vector<1x128xi32>
    %705 = arith.sitofp %704 : vector<1x128xi32> to vector<1x128xf32>
    %706 = arith.truncf %705 : vector<1x128xf32> to vector<1x128xbf16>
    %cst_265 = arith.constant dense<0.000000e+00> : vector<1x32xf32>
    %707 = tpu.matmul %706, %581, %cst_265 {dimension_numbers = #tpu.dot_dimension_numbers<[1], [0], [0], [1], [0, 0, 1, 1], [], []>} : vector<1x128xbf16>, vector<128x32xbf16>, vector<1x32xf32> -> vector<1x32xf32>
    %cst_266 = arith.constant 2.000000e+00 : f32
    %708 = vector.broadcast %cst_266 : f32 to vector<1x1xf32>
    %709 = arith.cmpf oeq, %701, %708 : vector<1x1xf32>
    %710 = arith.extui %709 : vector<1x1xi1> to vector<1x1xi32>
    %711 = arith.sitofp %710 : vector<1x1xi32> to vector<1x1xf32>
    %712 = arith.maximumf %602, %711 : vector<1x1xf32>
    %713 = arith.truncf %679 : vector<1x32xf32> to vector<1x32xbf16>
    %cst_267 = arith.constant dense<0.000000e+00> : vector<1x32xf32>
    %714 = tpu.matmul %713, %579, %cst_267 {dimension_numbers = #tpu.dot_dimension_numbers<[1], [0], [0], [1], [0, 0, 1, 1], [], []>} : vector<1x32xbf16>, vector<32x32xbf16>, vector<1x32xf32> -> vector<1x32xf32>
    %715 = vector.broadcast %714 : vector<1x32xf32> to vector<8x32xf32>
    %716 = arith.addf %578, %715 : vector<8x32xf32>
    %717 = math.tanh %716 : vector<8x32xf32>
    %718 = arith.truncf %717 : vector<8x32xf32> to vector<8x32xbf16>
    %cst_268 = arith.constant dense<0.000000e+00> : vector<1x8xf32>
    %719 = tpu.matmul %580, %718, %cst_268 {dimension_numbers = #tpu.dot_dimension_numbers<[1], [1], [0], [0], [0, 0, 1, 0], [], []>} : vector<1x32xbf16>, vector<8x32xbf16>, vector<1x8xf32> -> vector<1x8xf32>
    %cst_269 = arith.constant dense<0xFF800000> : vector<1xf32>
    %720 = vector.multi_reduction <maximumf>, %719, %cst_269 [1] : vector<1x8xf32> to vector<1xf32>
    %721 = vector.shape_cast %720 : vector<1xf32> to vector<1x1xf32>
    %722 = vector.broadcast %721 : vector<1x1xf32> to vector<1x8xf32>
    %723 = arith.subf %719, %722 : vector<1x8xf32>
    %724 = math.exp %723 : vector<1x8xf32>
    %cst_270 = arith.constant dense<0.000000e+00> : vector<1xf32>
    %725 = vector.multi_reduction <add>, %724, %cst_270 [1] : vector<1x8xf32> to vector<1xf32>
    %726 = vector.shape_cast %725 : vector<1xf32> to vector<1x1xf32>
    %727 = vector.broadcast %726 : vector<1x1xf32> to vector<1x8xf32>
    %728 = arith.divf %724, %727 : vector<1x8xf32>
    %729 = arith.truncf %728 : vector<1x8xf32> to vector<1x8xbf16>
    %cst_271 = arith.constant dense<0.000000e+00> : vector<1x32xf32>
    %730 = tpu.matmul %729, %576, %cst_271 {dimension_numbers = #tpu.dot_dimension_numbers<[1], [0], [0], [1], [0, 0, 1, 1], [], []>} : vector<1x8xbf16>, vector<8x32xbf16>, vector<1x32xf32> -> vector<1x32xf32>
    %731 = arith.truncf %707 : vector<1x32xf32> to vector<1x32xbf16>
    %cst_272 = arith.constant dense<0.000000e+00> : vector<1x96xf32>
    %732 = tpu.matmul %731, %582, %cst_272 {dimension_numbers = #tpu.dot_dimension_numbers<[1], [0], [0], [1], [0, 0, 1, 1], [], []>} : vector<1x32xbf16>, vector<32x96xbf16>, vector<1x96xf32> -> vector<1x96xf32>
    %733 = arith.truncf %730 : vector<1x32xf32> to vector<1x32xbf16>
    %cst_273 = arith.constant dense<0.000000e+00> : vector<1x96xf32>
    %734 = tpu.matmul %733, %583, %cst_273 {dimension_numbers = #tpu.dot_dimension_numbers<[1], [0], [0], [1], [0, 0, 1, 1], [], []>} : vector<1x32xbf16>, vector<32x96xbf16>, vector<1x96xf32> -> vector<1x96xf32>
    %735 = arith.addf %732, %734 : vector<1x96xf32>
    %736 = arith.addf %735, %585 : vector<1x96xf32>
    %737 = arith.truncf %651 : vector<1x32xf32> to vector<1x32xbf16>
    %cst_274 = arith.constant dense<0.000000e+00> : vector<1x96xf32>
    %738 = tpu.matmul %737, %584, %cst_274 {dimension_numbers = #tpu.dot_dimension_numbers<[1], [0], [0], [1], [0, 0, 1, 1], [], []>} : vector<1x32xbf16>, vector<32x96xbf16>, vector<1x96xf32> -> vector<1x96xf32>
    %739 = arith.addf %738, %586 : vector<1x96xf32>
    %740 = vector.extract_strided_slice %736 {offsets = [0, 0], sizes = [1, 64], strides = [1, 1]} : vector<1x96xf32> to vector<1x64xf32>
    %741 = vector.extract_strided_slice %739 {offsets = [0, 0], sizes = [1, 64], strides = [1, 1]} : vector<1x96xf32> to vector<1x64xf32>
    %742 = arith.addf %740, %741 : vector<1x64xf32>
    %cst_275 = arith.constant 5.000000e-01 : f32
    %743 = vector.broadcast %cst_275 : f32 to vector<1x64xf32>
    %744 = arith.mulf %743, %742 : vector<1x64xf32>
    %745 = math.tanh %744 : vector<1x64xf32>
    %cst_276 = arith.constant 1.000000e+00 : f32
    %746 = vector.broadcast %cst_276 : f32 to vector<1x64xf32>
    %747 = arith.addf %745, %746 : vector<1x64xf32>
    %cst_277 = arith.constant 5.000000e-01 : f32
    %748 = vector.broadcast %cst_277 : f32 to vector<1x64xf32>
    %749 = arith.mulf %748, %747 : vector<1x64xf32>
    %750 = vector.extract_strided_slice %749 {offsets = [0, 0], sizes = [1, 32], strides = [1, 1]} : vector<1x64xf32> to vector<1x32xf32>
    %751 = vector.extract_strided_slice %749 {offsets = [0, 32], sizes = [1, 32], strides = [1, 1]} : vector<1x64xf32> to vector<1x32xf32>
    %752 = vector.extract_strided_slice %736 {offsets = [0, 64], sizes = [1, 32], strides = [1, 1]} : vector<1x96xf32> to vector<1x32xf32>
    %753 = vector.extract_strided_slice %739 {offsets = [0, 64], sizes = [1, 32], strides = [1, 1]} : vector<1x96xf32> to vector<1x32xf32>
    %754 = arith.mulf %750, %753 : vector<1x32xf32>
    %755 = arith.addf %752, %754 : vector<1x32xf32>
    %756 = math.tanh %755 : vector<1x32xf32>
    %cst_278 = arith.constant 1.000000e+00 : f32
    %757 = vector.broadcast %cst_278 : f32 to vector<1x32xf32>
    %758 = arith.subf %757, %751 : vector<1x32xf32>
    %759 = arith.mulf %758, %756 : vector<1x32xf32>
    %760 = arith.mulf %751, %651 : vector<1x32xf32>
    %761 = arith.addf %759, %760 : vector<1x32xf32>
    %762 = arith.truncf %761 : vector<1x32xf32> to vector<1x32xbf16>
    %cst_279 = arith.constant dense<0.000000e+00> : vector<1x96xf32>
    %763 = tpu.matmul %762, %587, %cst_279 {dimension_numbers = #tpu.dot_dimension_numbers<[1], [0], [0], [1], [0, 0, 1, 1], [], []>} : vector<1x32xbf16>, vector<32x96xbf16>, vector<1x96xf32> -> vector<1x96xf32>
    %764 = arith.addf %763, %589 : vector<1x96xf32>
    %765 = arith.truncf %679 : vector<1x32xf32> to vector<1x32xbf16>
    %cst_280 = arith.constant dense<0.000000e+00> : vector<1x96xf32>
    %766 = tpu.matmul %765, %588, %cst_280 {dimension_numbers = #tpu.dot_dimension_numbers<[1], [0], [0], [1], [0, 0, 1, 1], [], []>} : vector<1x32xbf16>, vector<32x96xbf16>, vector<1x96xf32> -> vector<1x96xf32>
    %767 = arith.addf %766, %590 : vector<1x96xf32>
    %768 = vector.extract_strided_slice %764 {offsets = [0, 0], sizes = [1, 64], strides = [1, 1]} : vector<1x96xf32> to vector<1x64xf32>
    %769 = vector.extract_strided_slice %767 {offsets = [0, 0], sizes = [1, 64], strides = [1, 1]} : vector<1x96xf32> to vector<1x64xf32>
    %770 = arith.addf %768, %769 : vector<1x64xf32>
    %cst_281 = arith.constant 5.000000e-01 : f32
    %771 = vector.broadcast %cst_281 : f32 to vector<1x64xf32>
    %772 = arith.mulf %771, %770 : vector<1x64xf32>
    %773 = math.tanh %772 : vector<1x64xf32>
    %cst_282 = arith.constant 1.000000e+00 : f32
    %774 = vector.broadcast %cst_282 : f32 to vector<1x64xf32>
    %775 = arith.addf %773, %774 : vector<1x64xf32>
    %cst_283 = arith.constant 5.000000e-01 : f32
    %776 = vector.broadcast %cst_283 : f32 to vector<1x64xf32>
    %777 = arith.mulf %776, %775 : vector<1x64xf32>
    %778 = vector.extract_strided_slice %777 {offsets = [0, 0], sizes = [1, 32], strides = [1, 1]} : vector<1x64xf32> to vector<1x32xf32>
    %779 = vector.extract_strided_slice %777 {offsets = [0, 32], sizes = [1, 32], strides = [1, 1]} : vector<1x64xf32> to vector<1x32xf32>
    %780 = vector.extract_strided_slice %764 {offsets = [0, 64], sizes = [1, 32], strides = [1, 1]} : vector<1x96xf32> to vector<1x32xf32>
    %781 = vector.extract_strided_slice %767 {offsets = [0, 64], sizes = [1, 32], strides = [1, 1]} : vector<1x96xf32> to vector<1x32xf32>
    %782 = arith.mulf %778, %781 : vector<1x32xf32>
    %783 = arith.addf %780, %782 : vector<1x32xf32>
    %784 = math.tanh %783 : vector<1x32xf32>
    %cst_284 = arith.constant 1.000000e+00 : f32
    %785 = vector.broadcast %cst_284 : f32 to vector<1x32xf32>
    %786 = arith.subf %785, %779 : vector<1x32xf32>
    %787 = arith.mulf %786, %784 : vector<1x32xf32>
    %788 = arith.mulf %779, %679 : vector<1x32xf32>
    %789 = arith.addf %787, %788 : vector<1x32xf32>
    %790 = arith.truncf %789 : vector<1x32xf32> to vector<1x32xbf16>
    %cst_285 = arith.constant dense<0.000000e+00> : vector<1x128xf32>
    %791 = tpu.matmul %790, %591, %cst_285 {dimension_numbers = #tpu.dot_dimension_numbers<[1], [0], [0], [1], [0, 0, 1, 1], [], []>} : vector<1x32xbf16>, vector<32x128xbf16>, vector<1x128xf32> -> vector<1x128xf32>
    %792 = arith.truncf %730 : vector<1x32xf32> to vector<1x32xbf16>
    %cst_286 = arith.constant dense<0.000000e+00> : vector<1x128xf32>
    %793 = tpu.matmul %792, %592, %cst_286 {dimension_numbers = #tpu.dot_dimension_numbers<[1], [0], [0], [1], [0, 0, 1, 1], [], []>} : vector<1x32xbf16>, vector<32x128xbf16>, vector<1x128xf32> -> vector<1x128xf32>
    %794 = arith.addf %791, %793 : vector<1x128xf32>
    %795 = arith.addf %794, %593 : vector<1x128xf32>
    %cst_287 = arith.constant 1.000000e+00 : f32
    %796 = vector.broadcast %cst_287 : f32 to vector<1x1xf32>
    %797 = arith.subf %796, %712 : vector<1x1xf32>
    %798 = vector.broadcast %797 : vector<1x1xf32> to vector<1x128xf32>
    %799 = arith.mulf %795, %798 : vector<1x128xf32>
    %c1_288 = arith.constant 1 : index
    %c0_289 = arith.constant 0 : index
    %800 = vector.load %arg28[%c1_288, %c0_289] : memref<5x128xf32, #tpu.memory_space<vmem>>, vector<1x128xf32>
    tpu.vector_store %arg28[%c1_288, %c0_289], %799 {strides = array<i32>} : memref<5x128xf32, #tpu.memory_space<vmem>>, vector<1x128xf32>,
    %801 = vector.broadcast %797 : vector<1x1xf32> to vector<1x8xf32>
    %802 = arith.mulf %728, %801 : vector<1x8xf32>
    %c1_290 = arith.constant 1 : index
    %c0_291 = arith.constant 0 : index
    %803 = vector.load %arg29[%c1_290, %c0_291] : memref<5x128xf32, #tpu.memory_space<vmem>>, vector<1x8xf32>
    tpu.vector_store %arg29[%c1_290, %c0_291], %802 {strides = array<i32>} : memref<5x128xf32, #tpu.memory_space<vmem>>, vector<1x8xf32>,
    %cst_292 = arith.constant dense<0xFF800000> : vector<1xf32>
    %804 = vector.multi_reduction <maximumf>, %795, %cst_292 [1] : vector<1x128xf32> to vector<1xf32>
    %805 = vector.shape_cast %804 : vector<1xf32> to vector<1x1xf32>
    %806 = vector.broadcast %805 : vector<1x1xf32> to vector<1x128xf32>
    %807 = arith.cmpf oge, %795, %806 : vector<1x128xf32>
    %cst_293 = arith.constant 1.280000e+02 : f32
    %808 = vector.broadcast %cst_293 : f32 to vector<1x128xf32>
    %809 = arith.select %807, %595, %808 : vector<1x128xi1>, vector<1x128xf32>
    %cst_294 = arith.constant dense<0x7F800000> : vector<1xf32>
    %810 = vector.multi_reduction <minimumf>, %809, %cst_294 [1] : vector<1x128xf32> to vector<1xf32>
    %811 = vector.shape_cast %810 : vector<1xf32> to vector<1x1xf32>
    %812 = vector.broadcast %811 : vector<1x1xf32> to vector<1x128xf32>
    %813 = arith.cmpf oeq, %595, %812 : vector<1x128xf32>
    %814 = arith.extui %813 : vector<1x128xi1> to vector<1x128xi32>
    %815 = arith.sitofp %814 : vector<1x128xi32> to vector<1x128xf32>
    %816 = arith.truncf %815 : vector<1x128xf32> to vector<1x128xbf16>
    %cst_295 = arith.constant dense<0.000000e+00> : vector<1x32xf32>
    %817 = tpu.matmul %816, %581, %cst_295 {dimension_numbers = #tpu.dot_dimension_numbers<[1], [0], [0], [1], [0, 0, 1, 1], [], []>} : vector<1x128xbf16>, vector<128x32xbf16>, vector<1x32xf32> -> vector<1x32xf32>
    %cst_296 = arith.constant 2.000000e+00 : f32
    %818 = vector.broadcast %cst_296 : f32 to vector<1x1xf32>
    %819 = arith.cmpf oeq, %811, %818 : vector<1x1xf32>
    %820 = arith.extui %819 : vector<1x1xi1> to vector<1x1xi32>
    %821 = arith.sitofp %820 : vector<1x1xi32> to vector<1x1xf32>
    %822 = arith.maximumf %712, %821 : vector<1x1xf32>
    %823 = arith.truncf %789 : vector<1x32xf32> to vector<1x32xbf16>
    %cst_297 = arith.constant dense<0.000000e+00> : vector<1x32xf32>
    %824 = tpu.matmul %823, %579, %cst_297 {dimension_numbers = #tpu.dot_dimension_numbers<[1], [0], [0], [1], [0, 0, 1, 1], [], []>} : vector<1x32xbf16>, vector<32x32xbf16>, vector<1x32xf32> -> vector<1x32xf32>
    %825 = vector.broadcast %824 : vector<1x32xf32> to vector<8x32xf32>
    %826 = arith.addf %578, %825 : vector<8x32xf32>
    %827 = math.tanh %826 : vector<8x32xf32>
    %828 = arith.truncf %827 : vector<8x32xf32> to vector<8x32xbf16>
    %cst_298 = arith.constant dense<0.000000e+00> : vector<1x8xf32>
    %829 = tpu.matmul %580, %828, %cst_298 {dimension_numbers = #tpu.dot_dimension_numbers<[1], [1], [0], [0], [0, 0, 1, 0], [], []>} : vector<1x32xbf16>, vector<8x32xbf16>, vector<1x8xf32> -> vector<1x8xf32>
    %cst_299 = arith.constant dense<0xFF800000> : vector<1xf32>
    %830 = vector.multi_reduction <maximumf>, %829, %cst_299 [1] : vector<1x8xf32> to vector<1xf32>
    %831 = vector.shape_cast %830 : vector<1xf32> to vector<1x1xf32>
    %832 = vector.broadcast %831 : vector<1x1xf32> to vector<1x8xf32>
    %833 = arith.subf %829, %832 : vector<1x8xf32>
    %834 = math.exp %833 : vector<1x8xf32>
    %cst_300 = arith.constant dense<0.000000e+00> : vector<1xf32>
    %835 = vector.multi_reduction <add>, %834, %cst_300 [1] : vector<1x8xf32> to vector<1xf32>
    %836 = vector.shape_cast %835 : vector<1xf32> to vector<1x1xf32>
    %837 = vector.broadcast %836 : vector<1x1xf32> to vector<1x8xf32>
    %838 = arith.divf %834, %837 : vector<1x8xf32>
    %839 = arith.truncf %838 : vector<1x8xf32> to vector<1x8xbf16>
    %cst_301 = arith.constant dense<0.000000e+00> : vector<1x32xf32>
    %840 = tpu.matmul %839, %576, %cst_301 {dimension_numbers = #tpu.dot_dimension_numbers<[1], [0], [0], [1], [0, 0, 1, 1], [], []>} : vector<1x8xbf16>, vector<8x32xbf16>, vector<1x32xf32> -> vector<1x32xf32>
    %841 = arith.truncf %817 : vector<1x32xf32> to vector<1x32xbf16>
    %cst_302 = arith.constant dense<0.000000e+00> : vector<1x96xf32>
    %842 = tpu.matmul %841, %582, %cst_302 {dimension_numbers = #tpu.dot_dimension_numbers<[1], [0], [0], [1], [0, 0, 1, 1], [], []>} : vector<1x32xbf16>, vector<32x96xbf16>, vector<1x96xf32> -> vector<1x96xf32>
    %843 = arith.truncf %840 : vector<1x32xf32> to vector<1x32xbf16>
    %cst_303 = arith.constant dense<0.000000e+00> : vector<1x96xf32>
    %844 = tpu.matmul %843, %583, %cst_303 {dimension_numbers = #tpu.dot_dimension_numbers<[1], [0], [0], [1], [0, 0, 1, 1], [], []>} : vector<1x32xbf16>, vector<32x96xbf16>, vector<1x96xf32> -> vector<1x96xf32>
    %845 = arith.addf %842, %844 : vector<1x96xf32>
    %846 = arith.addf %845, %585 : vector<1x96xf32>
    %847 = arith.truncf %761 : vector<1x32xf32> to vector<1x32xbf16>
    %cst_304 = arith.constant dense<0.000000e+00> : vector<1x96xf32>
    %848 = tpu.matmul %847, %584, %cst_304 {dimension_numbers = #tpu.dot_dimension_numbers<[1], [0], [0], [1], [0, 0, 1, 1], [], []>} : vector<1x32xbf16>, vector<32x96xbf16>, vector<1x96xf32> -> vector<1x96xf32>
    %849 = arith.addf %848, %586 : vector<1x96xf32>
    %850 = vector.extract_strided_slice %846 {offsets = [0, 0], sizes = [1, 64], strides = [1, 1]} : vector<1x96xf32> to vector<1x64xf32>
    %851 = vector.extract_strided_slice %849 {offsets = [0, 0], sizes = [1, 64], strides = [1, 1]} : vector<1x96xf32> to vector<1x64xf32>
    %852 = arith.addf %850, %851 : vector<1x64xf32>
    %cst_305 = arith.constant 5.000000e-01 : f32
    %853 = vector.broadcast %cst_305 : f32 to vector<1x64xf32>
    %854 = arith.mulf %853, %852 : vector<1x64xf32>
    %855 = math.tanh %854 : vector<1x64xf32>
    %cst_306 = arith.constant 1.000000e+00 : f32
    %856 = vector.broadcast %cst_306 : f32 to vector<1x64xf32>
    %857 = arith.addf %855, %856 : vector<1x64xf32>
    %cst_307 = arith.constant 5.000000e-01 : f32
    %858 = vector.broadcast %cst_307 : f32 to vector<1x64xf32>
    %859 = arith.mulf %858, %857 : vector<1x64xf32>
    %860 = vector.extract_strided_slice %859 {offsets = [0, 0], sizes = [1, 32], strides = [1, 1]} : vector<1x64xf32> to vector<1x32xf32>
    %861 = vector.extract_strided_slice %859 {offsets = [0, 32], sizes = [1, 32], strides = [1, 1]} : vector<1x64xf32> to vector<1x32xf32>
    %862 = vector.extract_strided_slice %846 {offsets = [0, 64], sizes = [1, 32], strides = [1, 1]} : vector<1x96xf32> to vector<1x32xf32>
    %863 = vector.extract_strided_slice %849 {offsets = [0, 64], sizes = [1, 32], strides = [1, 1]} : vector<1x96xf32> to vector<1x32xf32>
    %864 = arith.mulf %860, %863 : vector<1x32xf32>
    %865 = arith.addf %862, %864 : vector<1x32xf32>
    %866 = math.tanh %865 : vector<1x32xf32>
    %cst_308 = arith.constant 1.000000e+00 : f32
    %867 = vector.broadcast %cst_308 : f32 to vector<1x32xf32>
    %868 = arith.subf %867, %861 : vector<1x32xf32>
    %869 = arith.mulf %868, %866 : vector<1x32xf32>
    %870 = arith.mulf %861, %761 : vector<1x32xf32>
    %871 = arith.addf %869, %870 : vector<1x32xf32>
    %872 = arith.truncf %871 : vector<1x32xf32> to vector<1x32xbf16>
    %cst_309 = arith.constant dense<0.000000e+00> : vector<1x96xf32>
    %873 = tpu.matmul %872, %587, %cst_309 {dimension_numbers = #tpu.dot_dimension_numbers<[1], [0], [0], [1], [0, 0, 1, 1], [], []>} : vector<1x32xbf16>, vector<32x96xbf16>, vector<1x96xf32> -> vector<1x96xf32>
    %874 = arith.addf %873, %589 : vector<1x96xf32>
    %875 = arith.truncf %789 : vector<1x32xf32> to vector<1x32xbf16>
    %cst_310 = arith.constant dense<0.000000e+00> : vector<1x96xf32>
    %876 = tpu.matmul %875, %588, %cst_310 {dimension_numbers = #tpu.dot_dimension_numbers<[1], [0], [0], [1], [0, 0, 1, 1], [], []>} : vector<1x32xbf16>, vector<32x96xbf16>, vector<1x96xf32> -> vector<1x96xf32>
    %877 = arith.addf %876, %590 : vector<1x96xf32>
    %878 = vector.extract_strided_slice %874 {offsets = [0, 0], sizes = [1, 64], strides = [1, 1]} : vector<1x96xf32> to vector<1x64xf32>
    %879 = vector.extract_strided_slice %877 {offsets = [0, 0], sizes = [1, 64], strides = [1, 1]} : vector<1x96xf32> to vector<1x64xf32>
    %880 = arith.addf %878, %879 : vector<1x64xf32>
    %cst_311 = arith.constant 5.000000e-01 : f32
    %881 = vector.broadcast %cst_311 : f32 to vector<1x64xf32>
    %882 = arith.mulf %881, %880 : vector<1x64xf32>
    %883 = math.tanh %882 : vector<1x64xf32>
    %cst_312 = arith.constant 1.000000e+00 : f32
    %884 = vector.broadcast %cst_312 : f32 to vector<1x64xf32>
    %885 = arith.addf %883, %884 : vector<1x64xf32>
    %cst_313 = arith.constant 5.000000e-01 : f32
    %886 = vector.broadcast %cst_313 : f32 to vector<1x64xf32>
    %887 = arith.mulf %886, %885 : vector<1x64xf32>
    %888 = vector.extract_strided_slice %887 {offsets = [0, 0], sizes = [1, 32], strides = [1, 1]} : vector<1x64xf32> to vector<1x32xf32>
    %889 = vector.extract_strided_slice %887 {offsets = [0, 32], sizes = [1, 32], strides = [1, 1]} : vector<1x64xf32> to vector<1x32xf32>
    %890 = vector.extract_strided_slice %874 {offsets = [0, 64], sizes = [1, 32], strides = [1, 1]} : vector<1x96xf32> to vector<1x32xf32>
    %891 = vector.extract_strided_slice %877 {offsets = [0, 64], sizes = [1, 32], strides = [1, 1]} : vector<1x96xf32> to vector<1x32xf32>
    %892 = arith.mulf %888, %891 : vector<1x32xf32>
    %893 = arith.addf %890, %892 : vector<1x32xf32>
    %894 = math.tanh %893 : vector<1x32xf32>
    %cst_314 = arith.constant 1.000000e+00 : f32
    %895 = vector.broadcast %cst_314 : f32 to vector<1x32xf32>
    %896 = arith.subf %895, %889 : vector<1x32xf32>
    %897 = arith.mulf %896, %894 : vector<1x32xf32>
    %898 = arith.mulf %889, %789 : vector<1x32xf32>
    %899 = arith.addf %897, %898 : vector<1x32xf32>
    %900 = arith.truncf %899 : vector<1x32xf32> to vector<1x32xbf16>
    %cst_315 = arith.constant dense<0.000000e+00> : vector<1x128xf32>
    %901 = tpu.matmul %900, %591, %cst_315 {dimension_numbers = #tpu.dot_dimension_numbers<[1], [0], [0], [1], [0, 0, 1, 1], [], []>} : vector<1x32xbf16>, vector<32x128xbf16>, vector<1x128xf32> -> vector<1x128xf32>
    %902 = arith.truncf %840 : vector<1x32xf32> to vector<1x32xbf16>
    %cst_316 = arith.constant dense<0.000000e+00> : vector<1x128xf32>
    %903 = tpu.matmul %902, %592, %cst_316 {dimension_numbers = #tpu.dot_dimension_numbers<[1], [0], [0], [1], [0, 0, 1, 1], [], []>} : vector<1x32xbf16>, vector<32x128xbf16>, vector<1x128xf32> -> vector<1x128xf32>
    %904 = arith.addf %901, %903 : vector<1x128xf32>
    %905 = arith.addf %904, %593 : vector<1x128xf32>
    %cst_317 = arith.constant 1.000000e+00 : f32
    %906 = vector.broadcast %cst_317 : f32 to vector<1x1xf32>
    %907 = arith.subf %906, %822 : vector<1x1xf32>
    %908 = vector.broadcast %907 : vector<1x1xf32> to vector<1x128xf32>
    %909 = arith.mulf %905, %908 : vector<1x128xf32>
    %c2_318 = arith.constant 2 : index
    %c0_319 = arith.constant 0 : index
    %910 = vector.load %arg28[%c2_318, %c0_319] : memref<5x128xf32, #tpu.memory_space<vmem>>, vector<1x128xf32>
    tpu.vector_store %arg28[%c2_318, %c0_319], %909 {strides = array<i32>} : memref<5x128xf32, #tpu.memory_space<vmem>>, vector<1x128xf32>,
    %911 = vector.broadcast %907 : vector<1x1xf32> to vector<1x8xf32>
    %912 = arith.mulf %838, %911 : vector<1x8xf32>
    %c2_320 = arith.constant 2 : index
    %c0_321 = arith.constant 0 : index
    %913 = vector.load %arg29[%c2_320, %c0_321] : memref<5x128xf32, #tpu.memory_space<vmem>>, vector<1x8xf32>
    tpu.vector_store %arg29[%c2_320, %c0_321], %912 {strides = array<i32>} : memref<5x128xf32, #tpu.memory_space<vmem>>, vector<1x8xf32>,
    %cst_322 = arith.constant dense<0xFF800000> : vector<1xf32>
    %914 = vector.multi_reduction <maximumf>, %905, %cst_322 [1] : vector<1x128xf32> to vector<1xf32>
    %915 = vector.shape_cast %914 : vector<1xf32> to vector<1x1xf32>
    %916 = vector.broadcast %915 : vector<1x1xf32> to vector<1x128xf32>
    %917 = arith.cmpf oge, %905, %916 : vector<1x128xf32>
    %cst_323 = arith.constant 1.280000e+02 : f32
    %918 = vector.broadcast %cst_323 : f32 to vector<1x128xf32>
    %919 = arith.select %917, %595, %918 : vector<1x128xi1>, vector<1x128xf32>
    %cst_324 = arith.constant dense<0x7F800000> : vector<1xf32>
    %920 = vector.multi_reduction <minimumf>, %919, %cst_324 [1] : vector<1x128xf32> to vector<1xf32>
    %921 = vector.shape_cast %920 : vector<1xf32> to vector<1x1xf32>
    %922 = vector.broadcast %921 : vector<1x1xf32> to vector<1x128xf32>
    %923 = arith.cmpf oeq, %595, %922 : vector<1x128xf32>
    %924 = arith.extui %923 : vector<1x128xi1> to vector<1x128xi32>
    %925 = arith.sitofp %924 : vector<1x128xi32> to vector<1x128xf32>
    %926 = arith.truncf %925 : vector<1x128xf32> to vector<1x128xbf16>
    %cst_325 = arith.constant dense<0.000000e+00> : vector<1x32xf32>
    %927 = tpu.matmul %926, %581, %cst_325 {dimension_numbers = #tpu.dot_dimension_numbers<[1], [0], [0], [1], [0, 0, 1, 1], [], []>} : vector<1x128xbf16>, vector<128x32xbf16>, vector<1x32xf32> -> vector<1x32xf32>
    %cst_326 = arith.constant 2.000000e+00 : f32
    %928 = vector.broadcast %cst_326 : f32 to vector<1x1xf32>
    %929 = arith.cmpf oeq, %921, %928 : vector<1x1xf32>
    %930 = arith.extui %929 : vector<1x1xi1> to vector<1x1xi32>
    %931 = arith.sitofp %930 : vector<1x1xi32> to vector<1x1xf32>
    %932 = arith.maximumf %822, %931 : vector<1x1xf32>
    %933 = arith.truncf %899 : vector<1x32xf32> to vector<1x32xbf16>
    %cst_327 = arith.constant dense<0.000000e+00> : vector<1x32xf32>
    %934 = tpu.matmul %933, %579, %cst_327 {dimension_numbers = #tpu.dot_dimension_numbers<[1], [0], [0], [1], [0, 0, 1, 1], [], []>} : vector<1x32xbf16>, vector<32x32xbf16>, vector<1x32xf32> -> vector<1x32xf32>
    %935 = vector.broadcast %934 : vector<1x32xf32> to vector<8x32xf32>
    %936 = arith.addf %578, %935 : vector<8x32xf32>
    %937 = math.tanh %936 : vector<8x32xf32>
    %938 = arith.truncf %937 : vector<8x32xf32> to vector<8x32xbf16>
    %cst_328 = arith.constant dense<0.000000e+00> : vector<1x8xf32>
    %939 = tpu.matmul %580, %938, %cst_328 {dimension_numbers = #tpu.dot_dimension_numbers<[1], [1], [0], [0], [0, 0, 1, 0], [], []>} : vector<1x32xbf16>, vector<8x32xbf16>, vector<1x8xf32> -> vector<1x8xf32>
    %cst_329 = arith.constant dense<0xFF800000> : vector<1xf32>
    %940 = vector.multi_reduction <maximumf>, %939, %cst_329 [1] : vector<1x8xf32> to vector<1xf32>
    %941 = vector.shape_cast %940 : vector<1xf32> to vector<1x1xf32>
    %942 = vector.broadcast %941 : vector<1x1xf32> to vector<1x8xf32>
    %943 = arith.subf %939, %942 : vector<1x8xf32>
    %944 = math.exp %943 : vector<1x8xf32>
    %cst_330 = arith.constant dense<0.000000e+00> : vector<1xf32>
    %945 = vector.multi_reduction <add>, %944, %cst_330 [1] : vector<1x8xf32> to vector<1xf32>
    %946 = vector.shape_cast %945 : vector<1xf32> to vector<1x1xf32>
    %947 = vector.broadcast %946 : vector<1x1xf32> to vector<1x8xf32>
    %948 = arith.divf %944, %947 : vector<1x8xf32>
    %949 = arith.truncf %948 : vector<1x8xf32> to vector<1x8xbf16>
    %cst_331 = arith.constant dense<0.000000e+00> : vector<1x32xf32>
    %950 = tpu.matmul %949, %576, %cst_331 {dimension_numbers = #tpu.dot_dimension_numbers<[1], [0], [0], [1], [0, 0, 1, 1], [], []>} : vector<1x8xbf16>, vector<8x32xbf16>, vector<1x32xf32> -> vector<1x32xf32>
    %951 = arith.truncf %927 : vector<1x32xf32> to vector<1x32xbf16>
    %cst_332 = arith.constant dense<0.000000e+00> : vector<1x96xf32>
    %952 = tpu.matmul %951, %582, %cst_332 {dimension_numbers = #tpu.dot_dimension_numbers<[1], [0], [0], [1], [0, 0, 1, 1], [], []>} : vector<1x32xbf16>, vector<32x96xbf16>, vector<1x96xf32> -> vector<1x96xf32>
    %953 = arith.truncf %950 : vector<1x32xf32> to vector<1x32xbf16>
    %cst_333 = arith.constant dense<0.000000e+00> : vector<1x96xf32>
    %954 = tpu.matmul %953, %583, %cst_333 {dimension_numbers = #tpu.dot_dimension_numbers<[1], [0], [0], [1], [0, 0, 1, 1], [], []>} : vector<1x32xbf16>, vector<32x96xbf16>, vector<1x96xf32> -> vector<1x96xf32>
    %955 = arith.addf %952, %954 : vector<1x96xf32>
    %956 = arith.addf %955, %585 : vector<1x96xf32>
    %957 = arith.truncf %871 : vector<1x32xf32> to vector<1x32xbf16>
    %cst_334 = arith.constant dense<0.000000e+00> : vector<1x96xf32>
    %958 = tpu.matmul %957, %584, %cst_334 {dimension_numbers = #tpu.dot_dimension_numbers<[1], [0], [0], [1], [0, 0, 1, 1], [], []>} : vector<1x32xbf16>, vector<32x96xbf16>, vector<1x96xf32> -> vector<1x96xf32>
    %959 = arith.addf %958, %586 : vector<1x96xf32>
    %960 = vector.extract_strided_slice %956 {offsets = [0, 0], sizes = [1, 64], strides = [1, 1]} : vector<1x96xf32> to vector<1x64xf32>
    %961 = vector.extract_strided_slice %959 {offsets = [0, 0], sizes = [1, 64], strides = [1, 1]} : vector<1x96xf32> to vector<1x64xf32>
    %962 = arith.addf %960, %961 : vector<1x64xf32>
    %cst_335 = arith.constant 5.000000e-01 : f32
    %963 = vector.broadcast %cst_335 : f32 to vector<1x64xf32>
    %964 = arith.mulf %963, %962 : vector<1x64xf32>
    %965 = math.tanh %964 : vector<1x64xf32>
    %cst_336 = arith.constant 1.000000e+00 : f32
    %966 = vector.broadcast %cst_336 : f32 to vector<1x64xf32>
    %967 = arith.addf %965, %966 : vector<1x64xf32>
    %cst_337 = arith.constant 5.000000e-01 : f32
    %968 = vector.broadcast %cst_337 : f32 to vector<1x64xf32>
    %969 = arith.mulf %968, %967 : vector<1x64xf32>
    %970 = vector.extract_strided_slice %969 {offsets = [0, 0], sizes = [1, 32], strides = [1, 1]} : vector<1x64xf32> to vector<1x32xf32>
    %971 = vector.extract_strided_slice %969 {offsets = [0, 32], sizes = [1, 32], strides = [1, 1]} : vector<1x64xf32> to vector<1x32xf32>
    %972 = vector.extract_strided_slice %956 {offsets = [0, 64], sizes = [1, 32], strides = [1, 1]} : vector<1x96xf32> to vector<1x32xf32>
    %973 = vector.extract_strided_slice %959 {offsets = [0, 64], sizes = [1, 32], strides = [1, 1]} : vector<1x96xf32> to vector<1x32xf32>
    %974 = arith.mulf %970, %973 : vector<1x32xf32>
    %975 = arith.addf %972, %974 : vector<1x32xf32>
    %976 = math.tanh %975 : vector<1x32xf32>
    %cst_338 = arith.constant 1.000000e+00 : f32
    %977 = vector.broadcast %cst_338 : f32 to vector<1x32xf32>
    %978 = arith.subf %977, %971 : vector<1x32xf32>
    %979 = arith.mulf %978, %976 : vector<1x32xf32>
    %980 = arith.mulf %971, %871 : vector<1x32xf32>
    %981 = arith.addf %979, %980 : vector<1x32xf32>
    %982 = arith.truncf %981 : vector<1x32xf32> to vector<1x32xbf16>
    %cst_339 = arith.constant dense<0.000000e+00> : vector<1x96xf32>
    %983 = tpu.matmul %982, %587, %cst_339 {dimension_numbers = #tpu.dot_dimension_numbers<[1], [0], [0], [1], [0, 0, 1, 1], [], []>} : vector<1x32xbf16>, vector<32x96xbf16>, vector<1x96xf32> -> vector<1x96xf32>
    %984 = arith.addf %983, %589 : vector<1x96xf32>
    %985 = arith.truncf %899 : vector<1x32xf32> to vector<1x32xbf16>
    %cst_340 = arith.constant dense<0.000000e+00> : vector<1x96xf32>
    %986 = tpu.matmul %985, %588, %cst_340 {dimension_numbers = #tpu.dot_dimension_numbers<[1], [0], [0], [1], [0, 0, 1, 1], [], []>} : vector<1x32xbf16>, vector<32x96xbf16>, vector<1x96xf32> -> vector<1x96xf32>
    %987 = arith.addf %986, %590 : vector<1x96xf32>
    %988 = vector.extract_strided_slice %984 {offsets = [0, 0], sizes = [1, 64], strides = [1, 1]} : vector<1x96xf32> to vector<1x64xf32>
    %989 = vector.extract_strided_slice %987 {offsets = [0, 0], sizes = [1, 64], strides = [1, 1]} : vector<1x96xf32> to vector<1x64xf32>
    %990 = arith.addf %988, %989 : vector<1x64xf32>
    %cst_341 = arith.constant 5.000000e-01 : f32
    %991 = vector.broadcast %cst_341 : f32 to vector<1x64xf32>
    %992 = arith.mulf %991, %990 : vector<1x64xf32>
    %993 = math.tanh %992 : vector<1x64xf32>
    %cst_342 = arith.constant 1.000000e+00 : f32
    %994 = vector.broadcast %cst_342 : f32 to vector<1x64xf32>
    %995 = arith.addf %993, %994 : vector<1x64xf32>
    %cst_343 = arith.constant 5.000000e-01 : f32
    %996 = vector.broadcast %cst_343 : f32 to vector<1x64xf32>
    %997 = arith.mulf %996, %995 : vector<1x64xf32>
    %998 = vector.extract_strided_slice %997 {offsets = [0, 0], sizes = [1, 32], strides = [1, 1]} : vector<1x64xf32> to vector<1x32xf32>
    %999 = vector.extract_strided_slice %997 {offsets = [0, 32], sizes = [1, 32], strides = [1, 1]} : vector<1x64xf32> to vector<1x32xf32>
    %1000 = vector.extract_strided_slice %984 {offsets = [0, 64], sizes = [1, 32], strides = [1, 1]} : vector<1x96xf32> to vector<1x32xf32>
    %1001 = vector.extract_strided_slice %987 {offsets = [0, 64], sizes = [1, 32], strides = [1, 1]} : vector<1x96xf32> to vector<1x32xf32>
    %1002 = arith.mulf %998, %1001 : vector<1x32xf32>
    %1003 = arith.addf %1000, %1002 : vector<1x32xf32>
    %1004 = math.tanh %1003 : vector<1x32xf32>
    %cst_344 = arith.constant 1.000000e+00 : f32
    %1005 = vector.broadcast %cst_344 : f32 to vector<1x32xf32>
    %1006 = arith.subf %1005, %999 : vector<1x32xf32>
    %1007 = arith.mulf %1006, %1004 : vector<1x32xf32>
    %1008 = arith.mulf %999, %899 : vector<1x32xf32>
    %1009 = arith.addf %1007, %1008 : vector<1x32xf32>
    %1010 = arith.truncf %1009 : vector<1x32xf32> to vector<1x32xbf16>
    %cst_345 = arith.constant dense<0.000000e+00> : vector<1x128xf32>
    %1011 = tpu.matmul %1010, %591, %cst_345 {dimension_numbers = #tpu.dot_dimension_numbers<[1], [0], [0], [1], [0, 0, 1, 1], [], []>} : vector<1x32xbf16>, vector<32x128xbf16>, vector<1x128xf32> -> vector<1x128xf32>
    %1012 = arith.truncf %950 : vector<1x32xf32> to vector<1x32xbf16>
    %cst_346 = arith.constant dense<0.000000e+00> : vector<1x128xf32>
    %1013 = tpu.matmul %1012, %592, %cst_346 {dimension_numbers = #tpu.dot_dimension_numbers<[1], [0], [0], [1], [0, 0, 1, 1], [], []>} : vector<1x32xbf16>, vector<32x128xbf16>, vector<1x128xf32> -> vector<1x128xf32>
    %1014 = arith.addf %1011, %1013 : vector<1x128xf32>
    %1015 = arith.addf %1014, %593 : vector<1x128xf32>
    %cst_347 = arith.constant 1.000000e+00 : f32
    %1016 = vector.broadcast %cst_347 : f32 to vector<1x1xf32>
    %1017 = arith.subf %1016, %932 : vector<1x1xf32>
    %1018 = vector.broadcast %1017 : vector<1x1xf32> to vector<1x128xf32>
    %1019 = arith.mulf %1015, %1018 : vector<1x128xf32>
    %c3_348 = arith.constant 3 : index
    %c0_349 = arith.constant 0 : index
    %1020 = vector.load %arg28[%c3_348, %c0_349] : memref<5x128xf32, #tpu.memory_space<vmem>>, vector<1x128xf32>
    tpu.vector_store %arg28[%c3_348, %c0_349], %1019 {strides = array<i32>} : memref<5x128xf32, #tpu.memory_space<vmem>>, vector<1x128xf32>,
    %1021 = vector.broadcast %1017 : vector<1x1xf32> to vector<1x8xf32>
    %1022 = arith.mulf %948, %1021 : vector<1x8xf32>
    %c3_350 = arith.constant 3 : index
    %c0_351 = arith.constant 0 : index
    %1023 = vector.load %arg29[%c3_350, %c0_351] : memref<5x128xf32, #tpu.memory_space<vmem>>, vector<1x8xf32>
    tpu.vector_store %arg29[%c3_350, %c0_351], %1022 {strides = array<i32>} : memref<5x128xf32, #tpu.memory_space<vmem>>, vector<1x8xf32>,
    %cst_352 = arith.constant dense<0xFF800000> : vector<1xf32>
    %1024 = vector.multi_reduction <maximumf>, %1015, %cst_352 [1] : vector<1x128xf32> to vector<1xf32>
    %1025 = vector.shape_cast %1024 : vector<1xf32> to vector<1x1xf32>
    %1026 = vector.broadcast %1025 : vector<1x1xf32> to vector<1x128xf32>
    %1027 = arith.cmpf oge, %1015, %1026 : vector<1x128xf32>
    %cst_353 = arith.constant 1.280000e+02 : f32
    %1028 = vector.broadcast %cst_353 : f32 to vector<1x128xf32>
    %1029 = arith.select %1027, %595, %1028 : vector<1x128xi1>, vector<1x128xf32>
    %cst_354 = arith.constant dense<0x7F800000> : vector<1xf32>
    %1030 = vector.multi_reduction <minimumf>, %1029, %cst_354 [1] : vector<1x128xf32> to vector<1xf32>
    %1031 = vector.shape_cast %1030 : vector<1xf32> to vector<1x1xf32>
    %1032 = vector.broadcast %1031 : vector<1x1xf32> to vector<1x128xf32>
    %1033 = arith.cmpf oeq, %595, %1032 : vector<1x128xf32>
    %1034 = arith.extui %1033 : vector<1x128xi1> to vector<1x128xi32>
    %1035 = arith.sitofp %1034 : vector<1x128xi32> to vector<1x128xf32>
    %1036 = arith.truncf %1035 : vector<1x128xf32> to vector<1x128xbf16>
    %cst_355 = arith.constant dense<0.000000e+00> : vector<1x32xf32>
    %1037 = tpu.matmul %1036, %581, %cst_355 {dimension_numbers = #tpu.dot_dimension_numbers<[1], [0], [0], [1], [0, 0, 1, 1], [], []>} : vector<1x128xbf16>, vector<128x32xbf16>, vector<1x32xf32> -> vector<1x32xf32>
    %cst_356 = arith.constant 2.000000e+00 : f32
    %1038 = vector.broadcast %cst_356 : f32 to vector<1x1xf32>
    %1039 = arith.cmpf oeq, %1031, %1038 : vector<1x1xf32>
    %1040 = arith.extui %1039 : vector<1x1xi1> to vector<1x1xi32>
    %1041 = arith.sitofp %1040 : vector<1x1xi32> to vector<1x1xf32>
    %1042 = arith.maximumf %932, %1041 : vector<1x1xf32>
    %1043 = arith.truncf %1009 : vector<1x32xf32> to vector<1x32xbf16>
    %cst_357 = arith.constant dense<0.000000e+00> : vector<1x32xf32>
    %1044 = tpu.matmul %1043, %579, %cst_357 {dimension_numbers = #tpu.dot_dimension_numbers<[1], [0], [0], [1], [0, 0, 1, 1], [], []>} : vector<1x32xbf16>, vector<32x32xbf16>, vector<1x32xf32> -> vector<1x32xf32>
    %1045 = vector.broadcast %1044 : vector<1x32xf32> to vector<8x32xf32>
    %1046 = arith.addf %578, %1045 : vector<8x32xf32>
    %1047 = math.tanh %1046 : vector<8x32xf32>
    %1048 = arith.truncf %1047 : vector<8x32xf32> to vector<8x32xbf16>
    %cst_358 = arith.constant dense<0.000000e+00> : vector<1x8xf32>
    %1049 = tpu.matmul %580, %1048, %cst_358 {dimension_numbers = #tpu.dot_dimension_numbers<[1], [1], [0], [0], [0, 0, 1, 0], [], []>} : vector<1x32xbf16>, vector<8x32xbf16>, vector<1x8xf32> -> vector<1x8xf32>
    %cst_359 = arith.constant dense<0xFF800000> : vector<1xf32>
    %1050 = vector.multi_reduction <maximumf>, %1049, %cst_359 [1] : vector<1x8xf32> to vector<1xf32>
    %1051 = vector.shape_cast %1050 : vector<1xf32> to vector<1x1xf32>
    %1052 = vector.broadcast %1051 : vector<1x1xf32> to vector<1x8xf32>
    %1053 = arith.subf %1049, %1052 : vector<1x8xf32>
    %1054 = math.exp %1053 : vector<1x8xf32>
    %cst_360 = arith.constant dense<0.000000e+00> : vector<1xf32>
    %1055 = vector.multi_reduction <add>, %1054, %cst_360 [1] : vector<1x8xf32> to vector<1xf32>
    %1056 = vector.shape_cast %1055 : vector<1xf32> to vector<1x1xf32>
    %1057 = vector.broadcast %1056 : vector<1x1xf32> to vector<1x8xf32>
    %1058 = arith.divf %1054, %1057 : vector<1x8xf32>
    %1059 = arith.truncf %1058 : vector<1x8xf32> to vector<1x8xbf16>
    %cst_361 = arith.constant dense<0.000000e+00> : vector<1x32xf32>
    %1060 = tpu.matmul %1059, %576, %cst_361 {dimension_numbers = #tpu.dot_dimension_numbers<[1], [0], [0], [1], [0, 0, 1, 1], [], []>} : vector<1x8xbf16>, vector<8x32xbf16>, vector<1x32xf32> -> vector<1x32xf32>
    %1061 = arith.truncf %1037 : vector<1x32xf32> to vector<1x32xbf16>
    %cst_362 = arith.constant dense<0.000000e+00> : vector<1x96xf32>
    %1062 = tpu.matmul %1061, %582, %cst_362 {dimension_numbers = #tpu.dot_dimension_numbers<[1], [0], [0], [1], [0, 0, 1, 1], [], []>} : vector<1x32xbf16>, vector<32x96xbf16>, vector<1x96xf32> -> vector<1x96xf32>
    %1063 = arith.truncf %1060 : vector<1x32xf32> to vector<1x32xbf16>
    %cst_363 = arith.constant dense<0.000000e+00> : vector<1x96xf32>
    %1064 = tpu.matmul %1063, %583, %cst_363 {dimension_numbers = #tpu.dot_dimension_numbers<[1], [0], [0], [1], [0, 0, 1, 1], [], []>} : vector<1x32xbf16>, vector<32x96xbf16>, vector<1x96xf32> -> vector<1x96xf32>
    %1065 = arith.addf %1062, %1064 : vector<1x96xf32>
    %1066 = arith.addf %1065, %585 : vector<1x96xf32>
    %1067 = arith.truncf %981 : vector<1x32xf32> to vector<1x32xbf16>
    %cst_364 = arith.constant dense<0.000000e+00> : vector<1x96xf32>
    %1068 = tpu.matmul %1067, %584, %cst_364 {dimension_numbers = #tpu.dot_dimension_numbers<[1], [0], [0], [1], [0, 0, 1, 1], [], []>} : vector<1x32xbf16>, vector<32x96xbf16>, vector<1x96xf32> -> vector<1x96xf32>
    %1069 = arith.addf %1068, %586 : vector<1x96xf32>
    %1070 = vector.extract_strided_slice %1066 {offsets = [0, 0], sizes = [1, 64], strides = [1, 1]} : vector<1x96xf32> to vector<1x64xf32>
    %1071 = vector.extract_strided_slice %1069 {offsets = [0, 0], sizes = [1, 64], strides = [1, 1]} : vector<1x96xf32> to vector<1x64xf32>
    %1072 = arith.addf %1070, %1071 : vector<1x64xf32>
    %cst_365 = arith.constant 5.000000e-01 : f32
    %1073 = vector.broadcast %cst_365 : f32 to vector<1x64xf32>
    %1074 = arith.mulf %1073, %1072 : vector<1x64xf32>
    %1075 = math.tanh %1074 : vector<1x64xf32>
    %cst_366 = arith.constant 1.000000e+00 : f32
    %1076 = vector.broadcast %cst_366 : f32 to vector<1x64xf32>
    %1077 = arith.addf %1075, %1076 : vector<1x64xf32>
    %cst_367 = arith.constant 5.000000e-01 : f32
    %1078 = vector.broadcast %cst_367 : f32 to vector<1x64xf32>
    %1079 = arith.mulf %1078, %1077 : vector<1x64xf32>
    %1080 = vector.extract_strided_slice %1079 {offsets = [0, 0], sizes = [1, 32], strides = [1, 1]} : vector<1x64xf32> to vector<1x32xf32>
    %1081 = vector.extract_strided_slice %1079 {offsets = [0, 32], sizes = [1, 32], strides = [1, 1]} : vector<1x64xf32> to vector<1x32xf32>
    %1082 = vector.extract_strided_slice %1066 {offsets = [0, 64], sizes = [1, 32], strides = [1, 1]} : vector<1x96xf32> to vector<1x32xf32>
    %1083 = vector.extract_strided_slice %1069 {offsets = [0, 64], sizes = [1, 32], strides = [1, 1]} : vector<1x96xf32> to vector<1x32xf32>
    %1084 = arith.mulf %1080, %1083 : vector<1x32xf32>
    %1085 = arith.addf %1082, %1084 : vector<1x32xf32>
    %1086 = math.tanh %1085 : vector<1x32xf32>
    %cst_368 = arith.constant 1.000000e+00 : f32
    %1087 = vector.broadcast %cst_368 : f32 to vector<1x32xf32>
    %1088 = arith.subf %1087, %1081 : vector<1x32xf32>
    %1089 = arith.mulf %1088, %1086 : vector<1x32xf32>
    %1090 = arith.mulf %1081, %981 : vector<1x32xf32>
    %1091 = arith.addf %1089, %1090 : vector<1x32xf32>
    %1092 = arith.truncf %1091 : vector<1x32xf32> to vector<1x32xbf16>
    %cst_369 = arith.constant dense<0.000000e+00> : vector<1x96xf32>
    %1093 = tpu.matmul %1092, %587, %cst_369 {dimension_numbers = #tpu.dot_dimension_numbers<[1], [0], [0], [1], [0, 0, 1, 1], [], []>} : vector<1x32xbf16>, vector<32x96xbf16>, vector<1x96xf32> -> vector<1x96xf32>
    %1094 = arith.addf %1093, %589 : vector<1x96xf32>
    %1095 = arith.truncf %1009 : vector<1x32xf32> to vector<1x32xbf16>
    %cst_370 = arith.constant dense<0.000000e+00> : vector<1x96xf32>
    %1096 = tpu.matmul %1095, %588, %cst_370 {dimension_numbers = #tpu.dot_dimension_numbers<[1], [0], [0], [1], [0, 0, 1, 1], [], []>} : vector<1x32xbf16>, vector<32x96xbf16>, vector<1x96xf32> -> vector<1x96xf32>
    %1097 = arith.addf %1096, %590 : vector<1x96xf32>
    %1098 = vector.extract_strided_slice %1094 {offsets = [0, 0], sizes = [1, 64], strides = [1, 1]} : vector<1x96xf32> to vector<1x64xf32>
    %1099 = vector.extract_strided_slice %1097 {offsets = [0, 0], sizes = [1, 64], strides = [1, 1]} : vector<1x96xf32> to vector<1x64xf32>
    %1100 = arith.addf %1098, %1099 : vector<1x64xf32>
    %cst_371 = arith.constant 5.000000e-01 : f32
    %1101 = vector.broadcast %cst_371 : f32 to vector<1x64xf32>
    %1102 = arith.mulf %1101, %1100 : vector<1x64xf32>
    %1103 = math.tanh %1102 : vector<1x64xf32>
    %cst_372 = arith.constant 1.000000e+00 : f32
    %1104 = vector.broadcast %cst_372 : f32 to vector<1x64xf32>
    %1105 = arith.addf %1103, %1104 : vector<1x64xf32>
    %cst_373 = arith.constant 5.000000e-01 : f32
    %1106 = vector.broadcast %cst_373 : f32 to vector<1x64xf32>
    %1107 = arith.mulf %1106, %1105 : vector<1x64xf32>
    %1108 = vector.extract_strided_slice %1107 {offsets = [0, 0], sizes = [1, 32], strides = [1, 1]} : vector<1x64xf32> to vector<1x32xf32>
    %1109 = vector.extract_strided_slice %1107 {offsets = [0, 32], sizes = [1, 32], strides = [1, 1]} : vector<1x64xf32> to vector<1x32xf32>
    %1110 = vector.extract_strided_slice %1094 {offsets = [0, 64], sizes = [1, 32], strides = [1, 1]} : vector<1x96xf32> to vector<1x32xf32>
    %1111 = vector.extract_strided_slice %1097 {offsets = [0, 64], sizes = [1, 32], strides = [1, 1]} : vector<1x96xf32> to vector<1x32xf32>
    %1112 = arith.mulf %1108, %1111 : vector<1x32xf32>
    %1113 = arith.addf %1110, %1112 : vector<1x32xf32>
    %1114 = math.tanh %1113 : vector<1x32xf32>
    %cst_374 = arith.constant 1.000000e+00 : f32
    %1115 = vector.broadcast %cst_374 : f32 to vector<1x32xf32>
    %1116 = arith.subf %1115, %1109 : vector<1x32xf32>
    %1117 = arith.mulf %1116, %1114 : vector<1x32xf32>
    %1118 = arith.mulf %1109, %1009 : vector<1x32xf32>
    %1119 = arith.addf %1117, %1118 : vector<1x32xf32>
    %1120 = arith.truncf %1119 : vector<1x32xf32> to vector<1x32xbf16>
    %cst_375 = arith.constant dense<0.000000e+00> : vector<1x128xf32>
    %1121 = tpu.matmul %1120, %591, %cst_375 {dimension_numbers = #tpu.dot_dimension_numbers<[1], [0], [0], [1], [0, 0, 1, 1], [], []>} : vector<1x32xbf16>, vector<32x128xbf16>, vector<1x128xf32> -> vector<1x128xf32>
    %1122 = arith.truncf %1060 : vector<1x32xf32> to vector<1x32xbf16>
    %cst_376 = arith.constant dense<0.000000e+00> : vector<1x128xf32>
    %1123 = tpu.matmul %1122, %592, %cst_376 {dimension_numbers = #tpu.dot_dimension_numbers<[1], [0], [0], [1], [0, 0, 1, 1], [], []>} : vector<1x32xbf16>, vector<32x128xbf16>, vector<1x128xf32> -> vector<1x128xf32>
    %1124 = arith.addf %1121, %1123 : vector<1x128xf32>
    %1125 = arith.addf %1124, %593 : vector<1x128xf32>
    %cst_377 = arith.constant 1.000000e+00 : f32
    %1126 = vector.broadcast %cst_377 : f32 to vector<1x1xf32>
    %1127 = arith.subf %1126, %1042 : vector<1x1xf32>
    %1128 = vector.broadcast %1127 : vector<1x1xf32> to vector<1x128xf32>
    %1129 = arith.mulf %1125, %1128 : vector<1x128xf32>
    %c4_378 = arith.constant 4 : index
    %c0_379 = arith.constant 0 : index
    %1130 = vector.load %arg28[%c4_378, %c0_379] : memref<5x128xf32, #tpu.memory_space<vmem>>, vector<1x128xf32>
    tpu.vector_store %arg28[%c4_378, %c0_379], %1129 {strides = array<i32>} : memref<5x128xf32, #tpu.memory_space<vmem>>, vector<1x128xf32>,
    %1131 = vector.broadcast %1127 : vector<1x1xf32> to vector<1x8xf32>
    %1132 = arith.mulf %1058, %1131 : vector<1x8xf32>
    %c4_380 = arith.constant 4 : index
    %c0_381 = arith.constant 0 : index
    %1133 = vector.load %arg29[%c4_380, %c0_381] : memref<5x128xf32, #tpu.memory_space<vmem>>, vector<1x8xf32>
    tpu.vector_store %arg29[%c4_380, %c0_381], %1132 {strides = array<i32>} : memref<5x128xf32, #tpu.memory_space<vmem>>, vector<1x8xf32>,
    return
  }
}

</mosaic_0001>

<bundles_post_ra>
// kernel: seq2seq_forward.1
= control target key start
LH: loop header
LB: loop body
LE: loop exit
PB: predicated region body
PF: predicated region fallthrough
CT: control target
= control target key end

     0   :  { %s4764_s6 = smov 1   ;;  %s4765_s10 = smov 2   ;;  %s6162_s0 = inlined_call_operand.smem [shape: u32[30], index: -1, kind: input, shape index: {}] }
   0x1   :  { %s4831_s5 = sld [smem:[%s6162_s0]]   ;;  %s4766_s14 = smov 3  }
   0x2   :  { %s4836_s9 = sld [smem:[%s6162_s0 + %s4764_s6]]   ;;  %s4767_s18 = smov 4  }
   0x3   :  { %s4841_s13 = sld [smem:[%s6162_s0 + %s4765_s10]]   ;;  %s4768_s22 = smov 5  }
   0x4   :  { %s4846_s17 = sld [smem:[%s6162_s0 + %s4766_s14]]   ;;  %s4769_s26 = smov 6  }
   0x5   :  { %s4851_s21 = sld [smem:[%s6162_s0 + %s4767_s18]]   ;;  %s4770_s30 = smov 7  }
   0x6   :  { %s4856_s25 = sld [smem:[%s6162_s0 + %s4768_s22]]   ;;  %s4771_s4 = smov 8  }
   0x7   :  { %s4861_s29 = sld [smem:[%s6162_s0 + %s4769_s26]]   ;;  %s4772_s10 = smov 9  }
   0x8   :  { %6176 = sst [smem:[#allocation50_spill]] %s4836_s9  ;;  %s4773_s15 = smov 10  }
   0x9   :  { %6177 = sst [smem:[#allocation51_spill]] %s4841_s13  ;;  %s4774_s20 = smov 11  }
   0xa   :  { %s4866_s3 = sld [smem:[%s6162_s0 + %s4770_s30]]   ;;  %s4775_s26 = smov 12  }
   0xb   :  { %s4871_s8 = sld [smem:[%s6162_s0 + %s4771_s4]]   ;;  %s4776_s1 = smov 13  }
   0xc   :  { %6178 = sst [smem:[#allocation52_spill]] %s4856_s25  ;;  %s4777_s7 = smov 14  }
   0xd   :  { %s4876_s14 = sld [smem:[%s6162_s0 + %s4772_s10]]   ;;  %s4779_s22 = smov 16  }
   0xe   :  { %s4881_s19 = sld [smem:[%s6162_s0 + %s4773_s15]]   ;;  %s4778_s15 = smov 15  }
   0xf   :  { %s4886_s24 = sld [smem:[%s6162_s0 + %s4774_s20]]   ;;  %s4780_s28 = smov 17  }
  0x10   :  { %6179 = sst [smem:[#allocation53_spill]] %s4866_s3 }
  0x11   :  { %s4891_s30 = sld [smem:[%s6162_s0 + %s4775_s26]]  }
  0x12   :  { %s4896_s6 = sld [smem:[%s6162_s0 + %s4776_s1]]  }
  0x13   :  { %6180 = sst [smem:[#allocation54_spill]] %s4876_s14 }
  0x14   :  { %s4901_s12 = sld [smem:[%s6162_s0 + %s4777_s7]]   ;;  %s4781_s7 = smov 18  }
  0x15   :  { %s4906_s20 = sld [smem:[%s6162_s0 + %s4778_s15]]   ;;  %s4782_s15 = smov 19  }
  0x16   :  { %s4911_s27 = sld [smem:[%s6162_s0 + %s4779_s22]]   ;;  %s4783_s22 = smov 20  }
  0x17   :  { %6181 = sst [smem:[#allocation55_spill]] %s4891_s30 }
  0x18   :  { %s4916_s4 = sld [smem:[%s6162_s0 + %s4780_s28]]   ;;  %s4784_s28 = smov 21  }
  0x19   :  { %s4921_s30 = sld [smem:[%s6162_s0 + %s4781_s7]]   ;;  %s4785_s7 = smov 22  }
  0x1a   :  { %s4926_s14 = sld [smem:[%s6162_s0 + %s4782_s15]]   ;;  %s4786_s15 = smov 23  }
  0x1b   :  { %6182 = sst [smem:[#allocation56_spill]] %s4906_s20 }
  0x1c   :  { %s4931_s3 = sld [smem:[%s6162_s0 + %s4783_s22]]   ;;  %s4787_s22 = smov 24  }
  0x1d   :  { %s4936_s9 = sld [smem:[%s6162_s0 + %s4784_s28]]   ;;  %s4788_s28 = smov 25  }
  0x1e   :  { %6183 = sst [smem:[#allocation57_spill]] %s4916_s4 }
  0x1f   :  { %s4941_s25 = sld [smem:[%s6162_s0 + %s4785_s7]]   ;;  %s4789_s7 = smov 26  }
  0x20   :  { %6184 = sst [smem:[#allocation58_spill]] %s4926_s14 }
  0x21   :  { %s4946_s13 = sld [smem:[%s6162_s0 + %s4786_s15]]   ;;  %s4790_s15 = smov 27  }
  0x22   :  { %s4951_s14 = sld [smem:[%s6162_s0 + %s4787_s22]]   ;;  %s4791_s22 = smov 28  }
  0x23   :  { %6185 = sst [smem:[#allocation59_spill]] %s4936_s9 }
  0x24   :  { %s4956_s9 = sld [smem:[%s6162_s0 + %s4788_s28]]   ;;  %s4792_s28 = smov 29  }
  0x25   :  { %s4961_s4 = sld [smem:[%s6162_s0 + %s4789_s7]]  }
  0x26   :  { %s4971_s20 = sld [smem:[%s6162_s0 + %s4791_s22]]  }
  0x27   :  { %6186 = sst [smem:[#allocation60_spill]] %s4946_s13 }
  0x28   :  { %s4966_s13 = sld [smem:[%s6162_s0 + %s4790_s15]]  }
  0x2a   :  { %6187 = sst [smem:[#allocation61_spill]] %s4956_s9 }
  0x2b   :  { %s4976_s9 = sld [smem:[%s6162_s0 + %s4792_s28]]  }
  0x2c   :  { %65 = vsyncpa [#allocation7], 0 }
  0x2d   :  { %66 = vsyncpa [#allocation6], 0 }
  0x2e   :  { %67 = vsyncpa [#allocation10], 0 }
  0x2f   :  { %68 = vsyncpa [#allocation13], 0 }
  0x30   :  { %69 = vsyncpa [#allocation16], 0 }
  0x31   :  { %70 = vsyncpa [#allocation19], 0 }
  0x32   :  { %71 = vsyncpa [#allocation22], 0 }
  0x33   :  { %72 = vsyncpa [#allocation25], 0 }
  0x34   :  { %73 = vsyncpa [#allocation28], 0 }
  0x35   :  { %74 = vsyncpa [#allocation31], 0 }
  0x36   :  { %75 = vsyncpa [#allocation34], 0  ;;  %s108_s7 = sshll.u32 %s4851_s21, 4  ;;  %s109_s7 = int_to_ptr.hbm [resolvable:$true] %s108_s7 }
  0x37   :  { %76 = vsyncpa [#allocation37], 0  ;;  %s4793_s10 = smov [#allocation9]   ;;  %s4248_s11 = sshra.s32 %s109_s7, 4  ;;  %s4249_s11 = int_to_ptr.hbm [resolvable:$true] %s4248_s11 }
  0x38   :  { %s110_s0 = sshll.u32 %s4793_s10, 4  ;;  %s4250_s15 = scalar_lea.hbm %s4249_s11, 2  ;;  %s111_s0 = int_to_ptr.vmem [resolvable:$true] %s110_s0 }
  0x39   :  { %p4251_p0 = scmp.ne.s32.totalorder %s4249_s11, %s4250_s15  ;;  %s4252_s16 = scalar_lea.hbm %s4851_s21, 2 }
  0x3a   :  { %p4253_p1 = scmp.lt.s32.totalorder %s4249_s11, %s4851_s21  ;;  %p4254_p2 = scmp.lt.s32.totalorder %s4252_s16, %s4250_s15 }
  0x3c   :  { %p4255_p3 = por %p4254_p2, %p4253_p1 }
  0x3e   :  { %p4256_p4 = pnand %p4255_p3, %p4251_p0 }
  0x40   :  { %4259 = shalt.err (!%p4256_p4)
}
  0x41   :  { %113 = dma.hbm_to_vmem [thread:$0]  %s109_s7, 32, %s111_s0, [#allocation10]  }
  0x42   :  { %s133_s18 = sshll.u32 %s4871_s8, 4  ;;  %s4794_s22 = smov [#allocation12]   ;;  %s134_s18 = int_to_ptr.hbm [resolvable:$true] %s133_s18 }
  0x43   :  { %s135_s23 = sshll.u32 %s4794_s22, 4  ;;  %s162_s26 = sshll.u32 %s4886_s24, 4  ;;  %s136_s23 = int_to_ptr.vmem [resolvable:$true] %s135_s23  ;;  %s163_s26 = int_to_ptr.hbm [resolvable:$true] %s162_s26 }
  0x44   :  { %s4272_s28 = sshra.s32 %s134_s18, 4  ;;  %s4276_s21 = scalar_lea.hbm %s4871_s8, 64  ;;  %s4273_s28 = int_to_ptr.hbm [resolvable:$true] %s4272_s28 }
  0x45   :  { %s4274_s1 = scalar_lea.hbm %s4273_s28, 64  ;;  %p4277_p6 = scmp.lt.s32.totalorder %s4273_s28, %s4871_s8 }
  0x46   :  { %p4275_p5 = scmp.ne.s32.totalorder %s4273_s28, %s4274_s1  ;;  %p4278_p7 = scmp.lt.s32.totalorder %s4276_s21, %s4274_s1 }
  0x48   :  { %p4279_p8 = por %p4278_p7, %p4277_p6 }
  0x4a   :  { %p4280_p9 = pnand %p4279_p8, %p4275_p5 }
  0x4c   :  { %4283 = shalt.err (!%p4280_p9)
}
  0x4d   :  { %s4795_s2 = smov 128   ;;  %s4796_s7 = smov 8  }
  0x4e   :  { %141 = dma.hbm_to_vmem [thread:$0]  %s134_s18, 1024, %s136_s23, [#allocation13], %s4795_s2, %s4795_s2, %s4796_s7  }
  0x4f   :  { %s4797_s10 = smov [#allocation15]   ;;  %s187_s11 = sshll.u32 %s4901_s12, 4  ;;  %s188_s11 = int_to_ptr.hbm [resolvable:$true] %s187_s11 }
  0x50   :  { %s164_s0 = sshll.u32 %s4797_s10, 4  ;;  %s4296_s15 = sshra.s32 %s163_s26, 4  ;;  %s165_s0 = int_to_ptr.vmem [resolvable:$true] %s164_s0  ;;  %s4297_s15 = int_to_ptr.hbm [resolvable:$true] %s4296_s15 }
  0x51   :  { %s4298_s8 = scalar_lea.hbm %s4297_s15, 2  ;;  %s4300_s16 = scalar_lea.hbm %s4886_s24, 2 }
  0x52   :  { %p4299_p10 = scmp.ne.s32.totalorder %s4297_s15, %s4298_s8  ;;  %p4301_p11 = scmp.lt.s32.totalorder %s4297_s15, %s4886_s24 }
  0x53   :  { %p4302_p12 = scmp.lt.s32.totalorder %s4300_s16, %s4298_s8 }
  0x55   :  { %p4303_p13 = por %p4302_p12, %p4301_p11 }
  0x57   :  { %p4304_p0 = pnand %p4303_p13, %p4299_p10 }
  0x59   :  { %4307 = shalt.err (!%p4304_p0)
}
  0x5a   :  { %167 = dma.hbm_to_vmem [thread:$0]  %s163_s26, 32, %s165_s0, [#allocation16]  }
  0x5b   :  { %s4798_s18 = smov [#allocation18]   ;;  %s214_s23 = sshll.u32 %s4911_s27, 4  ;;  %s4992_s23 = int_to_ptr.hbm [resolvable:$true] %s214_s23 }
  0x5c   :  { %s189_s22 = sshll.u32 %s4798_s18, 4  ;;  %s4320_s28 = sshra.s32 %s188_s11, 4  ;;  %s190_s22 = int_to_ptr.vmem [resolvable:$true] %s189_s22  ;;  %s4321_s28 = int_to_ptr.hbm [resolvable:$true] %s4320_s28 }
  0x5d   :  { %s4322_s1 = scalar_lea.hbm %s4321_s28, 16  ;;  %s4324_s24 = scalar_lea.hbm %s4901_s12, 16 }
  0x5e   :  { %p4323_p1 = scmp.ne.s32.totalorder %s4321_s28, %s4322_s1  ;;  %p4325_p2 = scmp.lt.s32.totalorder %s4321_s28, %s4901_s12 }
  0x5f   :  { %p4326_p3 = scmp.lt.s32.totalorder %s4324_s24, %s4322_s1 }
  0x61   :  { %p4327_p4 = por %p4326_p3, %p4325_p2 }
  0x63   :  { %p4328_p5 = pnand %p4327_p4, %p4323_p1 }
  0x65   :  { %4331 = shalt.err (!%p4328_p5)
}
  0x66   :  { %s4799_s26 = smov 64   ;;  %s4800_s21 = smov 4  }
  0x67   :  { %195 = dma.hbm_to_vmem [thread:$0]  %s188_s11, 256, %s190_s22, [#allocation19], %s4799_s26, %s4799_s26, %s4800_s21  }
  0x68   :  { %s235_s10 = sshll.u32 %s4921_s30, 4  ;;  %s4801_s0 = smov [#allocation21]   ;;  %s5000_s10 = int_to_ptr.hbm [resolvable:$true] %s235_s10 }
  0x69   :  { %s216_s15 = sshll.u32 %s4801_s0, 4  ;;  %s4344_s12 = sshra.s32 %s4992_s23, 4  ;;  %s217_s15 = int_to_ptr.vmem [resolvable:$true] %s216_s15  ;;  %s4345_s12 = int_to_ptr.hbm [resolvable:$true] %s4344_s12 }
  0x6a   :  { %s4346_s8 = scalar_lea.hbm %s4345_s12, 1  ;;  %s4348_s16 = scalar_lea.hbm %s4911_s27, 1 }
  0x6b   :  { %p4347_p6 = scmp.ne.s32.totalorder %s4345_s12, %s4346_s8  ;;  %p4349_p7 = scmp.lt.s32.totalorder %s4345_s12, %s4911_s27 }
  0x6c   :  { %p4350_p8 = scmp.lt.s32.totalorder %s4348_s16, %s4346_s8 }
  0x6e   :  { %p4351_p9 = por %p4350_p8, %p4349_p7 }
  0x70   :  { %p4352_p10 = pnand %p4351_p9, %p4347_p6 }
  0x72   :  { %4355 = shalt.err (!%p4352_p10)
}
  0x73   :  { %219 = dma.hbm_to_vmem [thread:$0]  %s4992_s23, 16, %s217_s15, [#allocation22]  }
  0x74   :  { %s4802_s11 = smov [#allocation24]   ;;  %s262_s22 = sshll.u32 %s4931_s3, 4  ;;  %s263_s22 = int_to_ptr.hbm [resolvable:$true] %s262_s22 }
  0x75   :  { %s237_s18 = sshll.u32 %s4802_s11, 4  ;;  %s4368_s28 = sshra.s32 %s5000_s10, 4  ;;  %s238_s18 = int_to_ptr.vmem [resolvable:$true] %s237_s18  ;;  %s4369_s28 = int_to_ptr.hbm [resolvable:$true] %s4368_s28 }
  0x76   :  { %s4370_s1 = scalar_lea.hbm %s4369_s28, 16  ;;  %s4372_s27 = scalar_lea.hbm %s4921_s30, 16 }
  0x77   :  { %p4371_p11 = scmp.ne.s32.totalorder %s4369_s28, %s4370_s1  ;;  %p4373_p12 = scmp.lt.s32.totalorder %s4369_s28, %s4921_s30 }
  0x78   :  { %p4374_p13 = scmp.lt.s32.totalorder %s4372_s27, %s4370_s1 }
  0x7a   :  { %p4375_p0 = por %p4374_p13, %p4373_p12 }
  0x7c   :  { %p4376_p1 = pnand %p4375_p0, %p4371_p11 }
  0x7e   :  { %4379 = shalt.err (!%p4376_p1)
}
  0x7f   :  { %243 = dma.hbm_to_vmem [thread:$0]  %s5000_s10, 256, %s238_s18, [#allocation25], %s4799_s26, %s4799_s26, %s4800_s21  }
  0x80   :  { %s283_s23 = sshll.u32 %s4941_s25, 4  ;;  %s4803_s24 = smov [#allocation27]   ;;  %s5015_s23 = int_to_ptr.hbm [resolvable:$true] %s283_s23 }
  0x81   :  { %s264_s0 = sshll.u32 %s4803_s24, 4  ;;  %s4392_s15 = sshra.s32 %s263_s22, 4  ;;  %s265_s0 = int_to_ptr.vmem [resolvable:$true] %s264_s0  ;;  %s4393_s15 = int_to_ptr.hbm [resolvable:$true] %s4392_s15 }
  0x82   :  { %s4394_s30 = scalar_lea.hbm %s4393_s15, 1  ;;  %s4396_s12 = scalar_lea.hbm %s4931_s3, 1 }
  0x83   :  { %p4395_p2 = scmp.ne.s32.totalorder %s4393_s15, %s4394_s30  ;;  %p4397_p3 = scmp.lt.s32.totalorder %s4393_s15, %s4931_s3 }
  0x84   :  { %p4398_p4 = scmp.lt.s32.totalorder %s4396_s12, %s4394_s30 }
  0x86   :  { %p4399_p5 = por %p4398_p4, %p4397_p3 }
  0x88   :  { %p4400_p6 = pnand %p4399_p5, %p4395_p2 }
  0x8a   :  { %4403 = shalt.err (!%p4400_p6)
}
  0x8b   :  { %267 = dma.hbm_to_vmem [thread:$0]  %s263_s22, 16, %s265_s0, [#allocation28]  }
  0x8c   :  { %s4804_s10 = smov [#allocation30]   ;;  %s310_s16 = sshll.u32 %s4951_s14, 4  ;;  %s311_s16 = int_to_ptr.hbm [resolvable:$true] %s310_s16 }
  0x8d   :  { %s285_s8 = sshll.u32 %s4804_s10, 4  ;;  %s4416_s11 = sshra.s32 %s5015_s23, 4  ;;  %s286_s8 = int_to_ptr.vmem [resolvable:$true] %s285_s8  ;;  %s4417_s11 = int_to_ptr.hbm [resolvable:$true] %s4416_s11 }
  0x8e   :  { %s4418_s18 = scalar_lea.hbm %s4417_s11, 16  ;;  %s4420_s28 = scalar_lea.hbm %s4941_s25, 16 }
  0x8f   :  { %p4419_p7 = scmp.ne.s32.totalorder %s4417_s11, %s4418_s18  ;;  %p4421_p8 = scmp.lt.s32.totalorder %s4417_s11, %s4941_s25 }
  0x90   :  { %p4422_p9 = scmp.lt.s32.totalorder %s4420_s28, %s4418_s18 }
  0x92   :  { %p4423_p10 = por %p4422_p9, %p4421_p8 }
  0x94   :  { %p4424_p11 = pnand %p4423_p10, %p4419_p7 }
  0x96   :  { %4427 = shalt.err (!%p4424_p11)
}
  0x97   :  { %291 = dma.hbm_to_vmem [thread:$0]  %s5015_s23, 256, %s286_s8, [#allocation31], %s4799_s26, %s4799_s26, %s4800_s21  }
  0x98   :  { %s82_s3 = sshll.u32 %s4831_s5, 4  ;;  %s4805_s22 = smov [#allocation33]   ;;  %s83_s3 = int_to_ptr.vmem [resolvable:$true] %s82_s3 }
  0x99   :  { %s312_s1 = sshll.u32 %s4805_s22, 4  ;;  %s4440_s27 = sshra.s32 %s311_s16, 4  ;;  %s313_s1 = int_to_ptr.vmem [resolvable:$true] %s312_s1  ;;  %s4441_s27 = int_to_ptr.hbm [resolvable:$true] %s4440_s27 }
  0x9a   :  { %s4442_s25 = scalar_lea.hbm %s4441_s27, 1  ;;  %s4444_s24 = scalar_lea.hbm %s4951_s14, 1 }
  0x9b   :  { %p4443_p12 = scmp.ne.s32.totalorder %s4441_s27, %s4442_s25  ;;  %p4445_p13 = scmp.lt.s32.totalorder %s4441_s27, %s4951_s14 }
  0x9c   :  { %p4446_p0 = scmp.lt.s32.totalorder %s4444_s24, %s4442_s25 }
  0x9e   :  { %p4447_p1 = por %p4446_p0, %p4445_p13 }
  0xa0   :  { %p4448_p2 = pnand %p4447_p1, %p4443_p12 }
  0xa2   :  { %4451 = shalt.err (!%p4448_p2)
}
  0xa3   :  { %315 = dma.hbm_to_vmem [thread:$0]  %s311_s16, 16, %s313_s1, [#allocation34]  }
  0xa4   :  { %s4464_s0 = sshra.s32 %s83_s3, 4  ;;  %s4468_s15 = scalar_lea.vmem %s4831_s5, 1  ;;  %s4465_s0 = int_to_ptr.vmem [resolvable:$true] %s4464_s0 }
  0xa5   :  { %s4466_s23 = scalar_lea.vmem %s4465_s0, 1  ;;  %p4469_p4 = scmp.lt.s32.totalorder %s4465_s0, %s4831_s5 }
  0xa6   :  { %p4467_p3 = scmp.ne.s32.totalorder %s4465_s0, %s4466_s23  ;;  %p4470_p5 = scmp.lt.s32.totalorder %s4468_s15, %s4466_s23 }
  0xa8   :  { %p4471_p6 = por %p4470_p5, %p4469_p4 }
  0xaa   :  { %p4472_p7 = pnand %p4471_p6, %p4467_p3 }
  0xac   :  { %4475 = shalt.err (!%p4472_p7)
}
  0xad   :  { %s4806_s30 = smov [#allocation5]   ;;  %s94_s14 = sshll.u32 %s4846_s17, 4  ;;  %s95_s14 = int_to_ptr.hbm [resolvable:$true] %s94_s14 }
  0xae   :  { %85 = dma.vmem_to_smem %s83_s3, 16, %s4806_s30, [#allocation7]  }
  0xaf   :  { %s4807_s12 = smov [#allocation8]   ;;  %s121_s8 = sshll.u32 %s4861_s29, 4  ;;  %s122_s8 = int_to_ptr.hbm [resolvable:$true] %s121_s8 }
  0xb0   :  { %s96_s10 = sshll.u32 %s4807_s12, 4  ;;  %s4476_s16 = sshra.s32 %s95_s14, 4  ;;  %s97_s10 = int_to_ptr.vmem [resolvable:$true] %s96_s10  ;;  %s4477_s16 = int_to_ptr.hbm [resolvable:$true] %s4476_s16 }
  0xb1   :  { %s4478_s11 = scalar_lea.hbm %s4477_s16, 32  ;;  %s4480_s5 = scalar_lea.hbm %s4846_s17, 32 }
  0xb2   :  { %p4479_p8 = scmp.ne.s32.totalorder %s4477_s16, %s4478_s11  ;;  %p4481_p9 = scmp.lt.s32.totalorder %s4477_s16, %s4846_s17 }
  0xb3   :  { %p4482_p10 = scmp.lt.s32.totalorder %s4480_s5, %s4478_s11 }
  0xb5   :  { %p4483_p11 = por %p4482_p10, %p4481_p9 }
  0xb7   :  { %p4484_p12 = pnand %p4483_p11, %p4479_p8 }
  0xb9   :  { %4487 = shalt.err (!%p4484_p12)
}
  0xba   :  { %102 = dma.hbm_to_vmem [thread:$0]  %s95_s14, 512, %s97_s10, [#allocation6], %s4795_s2, %s4795_s2, %s4796_s7  }
  0xbb   :  { %s4808_s18 = smov [#allocation11]   ;;  %s148_s3 = sshll.u32 %s4881_s19, 4  ;;  %s5040_s3 = int_to_ptr.hbm [resolvable:$true] %s148_s3 }
  0xbc   :  { %s123_s28 = sshll.u32 %s4808_s18, 4  ;;  %s4500_s22 = sshra.s32 %s122_s8, 4  ;;  %s124_s28 = int_to_ptr.vmem [resolvable:$true] %s123_s28  ;;  %s4501_s22 = int_to_ptr.hbm [resolvable:$true] %s4500_s22 }
  0xbd   :  { %s4502_s17 = scalar_lea.hbm %s4501_s22, 2  ;;  %s4504_s1 = scalar_lea.hbm %s4861_s29, 2 }
  0xbe   :  { %p4503_p13 = scmp.ne.s32.totalorder %s4501_s22, %s4502_s17  ;;  %p4505_p0 = scmp.lt.s32.totalorder %s4501_s22, %s4861_s29 }
  0xbf   :  { %p4506_p1 = scmp.lt.s32.totalorder %s4504_s1, %s4502_s17 }
  0xc1   :  { %p4507_p2 = por %p4506_p1, %p4505_p0 }
  0xc3   :  { %p4508_p3 = pnand %p4507_p2, %p4503_p13 }
  0xc5   :  { %4511 = shalt.err (!%p4508_p3)
}
  0xc6   :  { %126 = dma.hbm_to_vmem [thread:$0]  %s122_s8, 32, %s124_s28, [#allocation10]  }
  0xc7   :  { %s174_s27 = sshll.u32 %s4896_s6, 4  ;;  %s4809_s25 = smov [#allocation14]   ;;  %s5045_s27 = int_to_ptr.hbm [resolvable:$true] %s174_s27 }
  0xc8   :  { %s150_s24 = sshll.u32 %s4809_s25, 4  ;;  %s4524_s0 = sshra.s32 %s5040_s3, 4  ;;  %s151_s24 = int_to_ptr.vmem [resolvable:$true] %s150_s24  ;;  %s4525_s0 = int_to_ptr.hbm [resolvable:$true] %s4524_s0 }
  0xc9   :  { %s4526_s23 = scalar_lea.hbm %s4525_s0, 64  ;;  %s4528_s29 = scalar_lea.hbm %s4881_s19, 64 }
  0xca   :  { %p4527_p4 = scmp.ne.s32.totalorder %s4525_s0, %s4526_s23  ;;  %p4529_p5 = scmp.lt.s32.totalorder %s4525_s0, %s4881_s19 }
  0xcb   :  { %p4530_p6 = scmp.lt.s32.totalorder %s4528_s29, %s4526_s23 }
  0xcd   :  { %p4531_p7 = por %p4530_p6, %p4529_p5 }
  0xcf   :  { %p4532_p8 = pnand %p4531_p7, %p4527_p4 }
  0xd1   :  { %4535 = shalt.err (!%p4532_p8)
}
  0xd2   :  { %s6188_s15 = sld [smem:[#allocation56_spill]]  ;;  %s4810_s30 = smov [#allocation17]  }
  0xd3   :  { %156 = dma.hbm_to_vmem [thread:$0]  %s5040_s3, 1024, %s151_s24, [#allocation13], %s4795_s2, %s4795_s2, %s4796_s7  }
  0xd4   :  { %s176_s14 = sshll.u32 %s4810_s30, 4  ;;  %s4548_s19 = sshra.s32 %s5045_s27, 4  ;;  %s177_s14 = int_to_ptr.vmem [resolvable:$true] %s176_s14  ;;  %s4549_s19 = int_to_ptr.hbm [resolvable:$true] %s4548_s19 }
  0xd5   :  { %s4550_s10 = scalar_lea.hbm %s4549_s19, 16  ;;  %s4552_s8 = scalar_lea.hbm %s4896_s6, 16 }
  0xd6   :  { %p4551_p9 = scmp.ne.s32.totalorder %s4549_s19, %s4550_s10  ;;  %p4553_p10 = scmp.lt.s32.totalorder %s4549_s19, %s4896_s6 }
  0xd7   :  { %p4554_p11 = scmp.lt.s32.totalorder %s4552_s8, %s4550_s10 }
  0xd8   :  { %s200_s12 = sshll.u32 %s6188_s15, 4  ;;  %s5055_s12 = int_to_ptr.hbm [resolvable:$true] %s200_s12 }
  0xd9   :  { %p4555_p12 = por %p4554_p11, %p4553_p10 }
  0xdb   :  { %p4556_p13 = pnand %p4555_p12, %p4551_p9 }
  0xdd   :  { %4559 = shalt.err (!%p4556_p13)
}
  0xde   :  { %s6189_s2 = sld [smem:[#allocation57_spill]]  ;;  %s4811_s16 = smov [#allocation20]  }
  0xdf   :  { %182 = dma.hbm_to_vmem [thread:$0]  %s5045_s27, 256, %s177_s14, [#allocation16], %s4799_s26, %s4799_s26, %s4800_s21  }
  0xe0   :  { %s202_s11 = sshll.u32 %s4811_s16, 4  ;;  %s4572_s5 = sshra.s32 %s5055_s12, 4  ;;  %s203_s11 = int_to_ptr.vmem [resolvable:$true] %s202_s11  ;;  %s4573_s5 = int_to_ptr.hbm [resolvable:$true] %s4572_s5 }
  0xe1   :  { %s4574_s6 = scalar_lea.hbm %s4573_s5, 16  ;;  %s4576_s18 = scalar_lea.hbm %s6188_s15, 16 }
  0xe2   :  { %p4575_p0 = scmp.ne.s32.totalorder %s4573_s5, %s4574_s6  ;;  %p4577_p1 = scmp.lt.s32.totalorder %s4573_s5, %s6188_s15 }
  0xe3   :  { %p4578_p2 = scmp.lt.s32.totalorder %s4576_s18, %s4574_s6 }
  0xe4   :  { %s225_s7 = sshll.u32 %s6189_s2, 4  ;;  %s226_s7 = int_to_ptr.hbm [resolvable:$true] %s225_s7 }
  0xe5   :  { %p4579_p3 = por %p4578_p2, %p4577_p1 }
  0xe7   :  { %p4580_p4 = pnand %p4579_p3, %p4575_p0 }
  0xe9   :  { %4583 = shalt.err (!%p4580_p4)
}
  0xea   :  { %s6190_s28 = sld [smem:[#allocation58_spill]]  ;;  %s4812_s3 = smov [#allocation23]  }
  0xeb   :  { %208 = dma.hbm_to_vmem [thread:$0]  %s5055_s12, 256, %s203_s11, [#allocation19], %s4799_s26, %s4799_s26, %s4800_s21  }
  0xec   :  { %s227_s22 = sshll.u32 %s4812_s3, 4  ;;  %s4596_s1 = sshra.s32 %s226_s7, 4  ;;  %s228_s22 = int_to_ptr.vmem [resolvable:$true] %s227_s22  ;;  %s4597_s1 = int_to_ptr.hbm [resolvable:$true] %s4596_s1 }
  0xed   :  { %s4598_s27 = scalar_lea.hbm %s4597_s1, 1  ;;  %s4600_s25 = scalar_lea.hbm %s6189_s2, 1 }
  0xee   :  { %p4599_p5 = scmp.ne.s32.totalorder %s4597_s1, %s4598_s27  ;;  %p4601_p6 = scmp.lt.s32.totalorder %s4597_s1, %s6189_s2 }
  0xef   :  { %p4602_p7 = scmp.lt.s32.totalorder %s4600_s25, %s4598_s27 }
  0xf0   :  { %s248_s17 = sshll.u32 %s6190_s28, 4  ;;  %s5073_s17 = int_to_ptr.hbm [resolvable:$true] %s248_s17 }
  0xf1   :  { %p4603_p8 = por %p4602_p7, %p4601_p6 }
  0xf3   :  { %p4604_p9 = pnand %p4603_p8, %p4599_p5 }
  0xf5   :  { %4607 = shalt.err (!%p4604_p9)
}
  0xf6   :  { %230 = dma.hbm_to_vmem [thread:$0]  %s226_s7, 16, %s228_s22, [#allocation22]  }
  0xf7   :  { %s6191_s24 = sld [smem:[#allocation59_spill]]  ;;  %s4813_s23 = smov [#allocation26]  }
  0xf8   :  { %s250_s29 = sshll.u32 %s4813_s23, 4  ;;  %s4620_s15 = sshra.s32 %s5073_s17, 4  ;;  %s251_s29 = int_to_ptr.vmem [resolvable:$true] %s250_s29  ;;  %s4621_s15 = int_to_ptr.hbm [resolvable:$true] %s4620_s15 }
  0xf9   :  { %s4622_s30 = scalar_lea.hbm %s4621_s15, 16  ;;  %s4624_s14 = scalar_lea.hbm %s6190_s28, 16 }
  0xfa   :  { %p4623_p10 = scmp.ne.s32.totalorder %s4621_s15, %s4622_s30  ;;  %p4625_p11 = scmp.lt.s32.totalorder %s4621_s15, %s6190_s28 }
  0xfb   :  { %p4626_p12 = scmp.lt.s32.totalorder %s4624_s14, %s4622_s30 }
  0xfd   :  { %s273_s0 = sshll.u32 %s6191_s24, 4  ;;  %p4627_p13 = por %p4626_p12, %p4625_p11  ;;  %s274_s0 = int_to_ptr.hbm [resolvable:$true] %s273_s0 }
  0xff   :  { %p4628_p0 = pnand %p4627_p13, %p4623_p10 }
 0x101   :  { %4631 = shalt.err (!%p4628_p0)
}
 0x102   :  { %s6192_s12 = sld [smem:[#allocation60_spill]]  ;;  %s4814_s19 = smov [#allocation29]  }
 0x103   :  { %256 = dma.hbm_to_vmem [thread:$0]  %s5073_s17, 256, %s251_s29, [#allocation25], %s4799_s26, %s4799_s26, %s4800_s21  }
 0x104   :  { %s275_s10 = sshll.u32 %s4814_s19, 4  ;;  %s4644_s2 = sshra.s32 %s274_s0, 4  ;;  %s276_s10 = int_to_ptr.vmem [resolvable:$true] %s275_s10  ;;  %s4645_s2 = int_to_ptr.hbm [resolvable:$true] %s4644_s2 }
 0x105   :  { %s4646_s7 = scalar_lea.hbm %s4645_s2, 1  ;;  %s4648_s16 = scalar_lea.hbm %s6191_s24, 1 }
 0x106   :  { %p4647_p1 = scmp.ne.s32.totalorder %s4645_s2, %s4646_s7  ;;  %p4649_p2 = scmp.lt.s32.totalorder %s4645_s2, %s6191_s24 }
 0x107   :  { %p4650_p3 = scmp.lt.s32.totalorder %s4648_s16, %s4646_s7 }
 0x108   :  { %s296_s8 = sshll.u32 %s6192_s12, 4  ;;  %s5086_s8 = int_to_ptr.hbm [resolvable:$true] %s296_s8 }
 0x109   :  { %p4651_p4 = por %p4650_p3, %p4649_p2 }
 0x10b   :  { %p4652_p5 = pnand %p4651_p4, %p4647_p1 }
 0x10d   :  { %4655 = shalt.err (!%p4652_p5)
}
 0x10e   :  { %278 = dma.hbm_to_vmem [thread:$0]  %s274_s0, 16, %s276_s10, [#allocation28]  }
 0x10f   :  { %s6193_s11 = sld [smem:[#allocation61_spill]]  ;;  %s4815_s6 = smov [#allocation32]  }
 0x110   :  { %s298_s18 = sshll.u32 %s4815_s6, 4  ;;  %s4668_s28 = sshra.s32 %s5086_s8, 4  ;;  %s299_s18 = int_to_ptr.vmem [resolvable:$true] %s298_s18  ;;  %s4669_s28 = int_to_ptr.hbm [resolvable:$true] %s4668_s28 }
 0x111   :  { %s4670_s3 = scalar_lea.hbm %s4669_s28, 16  ;;  %s4672_s22 = scalar_lea.hbm %s6192_s12, 16 }
 0x112   :  { %p4671_p6 = scmp.ne.s32.totalorder %s4669_s28, %s4670_s3  ;;  %p4673_p7 = scmp.lt.s32.totalorder %s4669_s28, %s6192_s12 }
 0x113   :  { %p4674_p8 = scmp.lt.s32.totalorder %s4672_s22, %s4670_s3 }
 0x115   :  { %s320_s5 = sshll.u32 %s6193_s11, 4  ;;  %p4675_p9 = por %p4674_p8, %p4673_p7  ;;  %s5091_s5 = int_to_ptr.hbm [resolvable:$true] %s320_s5 }
 0x117   :  { %p4676_p10 = pnand %p4675_p9, %p4671_p6 }
 0x119   :  { %4679 = shalt.err (!%p4676_p10)
}
 0x11a   :  { %304 = dma.hbm_to_vmem [thread:$0]  %s5086_s8, 256, %s299_s18, [#allocation31], %s4799_s26, %s4799_s26, %s4800_s21  }
 0x11b   :  { %s4816_s17 = smov [#allocation35]   ;;  %s333_s27 = sshll.u32 %s4961_s4, 4  ;;  %s334_s27 = int_to_ptr.hbm [resolvable:$true] %s333_s27 }
 0x11c   :  { %s322_s1 = sshll.u32 %s4816_s17, 4  ;;  %s4692_s25 = sshra.s32 %s5091_s5, 4  ;;  %s323_s1 = int_to_ptr.vmem [resolvable:$true] %s322_s1  ;;  %s4693_s25 = int_to_ptr.hbm [resolvable:$true] %s4692_s25 }
 0x11d   :  { %s4694_s24 = scalar_lea.hbm %s4693_s25, 16  ;;  %s4696_s0 = scalar_lea.hbm %s6193_s11, 16 }
 0x11e   :  { %p4695_p11 = scmp.ne.s32.totalorder %s4693_s25, %s4694_s24  ;;  %p4697_p12 = scmp.lt.s32.totalorder %s4693_s25, %s6193_s11 }
 0x11f   :  { %p4698_p13 = scmp.lt.s32.totalorder %s4696_s0, %s4694_s24 }
 0x121   :  { %p4699_p0 = por %p4698_p13, %p4697_p12 }
 0x123   :  { %p4700_p1 = pnand %p4699_p0, %p4695_p11 }
 0x125   :  { %4703 = shalt.err (!%p4700_p1)
}
 0x126   :  { %328 = dma.hbm_to_vmem [thread:$0]  %s5091_s5, 256, %s323_s1, [#allocation34], %s4799_s26, %s4799_s26, %s4800_s21  }
 0x127   :  { %s4817_s23 = smov [#allocation36]   ;;  %s4716_s15 = sshra.s32 %s334_s27, 4  ;;  %s4717_s15 = int_to_ptr.hbm [resolvable:$true] %s4716_s15 }
 0x128   :  { %s335_s29 = sshll.u32 %s4817_s23, 4  ;;  %s4718_s30 = scalar_lea.hbm %s4717_s15, 16  ;;  %s336_s29 = int_to_ptr.vmem [resolvable:$true] %s335_s29 }
 0x129   :  { %p4719_p2 = scmp.ne.s32.totalorder %s4717_s15, %s4718_s30  ;;  %s4720_s14 = scalar_lea.hbm %s4961_s4, 16 }
 0x12a   :  { %p4721_p3 = scmp.lt.s32.totalorder %s4717_s15, %s4961_s4  ;;  %p4722_p4 = scmp.lt.s32.totalorder %s4720_s14, %s4718_s30 }
 0x12c   :  { %p4723_p5 = por %p4722_p4, %p4721_p3 }
 0x12e   :  { %p4724_p6 = pnand %p4723_p5, %p4719_p2 }
 0x130   :  { %4727 = shalt.err (!%p4724_p6)
}
 0x131   :  { %341 = dma.hbm_to_vmem [thread:$0]  %s334_s27, 256, %s336_s29, [#allocation37], %s4799_s26, %s4799_s26, %s4800_s21  }
 0x132   :  { %4740 = dma.done.wait [#allocation7], 16  }
 0x133   :  { %4741 = vsyncadd [#allocation7], 4294967280 }
 0x134   :  { %4742 = dma.done.wait [#allocation6], 512  }
 0x135   :  { %4743 = vsyncadd [#allocation6], 4294966784 }
 0x136   :  { %4744 = dma.done.wait [#allocation10], 64  }
 0x137   :  { %4745 = vsyncadd [#allocation10], 4294967232 }
 0x138   :  { %4746 = dma.done.wait [#allocation13], 2048  }
 0x139   :  { %4747 = vsyncadd [#allocation13], 4294965248 }
 0x13a   :  { %4748 = dma.done.wait [#allocation16], 288  }
 0x13b   :  { %4749 = vsyncadd [#allocation16], 4294967008 }
 0x13c   :  { %4750 = dma.done.wait [#allocation19], 512  }
 0x13d   :  { %4751 = vsyncadd [#allocation19], 4294966784 }
 0x13e   :  { %4752 = dma.done.wait [#allocation22], 32  }
 0x13f   :  { %4753 = vsyncadd [#allocation22], 4294967264 }
 0x140   :  { %4754 = dma.done.wait [#allocation25], 512  }
 0x141   :  { %4755 = vsyncadd [#allocation25], 4294966784 }
 0x142   :  { %4756 = dma.done.wait [#allocation28], 32  }
 0x143   :  { %4757 = vsyncadd [#allocation28], 4294967264 }
 0x144   :  { %4758 = dma.done.wait [#allocation31], 512  }
 0x145   :  { %4759 = vsyncadd [#allocation31], 4294966784 }
 0x146   :  { %4760 = dma.done.wait [#allocation34], 272  }
 0x147   :  { %4761 = vsyncadd [#allocation34], 4294967024 }
 0x148   :  { %4762 = dma.done.wait [#allocation37], 256  }
 0x149   :  { %4763 = vsyncadd [#allocation37], 4294967040 }
 0x14a   :  { %428 = sfence }
 0x14b   :  { %s6194_s4 = sld [smem:[#allocation51_spill]]  ;;  %v3617_v2 = vld [vmem:[#allocation8 + $0x10] sm:$0xf]  ;;  %v3966_v4 = vld [vmem:[#allocation8 + $0x14] sm:$0xf0]  ;;  %vm434_vm0 = vcmask 253952  }
 0x14c   :  { %s6195_s21 = sld [smem:[#allocation52_spill]]  ;;  %v3618_v7 = vor.u32 %v3966_v4, %v3617_v2  ;;  %v3609_v8 = vld [vmem:[#allocation8] sm:$0xf]  ;;  %v3964_v9 = vld [vmem:[#allocation8 + $0x4] sm:$0xf0]  ;;  %vm6174_vm1 = vcmask 261120  }
 0x14d   :  { %s5117_s12 = sld [smem:[#allocation5]]  ;;  %v3610_v12 = vor.u32 %v3964_v9, %v3609_v8  ;;  %v3965_v17 = vld [vmem:[#allocation8 + $0x14] sm:$0xf]  ;;  %v3619_v19 = vld [vmem:[#allocation8 + $0x18] sm:$0xf0]  ;;  %v4818_v58 = vmov 0  }
 0x14e   :  { %s5119_s19 = sld [smem:[#allocation5 + $0x1]]  ;;  %556 = vmatpush.bf16.msra.mxu2 %v3618_v7  ;;  %v3622_v21 = vor.u32 %v3965_v17, %v3619_v19  ;;  %v3963_v26 = vld [vmem:[#allocation8 + $0x4] sm:$0xf]  ;;  %v3611_v29 = vld [vmem:[#allocation8 + $0x8] sm:$0xf0]  ;;  %vm638_vm2 = vcmask 523264  }
 0x14f   :  { %s5122_s10 = sld [smem:[#allocation5 + $0x2]]  ;;  %v3614_v31 = vor.u32 %v3963_v26, %v3611_v29  ;;  %v470_v59 = vld [vmem:[#allocation9] sm:$0x3]  ;;  %vm689_vm3 = vcmask 516352   ;;  %vm903_vm4 = vcmask 257027   ;;  %vm905_vm5 = vcmask 519427  }
 0x150   :  { %s6196_s8 = sld [smem:[#allocation50_spill]]  ;;  %569 = vmatpush.bf16.msra.mxu3 %v3622_v21  ;;  %v473_v62 = vperm.slane %v470_v59, 1  ;;  %v472_v63 = vperm.slane %v470_v59, 0  ;;  %vm758_vm6 = vcmask 254977   ;;  %vm760_vm7 = vcmask 517377   ;;  %s4819_s0 = smov 32  }
 0x151   :  { %v3599_v0 = vld [vmem:[%s6194_s4 + $0x10] sm:$0xf]  ;;  %v3962_v1 = vld [vmem:[%s6194_s4 + $0x14] sm:$0xf0]  ;;  %v3591_v5 = vld [vmem:[%s6194_s4] sm:$0xf] }
 0x152   :  { %v3600_v3 = vor.u32 %v3962_v1, %v3599_v0  ;;  %v3960_v6 = vld [vmem:[%s6194_s4 + $0x4] sm:$0xf0]  ;;  %v3961_v11 = vld [vmem:[%s6194_s4 + $0x14] sm:$0xf]  ;;  %v3601_v13 = vld [vmem:[%s6194_s4 + $0x18] sm:$0xf0]  ;;  %557 = vmatpush.bf16.msra.mxu2 %v3610_v12 }
 0x153   :  { %v3592_v10 = vor.u32 %v3960_v6, %v3591_v5  ;;  %v3651_v14 = vld [vmem:[%s6195_s21 + $0x30] sm:$0xf]  ;;  %s5126_s2 = sld [smem:[#allocation5 + $0x3]]  ;;  %v3604_v15 = vor.u32 %v3961_v11, %v3601_v13  ;;  %v3974_v16 = vld [vmem:[%s6195_s21 + $0x34] sm:$0xf0]  ;;  %vm1105_vm8 = vcmask 260102  }
 0x154   :  { %506 = vmatpush.bf16.msra.mxu0 %v3600_v3  ;;  %s5129_s7 = sld [smem:[#allocation5 + $0x4]]  ;;  %v5131_v18 = vor.u32 %v3974_v16, %v3651_v14  ;;  %v3959_v20 = vld [vmem:[%s6194_s4 + $0x4] sm:$0xf]  ;;  %v3593_v22 = vld [vmem:[%s6194_s4 + $0x8] sm:$0xf0]  ;;  %570 = vmatpush.bf16.msra.mxu3 %v3614_v31  ;;  %vm1107_vm9 = vcmask 522502  }
 0x155   :  { %s5134_s16 = sld [smem:[#allocation5 + $0x5]]  ;;  %519 = vmatpush.bf16.msra.mxu1 %v3604_v15  ;;  %v3643_v23 = vld [vmem:[%s6195_s21 + $0x20] sm:$0xf]  ;;  %v3596_v24 = vor.u32 %v3959_v20, %v3593_v22  ;;  %v3972_v25 = vld [vmem:[%s6195_s21 + $0x24] sm:$0xf0]  ;;  %vm971_vm10 = vcmask 258052  }
 0x156   :  { %s432_s11 = scalar_lea.vmem %s6196_s8, %s5117_s12  ;;  %s5140_s5 = sld [smem:[#allocation5 + $0x6]]  ;;  %v5148_v28 = vor.u32 %v3972_v25, %v3643_v23  ;;  %708 = vmatpush.bf16.msrb.mxu2 %v5131_v18  ;;  %v3973_v32 = vld [vmem:[%s6195_s21 + $0x34] sm:$0xf]  ;;  %v3653_v34 = vld [vmem:[%s6195_s21 + $0x38] sm:$0xf0]  ;;  %vm973_vm11 = vcmask 520452  }
 0x157   :  { %v433_v27 = vld [vmem:[%s432_s11] sm:$0x1]  ;;  %s437_s6 = scalar_lea.vmem %s6196_s8, %s5119_s19  ;;  %s5146_s18 = sld [smem:[#allocation5 + $0x7]]  ;;  %v5163_v36 = vor.u32 %v3973_v32, %v3653_v34  ;;  %v3635_v37 = vld [vmem:[%s6195_s21 + $0x10] sm:$0xf]  ;;  %vm831_vm12 = vcmask 256002  }
 0x158   :  { %507 = vmatpush.bf16.msra.mxu0 %v3592_v10  ;;  %435 = vst.msk [vmem:[#allocation2] sm:$0x1] %vm434_vm0, %v433_v27  ;;  %v438_v30 = vld [vmem:[%s437_s6] sm:$0x1]  ;;  %s441_s28 = scalar_lea.vmem %s6196_s8, %s5122_s10  ;;  %v3970_v39 = vld [vmem:[%s6195_s21 + $0x14] sm:$0xf0] }
 0x159   :  { %439 = vst.msk [vmem:[#allocation2 + $0x1] sm:$0x1] %vm434_vm0, %v438_v30  ;;  %v442_v33 = vld [vmem:[%s441_s28] sm:$0x1]  ;;  %s445_s3 = scalar_lea.vmem %s6196_s8, %s5126_s2  ;;  %520 = vmatpush.bf16.msra.mxu1 %v3596_v24  ;;  %v5175_v41 = vor.u32 %v3970_v39, %v3635_v37  ;;  %v3971_v42 = vld [vmem:[%s6195_s21 + $0x24] sm:$0xf]  ;;  %721 = vmatpush.bf16.msrb.mxu3 %v5163_v36 }
 0x15a   :  { %443 = vst.msk [vmem:[#allocation2 + $0x2] sm:$0x1] %vm434_vm0, %v442_v33  ;;  %v446_v35 = vld [vmem:[%s445_s3] sm:$0x1]  ;;  %s449_s22 = scalar_lea.vmem %s6196_s8, %s5129_s7  ;;  %709 = vmatpush.bf16.msrb.mxu2 %v5148_v28  ;;  %v3645_v44 = vld [vmem:[%s6195_s21 + $0x28] sm:$0xf0] }
 0x15b   :  { %447 = vst.msk [vmem:[#allocation2 + $0x3] sm:$0x1] %vm434_vm0, %v446_v35  ;;  %v450_v38 = vld [vmem:[%s449_s22] sm:$0x1]  ;;  %s453_s17 = scalar_lea.vmem %s6196_s8, %s5134_s16  ;;  %v5185_v46 = vor.u32 %v3971_v42, %v3645_v44  ;;  %v3968_v48 = vld [vmem:[%s6195_s21 + $0x4] sm:$0xf0] }
 0x15c   :  { %646 = vmatpush.bf16.msrb.mxu0 %v5131_v18  ;;  %451 = vst.msk [vmem:[#allocation2 + $0x4] sm:$0x1] %vm434_vm0, %v450_v38  ;;  %v454_v40 = vld [vmem:[%s453_s17] sm:$0x1]  ;;  %s457_s1 = scalar_lea.vmem %s6196_s8, %s5140_s5  ;;  %v3969_v50 = vld [vmem:[%s6195_s21 + $0x14] sm:$0xf] }
 0x15d   :  { %659 = vmatpush.bf16.msrb.mxu1 %v5163_v36  ;;  %455 = vst.msk [vmem:[#allocation2 + $0x5] sm:$0x1] %vm434_vm0, %v454_v40  ;;  %v458_v43 = vld [vmem:[%s457_s1] sm:$0x1]  ;;  %s461_s27 = scalar_lea.vmem %s6196_s8, %s5146_s18  ;;  %v3637_v51 = vld [vmem:[%s6195_s21 + $0x18] sm:$0xf0]  ;;  %722 = vmatpush.bf16.msrb.mxu3 %v5185_v46 }
 0x15e   :  { %459 = vst.msk [vmem:[#allocation2 + $0x6] sm:$0x1] %vm434_vm0, %v458_v43  ;;  %v462_v45 = vld [vmem:[%s461_s27] sm:$0x1]  ;;  %710 = vmatpush.bf16.msrb.mxu2 %v5175_v41  ;;  %v5197_v52 = vor.u32 %v3969_v50, %v3637_v51  ;;  %v3967_v53 = vld [vmem:[%s6195_s21 + $0x4] sm:$0xf] }
 0x15f   :  { %v3627_v47 = vld [vmem:[%s6195_s21] sm:$0xf]  ;;  %463 = vst.msk [vmem:[#allocation2 + $0x7] sm:$0x1] %vm434_vm0, %v462_v45  ;;  %v3629_v54 = vld [vmem:[%s6195_s21 + $0x8] sm:$0xf0] }
 0x160   :  { %647 = vmatpush.bf16.msrb.mxu0 %v5148_v28  ;;  %v5192_v49 = vor.u32 %v3968_v48, %v3627_v47  ;;  %v5204_v55 = vor.u32 %v3967_v53, %v3629_v54  ;;  %v584_v15 = vld [vmem:[#allocation11] sm:$0x3]  ;;  %s6197_s25 = sld [smem:[#allocation53_spill]]  ;;  %vm833_vm13 = vcmask 518402   ;;  %vm1037_vm14 = vcmask 259077   ;;  %s4820_s23 = smov 96  }
 0x161   :  { %660 = vmatpush.bf16.msrb.mxu1 %v5185_v46  ;;  %723 = vmatpush.bf16.msrb.mxu3 %v5197_v52  ;;  %v5251_v21 = vperm.slane %v584_v15, 0  ;;  %v5257_v33 = vperm.slane %v584_v15, 1  ;;  %vm6175_vm15 = vcmask 521477   ;;  %s6198_s24 = sld [smem:[#allocation54_spill]] }
 0x162   :  { %711 = vmatpush.bf16.msrb.mxu2 %v5192_v49  ;;  %s6202_s29 = sld [smem:[#allocation55_spill]] }
 0x164   :  { %648 = vmatpush.bf16.msrb.mxu0 %v5175_v41 }
 0x165   :  { %661 = vmatpush.bf16.msrb.mxu1 %v5197_v52  ;;  %724 = vmatpush.bf16.msrb.mxu3 %v5204_v55 }
 0x166   :  { %v464_v56 = vld [vmem:[#allocation2] sm:$0xff] }
 0x167   :  { %v465_v57 = vpack.c.bf16 %v464_v56, %v464_v56 }
 0x168   :  { %649 = vmatpush.bf16.msrb.mxu0 %v5192_v49 }
 0x169   :  { %662 = vmatpush.bf16.msrb.mxu1 %v5204_v55  ;;  %3605 = vmatmul.msk.bf16.vlgmr.msra.gmra.mxu0 %vm6174_vm1, %v465_v57 }
 0x16a   :  { %3623 = vmatmul.msk.bf16.vlgmr.msra.gmra.mxu2 %vm6174_vm1, %v465_v57  ;;  %3606 = vmatmul.msk.bf16.vlgmr.msra.gmra.mxu1 %vm6174_vm1, %v465_v57 }
 0x16b   :  { %3624 = vmatmul.msk.bf16.vlgmr.msra.gmra.mxu3 %vm6174_vm1, %v465_v57  ;;  %853 = vmatpush.bf16.msra.mxu2 %v5131_v18  ;;  %vm1171_vm1 = vcmask 261127  }
 0x16c   :  { %781 = vmatpush.bf16.msra.mxu0 %v5131_v18  ;;  %866 = vmatpush.bf16.msra.mxu3 %v5163_v36 }
 0x16d   :  { %794 = vmatpush.bf16.msra.mxu1 %v5163_v36 }
 0x16f   :  { %854 = vmatpush.bf16.msra.mxu2 %v5148_v28 }
 0x170   :  { %782 = vmatpush.bf16.msra.mxu0 %v5148_v28  ;;  %867 = vmatpush.bf16.msra.mxu3 %v5185_v46 }
 0x171   :  { %795 = vmatpush.bf16.msra.mxu1 %v5185_v46 }
 0x173   :  { %855 = vmatpush.bf16.msra.mxu2 %v5175_v41 }
 0x174   :  { %783 = vmatpush.bf16.msra.mxu0 %v5175_v41  ;;  %868 = vmatpush.bf16.msra.mxu3 %v5197_v52 }
 0x175   :  { %796 = vmatpush.bf16.msra.mxu1 %v5197_v52 }
 0x177   :  { %856 = vmatpush.bf16.msra.mxu2 %v5192_v49 }
 0x178   :  { %784 = vmatpush.bf16.msra.mxu0 %v5192_v49  ;;  %869 = vmatpush.bf16.msra.mxu3 %v5204_v55 }
 0x179   :  { %797 = vmatpush.bf16.msra.mxu1 %v5204_v55  ;;  %650 = vmatmul.bf16.vlgmr.msrb.gmra.mxu0 %v4818_v58 }
 0x17a   :  { %663 = vmatmul.bf16.vlgmr.msrb.gmra.mxu1 %v4818_v58 }
 0x17c   :  { %921 = vmatpush.bf16.msrb.mxu0 %v5131_v18 }
 0x17d   :  { %934 = vmatpush.bf16.msrb.mxu1 %v5163_v36 }
 0x180   :  { %922 = vmatpush.bf16.msrb.mxu0 %v5148_v28 }
 0x181   :  { %935 = vmatpush.bf16.msrb.mxu1 %v5185_v46 }
 0x184   :  { %923 = vmatpush.bf16.msrb.mxu0 %v5175_v41 }
 0x185   :  { %936 = vmatpush.bf16.msrb.mxu1 %v5197_v52 }
 0x188   :  { %924 = vmatpush.bf16.msrb.mxu0 %v5192_v49 }
 0x189   :  { %937 = vmatpush.bf16.msrb.mxu1 %v5204_v55 }
 0x1e6   :  { %v509_v60 = vpop.f32.mrf.mxu0 }
 0x1e7   :  { %v522_v61 = vpop.f32.mrf.mxu1  ;;  %v510_v2 = vadd.f32 %v509_v60, %v472_v63 }
 0x1e8   :  { %v523_v1 = vadd.f32 %v522_v61, %v473_v62 }
 0x1ed   :  { %v559_v0 = vpop.f32.mrf.mxu2 }
 0x1ee   :  { %v691_v3 = vrot.slane %v559_v0, 5  ;;  %v762_v4 = vrot.slane %v559_v0, 3  ;;  %v835_v5 = vrot.slane %v559_v0, 1  ;;  %v572_v6 = vpop.f32.mrf.mxu3  ;;  %v511_v7 = vpop.f32.mrf.mxu0  ;;  %v587_v20 = vrot.slane %v559_v0, 7 }
 0x1ef   :  { %v836_v8 = vrot.slane %v572_v6, 1  ;;  %v692_v9 = vrot.slane %v572_v6, 5  ;;  %v763_v10 = vrot.slane %v572_v6, 3  ;;  %v524_v11 = vpop.f32.mrf.mxu1  ;;  %v588_v38 = vrot.slane %v572_v6, 7 }
 0x1f0   :  { %v5239_v12 = vadd.f32 %v691_v3, %v510_v2  ;;  %v5241_v13 = vadd.f32 %v762_v4, %v510_v2  ;;  %v5243_v14 = vadd.f32 %v835_v5, %v510_v2  ;;  %v5253_v25 = vadd.f32 %v587_v20, %v510_v2 }
 0x1f1   :  { %v5245_v16 = vadd.f32 %v692_v9, %v523_v1  ;;  %v5247_v17 = vadd.f32 %v763_v10, %v523_v1  ;;  %v5249_v19 = vadd.f32 %v836_v8, %v523_v1  ;;  %v5260_v42 = vadd.f32 %v588_v38, %v523_v1 }
 0x1f5   :  { %v561_v22 = vpop.f32.mrf.mxu2 }
 0x1f6   :  { %v574_v23 = vpop.f32.mrf.mxu3  ;;  %v651_v24 = vpop.f32.mrf.mxu0 }
 0x1f7   :  { %v652_v26 = vadd.f32 %v651_v24, %v5251_v21  ;;  %v664_v27 = vpop.f32.mrf.mxu1 }
 0x1f8   :  { %v665_v37 = vadd.f32 %v664_v27, %v5257_v33 }
 0x1f9   :  { %v668_v29 = vadd.f32 %v652_v26, %v5253_v25 }
 0x1fb   :  { %v669_v30 = vmul.f32 0.5, %v668_v29 }
 0x1fd   :  { %4084 = vtanh.f32 %v669_v30 }
 0x1fe   :  { %v653_v31 = vpop.f32.mrf.mxu0 }
 0x1ff   :  { %v666_v32 = vpop.f32.mrf.mxu1 }
 0x203   :  { %v4085_v34 = vpop.eup %4084 }
 0x204   :  { %v671_v35 = vadd.f32 1.0, %v4085_v34 }
 0x206   :  { %v672_v39 = vmul.f32 0.5, %v671_v35 }
 0x208   :  { %v673_v40 = vmul.f32 %v672_v39, %v665_v37  ;;  %v676_v45 = vsub.f32 1.0, %v672_v39  ;;  %v682_v48 = vmul.f32 0.0, %v672_v39 }
 0x20a   :  { %v674_v43 = vadd.f32 %v673_v40, %v5260_v42 }
 0x20c   :  { %4086 = vtanh.f32 %v674_v43 }
 0x212   :  { %v4087_v44 = vpop.eup %4086 }
 0x213   :  { %678 = vrot.lane.b32.xlu0 %v4087_v44, %s4799_s26 }
 0x285   :  { %v679_v47 = vpop.permute.xlu0 %678 }
 0x286   :  { %v681_v50 = vmul.f32 %v679_v47, %v676_v45 }
 0x288   :  { %v5264_v51 = vadd.f32 %v682_v48, %v681_v50 }
 0x28a   :  { %v697_v53 = vpack.c.bf16 %v5264_v51, %v5264_v51  ;;  %v750_v10 = vrot.slane %v5264_v51, 7 }
 0x28c   :  { %699 = vrot.lane.b32.xlu0 %v697_v53, %s4799_s26 }
 0x2fe   :  { %v700_v54 = vpop.permute.xlu0 %699 }
 0x2ff   :  { %3657 = vmatmul.msk.bf16.vlgmr.msrb.gmra.mxu2 %vm638_vm2, %v700_v54  ;;  %3658 = vmatmul.msk.bf16.vlgmr.msrb.gmra.mxu3 %vm638_vm2, %v700_v54 }
 0x300   :  { %987 = vmatpush.bf16.msrb.mxu2 %v5131_v18  ;;  %1000 = vmatpush.bf16.msrb.mxu3 %v5163_v36 }
 0x304   :  { %988 = vmatpush.bf16.msrb.mxu2 %v5148_v28  ;;  %1001 = vmatpush.bf16.msrb.mxu3 %v5185_v46 }
 0x308   :  { %989 = vmatpush.bf16.msrb.mxu2 %v5175_v41  ;;  %1002 = vmatpush.bf16.msrb.mxu3 %v5197_v52 }
 0x30c   :  { %990 = vmatpush.bf16.msrb.mxu2 %v5192_v49  ;;  %1003 = vmatpush.bf16.msrb.mxu3 %v5204_v55 }
 0x382   :  { %v713_v56 = vpop.f32.mrf.mxu2  ;;  %v726_v57 = vpop.f32.mrf.mxu3 }
 0x383   :  { %v714_v59 = vadd.f32 %v713_v56, %v5251_v21  ;;  %v727_v1 = vadd.f32 %v726_v57, %v5257_v33 }
 0x385   :  { %v731_v60 = vrot.slane %v714_v59, 7  ;;  %v739_v5 = vrot.slane %v727_v1, 7 }
 0x387   :  { %v733_v61 = vadd.f32 %v731_v60, %v5239_v12 }
 0x389   :  { %v734_v62 = vmul.f32 0.5, %v733_v61 }
 0x38a   :  { %v715_v63 = vpop.f32.mrf.mxu2  ;;  %v728_v0 = vpop.f32.mrf.mxu3 }
 0x38b   :  { %4088 = vtanh.f32 %v734_v62 }
 0x391   :  { %v4089_v2 = vpop.eup %4088 }
 0x392   :  { %v736_v3 = vadd.f32 1.0, %v4089_v2 }
 0x394   :  { %v737_v4 = vmul.f32 0.5, %v736_v3 }
 0x396   :  { %v741_v6 = vmul.f32 %v739_v5, %v737_v4  ;;  %v744_v9 = vsub.f32 1.0, %v737_v4  ;;  %v752_v15 = vmul.f32 %v750_v10, %v737_v4 }
 0x398   :  { %v742_v7 = vadd.f32 %v741_v6, %v5245_v16 }
 0x39a   :  { %4090 = vtanh.f32 %v742_v7 }
 0x3a0   :  { %v4091_v8 = vpop.eup %4090 }
 0x3a1   :  { %746 = vrot.lane.b32.xlu1 %v4091_v8, %s4799_s26 }
 0x413   :  { %v747_v11 = vpop.permute.xlu1 %746 }
 0x414   :  { %v749_v20 = vmul.f32 %v747_v11, %v744_v9 }
 0x416   :  { %v5285_v22 = vadd.f32 %v752_v15, %v749_v20 }
 0x418   :  { %v768_v23 = vpack.c.bf16 %v5285_v22, %v5285_v22  ;;  %v823_v53 = vrot.slane %v5285_v22, 7 }
 0x41a   :  { %v770_v24 = vshrl.u32 %v768_v23, 16 }
 0x41c   :  { %772 = vrot.lane.b32.xlu1 %v770_v24, %s4799_s26 }
 0x48e   :  { %v773_v26 = vpop.permute.xlu1 %772 }
 0x48f   :  { %3659 = vmatmul.msk.bf16.vlgmr.msra.gmra.mxu0 %vm638_vm2, %v773_v26  ;;  %3660 = vmatmul.msk.bf16.vlgmr.msra.gmra.mxu1 %vm638_vm2, %v773_v26 }
 0x490   :  { %1055 = vmatpush.bf16.msra.mxu0 %v5131_v18  ;;  %1068 = vmatpush.bf16.msra.mxu1 %v5163_v36 }
 0x494   :  { %1056 = vmatpush.bf16.msra.mxu0 %v5148_v28  ;;  %1069 = vmatpush.bf16.msra.mxu1 %v5185_v46 }
 0x498   :  { %1057 = vmatpush.bf16.msra.mxu0 %v5175_v41  ;;  %1070 = vmatpush.bf16.msra.mxu1 %v5197_v52 }
 0x49c   :  { %1058 = vmatpush.bf16.msra.mxu0 %v5192_v49  ;;  %1071 = vmatpush.bf16.msra.mxu1 %v5204_v55 }
 0x50c   :  { %v786_v27 = vpop.f32.mrf.mxu0  ;;  %v799_v29 = vpop.f32.mrf.mxu1 }
 0x50d   :  { %v787_v30 = vadd.f32 %v786_v27, %v5251_v21  ;;  %v800_v38 = vadd.f32 %v799_v29, %v5257_v33 }
 0x50f   :  { %v804_v31 = vrot.slane %v787_v30, 6  ;;  %v812_v44 = vrot.slane %v800_v38, 6 }
 0x511   :  { %v806_v32 = vadd.f32 %v804_v31, %v5241_v13 }
 0x513   :  { %v807_v34 = vmul.f32 0.5, %v806_v32 }
 0x514   :  { %v788_v35 = vpop.f32.mrf.mxu0  ;;  %v801_v37 = vpop.f32.mrf.mxu1 }
 0x515   :  { %4092 = vtanh.f32 %v807_v34 }
 0x51b   :  { %v4093_v39 = vpop.eup %4092 }
 0x51c   :  { %v809_v40 = vadd.f32 1.0, %v4093_v39 }
 0x51e   :  { %v810_v43 = vmul.f32 0.5, %v809_v40 }
 0x520   :  { %v814_v45 = vmul.f32 %v812_v44, %v810_v43  ;;  %v817_v50 = vsub.f32 1.0, %v810_v43  ;;  %v825_v56 = vmul.f32 %v823_v53, %v810_v43 }
 0x522   :  { %v815_v47 = vadd.f32 %v814_v45, %v5247_v17 }
 0x524   :  { %4094 = vtanh.f32 %v815_v47 }
 0x52a   :  { %v4095_v48 = vpop.eup %4094 }
 0x52b   :  { %819 = vrot.lane.b32.xlu2 %v4095_v48, %s4799_s26 }
 0x585   :  { %v820_v54 = vpop.permute.xlu2 %819 }
 0x586   :  { %v822_v57 = vmul.f32 %v820_v54, %v817_v50 }
 0x588   :  { %v5306_v59 = vadd.f32 %v825_v56, %v822_v57 }
 0x58a   :  { %v841_v60 = vpack.c.bf16 %v5306_v59, %v5306_v59  ;;  %v895_v8 = vrot.slane %v5306_v59, 7 }
 0x58c   :  { %v843_v61 = vrot.slane %v841_v60, 1 }
 0x58e   :  { %844 = vrot.lane.b32.xlu2 %v843_v61, %s4799_s26 }
 0x5e8   :  { %v845_v62 = vpop.permute.xlu2 %844 }
 0x5e9   :  { %3661 = vmatmul.msk.bf16.vlgmr.msra.gmra.mxu2 %vm638_vm2, %v845_v62  ;;  %3662 = vmatmul.msk.bf16.vlgmr.msra.gmra.mxu3 %vm638_vm2, %v845_v62 }
 0x5ea   :  { %1121 = vmatpush.bf16.msra.mxu2 %v5131_v18  ;;  %1134 = vmatpush.bf16.msra.mxu3 %v5163_v36 }
 0x5ee   :  { %1122 = vmatpush.bf16.msra.mxu2 %v5148_v28  ;;  %1135 = vmatpush.bf16.msra.mxu3 %v5185_v46 }
 0x5f2   :  { %1123 = vmatpush.bf16.msra.mxu2 %v5175_v41  ;;  %1136 = vmatpush.bf16.msra.mxu3 %v5197_v52 }
 0x5f6   :  { %1124 = vmatpush.bf16.msra.mxu2 %v5192_v49  ;;  %1137 = vmatpush.bf16.msra.mxu3 %v5204_v55 }
 0x66c   :  { %v858_v63 = vpop.f32.mrf.mxu2  ;;  %v871_v0 = vpop.f32.mrf.mxu3 }
 0x66d   :  { %v859_v1 = vadd.f32 %v858_v63, %v5251_v21  ;;  %v872_v46 = vadd.f32 %v871_v0, %v5257_v33 }
 0x66f   :  { %v876_v2 = vrot.slane %v859_v1, 5  ;;  %v884_v5 = vrot.slane %v872_v46, 5 }
 0x671   :  { %v878_v18 = vadd.f32 %v876_v2, %v5243_v14 }
 0x673   :  { %v879_v36 = vmul.f32 0.5, %v878_v18 }
 0x674   :  { %v860_v3 = vpop.f32.mrf.mxu2  ;;  %v873_v28 = vpop.f32.mrf.mxu3 }
 0x675   :  { %4096 = vtanh.f32 %v879_v36 }
 0x67b   :  { %v4097_v41 = vpop.eup %4096 }
 0x67c   :  { %v881_v4 = vadd.f32 1.0, %v4097_v41 }
 0x67e   :  { %v882_v52 = vmul.f32 0.5, %v881_v4 }
 0x680   :  { %v886_v49 = vmul.f32 %v884_v5, %v882_v52  ;;  %v889_v7 = vsub.f32 1.0, %v882_v52  ;;  %v897_v10 = vmul.f32 %v895_v8, %v882_v52 }
 0x682   :  { %v887_v55 = vadd.f32 %v886_v49, %v5249_v19 }
 0x684   :  { %4098 = vtanh.f32 %v887_v55 }
 0x68a   :  { %v4099_v6 = vpop.eup %4098 }
 0x68b   :  { %891 = vrot.lane.b32.xlu0 %v4099_v6, %s4799_s26 }
 0x6fd   :  { %v892_v9 = vpop.permute.xlu0 %891 }
 0x6fe   :  { %v894_v11 = vmul.f32 %v892_v9, %v889_v7 }
 0x700   :  { %v5327_v15 = vadd.f32 %v897_v10, %v894_v11 }
 0x702   :  { %v907_v20 = vpack.c.bf16 %v5327_v15, %v5327_v15 }
 0x704   :  { %v909_v23 = vshrl.u32 %v907_v20, 16 }
 0x706   :  { %v911_v24 = vrot.slane %v909_v23, 1 }
 0x708   :  { %912 = vrot.lane.b32.xlu1 %v911_v24, %s4799_s26 }
 0x77a   :  { %v913_v26 = vpop.permute.xlu1 %912 }
 0x77b   :  { %3663 = vmatmul.msk.bf16.vlgmr.msrb.gmra.mxu0 %vm638_vm2, %v913_v26  ;;  %3664 = vmatmul.msk.bf16.vlgmr.msrb.gmra.mxu1 %vm638_vm2, %v913_v26 }
 0x7f8   :  { %v926_v27 = vpop.f32.mrf.mxu0  ;;  %v939_v29 = vpop.f32.mrf.mxu1 }
 0x7f9   :  { %v927_v30 = vadd.f32 %v926_v27, %v5251_v21  ;;  %v940_v38 = vadd.f32 %v939_v29, %v5257_v33 }
 0x7fb   :  { %v944_v31 = vrot.slane %v927_v30, 4  ;;  %v952_v44 = vrot.slane %v940_v38, 4 }
 0x7fd   :  { %v946_v32 = vadd.f32 %v944_v31, %v5253_v25  ;;  %v963_v25 = vrot.slane %v5327_v15, 7 }
 0x7ff   :  { %v947_v34 = vmul.f32 0.5, %v946_v32 }
 0x800   :  { %v928_v35 = vpop.f32.mrf.mxu0  ;;  %v941_v37 = vpop.f32.mrf.mxu1 }
 0x801   :  { %4100 = vtanh.f32 %v947_v34 }
 0x807   :  { %v4101_v39 = vpop.eup %4100 }
 0x808   :  { %v949_v40 = vadd.f32 1.0, %v4101_v39 }
 0x80a   :  { %v950_v43 = vmul.f32 0.5, %v949_v40 }
 0x80c   :  { %v954_v45 = vmul.f32 %v952_v44, %v950_v43  ;;  %v957_v50 = vsub.f32 1.0, %v950_v43  ;;  %v965_v54 = vmul.f32 %v963_v25, %v950_v43 }
 0x80e   :  { %v955_v47 = vadd.f32 %v954_v45, %v5260_v42 }
 0x810   :  { %4102 = vtanh.f32 %v955_v47 }
 0x816   :  { %v4103_v48 = vpop.eup %4102 }
 0x817   :  { %959 = vrot.lane.b32.xlu2 %v4103_v48, %s4799_s26 }
 0x871   :  { %v960_v53 = vpop.permute.xlu2 %959 }
 0x872   :  { %v962_v56 = vmul.f32 %v960_v53, %v957_v50 }
 0x874   :  { %v5340_v57 = vadd.f32 %v965_v54, %v962_v56 }
 0x876   :  { %v975_v60 = vpack.c.bf16 %v5340_v57, %v5340_v57 }
 0x878   :  { %v977_v61 = vrot.slane %v975_v60, 2 }
 0x87a   :  { %978 = vrot.lane.b32.xlu0 %v977_v61, %s4799_s26 }
 0x8ec   :  { %v979_v62 = vpop.permute.xlu0 %978 }
 0x8ed   :  { %3665 = vmatmul.msk.bf16.vlgmr.msrb.gmra.mxu2 %vm638_vm2, %v979_v62  ;;  %3666 = vmatmul.msk.bf16.vlgmr.msrb.gmra.mxu3 %vm638_vm2, %v979_v62 }
 0x970   :  { %v992_v42 = vpop.f32.mrf.mxu2  ;;  %v1005_v63 = vpop.f32.mrf.mxu3 }
 0x971   :  { %v993_v0 = vadd.f32 %v992_v42, %v5251_v21  ;;  %v1006_v28 = vadd.f32 %v1005_v63, %v5257_v33 }
 0x973   :  { %v1010_v1 = vrot.slane %v993_v0, 3  ;;  %v1018_v52 = vrot.slane %v1006_v28, 3 }
 0x975   :  { %v1012_v2 = vadd.f32 %v1010_v1, %v5239_v12  ;;  %v1029_v12 = vrot.slane %v5340_v57, 7 }
 0x977   :  { %v1013_v18 = vmul.f32 0.5, %v1012_v2 }
 0x978   :  { %v994_v36 = vpop.f32.mrf.mxu2  ;;  %v1007_v3 = vpop.f32.mrf.mxu3 }
 0x979   :  { %4104 = vtanh.f32 %v1013_v18 }
 0x97f   :  { %v4105_v46 = vpop.eup %4104 }
 0x980   :  { %v1015_v41 = vadd.f32 1.0, %v4105_v46 }
 0x982   :  { %v1016_v4 = vmul.f32 0.5, %v1015_v41 }
 0x984   :  { %v1020_v5 = vmul.f32 %v1018_v52, %v1016_v4  ;;  %v1023_v6 = vsub.f32 1.0, %v1016_v4  ;;  %v1031_v8 = vmul.f32 %v1029_v12, %v1016_v4  ;;  %v3699_v12 = vld [vmem:[%s6197_s25 + $0x38] sm:$0xf0] }
 0x986   :  { %v1021_v49 = vadd.f32 %v1020_v5, %v5245_v16 }
 0x988   :  { %4106 = vtanh.f32 %v1021_v49  ;;  %v3982_v49 = vld [vmem:[%s6197_s25 + $0x34] sm:$0xf0] }
 0x98e   :  { %v4107_v55 = vpop.eup %4106 }
 0x98f   :  { %1025 = vrot.lane.b32.xlu1 %v4107_v55, %s4799_s26  ;;  %v3981_v55 = vld [vmem:[%s6197_s25 + $0x34] sm:$0xf] }
 0xa01   :  { %v1026_v7 = vpop.permute.xlu1 %1025 }
 0xa02   :  { %v1028_v9 = vmul.f32 %v1026_v7, %v1023_v6  ;;  %v3990_v7 = vld [vmem:[#allocation12 + $0x34] sm:$0xf0] }
 0xa04   :  { %v5353_v10 = vadd.f32 %v1031_v8, %v1028_v9  ;;  %v3702_v8 = vor.u32 %v3981_v55, %v3699_v12  ;;  %v3995_v55 = vld [vmem:[#allocation14 + $0x24] sm:$0xf] }
 0xa06   :  { %v1041_v11 = vpack.c.bf16 %v5353_v10, %v5353_v10  ;;  %v1097_v47 = vrot.slane %v5353_v10, 7  ;;  %1251 = vmatpush.bf16.msrb.mxu1 %v3702_v8  ;;  %v3992_v8 = vld [vmem:[#allocation14 + $0x4] sm:$0xf0] }
 0xa08   :  { %v1043_v20 = vshrl.u32 %v1041_v11, 16  ;;  %v3989_v11 = vld [vmem:[#allocation12 + $0x34] sm:$0xf] }
 0xa0a   :  { %v1045_v23 = vrot.slane %v1043_v20, 2  ;;  %v3733_v20 = vld [vmem:[#allocation12 + $0x38] sm:$0xf0] }
 0xa0c   :  { %1046 = vrot.lane.b32.xlu2 %v1045_v23, %s4799_s26  ;;  %v3689_v23 = vld [vmem:[%s6197_s25 + $0x20] sm:$0xf] }
 0xa66   :  { %v1047_v16 = vpop.permute.xlu2 %1046 }
 0xa67   :  { %3667 = vmatmul.msk.bf16.vlgmr.msra.gmra.mxu0 %vm638_vm2, %v1047_v16  ;;  %3668 = vmatmul.msk.bf16.vlgmr.msra.gmra.mxu1 %vm638_vm2, %v1047_v16  ;;  %v3980_v16 = vld [vmem:[%s6197_s25 + $0x24] sm:$0xf0] }
 0xae4   :  { %v1060_v24 = vpop.f32.mrf.mxu0  ;;  %v1073_v26 = vpop.f32.mrf.mxu1 }
 0xae5   :  { %v1061_v27 = vadd.f32 %v1060_v24, %v5251_v21  ;;  %v1074_v35 = vadd.f32 %v1073_v26, %v5257_v33  ;;  %v3979_v24 = vld [vmem:[%s6197_s25 + $0x24] sm:$0xf]  ;;  %v3691_v26 = vld [vmem:[%s6197_s25 + $0x28] sm:$0xf0] }
 0xae7   :  { %v1078_v29 = vrot.slane %v1061_v27, 2  ;;  %v1086_v40 = vrot.slane %v1074_v35, 2  ;;  %v3694_v27 = vor.u32 %v3979_v24, %v3691_v26 }
 0xae9   :  { %v1080_v30 = vadd.f32 %v1078_v29, %v5241_v13  ;;  %v3723_v29 = vld [vmem:[#allocation12 + $0x20] sm:$0xf]  ;;  %1252 = vmatpush.bf16.msrb.mxu1 %v3694_v27 }
 0xaeb   :  { %v1081_v31 = vmul.f32 0.5, %v1080_v30  ;;  %v3988_v30 = vld [vmem:[#allocation12 + $0x24] sm:$0xf0] }
 0xaec   :  { %v1062_v32 = vpop.f32.mrf.mxu0  ;;  %v1075_v34 = vpop.f32.mrf.mxu1 }
 0xaed   :  { %4108 = vtanh.f32 %v1081_v31  ;;  %v3987_v31 = vld [vmem:[#allocation12 + $0x24] sm:$0xf]  ;;  %v3724_v32 = vor.u32 %v3988_v30, %v3723_v29  ;;  %v3725_v34 = vld [vmem:[#allocation12 + $0x28] sm:$0xf0] }
 0xaee   :  { %v3728_v35 = vor.u32 %v3987_v31, %v3725_v34  ;;  %v1185_v31 = vld [vmem:[%s6198_s24] sm:$0x3] }
 0xaf3   :  { %v4109_v37 = vpop.eup %4108 }
 0xaf4   :  { %v1083_v38 = vadd.f32 1.0, %v4109_v37 }
 0xaf6   :  { %v1084_v39 = vmul.f32 0.5, %v1083_v38 }
 0xaf8   :  { %v1088_v43 = vmul.f32 %v1086_v40, %v1084_v39  ;;  %v1091_v13 = vsub.f32 1.0, %v1084_v39  ;;  %v1099_v50 = vmul.f32 %v1097_v47, %v1084_v39  ;;  %v3977_v47 = vld [vmem:[%s6197_s25 + $0x14] sm:$0xf] }
 0xafa   :  { %v1089_v44 = vadd.f32 %v1088_v43, %v5247_v17 }
 0xafc   :  { %4110 = vtanh.f32 %v1089_v44 }
 0xb02   :  { %v4111_v45 = vpop.eup %4110 }
 0xb03   :  { %1093 = vrot.lane.b32.xlu0 %v4111_v45, %s4799_s26  ;;  %v3681_v45 = vld [vmem:[%s6197_s25 + $0x10] sm:$0xf] }
 0xb0b   :  { %685 = vrot.lane.b32.xlu0 %v5264_v51, %s4799_s26 }
 0xb13   :  { %900 = vrot.lane.b32.xlu0 %v5327_v15, %s4799_s26 }
 0xb75   :  { %v1094_v48 = vpop.permute.xlu0 %1093 }
 0xb76   :  { %v1096_v25 = vmul.f32 %v1094_v48, %v1091_v13  ;;  %v3978_v13 = vld [vmem:[%s6197_s25 + $0x14] sm:$0xf0] }
 0xb77   :  { %v3682_v48 = vor.u32 %v3978_v13, %v3681_v45 }
 0xb78   :  { %v1100_v53 = vadd.f32 %v1099_v50, %v1096_v25  ;;  %v3683_v50 = vld [vmem:[%s6197_s25 + $0x18] sm:$0xf0]  ;;  %v3715_v25 = vld [vmem:[#allocation12 + $0x10] sm:$0xf] }
 0xb7a   :  { %1102 = vrot.lane.b32.xlu0 %v1100_v53, %s4799_s26  ;;  %v1109_v17 = vpack.c.bf16 %v1100_v53, %v1100_v53  ;;  %v1163_v4 = vrot.slane %v1100_v53, 7  ;;  %v3986_v53 = vld [vmem:[#allocation12 + $0x14] sm:$0xf0] }
 0xb7c   :  { %v1111_v54 = vrot.slane %v1109_v17, 3  ;;  %v3686_v17 = vor.u32 %v3977_v47, %v3683_v50  ;;  %v1342_v50 = vld [vmem:[#allocation15] sm:$0x3] }
 0xb7d   :  { %v686_v56 = vpop.permute.xlu0 %685 }
 0xb7e   :  { %688 = vst.msk [vmem:[#allocation3] sm:$0x1] %vm434_vm0, %v686_v56  ;;  %1112 = vrot.lane.b32.xlu1 %v1111_v54, %s4799_s26  ;;  %v3716_v54 = vor.u32 %v3986_v53, %v3715_v25  ;;  %1253 = vmatpush.bf16.msrb.mxu1 %v3686_v17 }
 0xb7f   :  { %690 = vst.msk [vmem:[#allocation3 + $0x7] sm:$0x1] %vm689_vm3, %v686_v56  ;;  %v3985_v56 = vld [vmem:[#allocation12 + $0x14] sm:$0xf] }
 0xb85   :  { %v901_v51 = vpop.permute.xlu0 %900 }
 0xb86   :  { %904 = vst.msk [vmem:[#allocation3] sm:$0x8] %vm903_vm4, %v901_v51  ;;  %755 = vrot.lane.b32.xlu1 %v5285_v22, %s4799_s26 }
 0xb87   :  { %906 = vst.msk [vmem:[#allocation3 + $0x1] sm:$0x8] %vm905_vm5, %v901_v51  ;;  %v3717_v51 = vld [vmem:[#allocation12 + $0x18] sm:$0xf0] }
 0xb8e   :  { %968 = vrot.lane.b32.xlu1 %v5340_v57, %s4799_s26 }
 0xbec   :  { %v1103_v61 = vpop.permute.xlu0 %1102 }
 0xbf0   :  { %v1113_v15 = vpop.permute.xlu1 %1112 }
 0xbf1   :  { %3669 = vmatmul.msk.bf16.vlgmr.msra.gmra.mxu2 %vm638_vm2, %v1113_v15  ;;  %3670 = vmatmul.msk.bf16.vlgmr.msra.gmra.mxu3 %vm638_vm2, %v1113_v15  ;;  %v3673_v15 = vld [vmem:[%s6197_s25] sm:$0xf] }
 0xbf8   :  { %v756_v60 = vpop.permute.xlu1 %755 }
 0xbf9   :  { %759 = vst.msk [vmem:[#allocation3] sm:$0x2] %vm758_vm6, %v756_v60 }
 0xbfa   :  { %761 = vst.msk [vmem:[#allocation3 + $0x5] sm:$0x2] %vm760_vm7, %v756_v60  ;;  %v3720_v60 = vor.u32 %v3985_v56, %v3717_v51 }
 0xbfb   :  { %1106 = vst.msk [vmem:[#allocation3] sm:$0x40] %vm1105_vm8, %v1103_v61 }
 0xbfc   :  { %1108 = vst.msk [vmem:[#allocation3 - $0x5] sm:$0x40] %vm1107_vm9, %v1103_v61  ;;  %v3976_v61 = vld [vmem:[%s6197_s25 + $0x4] sm:$0xf0] }
 0xc00   :  { %v969_v22 = vpop.permute.xlu1 %968 }
 0xc01   :  { %972 = vst.msk [vmem:[#allocation3] sm:$0x10] %vm971_vm10, %v969_v22 }
 0xc02   :  { %974 = vst.msk [vmem:[#allocation3 - $0x1] sm:$0x10] %vm973_vm11, %v969_v22  ;;  %v3975_v22 = vld [vmem:[%s6197_s25 + $0x4] sm:$0xf] }
 0xc74   :  { %v1126_v57 = vpop.f32.mrf.mxu2  ;;  %v1139_v62 = vpop.f32.mrf.mxu3 }
 0xc75   :  { %v1127_v42 = vadd.f32 %v1126_v57, %v5251_v21  ;;  %v1140_v36 = vadd.f32 %v1139_v62, %v5257_v33  ;;  %v3697_v33 = vld [vmem:[%s6197_s25 + $0x30] sm:$0xf]  ;;  %v3675_v57 = vld [vmem:[%s6197_s25 + $0x8] sm:$0xf0]  ;;  %v3674_v62 = vor.u32 %v3976_v61, %v3673_v15 }
 0xc76   :  { %v3698_v6 = vor.u32 %v3982_v49, %v3697_v33  ;;  %v3994_v49 = vld [vmem:[#allocation14 + $0x14] sm:$0xf0] }
 0xc77   :  { %v1144_v63 = vrot.slane %v1127_v42, 1  ;;  %v1152_v41 = vrot.slane %v1140_v36, 1  ;;  %v3678_v42 = vor.u32 %v3975_v22, %v3675_v57 }
 0xc78   :  { %1238 = vmatpush.bf16.msrb.mxu0 %v3698_v6  ;;  %v3759_v6 = vld [vmem:[#allocation14 + $0x28] sm:$0xf0] }
 0xc79   :  { %v1146_v0 = vadd.f32 %v1144_v63, %v5243_v14  ;;  %v3707_v63 = vld [vmem:[#allocation12] sm:$0xf]  ;;  %1254 = vmatpush.bf16.msrb.mxu1 %v3678_v42  ;;  %v5427_v12 = vor.u32 %v3995_v55, %v3759_v6 }
 0xc7b   :  { %v1147_v1 = vmul.f32 0.5, %v1146_v0  ;;  %v3984_v0 = vld [vmem:[#allocation12 + $0x4] sm:$0xf0] }
 0xc7c   :  { %v1128_v2 = vpop.f32.mrf.mxu2  ;;  %v1141_v18 = vpop.f32.mrf.mxu3 }
 0xc7d   :  { %4112 = vtanh.f32 %v1147_v1  ;;  %v3983_v1 = vld [vmem:[#allocation12 + $0x4] sm:$0xf]  ;;  %v3708_v2 = vor.u32 %v3984_v0, %v3707_v63  ;;  %v3709_v18 = vld [vmem:[#allocation12 + $0x8] sm:$0xf0] }
 0xc7e   :  { %v3712_v36 = vor.u32 %v3983_v1, %v3709_v18 }
 0xc83   :  { %v4113_v3 = vpop.eup %4112 }
 0xc84   :  { %v1149_v28 = vadd.f32 1.0, %v4113_v3  ;;  %v3765_v3 = vld [vmem:[#allocation14 + $0x30] sm:$0xf] }
 0xc86   :  { %v1150_v46 = vmul.f32 0.5, %v1149_v28  ;;  %v3998_v28 = vld [vmem:[#allocation14 + $0x34] sm:$0xf0] }
 0xc88   :  { %v1154_v52 = vmul.f32 %v1152_v41, %v1150_v46  ;;  %v1165_v21 = vmul.f32 %v1163_v4, %v1150_v46  ;;  %v1157_v37 = vsub.f32 1.0, %v1150_v46  ;;  %v5418_v46 = vor.u32 %v3998_v28, %v3765_v3  ;;  %v3757_v41 = vld [vmem:[#allocation14 + $0x20] sm:$0xf]  ;;  %v3996_v4 = vld [vmem:[#allocation14 + $0x24] sm:$0xf0] }
 0xc8a   :  { %v1155_v5 = vadd.f32 %v1154_v52, %v5249_v19  ;;  %v3731_v19 = vld [vmem:[#allocation12 + $0x30] sm:$0xf]  ;;  %v3997_v52 = vld [vmem:[#allocation14 + $0x34] sm:$0xf] }
 0xc8b   :  { %v3732_v9 = vor.u32 %v3990_v7, %v3731_v19  ;;  %v3741_v7 = vld [vmem:[#allocation14] sm:$0xf] }
 0xc8c   :  { %4114 = vtanh.f32 %v1155_v5  ;;  %v3767_v5 = vld [vmem:[#allocation14 + $0x38] sm:$0xf0] }
 0xc8d   :  { %1312 = vmatpush.bf16.msrb.mxu2 %v3732_v9  ;;  %v5424_v33 = vor.u32 %v3997_v52, %v3767_v5  ;;  %v5437_v9 = vor.u32 %v3992_v8, %v3741_v7 }
 0xc8f   :  { %1413 = vmatpush.bf16.msra.mxu1 %v5424_v33 }
 0xc91   :  { %1313 = vmatpush.bf16.msrb.mxu2 %v3724_v32  ;;  %v1188_v32 = vperm.slane %v1185_v31, 1 }
 0xc92   :  { %v4115_v14 = vpop.eup %4114 }
 0xc93   :  { %1159 = vrot.lane.b32.xlu2 %v4115_v14, %s4799_s26  ;;  %v3749_v14 = vld [vmem:[#allocation14 + $0x10] sm:$0xf]  ;;  %1414 = vmatpush.bf16.msra.mxu1 %v5427_v12 }
 0xc94   :  { %v5431_v19 = vor.u32 %v3994_v49, %v3749_v14 }
 0xc95   :  { %1314 = vmatpush.bf16.msrb.mxu2 %v3716_v54 }
 0xc99   :  { %1315 = vmatpush.bf16.msrb.mxu2 %v3708_v2 }
 0xc9b   :  { %828 = vrot.lane.b32.xlu2 %v5306_v59, %s4799_s26  ;;  %v3736_v59 = vor.u32 %v3989_v11, %v3733_v20  ;;  %v3993_v11 = vld [vmem:[#allocation14 + $0x14] sm:$0xf]  ;;  %v3751_v20 = vld [vmem:[#allocation14 + $0x18] sm:$0xf0] }
 0xc9d   :  { %1325 = vmatpush.bf16.msrb.mxu3 %v3736_v59  ;;  %1461 = vmatpush.bf16.msra.mxu2 %v5418_v46  ;;  %v3991_v59 = vld [vmem:[#allocation14 + $0x4] sm:$0xf] }
 0xca1   :  { %1326 = vmatpush.bf16.msrb.mxu3 %v3728_v35 }
 0xca3   :  { %1034 = vrot.lane.b32.xlu2 %v5353_v10, %s4799_s26  ;;  %v3690_v10 = vor.u32 %v3980_v16, %v3689_v23  ;;  %v5442_v23 = vor.u32 %v3993_v11, %v3751_v20  ;;  %v3743_v16 = vld [vmem:[#allocation14 + $0x8] sm:$0xf0] }
 0xca4   :  { %v5445_v24 = vor.u32 %v3991_v59, %v3743_v16 }
 0xca5   :  { %1239 = vmatpush.bf16.msrb.mxu0 %v3690_v10  ;;  %1327 = vmatpush.bf16.msrb.mxu3 %v3720_v60  ;;  %v5495_v60 = vperm.slane %v1342_v50, 0 }
 0xca6   :  { %1415 = vmatpush.bf16.msra.mxu1 %v5442_v23 }
 0xca9   :  { %1240 = vmatpush.bf16.msrb.mxu0 %v3682_v48  ;;  %1328 = vmatpush.bf16.msrb.mxu3 %v3712_v36  ;;  %v5501_v36 = vperm.slane %v1342_v50, 1 }
 0xcaa   :  { %1416 = vmatpush.bf16.msra.mxu1 %v5445_v24 }
 0xcad   :  { %1241 = vmatpush.bf16.msrb.mxu0 %v3674_v62  ;;  %1474 = vmatpush.bf16.msra.mxu3 %v5424_v33 }
 0xcb1   :  { %1400 = vmatpush.bf16.msra.mxu0 %v5418_v46  ;;  %1475 = vmatpush.bf16.msra.mxu3 %v5427_v12 }
 0xcb5   :  { %1476 = vmatpush.bf16.msra.mxu3 %v5442_v23 }
 0xcb9   :  { %1477 = vmatpush.bf16.msra.mxu3 %v5445_v24 }
 0xced   :  { %v1160_v38 = vpop.permute.xlu2 %1159 }
 0xcee   :  { %v1162_v39 = vmul.f32 %v1160_v38, %v1157_v37 }
 0xcf0   :  { %v1166_v40 = vadd.f32 %v1165_v21, %v1162_v39  ;;  %v5421_v21 = vor.u32 %v3996_v4, %v3757_v41 }
 0xcf2   :  { %1168 = vrot.lane.b32.xlu1 %v1166_v40, %s4799_s26  ;;  %1401 = vmatpush.bf16.msra.mxu0 %v5421_v21 }
 0xcf3   :  { %1462 = vmatpush.bf16.msra.mxu2 %v5421_v21 }
 0xcf5   :  { %v829_v43 = vpop.permute.xlu2 %828 }
 0xcf6   :  { %832 = vst.msk [vmem:[#allocation3] sm:$0x4] %vm831_vm12, %v829_v43  ;;  %1402 = vmatpush.bf16.msra.mxu0 %v5431_v19 }
 0xcf7   :  { %834 = vst.msk [vmem:[#allocation3 + $0x3] sm:$0x4] %vm833_vm13, %v829_v43  ;;  %1463 = vmatpush.bf16.msra.mxu2 %v5431_v19 }
 0xcfa   :  { %1403 = vmatpush.bf16.msra.mxu0 %v5437_v9 }
 0xcfb   :  { %1464 = vmatpush.bf16.msra.mxu2 %v5437_v9 }
 0xcfd   :  { %v1035_v44 = vpop.permute.xlu2 %1034 }
 0xcfe   :  { %1038 = vst.msk [vmem:[#allocation3] sm:$0x20] %vm1037_vm14, %v1035_v44 }
 0xcff   :  { %1040 = vst.msk [vmem:[#allocation3 - $0x3] sm:$0x20] %vm6175_vm15, %v1035_v44  ;;  %vm1173_vm15 = vcmask 523527  }
 0xd64   :  { %v1169_v26 = vpop.permute.xlu1 %1168 }
 0xd65   :  { %1172 = vst.msk [vmem:[#allocation3] sm:$0x80] %vm1171_vm1, %v1169_v26 }
 0xd66   :  { %1174 = vst.msk [vmem:[#allocation3 - $0x7] sm:$0x80] %vm1173_vm15, %v1169_v26 }
 0xd6d   :  { %v1175_v10 = vld [vmem:[#allocation3] sm:$0xff] }
 0xd6e   :  { %v1176_v27 = vpack.c.bf16 %v1175_v10, %v1175_v10 }
 0xd70   :  { %3703 = vmatmul.msk.bf16.vlgmr.msrb.gmra.mxu0 %vm638_vm2, %v1176_v27  ;;  %3704 = vmatmul.msk.bf16.vlgmr.msrb.gmra.mxu1 %vm638_vm2, %v1176_v27 }
 0xd71   :  { %3737 = vmatmul.msk.bf16.vlgmr.msrb.gmra.mxu2 %vm638_vm2, %v1176_v27  ;;  %3738 = vmatmul.msk.bf16.vlgmr.msrb.gmra.mxu3 %vm638_vm2, %v1176_v27 }
 0xd72   :  { %1532 = vmatpush.bf16.msrb.mxu0 %v5418_v46  ;;  %1545 = vmatpush.bf16.msrb.mxu1 %v5424_v33 }
 0xd73   :  { %1602 = vmatpush.bf16.msrb.mxu2 %v5418_v46  ;;  %1615 = vmatpush.bf16.msrb.mxu3 %v5424_v33 }
 0xd76   :  { %1533 = vmatpush.bf16.msrb.mxu0 %v5421_v21  ;;  %1546 = vmatpush.bf16.msrb.mxu1 %v5427_v12 }
 0xd77   :  { %1603 = vmatpush.bf16.msrb.mxu2 %v5421_v21  ;;  %1616 = vmatpush.bf16.msrb.mxu3 %v5427_v12 }
 0xd7a   :  { %1534 = vmatpush.bf16.msrb.mxu0 %v5431_v19  ;;  %1547 = vmatpush.bf16.msrb.mxu1 %v5442_v23 }
 0xd7b   :  { %1604 = vmatpush.bf16.msrb.mxu2 %v5431_v19  ;;  %1617 = vmatpush.bf16.msrb.mxu3 %v5442_v23 }
 0xd7e   :  { %1535 = vmatpush.bf16.msrb.mxu0 %v5437_v9  ;;  %1548 = vmatpush.bf16.msrb.mxu1 %v5445_v24 }
 0xd7f   :  { %1605 = vmatpush.bf16.msrb.mxu2 %v5437_v9  ;;  %1618 = vmatpush.bf16.msrb.mxu3 %v5445_v24 }
 0xd80   :  { %1404 = vmatmul.bf16.vlgmr.msra.gmra.mxu0 %v4818_v58  ;;  %1417 = vmatmul.bf16.vlgmr.msra.gmra.mxu1 %v4818_v58  ;;  %v1187_v58 = vperm.slane %v1185_v31, 0 }
 0xd82   :  { %1668 = vmatpush.bf16.msra.mxu0 %v5418_v46  ;;  %1681 = vmatpush.bf16.msra.mxu1 %v5424_v33 }
 0xd86   :  { %1669 = vmatpush.bf16.msra.mxu0 %v5421_v21  ;;  %1682 = vmatpush.bf16.msra.mxu1 %v5427_v12 }
 0xd8a   :  { %1670 = vmatpush.bf16.msra.mxu0 %v5431_v19  ;;  %1683 = vmatpush.bf16.msra.mxu1 %v5442_v23 }
 0xd8e   :  { %1671 = vmatpush.bf16.msra.mxu0 %v5437_v9  ;;  %1684 = vmatpush.bf16.msra.mxu1 %v5445_v24 }
 0xded   :  { %v1243_v29 = vpop.f32.mrf.mxu0  ;;  %v1256_v30 = vpop.f32.mrf.mxu1 }
 0xdee   :  { %v1244_v37 = vadd.f32 %v1243_v29, %v1187_v58  ;;  %v1257_v45 = vadd.f32 %v1256_v30, %v1188_v32 }
 0xdf4   :  { %v1317_v34 = vpop.f32.mrf.mxu2  ;;  %v1330_v35 = vpop.f32.mrf.mxu3 }
 0xdf5   :  { %v1444_v38 = vrot.slane %v1317_v34, 5  ;;  %v1513_v39 = vrot.slane %v1317_v34, 3  ;;  %v1584_v40 = vrot.slane %v1317_v34, 1  ;;  %v1245_v43 = vpop.f32.mrf.mxu0  ;;  %v1258_v44 = vpop.f32.mrf.mxu1  ;;  %v1445_v13 = vrot.slane %v1330_v35, 5 }
 0xdf6   :  { %v1514_v47 = vrot.slane %v1330_v35, 3  ;;  %v1585_v48 = vrot.slane %v1330_v35, 1  ;;  %v1345_v15 = vrot.slane %v1317_v34, 7  ;;  %v1346_v28 = vrot.slane %v1330_v35, 7 }
 0xdf7   :  { %v5483_v25 = vadd.f32 %v1444_v38, %v1244_v37  ;;  %v5485_v53 = vadd.f32 %v1513_v39, %v1244_v37  ;;  %v5487_v17 = vadd.f32 %v1584_v40, %v1244_v37  ;;  %v5489_v54 = vadd.f32 %v1445_v13, %v1257_v45 }
 0xdf8   :  { %v5491_v56 = vadd.f32 %v1514_v47, %v1257_v45  ;;  %v5493_v51 = vadd.f32 %v1585_v48, %v1257_v45  ;;  %v5497_v42 = vadd.f32 %v1345_v15, %v1244_v37  ;;  %v5504_v5 = vadd.f32 %v1346_v28, %v1257_v45 }
 0xdfc   :  { %v1319_v61 = vpop.f32.mrf.mxu2  ;;  %v1332_v22 = vpop.f32.mrf.mxu3 }
 0xdfd   :  { %v1405_v57 = vpop.f32.mrf.mxu0  ;;  %v1418_v62 = vpop.f32.mrf.mxu1 }
 0xdfe   :  { %v1406_v63 = vadd.f32 %v1405_v57, %v5495_v60  ;;  %v1419_v4 = vadd.f32 %v1418_v62, %v5501_v36 }
 0xe00   :  { %v1422_v0 = vadd.f32 %v1406_v63, %v5497_v42 }
 0xe02   :  { %v1423_v1 = vmul.f32 0.5, %v1422_v0 }
 0xe04   :  { %4116 = vtanh.f32 %v1423_v1 }
 0xe05   :  { %v1407_v2 = vpop.f32.mrf.mxu0  ;;  %v1420_v18 = vpop.f32.mrf.mxu1 }
 0xe0a   :  { %v4117_v3 = vpop.eup %4116 }
 0xe0b   :  { %v1425_v41 = vadd.f32 1.0, %v4117_v3 }
 0xe0d   :  { %v1426_v52 = vmul.f32 0.5, %v1425_v41 }
 0xe0f   :  { %v1427_v14 = vmul.f32 %v1426_v52, %v1419_v4  ;;  %v1430_v6 = vsub.f32 1.0, %v1426_v52  ;;  %v1436_v8 = vmul.f32 0.0, %v1426_v52 }
 0xe11   :  { %v1428_v49 = vadd.f32 %v1427_v14, %v5504_v5 }
 0xe13   :  { %4118 = vtanh.f32 %v1428_v49 }
 0xe19   :  { %v4119_v55 = vpop.eup %4118 }
 0xe1a   :  { %1432 = vrot.lane.b32.xlu2 %v4119_v55, %s4799_s26 }
 0xe74   :  { %v1433_v7 = vpop.permute.xlu2 %1432 }
 0xe75   :  { %v1435_v11 = vmul.f32 %v1433_v7, %v1430_v6 }
 0xe77   :  { %v5508_v20 = vadd.f32 %v1436_v8, %v1435_v11 }
 0xe79   :  { %v1450_v59 = vpack.c.bf16 %v5508_v20, %v5508_v20  ;;  %v1503_v13 = vrot.slane %v5508_v20, 7 }
 0xe7b   :  { %1452 = vrot.lane.b32.xlu0 %v1450_v59, %s4799_s26 }
 0xeed   :  { %v1453_v16 = vpop.permute.xlu0 %1452 }
 0xeee   :  { %3771 = vmatmul.msk.bf16.vlgmr.msra.gmra.mxu2 %vm638_vm2, %v1453_v16  ;;  %3772 = vmatmul.msk.bf16.vlgmr.msra.gmra.mxu3 %vm638_vm2, %v1453_v16 }
 0xeef   :  { %1732 = vmatpush.bf16.msra.mxu2 %v5418_v46  ;;  %1745 = vmatpush.bf16.msra.mxu3 %v5424_v33 }
 0xef3   :  { %1733 = vmatpush.bf16.msra.mxu2 %v5421_v21  ;;  %1746 = vmatpush.bf16.msra.mxu3 %v5427_v12 }
 0xef7   :  { %1734 = vmatpush.bf16.msra.mxu2 %v5431_v19  ;;  %1747 = vmatpush.bf16.msra.mxu3 %v5442_v23 }
 0xefb   :  { %1735 = vmatpush.bf16.msra.mxu2 %v5437_v9  ;;  %1748 = vmatpush.bf16.msra.mxu3 %v5445_v24 }
 0xf71   :  { %v1466_v26 = vpop.f32.mrf.mxu2  ;;  %v1479_v10 = vpop.f32.mrf.mxu3 }
 0xf72   :  { %v1467_v27 = vadd.f32 %v1466_v26, %v5495_v60  ;;  %v1480_v34 = vadd.f32 %v1479_v10, %v5501_v36 }
 0xf74   :  { %v1484_v29 = vrot.slane %v1467_v27, 7  ;;  %v1492_v39 = vrot.slane %v1480_v34, 7 }
 0xf76   :  { %v1486_v30 = vadd.f32 %v1484_v29, %v5483_v25 }
 0xf78   :  { %v1487_v31 = vmul.f32 0.5, %v1486_v30 }
 0xf79   :  { %v1468_v58 = vpop.f32.mrf.mxu2  ;;  %v1481_v32 = vpop.f32.mrf.mxu3 }
 0xf7a   :  { %4120 = vtanh.f32 %v1487_v31 }
 0xf80   :  { %v4121_v35 = vpop.eup %4120 }
 0xf81   :  { %v1489_v37 = vadd.f32 1.0, %v4121_v35 }
 0xf83   :  { %v1490_v38 = vmul.f32 0.5, %v1489_v37 }
 0xf85   :  { %v1494_v40 = vmul.f32 %v1492_v39, %v1490_v38  ;;  %v1497_v45 = vsub.f32 1.0, %v1490_v38  ;;  %v1505_v48 = vmul.f32 %v1503_v13, %v1490_v38 }
 0xf87   :  { %v1495_v43 = vadd.f32 %v1494_v40, %v5489_v54 }
 0xf89   :  { %4122 = vtanh.f32 %v1495_v43 }
 0xf8f   :  { %v4123_v44 = vpop.eup %4122 }
 0xf90   :  { %1499 = vrot.lane.b32.xlu1 %v4123_v44, %s4799_s26 }
0x1002   :  { %v1500_v47 = vpop.permute.xlu1 %1499 }
0x1003   :  { %v1502_v50 = vmul.f32 %v1500_v47, %v1497_v45 }
0x1005   :  { %v5529_v15 = vadd.f32 %v1505_v48, %v1502_v50 }
0x1007   :  { %v1519_v61 = vpack.c.bf16 %v5529_v15, %v5529_v15  ;;  %v1574_v11 = vrot.slane %v5529_v15, 7 }
0x1009   :  { %v1521_v22 = vshrl.u32 %v1519_v61, 16 }
0x100b   :  { %1523 = vrot.lane.b32.xlu2 %v1521_v22, %s4799_s26 }
0x1065   :  { %v1524_v57 = vpop.permute.xlu2 %1523 }
0x1066   :  { %3773 = vmatmul.msk.bf16.vlgmr.msrb.gmra.mxu0 %vm638_vm2, %v1524_v57  ;;  %3774 = vmatmul.msk.bf16.vlgmr.msrb.gmra.mxu1 %vm638_vm2, %v1524_v57 }
0x1067   :  { %1798 = vmatpush.bf16.msrb.mxu0 %v5418_v46  ;;  %1811 = vmatpush.bf16.msrb.mxu1 %v5424_v33 }
0x106b   :  { %1799 = vmatpush.bf16.msrb.mxu0 %v5421_v21  ;;  %1812 = vmatpush.bf16.msrb.mxu1 %v5427_v12 }
0x106f   :  { %1800 = vmatpush.bf16.msrb.mxu0 %v5431_v19  ;;  %1813 = vmatpush.bf16.msrb.mxu1 %v5442_v23 }
0x1073   :  { %1801 = vmatpush.bf16.msrb.mxu0 %v5437_v9  ;;  %1814 = vmatpush.bf16.msrb.mxu1 %v5445_v24 }
0x10e3   :  { %v1537_v62 = vpop.f32.mrf.mxu0  ;;  %v1550_v63 = vpop.f32.mrf.mxu1 }
0x10e4   :  { %v1538_v0 = vadd.f32 %v1537_v62, %v5495_v60  ;;  %v1551_v41 = vadd.f32 %v1550_v63, %v5501_v36 }
0x10e6   :  { %v1555_v1 = vrot.slane %v1538_v0, 6  ;;  %v1563_v49 = vrot.slane %v1551_v41, 6 }
0x10e8   :  { %v1557_v2 = vadd.f32 %v1555_v1, %v5485_v53 }
0x10ea   :  { %v1558_v18 = vmul.f32 0.5, %v1557_v2 }
0x10eb   :  { %v1539_v3 = vpop.f32.mrf.mxu0  ;;  %v1552_v28 = vpop.f32.mrf.mxu1 }
0x10ec   :  { %4124 = vtanh.f32 %v1558_v18 }
0x10f2   :  { %v4125_v4 = vpop.eup %4124 }
0x10f3   :  { %v1560_v52 = vadd.f32 1.0, %v4125_v4 }
0x10f5   :  { %v1561_v14 = vmul.f32 0.5, %v1560_v52 }
0x10f7   :  { %v1565_v55 = vmul.f32 %v1563_v49, %v1561_v14  ;;  %v1568_v8 = vsub.f32 1.0, %v1561_v14  ;;  %v1576_v16 = vmul.f32 %v1574_v11, %v1561_v14 }
0x10f9   :  { %v1566_v6 = vadd.f32 %v1565_v55, %v5491_v56 }
0x10fb   :  { %4126 = vtanh.f32 %v1566_v6 }
0x1101   :  { %v4127_v7 = vpop.eup %4126 }
0x1102   :  { %1570 = vrot.lane.b32.xlu0 %v4127_v7, %s4799_s26 }
0x1174   :  { %v1571_v59 = vpop.permute.xlu0 %1570 }
0x1175   :  { %v1573_v26 = vmul.f32 %v1571_v59, %v1568_v8 }
0x1177   :  { %v5550_v10 = vadd.f32 %v1576_v16, %v1573_v26 }
0x1179   :  { %v1590_v27 = vpack.c.bf16 %v5550_v10, %v5550_v10  ;;  %v1644_v43 = vrot.slane %v5550_v10, 7 }
0x117b   :  { %v1592_v29 = vrot.slane %v1590_v27, 1 }
0x117d   :  { %1593 = vrot.lane.b32.xlu1 %v1592_v29, %s4799_s26 }
0x11ef   :  { %v1594_v30 = vpop.permute.xlu1 %1593 }
0x11f0   :  { %3775 = vmatmul.msk.bf16.vlgmr.msrb.gmra.mxu2 %vm638_vm2, %v1594_v30  ;;  %3776 = vmatmul.msk.bf16.vlgmr.msrb.gmra.mxu3 %vm638_vm2, %v1594_v30 }
0x11f1   :  { %1862 = vmatpush.bf16.msrb.mxu2 %v5418_v46  ;;  %1875 = vmatpush.bf16.msrb.mxu3 %v5424_v33 }
0x11f5   :  { %1863 = vmatpush.bf16.msrb.mxu2 %v5421_v21  ;;  %1876 = vmatpush.bf16.msrb.mxu3 %v5427_v12 }
0x11f9   :  { %1864 = vmatpush.bf16.msrb.mxu2 %v5431_v19  ;;  %1877 = vmatpush.bf16.msrb.mxu3 %v5442_v23 }
0x11fd   :  { %1865 = vmatpush.bf16.msrb.mxu2 %v5437_v9  ;;  %1878 = vmatpush.bf16.msrb.mxu3 %v5445_v24 }
0x1273   :  { %v1607_v31 = vpop.f32.mrf.mxu2  ;;  %v1620_v58 = vpop.f32.mrf.mxu3 }
0x1274   :  { %v1608_v32 = vadd.f32 %v1607_v31, %v5495_v60  ;;  %v1621_v12 = vadd.f32 %v1620_v58, %v5501_v36 }
0x1276   :  { %v1625_v34 = vrot.slane %v1608_v32, 5  ;;  %v1633_v38 = vrot.slane %v1621_v12, 5 }
0x1278   :  { %v1627_v46 = vadd.f32 %v1625_v34, %v5487_v17 }
0x127a   :  { %v1628_v33 = vmul.f32 0.5, %v1627_v46 }
0x127b   :  { %v1609_v35 = vpop.f32.mrf.mxu2  ;;  %v1622_v21 = vpop.f32.mrf.mxu3 }
0x127c   :  { %4128 = vtanh.f32 %v1628_v33 }
0x1282   :  { %v4129_v19 = vpop.eup %4128 }
0x1283   :  { %v1630_v37 = vadd.f32 1.0, %v4129_v19 }
0x1285   :  { %v1631_v23 = vmul.f32 0.5, %v1630_v37 }
0x1287   :  { %v1635_v9 = vmul.f32 %v1633_v38, %v1631_v23  ;;  %v1638_v40 = vsub.f32 1.0, %v1631_v23  ;;  %v1646_v45 = vmul.f32 %v1644_v43, %v1631_v23 }
0x1289   :  { %v1636_v24 = vadd.f32 %v1635_v9, %v5493_v51 }
0x128b   :  { %4130 = vtanh.f32 %v1636_v24 }
0x1291   :  { %v4131_v39 = vpop.eup %4130 }
0x1292   :  { %1640 = vrot.lane.b32.xlu2 %v4131_v39, %s4799_s26 }
0x12ec   :  { %v1641_v44 = vpop.permute.xlu2 %1640 }
0x12ed   :  { %v1643_v13 = vmul.f32 %v1641_v44, %v1638_v40 }
0x12ef   :  { %v5571_v47 = vadd.f32 %v1646_v45, %v1643_v13 }
0x12f1   :  { %v1654_v48 = vpack.c.bf16 %v5571_v47, %v5571_v47 }
0x12f3   :  { %v1656_v50 = vshrl.u32 %v1654_v48, 16 }
0x12f5   :  { %v1658_v61 = vrot.slane %v1656_v50, 1 }
0x12f7   :  { %1659 = vrot.lane.b32.xlu0 %v1658_v61, %s4799_s26 }
0x1369   :  { %v1660_v22 = vpop.permute.xlu0 %1659 }
0x136a   :  { %3777 = vmatmul.msk.bf16.vlgmr.msra.gmra.mxu0 %vm638_vm2, %v1660_v22  ;;  %3778 = vmatmul.msk.bf16.vlgmr.msra.gmra.mxu1 %vm638_vm2, %v1660_v22 }
0x13e7   :  { %v1673_v57 = vpop.f32.mrf.mxu0  ;;  %v1686_v62 = vpop.f32.mrf.mxu1 }
0x13e8   :  { %v1674_v63 = vadd.f32 %v1673_v57, %v5495_v60  ;;  %v1687_v28 = vadd.f32 %v1686_v62, %v5501_v36 }
0x13ea   :  { %v1691_v0 = vrot.slane %v1674_v63, 4  ;;  %v1699_v14 = vrot.slane %v1687_v28, 4 }
0x13ec   :  { %v1693_v1 = vadd.f32 %v1691_v0, %v5497_v42  ;;  %v1710_v42 = vrot.slane %v5571_v47, 7 }
0x13ee   :  { %v1694_v2 = vmul.f32 0.5, %v1693_v1 }
0x13ef   :  { %v1675_v18 = vpop.f32.mrf.mxu0  ;;  %v1688_v3 = vpop.f32.mrf.mxu1 }
0x13f0   :  { %4132 = vtanh.f32 %v1694_v2 }
0x13f6   :  { %v4133_v41 = vpop.eup %4132 }
0x13f7   :  { %v1696_v4 = vadd.f32 1.0, %v4133_v41 }
0x13f9   :  { %v1697_v52 = vmul.f32 0.5, %v1696_v4 }
0x13fb   :  { %v1701_v49 = vmul.f32 %v1699_v14, %v1697_v52  ;;  %v1704_v7 = vsub.f32 1.0, %v1697_v52  ;;  %v1712_v11 = vmul.f32 %v1710_v42, %v1697_v52 }
0x13fd   :  { %v1702_v55 = vadd.f32 %v1701_v49, %v5504_v5 }
0x13ff   :  { %4134 = vtanh.f32 %v1702_v55 }
0x1405   :  { %v4135_v6 = vpop.eup %4134 }
0x1406   :  { %1706 = vrot.lane.b32.xlu1 %v4135_v6, %s4799_s26 }
0x1478   :  { %v1707_v8 = vpop.permute.xlu1 %1706 }
0x1479   :  { %v1709_v59 = vmul.f32 %v1707_v8, %v1704_v7 }
0x147b   :  { %v5584_v16 = vadd.f32 %v1712_v11, %v1709_v59 }
0x147d   :  { %v1720_v26 = vpack.c.bf16 %v5584_v16, %v5584_v16 }
0x147f   :  { %v1722_v27 = vrot.slane %v1720_v26, 2 }
0x1481   :  { %1723 = vrot.lane.b32.xlu2 %v1722_v27, %s4799_s26 }
0x14db   :  { %v1724_v29 = vpop.permute.xlu2 %1723 }
0x14dc   :  { %3779 = vmatmul.msk.bf16.vlgmr.msra.gmra.mxu2 %vm638_vm2, %v1724_v29  ;;  %3780 = vmatmul.msk.bf16.vlgmr.msra.gmra.mxu3 %vm638_vm2, %v1724_v29 }
0x155f   :  { %v1737_v5 = vpop.f32.mrf.mxu2  ;;  %v1750_v30 = vpop.f32.mrf.mxu3 }
0x1560   :  { %v1738_v31 = vadd.f32 %v1737_v5, %v5495_v60  ;;  %v1751_v35 = vadd.f32 %v1750_v30, %v5501_v36 }
0x1562   :  { %v1755_v58 = vrot.slane %v1738_v31, 3  ;;  %v1763_v37 = vrot.slane %v1751_v35, 3 }
0x1564   :  { %v1757_v32 = vadd.f32 %v1755_v58, %v5483_v25  ;;  %v1774_v25 = vrot.slane %v5584_v16, 7 }
0x1566   :  { %v1758_v34 = vmul.f32 0.5, %v1757_v32 }
0x1567   :  { %v1739_v46 = vpop.f32.mrf.mxu2  ;;  %v1752_v33 = vpop.f32.mrf.mxu3 }
0x1568   :  { %4136 = vtanh.f32 %v1758_v34 }
0x156e   :  { %v4137_v21 = vpop.eup %4136 }
0x156f   :  { %v1760_v12 = vadd.f32 1.0, %v4137_v21 }
0x1571   :  { %v1761_v19 = vmul.f32 0.5, %v1760_v12 }
0x1573   :  { %v1765_v23 = vmul.f32 %v1763_v37, %v1761_v19  ;;  %v1768_v24 = vsub.f32 1.0, %v1761_v19  ;;  %v1776_v40 = vmul.f32 %v1774_v25, %v1761_v19 }
0x1575   :  { %v1766_v38 = vadd.f32 %v1765_v23, %v5489_v54 }
0x1577   :  { %4138 = vtanh.f32 %v1766_v38 }
0x157d   :  { %v4139_v9 = vpop.eup %4138 }
0x157e   :  { %1770 = vrot.lane.b32.xlu0 %v4139_v9, %s4799_s26 }
0x15f0   :  { %v1771_v39 = vpop.permute.xlu0 %1770 }
0x15f1   :  { %v1773_v43 = vmul.f32 %v1771_v39, %v1768_v24 }
0x15f3   :  { %v5597_v44 = vadd.f32 %v1776_v40, %v1773_v43  ;;  %v5654_v43 = vld [vmem:[#allocation32] sm:$0xff] }
0x15f5   :  { %v1784_v45 = vpack.c.bf16 %v5597_v44, %v5597_v44  ;;  %v1840_v49 = vrot.slane %v5597_v44, 7 }
0x15f7   :  { %v1786_v13 = vshrl.u32 %v1784_v45, 16 }
0x15f9   :  { %v1788_v48 = vrot.slane %v1786_v13, 2 }
0x15fb   :  { %1789 = vrot.lane.b32.xlu1 %v1788_v48, %s4799_s26 }
0x166d   :  { %v1790_v54 = vpop.permute.xlu1 %1789 }
0x166e   :  { %3781 = vmatmul.msk.bf16.vlgmr.msrb.gmra.mxu0 %vm638_vm2, %v1790_v54  ;;  %3782 = vmatmul.msk.bf16.vlgmr.msrb.gmra.mxu1 %vm638_vm2, %v1790_v54  ;;  %v3999_v54 = vld [vmem:[#allocation30] sm:$0xff] }
0x16eb   :  { %v1803_v50 = vpop.f32.mrf.mxu0  ;;  %v1816_v61 = vpop.f32.mrf.mxu1 }
0x16ec   :  { %v1804_v22 = vadd.f32 %v1803_v50, %v5495_v60  ;;  %v1817_v2 = vadd.f32 %v1816_v61, %v5501_v36 }
0x16ee   :  { %v1821_v57 = vrot.slane %v1804_v22, 2  ;;  %v1829_v41 = vrot.slane %v1817_v2, 2 }
0x16f0   :  { %v1823_v62 = vadd.f32 %v1821_v57, %v5485_v53 }
0x16f2   :  { %v1824_v63 = vmul.f32 0.5, %v1823_v62 }
0x16f3   :  { %v1805_v0 = vpop.f32.mrf.mxu0  ;;  %v1818_v1 = vpop.f32.mrf.mxu1 }
0x16f4   :  { %4140 = vtanh.f32 %v1824_v63 }
0x16fa   :  { %v4141_v18 = vpop.eup %4140 }
0x16fb   :  { %v1826_v3 = vadd.f32 1.0, %v4141_v18 }
0x16fd   :  { %v1827_v28 = vmul.f32 0.5, %v1826_v3 }
0x16ff   :  { %v1831_v4 = vmul.f32 %v1829_v41, %v1827_v28  ;;  %v1834_v53 = vsub.f32 1.0, %v1827_v28  ;;  %v1842_v6 = vmul.f32 %v1840_v49, %v1827_v28  ;;  %v5679_v49 = vld [vmem:[%s6202_s29 + $0x38] sm:$0xff] }
0x1700   :  { %2062 = vmatpush.bf16.msra.mxu1 %v5679_v49 }
0x1701   :  { %v1832_v52 = vadd.f32 %v1831_v4, %v5491_v56  ;;  %v5673_v4 = vld [vmem:[#allocation33] sm:$0x1] }
0x1703   :  { %4142 = vtanh.f32 %v1832_v52 }
0x1709   :  { %v4143_v14 = vpop.eup %4142 }
0x170a   :  { %1836 = vrot.lane.b32.xlu2 %v4143_v14, %s4799_s26 }
0x1712   :  { %1439 = vrot.lane.b32.xlu2 %v5508_v20, %s4799_s26 }
0x171a   :  { %1649 = vrot.lane.b32.xlu2 %v5571_v47, %s4799_s26 }
0x1764   :  { %v1837_v55 = vpop.permute.xlu2 %1836 }
0x1765   :  { %v1839_v7 = vmul.f32 %v1837_v55, %v1834_v53  ;;  %v5683_v55 = vld [vmem:[%s6202_s29 + $0x30] sm:$0xff] }
0x1766   :  { %2063 = vmatpush.bf16.msra.mxu1 %v5683_v55 }
0x1767   :  { %v1843_v42 = vadd.f32 %v1842_v6, %v1839_v7  ;;  %v5687_v6 = vld [vmem:[%s6202_s29 + $0x28] sm:$0xff]  ;;  %v5691_v7 = vld [vmem:[%s6202_s29 + $0x20] sm:$0xff] }
0x1769   :  { %1845 = vrot.lane.b32.xlu2 %v1843_v42, %s4799_s26  ;;  %v1850_v56 = vpack.c.bf16 %v1843_v42, %v1843_v42  ;;  %v1904_v12 = vrot.slane %v1843_v42, 7  ;;  %v5695_v42 = vld [vmem:[%s6202_s29 + $0x18] sm:$0xff] }
0x176a   :  { %2064 = vmatpush.bf16.msra.mxu1 %v5687_v6 }
0x176b   :  { %v1852_v8 = vrot.slane %v1850_v56, 3  ;;  %v5699_v56 = vld [vmem:[%s6202_s29 + $0x10] sm:$0xff] }
0x176c   :  { %v1440_v11 = vpop.permute.xlu2 %1439 }
0x176d   :  { %1442 = vst.msk [vmem:[#allocation4] sm:$0x1] %vm434_vm0, %v1440_v11  ;;  %1853 = vrot.lane.b32.xlu0 %v1852_v8, %s4799_s26  ;;  %vm6199_vm0 = vcmask 521477  }
0x176e   :  { %1443 = vst.msk [vmem:[#allocation4 + $0x7] sm:$0x1] %vm689_vm3, %v1440_v11  ;;  %vm2163_vm3 = vcmask 1043456   ;;  %2065 = vmatpush.bf16.msra.mxu1 %v5691_v7 }
0x1772   :  { %2066 = vmatpush.bf16.msra.mxu1 %v5695_v42 }
0x1774   :  { %v1650_v20 = vpop.permute.xlu2 %1649 }
0x1775   :  { %1652 = vst.msk [vmem:[#allocation4] sm:$0x8] %vm903_vm4, %v1650_v20  ;;  %1508 = vrot.lane.b32.xlu0 %v5529_v15, %s4799_s26 }
0x1776   :  { %1653 = vst.msk [vmem:[#allocation4 + $0x1] sm:$0x8] %vm905_vm5, %v1650_v20  ;;  %2067 = vmatpush.bf16.msra.mxu1 %v5699_v56 }
0x177d   :  { %1715 = vrot.lane.b32.xlu0 %v5584_v16, %s4799_s26 }
0x17c3   :  { %v1846_v26 = vpop.permute.xlu2 %1845 }
0x17df   :  { %v1854_v47 = vpop.permute.xlu0 %1853 }
0x17e0   :  { %3783 = vmatmul.msk.bf16.vlgmr.msrb.gmra.mxu2 %vm638_vm2, %v1854_v47  ;;  %3784 = vmatmul.msk.bf16.vlgmr.msrb.gmra.mxu3 %vm638_vm2, %v1854_v47  ;;  %vm6200_vm2 = vcmask 261120   ;;  %v5703_v47 = vld [vmem:[%s6202_s29 + $0x8] sm:$0xff] }
0x17e1   :  { %2068 = vmatpush.bf16.msra.mxu1 %v5703_v47 }
0x17e7   :  { %v1509_v59 = vpop.permute.xlu0 %1508 }
0x17e8   :  { %1511 = vst.msk [vmem:[#allocation4] sm:$0x2] %vm758_vm6, %v1509_v59  ;;  %vm2133_vm6 = vcmask 57344  }
0x17e9   :  { %1512 = vst.msk [vmem:[#allocation4 + $0x5] sm:$0x2] %vm760_vm7, %v1509_v59 }
0x17ea   :  { %1848 = vst.msk [vmem:[#allocation4] sm:$0x40] %vm1105_vm8, %v1846_v26 }
0x17eb   :  { %1849 = vst.msk [vmem:[#allocation4 - $0x5] sm:$0x40] %vm1107_vm9, %v1846_v26 }
0x17ef   :  { %v1716_v15 = vpop.permute.xlu0 %1715 }
0x17f0   :  { %1718 = vst.msk [vmem:[#allocation4] sm:$0x10] %vm971_vm10, %v1716_v15 }
0x17f1   :  { %1719 = vst.msk [vmem:[#allocation4 - $0x1] sm:$0x10] %vm973_vm11, %v1716_v15  ;;  %v2007_v15 = vlaneseq }
0x1863   :  { %v1867_v16 = vpop.f32.mrf.mxu2  ;;  %v1880_v27 = vpop.f32.mrf.mxu3 }
0x1864   :  { %v1868_v29 = vadd.f32 %v1867_v16, %v5495_v60  ;;  %v1881_v34 = vadd.f32 %v1880_v27, %v5501_v36  ;;  %v2008_v16 = vand.u32 127, %v2007_v15  ;;  %v5708_v27 = vld [vmem:[%s6202_s29] sm:$0xff] }
0x1865   :  { %2069 = vmatpush.bf16.msra.mxu1 %v5708_v27 }
0x1866   :  { %v1885_v5 = vrot.slane %v1868_v29, 1  ;;  %v1893_v21 = vrot.slane %v1881_v34, 1  ;;  %v5710_v29 = vcvt.s32.f32 %v2008_v16 }
0x1868   :  { %v1887_v30 = vadd.f32 %v1885_v5, %v5487_v17  ;;  %v5641_v17 = vld [vmem:[#allocation32 + $0x8] sm:$0xff]  ;;  %vm2010_vm7 = vcmp.eq.f32.partialorder %v5710_v29, 2.0  ;;  %v4821_v5 = vmov 1.0|1.0  }
0x1869   :  { %2103 = vmatpush.bf16.msra.mxu2 %v5641_v17  ;;  %vm3827_vm8 = vmpackc.low %vm2010_vm7, %vm2010_vm7  ;;  %vm2440_vm7 = vcmask 1040384  }
0x186a   :  { %v1888_v31 = vmul.f32 0.5, %v1887_v30  ;;  %3828 = vmatmul.msk.bf16.vlgmr.msra.gmra.mxu1 %vm3827_vm8, %v4821_v5  ;;  %v4822_v30 = vmov 0.0  }
0x186b   :  { %v1869_v58 = vpop.f32.mrf.mxu2  ;;  %v1882_v32 = vpop.f32.mrf.mxu3  ;;  %430 = vst [vmem:[%s4976_s9] sm:$0x1f] %v4822_v30 }
0x186c   :  { %4144 = vtanh.f32 %v1888_v31  ;;  %v5717_v31 = vld [vmem:[#allocation20 + $0x8] sm:$0xff]  ;;  %v5720_v58 = vld [vmem:[#allocation20] sm:$0xff] }
0x186d   :  { %2104 = vmatpush.bf16.msra.mxu2 %v5654_v43 }
0x1872   :  { %v4145_v46 = vpop.eup %4144 }
0x1873   :  { %v1890_v33 = vadd.f32 1.0, %v4145_v46  ;;  %v5723_v46 = vld [vmem:[#allocation17 + $0x8] sm:$0xff] }
0x1875   :  { %v1891_v35 = vmul.f32 0.5, %v1890_v33 }
0x1877   :  { %v1895_v19 = vmul.f32 %v1893_v21, %v1891_v35  ;;  %v1906_v37 = vmul.f32 %v1904_v12, %v1891_v35  ;;  %v1898_v36 = vsub.f32 1.0, %v1891_v35 }
0x1879   :  { %v1896_v23 = vadd.f32 %v1895_v19, %v5493_v51 }
0x187b   :  { %4146 = vtanh.f32 %v1896_v23 }
0x1881   :  { %v4147_v60 = vpop.eup %4146 }
0x1882   :  { %1900 = vrot.lane.b32.xlu1 %v4147_v60, %s4799_s26 }
0x188a   :  { %1579 = vrot.lane.b32.xlu1 %v5550_v10, %s4799_s26 }
0x1892   :  { %1779 = vrot.lane.b32.xlu1 %v5597_v44, %s4799_s26  ;;  %v4000_v44 = vld [vmem:[#allocation30 + $0x8] sm:$0xff] }
0x1893   :  { %1946 = vmatpush.bf16.msra.mxu0 %v4000_v44  ;;  %v5742_v44 = vld [vmem:[#allocation36 + $0x8] sm:$0xff] }
0x1897   :  { %1947 = vmatpush.bf16.msra.mxu0 %v3999_v54 }
0x18f4   :  { %v1901_v38 = vpop.permute.xlu1 %1900 }
0x18f5   :  { %v1903_v9 = vmul.f32 %v1901_v38, %v1898_v36 }
0x18f7   :  { %v5644_v24 = vadd.f32 %v1906_v37, %v1903_v9  ;;  %v5726_v9 = vld [vmem:[#allocation35 + $0x8] sm:$0xff] }
0x18f9   :  { %1909 = vrot.lane.b32.xlu0 %v5644_v24, %s4799_s26  ;;  %v2075_v51 = vpack.c.bf16 %v5644_v24, %v5644_v24 }
0x18fb   :  { %v2077_v25 = vshrl.u32 %v2075_v51, 16 }
0x18fc   :  { %v1580_v10 = vpop.permute.xlu1 %1579 }
0x18fd   :  { %1582 = vst.msk [vmem:[#allocation4] sm:$0x4] %vm831_vm12, %v1580_v10  ;;  %v2079_v39 = vrot.slane %v2077_v25, 3  ;;  %v5732_v25 = vld [vmem:[#allocation35] sm:$0xff] }
0x18fe   :  { %1583 = vst.msk [vmem:[#allocation4 + $0x3] sm:$0x4] %vm833_vm13, %v1580_v10  ;;  %vm2159_vm13 = vcmask 64512  }
0x18ff   :  { %2080 = vrot.lane.b32.xlu1 %v2079_v39, %s4819_s0 }
0x1904   :  { %v1780_v40 = vpop.permute.xlu1 %1779 }
0x1905   :  { %1782 = vst.msk [vmem:[#allocation4] sm:$0x20] %vm1037_vm14, %v1780_v40 }
0x1906   :  { %1783 = vst.msk [vmem:[#allocation4 - $0x3] sm:$0x20] %vm6199_vm0, %v1780_v40  ;;  %v5740_v40 = vld [vmem:[#allocation18 + $0x8] sm:$0xff] }
0x1907   :  { %2202 = vmatpush.bf16.msrb.mxu2 %v5740_v40 }
0x196b   :  { %v1910_v45 = vpop.permute.xlu0 %1909 }
0x196c   :  { %1912 = vst.msk [vmem:[#allocation4] sm:$0x80] %vm1171_vm1, %v1910_v45  ;;  %vm6201_vm1 = vmmov %vm6200_vm2 }
0x196d   :  { %1913 = vst.msk [vmem:[#allocation4 - $0x7] sm:$0x80] %vm1173_vm15, %v1910_v45  ;;  %vm6203_vm4 = vmmov %vm6201_vm1  ;;  %v2071_v45 = vpop.f32.mrf.mxu1 }
0x196e   :  { %vm6204_vm5 = vmmov %vm6201_vm1 }
0x196f   :  { %vm6205_vm14 = vmmov %vm6201_vm1 }
0x1970   :  { %vm6206_vm15 = vmmov %vm6201_vm1 }
0x1971   :  { %v5659_v13 = vpop.permute.xlu1 %2080  ;;  %vm6207_vm0 = vmmov %vm6201_vm1 }
0x1972   :  { %3837 = vmatmul.msk.bf16.vlgmr.msra.gmra.mxu2 %vm6200_vm2, %v5659_v13  ;;  %vm6208_vm2 = vmmov %vm6207_vm0 }
0x1973   :  { %vm6213_vm8 = vmmov %vm6207_vm0 }
0x1974   :  { %v1914_v48 = vld [vmem:[#allocation4] sm:$0xff] }
0x1975   :  { %1916 = vrot.lane.b32.xlu2 %v1914_v48, %s4820_s23  ;;  %v2073_v54 = vpop.f32.mrf.mxu1 }
0x197d   :  { %2238 = vrot.lane.b32.xlu2 %v2079_v39, %s4799_s26  ;;  %v5737_v39 = vld [vmem:[#allocation17] sm:$0xff] }
0x19cf   :  { %v1917_v50 = vpop.permute.xlu2 %1916 }
0x19d0   :  { %v1919_v61 = vadd.f32 %v1917_v50, %v1914_v48  ;;  %v2179_v48 = vpack.c.bf16 %v2071_v45, %v2071_v45  ;;  %v5747_v50 = vld [vmem:[#allocation18] sm:$0xff] }
0x19d1   :  { %2203 = vmatpush.bf16.msrb.mxu2 %v5747_v50  ;;  %v5787_v45 = vld [vmem:[#allocation24] sm:$0xff] }
0x19d2   :  { %v1920_v22 = vpack.c.bf16 %v1919_v61, %v1919_v61  ;;  %v5749_v61 = vld [vmem:[#allocation36] sm:$0xff] }
0x19d4   :  { %v5665_v57 = vsel %vm2163_vm3, %v1920_v22, 0  ;;  %3793 = vmatmul.msk.bf16.vlgmr.msra.gmra.mxu0 %vm6201_vm1, %v1920_v22  ;;  %v5753_v22 = vld [vmem:[#allocation26 + $0x8] sm:$0xff]  ;;  %vm6209_vm3 = vmmov %vm6207_vm0 }
0x19d5   :  { %2173 = vmatpush.bf16.msrb.mxu0 %v5665_v57  ;;  %2346 = vmatpush.bf16.msra.mxu2 %v5753_v22  ;;  %vm6210_vm1 = vmmov %vm6207_vm0 }
0x19d7   :  { %v2239_v10 = vpop.permute.xlu2 %2238 }
0x19d9   :  { %2261 = vmatpush.bf16.msra.mxu0 %v5717_v31 }
0x19dd   :  { %2262 = vmatpush.bf16.msra.mxu0 %v5720_v58 }
0x19f5   :  { %v2106_v62 = vpop.f32.mrf.mxu2 }
0x19f6   :  { %v2110_v0 = vperm.slane %v2106_v62, 0  ;;  %v5756_v62 = vld [vmem:[#allocation26] sm:$0xff] }
0x19f7   :  { %2347 = vmatpush.bf16.msra.mxu2 %v5756_v62 }
0x19fd   :  { %v2108_v63 = vpop.f32.mrf.mxu2 }
0x1a51   :  { %v5669_v1 = vpop.f32.mrf.mxu0 }
0x1a52   :  { %v2111_v2 = vadd.f32 %v2110_v0, %v5669_v1 }
0x1a54   :  { %4148 = vtanh.f32 %v2111_v2 }
0x1a59   :  { %v1951_v18 = vpop.f32.mrf.mxu0 }
0x1a5a   :  { %v4149_v3 = vpop.eup %4148  ;;  %v5763_v18 = vld [vmem:[#allocation23] sm:$0x1] }
0x1a5b   :  { %v2113_v28 = vpack.c.bf16 %v4149_v3, %v4149_v3 }
0x1a5d   :  { %v2118_v41 = vsel %vm6203_vm4, %v2113_v28, 0  ;;  %vm6211_vm4 = vmmov %vm6207_vm0 }
0x1a5e   :  { %2127 = vmatpush.bf16.xpose.msra.mxu3 %v2118_v41 }
0x1a65   :  { %3838 = vmatmul.msk.bf16.vlgmr.msra.gmra.mxu3 %vm6204_vm5, %v5673_v4  ;;  %vm6212_vm5 = vmmov %vm6207_vm0 }
0x1a66   :  { %2230 = vmatpush.bf16.msrb.mxu3 %v5723_v46 }
0x1a6a   :  { %2231 = vmatpush.bf16.msrb.mxu3 %v5737_v39 }
0x1a6e   :  { %2399 = vmatpush.bf16.msra.mxu3 %v5742_v44 }
0x1a72   :  { %2400 = vmatpush.bf16.msra.mxu3 %v5749_v61 }
0x1a75   :  { %3857 = vmatmul.msk.bf16.vlgmr.msrb.gmra.mxu3 %vm6206_vm15, %v2179_v48  ;;  %vm6215_vm15 = vmmov %vm6207_vm0 }
0x1ae8   :  { %v2129_v52 = vpop.f32.mrf.mxu3 }
0x1ae9   :  { %v2134_v14 = vsel %vm2133_vm6, %v2129_v52, -inf }
0x1aea   :  { %2135 = vmax.xlane.f32.xlu0 %v2134_v14 }
0x1af0   :  { %v2131_v53 = vpop.f32.mrf.mxu3 }
0x1af1   :  { %v5771_v53 = vld [vmem:[#allocation21] sm:$0x1] }
0x1b5d   :  { %v2136_v8 = vpop.xlane.xlu0 %2135 }
0x1b5e   :  { %v2137_v11 = vsub.f32 %v2129_v52, %v2136_v8  ;;  %v2233_v52 = vpop.f32.mrf.mxu3 }
0x1b60   :  { %v2138_v20 = vmul.f32 1.442695, %v2137_v11 }
0x1b62   :  { %4150 = vpow2.f32 %v2138_v20 }
0x1b66   :  { %v2235_v14 = vpop.f32.mrf.mxu3 }
0x1b68   :  { %v4151_v59 = vpop.eup %4150 }
0x1b69   :  { %v2140_v26 = vsel %vm2133_vm6, %v4151_v59, 0.0 }
0x1b6a   :  { %2141 = vadd.xlane.f32.xlu1 %v2140_v26 }
0x1bdd   :  { %v2142_v32 = vpop.xlane.xlu1 %2141 }
0x1bde   :  { %4152 = vrcp.f32 %v2142_v32  ;;  %v2154_v21 = vand.u32 2147483648, %v2142_v32  ;;  %v2152_v19 = vand.u32 2147483647, %v2142_v32  ;;  %vm2148_vm10 = vweird.f32 %v2142_v32 }
0x1be0   :  { %v2155_v23 = vor.u32 1.1754944e-38, %v2154_v21  ;;  %vm2153_vm12 = vcmp.eq.f32.partialorder %v2152_v19, 8.507059e+37 }
0x1be4   :  { %v4153_v34 = vpop.eup %4152 }
0x1be5   :  { %v2144_v33 = vmul.f32 %v4153_v34, %v2142_v32  ;;  %vm2149_vm9 = vweird.f32 %v4153_v34  ;;  %v5776_v32 = vld [vmem:[#allocation29] sm:$0x1] }
0x1be6   :  { %vm2150_vm11 = vmor %vm2148_vm10, %vm2149_vm9 }
0x1be7   :  { %v2145_v35 = vsub.f32 1.0, %v2144_v33  ;;  %vm6214_vm9 = vmmov %vm6207_vm0 }
0x1be9   :  { %v2146_v12 = vmul.f32 %v4153_v34, %v2145_v35 }
0x1beb   :  { %v2147_v37 = vadd.f32 %v4153_v34, %v2146_v12 }
0x1bed   :  { %v2151_v60 = vsel %vm2150_vm11, %v4153_v34, %v2147_v37 }
0x1bee   :  { %v2156_v36 = vsel %vm2153_vm12, %v2155_v23, %v2151_v60 }
0x1bef   :  { %v2157_v38 = vmul.f32 %v4151_v59, %v2156_v36 }
0x1bf1   :  { %v2158_v51 = vpack.c.bf16 %v2157_v38, %v2157_v38  ;;  %2439 = vst.msk [vmem:[%s4976_s9] sm:$0x1] %vm2133_vm6, %v2157_v38 }
0x1bf3   :  { %3839 = vmatmul.msk.bf16.vlgmr.msrb.gmra.mxu0 %vm2159_vm13, %v2158_v51  ;;  %v2290_v51 = vrot.slane %v5644_v24, 7 }
0x1bf4   :  { %2430 = vmatpush.bf16.msrb.mxu0 %v5726_v9 }
0x1bf8   :  { %2431 = vmatpush.bf16.msrb.mxu0 %v5732_v25 }
0x1c03   :  { %3866 = vmatmul.msk.bf16.vlgmr.msra.gmra.mxu0 %vm6205_vm14, %v2239_v10  ;;  %v5784_v10 = vld [vmem:[#allocation24 + $0x8] sm:$0xff] }
0x1c04   :  { %2538 = vmatpush.bf16.msra.mxu0 %v5665_v57  ;;  %2321 = vmatpush.bf16.msrb.mxu1 %v5784_v10 }
0x1c08   :  { %2322 = vmatpush.bf16.msrb.mxu1 %v5787_v45 }
0x1c0c   :  { %2453 = vmatpush.bf16.msra.mxu1 %v5679_v49 }
0x1c10   :  { %2454 = vmatpush.bf16.msra.mxu1 %v5683_v55 }
0x1c14   :  { %2455 = vmatpush.bf16.msra.mxu1 %v5687_v6 }
0x1c18   :  { %2456 = vmatpush.bf16.msra.mxu1 %v5691_v7 }
0x1c1c   :  { %2457 = vmatpush.bf16.msra.mxu1 %v5695_v42 }
0x1c20   :  { %2458 = vmatpush.bf16.msra.mxu1 %v5699_v56 }
0x1c24   :  { %2459 = vmatpush.bf16.msra.mxu1 %v5703_v47 }
0x1c28   :  { %2460 = vmatpush.bf16.msra.mxu1 %v5708_v27 }
0x1c70   :  { %v2175_v63 = vpop.f32.mrf.mxu0 }
0x1c71   :  { %v2180_v0 = vpack.c.bf16 %v2175_v63, %v2175_v63 }
0x1c73   :  { %3848 = vmatmul.msk.bf16.vlgmr.msrb.gmra.mxu2 %vm6207_vm0, %v2180_v0  ;;  %3893 = vmatmul.msk.bf16.vlgmr.msra.gmra.mxu3 %vm6208_vm2, %v2180_v0 }
0x1c74   :  { %2476 = vmatpush.bf16.msrb.mxu2 %v5641_v17 }
0x1c78   :  { %v2177_v2 = vpop.f32.mrf.mxu0  ;;  %2477 = vmatpush.bf16.msrb.mxu2 %v5654_v43 }
0x1c80   :  { %v2264_v3 = vpop.f32.mrf.mxu0 }
0x1c81   :  { %v2265_v28 = vadd.f32 %v2264_v3, %v5763_v18 }
0x1c83   :  { %3884 = vmatmul.msk.bf16.vlgmr.msra.gmra.mxu2 %vm6209_vm3, %v5659_v13  ;;  %2274 = vrot.lane.b32.xlu2 %v2265_v28, %s4799_s26 }
0x1c84   :  { %2555 = vmatpush.bf16.msra.mxu2 %v5740_v40 }
0x1c88   :  { %v2266_v41 = vpop.f32.mrf.mxu0  ;;  %2556 = vmatpush.bf16.msra.mxu2 %v5747_v50 }
0x1c89   :  { %v5809_v41 = vld [vmem:[#allocation27] sm:$0x1] }
0x1cdd   :  { %v2275_v19 = vpop.permute.xlu2 %2274 }
0x1cf6   :  { %v2205_v8 = vpop.f32.mrf.mxu2  ;;  %v5773_v11 = vpop.f32.mrf.mxu3 }
0x1cf7   :  { %v2234_v20 = vadd.f32 %v2233_v52, %v2205_v8 }
0x1cf9   :  { %v2237_v59 = vadd.f32 %v2234_v20, %v5771_v53 }
0x1cfb   :  { %v2268_v26 = vadd.f32 %v2265_v28, %v2237_v59 }
0x1cfd   :  { %v2269_v15 = vmul.f32 0.5, %v2268_v26 }
0x1cfe   :  { %v2207_v13 = vpop.f32.mrf.mxu2  ;;  %v2404_v16 = vpop.f32.mrf.mxu3 }
0x1cff   :  { %4154 = vtanh.f32 %v2269_v15 }
0x1d05   :  { %v4155_v34 = vpop.eup %4154 }
0x1d06   :  { %v2349_v33 = vpop.f32.mrf.mxu2  ;;  %v2271_v35 = vadd.f32 1.0, %v4155_v34 }
0x1d07   :  { %v2350_v21 = vadd.f32 %v2349_v33, %v5776_v32 }
0x1d08   :  { %v2272_v12 = vmul.f32 0.5, %v2271_v35 }
0x1d09   :  { %2359 = vrot.lane.b32.xlu0 %v2350_v21, %s4799_s26 }
0x1d0a   :  { %v2277_v37 = vmul.f32 %v2275_v19, %v2272_v12  ;;  %v2284_v24 = vsub.f32 1.0, %v2272_v12 }
0x1d0c   :  { %2279 = vrot.lane.b32.xlu2 %v2277_v37, %s4799_s26 }
0x1d0e   :  { %v2351_v23 = vpop.f32.mrf.mxu2 }
0x1d66   :  { %v2280_v60 = vpop.permute.xlu2 %2279 }
0x1d67   :  { %v2282_v36 = vadd.f32 %v2280_v60, %v2237_v59 }
0x1d69   :  { %4156 = vtanh.f32 %v2282_v36 }
0x1d6f   :  { %v4157_v38 = vpop.eup %4156 }
0x1d70   :  { %2286 = vrot.lane.b32.xlu2 %v4157_v38, %s4820_s23 }
0x1d78   :  { %2291 = vrot.lane.b32.xlu2 %v2290_v51, %s4820_s23 }
0x1d7b   :  { %v2360_v16 = vpop.permute.xlu0 %2359 }
0x1dca   :  { %v2287_v48 = vpop.permute.xlu2 %2286 }
0x1dcb   :  { %v2289_v63 = vmul.f32 %v2287_v48, %v2284_v24 }
0x1dd2   :  { %v2292_v54 = vpop.permute.xlu2 %2291 }
0x1dd3   :  { %v2294_v0 = vmul.f32 %v2292_v54, %v2272_v12 }
0x1dd5   :  { %v5796_v2 = vadd.f32 %v2294_v0, %v2289_v63 }
0x1dd7   :  { %v2296_v3 = vpack.c.bf16 %v5796_v2, %v5796_v2 }
0x1dd9   :  { %2298 = vrot.lane.b32.xlu2 %v2296_v3, %s4820_s23 }
0x1e33   :  { %v5803_v28 = vpop.permute.xlu2 %2298 }
0x1e34   :  { %3875 = vmatmul.msk.bf16.vlgmr.msrb.gmra.mxu1 %vm6210_vm1, %v5803_v28 }
0x1e35   :  { %2629 = vmatpush.bf16.msrb.mxu1 %v5784_v10 }
0x1e39   :  { %2630 = vmatpush.bf16.msrb.mxu1 %v5787_v45 }
0x1eb1   :  { %v2324_v52 = vpop.f32.mrf.mxu1 }
0x1eb2   :  { %v2325_v14 = vadd.f32 %v2324_v52, %v5809_v41 }
0x1eb4   :  { %v2353_v8 = vadd.f32 %v2350_v21, %v2325_v14 }
0x1eb6   :  { %v2354_v20 = vmul.f32 0.5, %v2353_v8 }
0x1eb8   :  { %4158 = vtanh.f32 %v2354_v20 }
0x1eb9   :  { %v2326_v59 = vpop.f32.mrf.mxu1 }
0x1ebe   :  { %v4159_v26 = vpop.eup %4158 }
0x1ebf   :  { %v2356_v15 = vadd.f32 1.0, %v4159_v26 }
0x1ec1   :  { %v2357_v13 = vmul.f32 0.5, %v2356_v15 }
0x1ec3   :  { %v2362_v34 = vmul.f32 %v2360_v16, %v2357_v13  ;;  %v2369_v19 = vsub.f32 1.0, %v2357_v13 }
0x1ec5   :  { %2364 = vrot.lane.b32.xlu1 %v2362_v34, %s4799_s26 }
0x1f37   :  { %v2365_v33 = vpop.permute.xlu1 %2364 }
0x1f38   :  { %v2367_v35 = vadd.f32 %v2365_v33, %v2325_v14 }
0x1f3a   :  { %4160 = vtanh.f32 %v2367_v35 }
0x1f40   :  { %v4161_v12 = vpop.eup %4160 }
0x1f41   :  { %2371 = vrot.lane.b32.xlu2 %v4161_v12, %s4820_s23 }
0x1f49   :  { %2375 = vrot.lane.b32.xlu2 %v2290_v51, %s4799_s26  ;;  %v5831_v51 = vld [vmem:[%s4966_s13] sm:$0x1] }
0x1f9b   :  { %v2372_v21 = vpop.permute.xlu2 %2371 }
0x1f9c   :  { %v2374_v23 = vmul.f32 %v2372_v21, %v2369_v19 }
0x1fa3   :  { %v2376_v37 = vpop.permute.xlu2 %2375 }
0x1fa4   :  { %v2378_v60 = vmul.f32 %v2376_v37, %v2357_v13 }
0x1fa6   :  { %v5815_v36 = vadd.f32 %v2378_v60, %v2374_v23 }
0x1fa8   :  { %v2380_v38 = vpack.c.bf16 %v5815_v36, %v5815_v36 }
0x1faa   :  { %2407 = vrot.lane.b32.xlu0 %v2380_v38, %s4820_s23 }
0x201c   :  { %v5820_v48 = vpop.permute.xlu0 %2407 }
0x201d   :  { %3902 = vmatmul.msk.bf16.vlgmr.msrb.gmra.mxu0 %vm6211_vm4, %v5820_v48  ;;  %3907 = vmatmul.msk.bf16.vlgmr.msrb.gmra.mxu2 %vm6212_vm5, %v5820_v48  ;;  %vm6216_vm5 = vmmov %vm6211_vm4 }
0x201e   :  { %2585 = vmatpush.bf16.msrb.mxu0 %v5717_v31  ;;  %2642 = vmatpush.bf16.msrb.mxu2 %v5753_v22 }
0x2022   :  { %2586 = vmatpush.bf16.msrb.mxu0 %v5720_v58  ;;  %2643 = vmatpush.bf16.msrb.mxu2 %v5756_v62 }
0x209a   :  { %v2433_v24 = vpop.f32.mrf.mxu0 }
0x209b   :  { %v2434_v54 = vadd.f32 %v2433_v24, %v5773_v11 }
0x209d   :  { %v2437_v63 = vadd.f32 %v2434_v54, %v5831_v51 }
0x209f   :  { %2438 = vst [vmem:[%s4971_s20] sm:$0x1] %v2437_v63  ;;  %v2441_v0 = vsel %vm2440_vm7, %v2437_v63, -inf }
0x20a0   :  { %v2479_v3 = vpop.f32.mrf.mxu2  ;;  %2442 = vmax.xlane.f32.xlu1 %v2441_v0 }
0x20a1   :  { %v2483_v52 = vperm.slane %v2479_v3, 0 }
0x20a2   :  { %v2435_v14 = vpop.f32.mrf.mxu0 }
0x20a3   :  { %v2484_v8 = vadd.f32 %v2483_v52, %v5669_v1 }
0x20a5   :  { %4162 = vtanh.f32 %v2484_v8 }
0x20a8   :  { %v2481_v20 = vpop.f32.mrf.mxu2 }
0x20ab   :  { %v4163_v59 = vpop.eup %4162 }
0x20ac   :  { %v2486_v26 = vpack.c.bf16 %v4163_v59, %v4163_v59 }
0x20ae   :  { %v2488_v15 = vsel %vm6213_vm8, %v2486_v26, 0  ;;  %vm6217_vm8 = vmmov %vm6211_vm4 }
0x20af   :  { %2497 = vmatpush.bf16.xpose.msrb.mxu3 %v2488_v15 }
0x20b6   :  { %3908 = vmatmul.msk.bf16.vlgmr.msrb.gmra.mxu3 %vm6214_vm9, %v5673_v4  ;;  %vm6218_vm9 = vmmov %vm6211_vm4 }
0x20b7   :  { %2571 = vmatpush.bf16.msra.mxu3 %v5723_v46 }
0x20bb   :  { %2572 = vmatpush.bf16.msra.mxu3 %v5737_v39 }
0x20bf   :  { %2680 = vmatpush.bf16.msrb.mxu3 %v5742_v44 }
0x20c3   :  { %2681 = vmatpush.bf16.msrb.mxu3 %v5749_v61 }
0x2113   :  { %v2443_v11 = vpop.xlane.xlu1 %2442 }
0x2114   :  { %vm2444_vm10 = vcmp.ge.f32.partialorder %v2437_v63, %v2443_v11 }
0x2115   :  { %v2445_v34 = vsel %vm2444_vm10, %v5710_v29, 128.0  ;;  %vm6219_vm10 = vmmov %vm6211_vm4 }
0x2116   :  { %v2446_v35 = vsel %vm2440_vm7, %v2445_v34, inf }
0x2139   :  { %v2499_v13 = vpop.f32.mrf.mxu3 }
0x213a   :  { %v2503_v16 = vsel %vm2133_vm6, %v2499_v13, -inf }
0x213b   :  { %2504 = vmax.xlane.f32.xlu2 %v2503_v16 }
0x2141   :  { %v2501_v33 = vpop.f32.mrf.mxu3 }
0x2143   :  { %2447 = vmin.xlane.f32.xlu2 %v2446_v35 }
0x21ae   :  { %v2505_v12 = vpop.xlane.xlu2 %2504 }
0x21af   :  { %v2506_v21 = vsub.f32 %v2499_v13, %v2505_v12 }
0x21b1   :  { %v2507_v19 = vmul.f32 1.442695, %v2506_v21 }
0x21b3   :  { %4164 = vpow2.f32 %v2507_v19 }
0x21b6   :  { %v2448_v37 = vpop.xlane.xlu2 %2447 }
0x21b7   :  { %vm2449_vm11 = vcmp.eq.f32.partialorder %v5710_v29, %v2448_v37  ;;  %vm2466_vm14 = vcmp.eq.f32.partialorder %v2448_v37, 2.0 }
0x21b8   :  { %vm3904_vm12 = vmpackc.low %vm2449_vm11, %vm2449_vm11  ;;  %v5860_v52 = vsel %vm2466_vm14, 1.0, %v4822_v30 }
0x21b9   :  { %v4165_v23 = vpop.eup %4164  ;;  %3905 = vmatmul.msk.bf16.vlgmr.msra.gmra.mxu1 %vm3904_vm12, %v4821_v5  ;;  %v2469_v59 = vmax.f32 %v5860_v52, 0.0  ;;  %vm6220_vm11 = vmmov %vm6211_vm4 }
0x21ba   :  { %v2509_v60 = vsel %vm2133_vm6, %v4165_v23, 0.0  ;;  %2724 = vmatpush.bf16.msra.mxu1 %v5679_v49  ;;  %vm6221_vm12 = vmmov %vm6211_vm4 }
0x21bb   :  { %2510 = vadd.xlane.f32.xlu0 %v2509_v60  ;;  %v5866_v34 = vsub.f32 1.0, %v2469_v59  ;;  %vm6222_vm14 = vmmov %vm6211_vm4 }
0x21be   :  { %2725 = vmatpush.bf16.msra.mxu1 %v5683_v55 }
0x21c2   :  { %2726 = vmatpush.bf16.msra.mxu1 %v5687_v6 }
0x21c6   :  { %2727 = vmatpush.bf16.msra.mxu1 %v5691_v7 }
0x21ca   :  { %2728 = vmatpush.bf16.msra.mxu1 %v5695_v42 }
0x21ce   :  { %2729 = vmatpush.bf16.msra.mxu1 %v5699_v56 }
0x21d2   :  { %2730 = vmatpush.bf16.msra.mxu1 %v5703_v47 }
0x21d6   :  { %2731 = vmatpush.bf16.msra.mxu1 %v5708_v27 }
0x222e   :  { %v2511_v38 = vpop.xlane.xlu0 %2510 }
0x222f   :  { %4166 = vrcp.f32 %v2511_v38  ;;  %v2523_v14 = vand.u32 2147483648, %v2511_v38  ;;  %v2521_v20 = vand.u32 2147483647, %v2511_v38  ;;  %vm2517_vm2 = vweird.f32 %v2511_v38 }
0x2231   :  { %v2524_v15 = vor.u32 1.1754944e-38, %v2523_v14  ;;  %vm2522_vm1 = vcmp.eq.f32.partialorder %v2521_v20, 8.507059e+37 }
0x2235   :  { %v4167_v24 = vpop.eup %4166 }
0x2236   :  { %v2513_v54 = vmul.f32 %v4167_v24, %v2511_v38  ;;  %v2462_v63 = vpop.f32.mrf.mxu1  ;;  %vm2518_vm0 = vweird.f32 %v4167_v24 }
0x2237   :  { %v2544_v0 = vpack.c.bf16 %v2462_v63, %v2462_v63  ;;  %vm2519_vm3 = vmor %vm2517_vm2, %vm2518_vm0 }
0x2238   :  { %v2514_v3 = vsub.f32 1.0, %v2513_v54 }
0x2239   :  { %3911 = vmatmul.msk.bf16.vlgmr.msra.gmra.mxu3 %vm6215_vm15, %v2544_v0  ;;  %vm6223_vm15 = vmmov %vm6211_vm4 }
0x223a   :  { %v2515_v8 = vmul.f32 %v4167_v24, %v2514_v3 }
0x223c   :  { %v2516_v26 = vadd.f32 %v4167_v24, %v2515_v8 }
0x223e   :  { %v2520_v11 = vsel %vm2519_vm3, %v4167_v24, %v2516_v26  ;;  %v2464_v13 = vpop.f32.mrf.mxu1 }
0x223f   :  { %v2525_v16 = vsel %vm2522_vm1, %v2524_v15, %v2520_v11 }
0x2240   :  { %v2526_v33 = vmul.f32 %v4165_v23, %v2525_v16 }
0x2242   :  { %v2527_v35 = vpack.c.bf16 %v2526_v33, %v2526_v33  ;;  %v2710_v12 = vmul.f32 %v5866_v34, %v2526_v33 }
0x2244   :  { %2711 = vst.msk [vmem:[%s4976_s9 + $0x1] sm:$0x1] %vm2133_vm6, %v2710_v12  ;;  %3909 = vmatmul.msk.bf16.vlgmr.msra.gmra.mxu0 %vm2159_vm13, %v2527_v35 }
0x2245   :  { %2699 = vmatpush.bf16.msra.mxu0 %v5726_v9 }
0x2249   :  { %2700 = vmatpush.bf16.msra.mxu0 %v5732_v25 }
0x2254   :  { %3912 = vmatmul.msk.bf16.vlgmr.msrb.gmra.mxu0 %vm6211_vm4, %v5803_v28 }
0x2255   :  { %2809 = vmatpush.bf16.msrb.mxu0 %v5665_v57 }
0x22bc   :  { %v2574_v21 = vpop.f32.mrf.mxu3 }
0x22c1   :  { %v2540_v19 = vpop.f32.mrf.mxu0 }
0x22c2   :  { %v2545_v37 = vpack.c.bf16 %v2540_v19, %v2540_v19 }
0x22c4   :  { %3910 = vmatmul.msk.bf16.vlgmr.msra.gmra.mxu2 %vm6216_vm5, %v2545_v37  ;;  %v2576_v23 = vpop.f32.mrf.mxu3  ;;  %3915 = vmatmul.msk.bf16.vlgmr.msrb.gmra.mxu3 %vm6217_vm8, %v2545_v37 }
0x22c5   :  { %2747 = vmatpush.bf16.msra.mxu2 %v5641_v17 }
0x22c9   :  { %v2542_v60 = vpop.f32.mrf.mxu0  ;;  %2748 = vmatpush.bf16.msra.mxu2 %v5654_v43 }
0x22d1   :  { %v2588_v38 = vpop.f32.mrf.mxu0 }
0x22d2   :  { %v2589_v24 = vadd.f32 %v2588_v38, %v5763_v18 }
0x22d4   :  { %3914 = vmatmul.msk.bf16.vlgmr.msrb.gmra.mxu2 %vm6218_vm9, %v5820_v48  ;;  %2598 = vrot.lane.b32.xlu1 %v2589_v24, %s4799_s26 }
0x22d5   :  { %2826 = vmatpush.bf16.msrb.mxu2 %v5740_v40 }
0x22d9   :  { %v2590_v28 = vpop.f32.mrf.mxu0  ;;  %2827 = vmatpush.bf16.msrb.mxu2 %v5747_v50 }
0x2346   :  { %v2599_v33 = vpop.permute.xlu1 %2598 }
0x2347   :  { %v2558_v54 = vpop.f32.mrf.mxu2  ;;  %v5887_v63 = vpop.f32.mrf.mxu3 }
0x2348   :  { %v2575_v0 = vadd.f32 %v2574_v21, %v2558_v54 }
0x234a   :  { %v2578_v3 = vadd.f32 %v2575_v0, %v5771_v53 }
0x234c   :  { %v2592_v14 = vadd.f32 %v2589_v24, %v2578_v3 }
0x234e   :  { %v2593_v8 = vmul.f32 0.5, %v2592_v14 }
0x234f   :  { %v2560_v20 = vpop.f32.mrf.mxu2  ;;  %v2685_v26 = vpop.f32.mrf.mxu3 }
0x2350   :  { %4168 = vtanh.f32 %v2593_v8 }
0x2356   :  { %v4169_v15 = vpop.eup %4168 }
0x2357   :  { %v2645_v48 = vpop.f32.mrf.mxu2  ;;  %v2595_v11 = vadd.f32 1.0, %v4169_v15 }
0x2358   :  { %v2646_v13 = vadd.f32 %v2645_v48, %v5776_v32 }
0x2359   :  { %v2596_v16 = vmul.f32 0.5, %v2595_v11 }
0x235a   :  { %2655 = vrot.lane.b32.xlu1 %v2646_v13, %s4799_s26 }
0x235b   :  { %v2601_v35 = vmul.f32 %v2599_v33, %v2596_v16  ;;  %v2608_v23 = vsub.f32 1.0, %v2596_v16  ;;  %v2614_v38 = vmul.f32 %v2596_v16, %v5796_v2 }
0x235d   :  { %2603 = vrot.lane.b32.xlu0 %v2601_v35, %s4799_s26 }
0x235f   :  { %v2647_v12 = vpop.f32.mrf.mxu2 }
0x23cc   :  { %v2656_v11 = vpop.permute.xlu1 %2655 }
0x23cf   :  { %v2604_v21 = vpop.permute.xlu0 %2603 }
0x23d0   :  { %v2606_v19 = vadd.f32 %v2604_v21, %v2578_v3 }
0x23d2   :  { %4170 = vtanh.f32 %v2606_v19 }
0x23d8   :  { %v4171_v37 = vpop.eup %4170 }
0x23d9   :  { %2610 = vrot.lane.b32.xlu2 %v4171_v37, %s4820_s23 }
0x2433   :  { %v2611_v60 = vpop.permute.xlu2 %2610 }
0x2434   :  { %v2613_v24 = vmul.f32 %v2611_v60, %v2608_v23 }
0x2436   :  { %v5895_v28 = vadd.f32 %v2614_v38, %v2613_v24 }
0x2438   :  { %v2616_v54 = vpack.c.bf16 %v5895_v28, %v5895_v28 }
0x243a   :  { %2618 = vrot.lane.b32.xlu0 %v2616_v54, %s4820_s23 }
0x24ac   :  { %v5900_v0 = vpop.permute.xlu0 %2618 }
0x24ad   :  { %3913 = vmatmul.msk.bf16.vlgmr.msrb.gmra.mxu1 %vm6219_vm10, %v5900_v0 }
0x24ae   :  { %2900 = vmatpush.bf16.msrb.mxu1 %v5784_v10 }
0x24b2   :  { %2901 = vmatpush.bf16.msrb.mxu1 %v5787_v45 }
0x252a   :  { %v2632_v3 = vpop.f32.mrf.mxu1 }
0x252b   :  { %v2633_v2 = vadd.f32 %v2632_v3, %v5809_v41 }
0x252d   :  { %v2649_v14 = vadd.f32 %v2646_v13, %v2633_v2 }
0x252f   :  { %v2650_v8 = vmul.f32 0.5, %v2649_v14 }
0x2531   :  { %4172 = vtanh.f32 %v2650_v8 }
0x2532   :  { %v2634_v20 = vpop.f32.mrf.mxu1 }
0x2537   :  { %v4173_v26 = vpop.eup %4172 }
0x2538   :  { %v2652_v15 = vadd.f32 1.0, %v4173_v26 }
0x253a   :  { %v2653_v48 = vmul.f32 0.5, %v2652_v15 }
0x253c   :  { %v2658_v16 = vmul.f32 %v2656_v11, %v2653_v48  ;;  %v2665_v21 = vsub.f32 1.0, %v2653_v48  ;;  %v2671_v13 = vmul.f32 %v2653_v48, %v5815_v36 }
0x253e   :  { %2660 = vrot.lane.b32.xlu2 %v2658_v16, %s4799_s26 }
0x2598   :  { %v2661_v33 = vpop.permute.xlu2 %2660 }
0x2599   :  { %v2663_v35 = vadd.f32 %v2661_v33, %v2633_v2 }
0x259b   :  { %4174 = vtanh.f32 %v2663_v35 }
0x25a1   :  { %v4175_v12 = vpop.eup %4174 }
0x25a2   :  { %2667 = vrot.lane.b32.xlu0 %v4175_v12, %s4820_s23 }
0x2614   :  { %v2668_v19 = vpop.permute.xlu0 %2667 }
0x2615   :  { %v2670_v37 = vmul.f32 %v2668_v19, %v2665_v21 }
0x2617   :  { %v5910_v23 = vadd.f32 %v2671_v13, %v2670_v37 }
0x2619   :  { %v2673_v60 = vpack.c.bf16 %v5910_v23, %v5910_v23 }
0x261b   :  { %2688 = vrot.lane.b32.xlu1 %v2673_v60, %s4820_s23 }
0x268d   :  { %v5915_v38 = vpop.permute.xlu1 %2688 }
0x268e   :  { %3916 = vmatmul.msk.bf16.vlgmr.msra.gmra.mxu0 %vm6220_vm11, %v5915_v38  ;;  %3921 = vmatmul.msk.bf16.vlgmr.msra.gmra.mxu2 %vm6221_vm12, %v5915_v38  ;;  %vm6224_vm11 = vmmov %vm6211_vm4 }
0x268f   :  { %2856 = vmatpush.bf16.msra.mxu0 %v5717_v31  ;;  %2913 = vmatpush.bf16.msra.mxu2 %v5753_v22  ;;  %vm6225_vm12 = vmmov %vm6211_vm4 }
0x2693   :  { %2857 = vmatpush.bf16.msra.mxu0 %v5720_v58  ;;  %2914 = vmatpush.bf16.msra.mxu2 %v5756_v62 }
0x270b   :  { %v2702_v36 = vpop.f32.mrf.mxu0 }
0x270c   :  { %v2703_v24 = vadd.f32 %v2702_v36, %v5887_v63 }
0x270e   :  { %v2706_v54 = vadd.f32 %v2703_v24, %v5831_v51 }
0x2710   :  { %v2708_v3 = vmul.f32 %v5866_v34, %v2706_v54  ;;  %v2712_v2 = vsel %vm2440_vm7, %v2706_v54, -inf }
0x2711   :  { %v2750_v14 = vpop.f32.mrf.mxu2  ;;  %2713 = vmax.xlane.f32.xlu0 %v2712_v2 }
0x2712   :  { %2709 = vst [vmem:[%s4971_s20 + $0x1] sm:$0x1] %v2708_v3  ;;  %v2754_v8 = vperm.slane %v2750_v14, 0 }
0x2713   :  { %v2704_v20 = vpop.f32.mrf.mxu0 }
0x2714   :  { %v2755_v26 = vadd.f32 %v2754_v8, %v5669_v1 }
0x2716   :  { %4176 = vtanh.f32 %v2755_v26 }
0x2719   :  { %v2752_v15 = vpop.f32.mrf.mxu2 }
0x271c   :  { %v4177_v48 = vpop.eup %4176 }
0x271d   :  { %v2757_v11 = vpack.c.bf16 %v4177_v48, %v4177_v48 }
0x271f   :  { %v2759_v16 = vsel %vm6222_vm14, %v2757_v11, 0  ;;  %vm6226_vm14 = vmmov %vm6211_vm4 }
0x2720   :  { %2768 = vmatpush.bf16.xpose.msra.mxu3 %v2759_v16 }
0x2727   :  { %3922 = vmatmul.msk.bf16.vlgmr.msra.gmra.mxu3 %vm6223_vm15, %v5673_v4  ;;  %vm6227_vm15 = vmmov %vm6211_vm4 }
0x2728   :  { %2842 = vmatpush.bf16.msrb.mxu3 %v5723_v46 }
0x272c   :  { %2843 = vmatpush.bf16.msrb.mxu3 %v5737_v39 }
0x2730   :  { %2951 = vmatpush.bf16.msra.mxu3 %v5742_v44 }
0x2734   :  { %2952 = vmatpush.bf16.msra.mxu3 %v5749_v61 }
0x2784   :  { %v2714_v34 = vpop.xlane.xlu0 %2713 }
0x2785   :  { %vm2715_vm0 = vcmp.ge.f32.partialorder %v2706_v54, %v2714_v34 }
0x2786   :  { %v2716_v35 = vsel %vm2715_vm0, %v5710_v29, 128.0  ;;  %vm6228_vm0 = vmmov %vm6211_vm4 }
0x2787   :  { %v2717_v21 = vsel %vm2440_vm7, %v2716_v35, inf }
0x27aa   :  { %v2770_v63 = vpop.f32.mrf.mxu3 }
0x27ab   :  { %v2774_v33 = vsel %vm2133_vm6, %v2770_v63, -inf }
0x27ac   :  { %2775 = vmax.xlane.f32.xlu2 %v2774_v33 }
0x27b2   :  { %v2772_v12 = vpop.f32.mrf.mxu3 }
0x27b4   :  { %2718 = vmin.xlane.f32.xlu2 %v2717_v21 }
0x281f   :  { %v2776_v19 = vpop.xlane.xlu2 %2775 }
0x2820   :  { %v2777_v13 = vsub.f32 %v2770_v63, %v2776_v19 }
0x2822   :  { %v2778_v37 = vmul.f32 1.442695, %v2777_v13 }
0x2824   :  { %4178 = vpow2.f32 %v2778_v37 }
0x2827   :  { %v2719_v4 = vpop.xlane.xlu2 %2718 }
0x2828   :  { %vm2720_vm2 = vcmp.eq.f32.partialorder %v5710_v29, %v2719_v4  ;;  %vm2737_vm1 = vcmp.eq.f32.partialorder %v2719_v4, 2.0 }
0x2829   :  { %vm3918_vm3 = vmpackc.low %vm2720_vm2, %vm2720_vm2 }
0x282a   :  { %v4179_v60 = vpop.eup %4178  ;;  %3919 = vmatmul.msk.bf16.vlgmr.msra.gmra.mxu1 %vm3918_vm3, %v4821_v5  ;;  %vm6229_vm2 = vmmov %vm6228_vm0 }
0x282b   :  { %v2780_v36 = vsel %vm2133_vm6, %v4179_v60, 0.0  ;;  %2995 = vmatpush.bf16.msra.mxu1 %v5679_v49  ;;  %vm6230_vm3 = vmmov %vm6228_vm0 }
0x282c   :  { %2781 = vadd.xlane.f32.xlu1 %v2780_v36 }
0x282f   :  { %2996 = vmatpush.bf16.msra.mxu1 %v5683_v55 }
0x2833   :  { %2997 = vmatpush.bf16.msra.mxu1 %v5687_v6  ;;  %v3920_v6 = vsel %vm2737_vm1, 1.0, %v4822_v30  ;;  %vm6231_vm1 = vmmov %vm6228_vm0 }
0x2837   :  { %2998 = vmatpush.bf16.msra.mxu1 %v5691_v7 }
0x283b   :  { %2999 = vmatpush.bf16.msra.mxu1 %v5695_v42 }
0x283f   :  { %3000 = vmatpush.bf16.msra.mxu1 %v5699_v56  ;;  %v5956_v56 = vmax.f32 %v2469_v59, %v3920_v6 }
0x2841   :  { %v2978_v15 = vsub.f32 1.0, %v5956_v56 }
0x2843   :  { %3001 = vmatpush.bf16.msra.mxu1 %v5703_v47 }
0x2847   :  { %3002 = vmatpush.bf16.msra.mxu1 %v5708_v27 }
0x289f   :  { %v2782_v24 = vpop.xlane.xlu1 %2781 }
0x28a0   :  { %4180 = vrcp.f32 %v2782_v24  ;;  %v2794_v14 = vand.u32 2147483648, %v2782_v24  ;;  %v2792_v42 = vand.u32 2147483647, %v2782_v24  ;;  %vm2788_vm8 = vweird.f32 %v2782_v24 }
0x28a2   :  { %v2795_v27 = vor.u32 1.1754944e-38, %v2794_v14  ;;  %vm2793_vm10 = vcmp.eq.f32.partialorder %v2792_v42, 8.507059e+37 }
0x28a6   :  { %v4181_v54 = vpop.eup %4180 }
0x28a7   :  { %v2784_v49 = vmul.f32 %v4181_v54, %v2782_v24  ;;  %v2733_v3 = vpop.f32.mrf.mxu1  ;;  %vm2789_vm5 = vweird.f32 %v4181_v54 }
0x28a8   :  { %v2815_v2 = vpack.c.bf16 %v2733_v3, %v2733_v3  ;;  %vm2790_vm9 = vmor %vm2788_vm8, %vm2789_vm5 }
0x28a9   :  { %v2785_v55 = vsub.f32 1.0, %v2784_v49 }
0x28aa   :  { %3925 = vmatmul.msk.bf16.vlgmr.msrb.gmra.mxu3 %vm6211_vm4, %v2815_v2  ;;  %vm6232_vm4 = vmmov %vm6228_vm0 }
0x28ab   :  { %v2786_v7 = vmul.f32 %v4181_v54, %v2785_v55 }
0x28ad   :  { %v2787_v47 = vadd.f32 %v4181_v54, %v2786_v7 }
0x28af   :  { %v2791_v8 = vsel %vm2790_vm9, %v4181_v54, %v2787_v47  ;;  %v2735_v20 = vpop.f32.mrf.mxu1 }
0x28b0   :  { %v2796_v26 = vsel %vm2793_vm10, %v2795_v27, %v2791_v8  ;;  %vm6233_vm10 = vmmov %vm6228_vm0 }
0x28b1   :  { %v2797_v48 = vmul.f32 %v4179_v60, %v2796_v26 }
0x28b3   :  { %v2798_v11 = vpack.c.bf16 %v2797_v48, %v2797_v48  ;;  %v2981_v16 = vmul.f32 %v2978_v15, %v2797_v48 }
0x28b5   :  { %2982 = vst.msk [vmem:[%s4976_s9 + $0x2] sm:$0x1] %vm2133_vm6, %v2981_v16  ;;  %3923 = vmatmul.msk.bf16.vlgmr.msrb.gmra.mxu0 %vm2159_vm13, %v2798_v11 }
0x28b6   :  { %2970 = vmatpush.bf16.msrb.mxu0 %v5726_v9 }
0x28ba   :  { %2971 = vmatpush.bf16.msrb.mxu0 %v5732_v25 }
0x28c5   :  { %3926 = vmatmul.msk.bf16.vlgmr.msra.gmra.mxu0 %vm6224_vm11, %v5900_v0 }
0x28c6   :  { %3080 = vmatpush.bf16.msra.mxu0 %v5665_v57 }
0x292d   :  { %v2845_v52 = vpop.f32.mrf.mxu3 }
0x2932   :  { %v2811_v59 = vpop.f32.mrf.mxu0 }
0x2933   :  { %v2816_v34 = vpack.c.bf16 %v2811_v59, %v2811_v59 }
0x2935   :  { %3924 = vmatmul.msk.bf16.vlgmr.msrb.gmra.mxu2 %vm6225_vm12, %v2816_v34  ;;  %v2847_v63 = vpop.f32.mrf.mxu3  ;;  %3929 = vmatmul.msk.bf16.vlgmr.msra.gmra.mxu3 %vm6226_vm14, %v2816_v34 }
0x2936   :  { %3018 = vmatpush.bf16.msrb.mxu2 %v5641_v17 }
0x293a   :  { %v2813_v33 = vpop.f32.mrf.mxu0  ;;  %3019 = vmatpush.bf16.msrb.mxu2 %v5654_v43 }
0x2942   :  { %v2859_v9 = vpop.f32.mrf.mxu0 }
0x2943   :  { %v2860_v25 = vadd.f32 %v2859_v9, %v5763_v18 }
0x2945   :  { %3928 = vmatmul.msk.bf16.vlgmr.msra.gmra.mxu2 %vm6227_vm15, %v5915_v38  ;;  %2869 = vrot.lane.b32.xlu0 %v2860_v25, %s4799_s26 }
0x2946   :  { %3097 = vmatpush.bf16.msra.mxu2 %v5740_v40 }
0x294a   :  { %v2861_v0 = vpop.f32.mrf.mxu0  ;;  %3098 = vmatpush.bf16.msra.mxu2 %v5747_v50 }
0x29b7   :  { %v2870_v36 = vpop.permute.xlu0 %2869 }
0x29b8   :  { %v2829_v35 = vpop.f32.mrf.mxu2  ;;  %v5979_v12 = vpop.f32.mrf.mxu3 }
0x29b9   :  { %v2846_v17 = vadd.f32 %v2845_v52, %v2829_v35 }
0x29bb   :  { %v2849_v21 = vadd.f32 %v2846_v17, %v5771_v53 }
0x29bd   :  { %v2863_v43 = vadd.f32 %v2860_v25, %v2849_v21 }
0x29bf   :  { %v2864_v19 = vmul.f32 0.5, %v2863_v43 }
0x29c0   :  { %v2831_v13 = vpop.f32.mrf.mxu2  ;;  %v2956_v18 = vpop.f32.mrf.mxu3 }
0x29c1   :  { %4182 = vtanh.f32 %v2864_v19 }
0x29c7   :  { %v4183_v37 = vpop.eup %4182 }
0x29c8   :  { %v2916_v38 = vpop.f32.mrf.mxu2  ;;  %v2866_v4 = vadd.f32 1.0, %v4183_v37 }
0x29c9   :  { %v2917_v24 = vadd.f32 %v2916_v38, %v5776_v32 }
0x29ca   :  { %v2867_v60 = vmul.f32 0.5, %v2866_v4 }
0x29cc   :  { %v2872_v40 = vmul.f32 %v2870_v36, %v2867_v60  ;;  %v2879_v3 = vsub.f32 1.0, %v2867_v60  ;;  %v2885_v55 = vmul.f32 %v2867_v60, %v5895_v28  ;;  %v4220_v36 = vld [vmem:[%s6202_s29 + $0x30] sm:$0xff] }
0x29ce   :  { %2874 = vrot.lane.b32.xlu1 %v2872_v40, %s4799_s26  ;;  %v4221_v40 = vld [vmem:[%s6202_s29 + $0x28] sm:$0xff] }
0x29d0   :  { %v2918_v50 = vpop.f32.mrf.mxu2 }
0x29d1   :  { %v4222_v50 = vld [vmem:[%s6202_s29 + $0x20] sm:$0xff] }
0x29d6   :  { %2926 = vrot.lane.b32.xlu1 %v2917_v24, %s4799_s26 }
0x2a40   :  { %v2875_v54 = vpop.permute.xlu1 %2874 }
0x2a41   :  { %v2877_v53 = vadd.f32 %v2875_v54, %v2849_v21  ;;  %v4224_v54 = vld [vmem:[%s6202_s29 + $0x10] sm:$0xff] }
0x2a43   :  { %4184 = vtanh.f32 %v2877_v53  ;;  %v4225_v53 = vld [vmem:[%s6202_s29 + $0x8] sm:$0xff] }
0x2a48   :  { %v2927_v11 = vpop.permute.xlu1 %2926 }
0x2a49   :  { %v4185_v49 = vpop.eup %4184 }
0x2a4a   :  { %2881 = vrot.lane.b32.xlu2 %v4185_v49, %s4820_s23  ;;  %v4226_v49 = vld [vmem:[%s6202_s29] sm:$0xff] }
0x2aa4   :  { %v2882_v2 = vpop.permute.xlu2 %2881 }
0x2aa5   :  { %v2884_v6 = vmul.f32 %v2882_v2, %v2879_v3 }
0x2aa7   :  { %v5987_v14 = vadd.f32 %v2885_v55, %v2884_v6 }
0x2aa9   :  { %v2887_v7 = vpack.c.bf16 %v5987_v14, %v5987_v14 }
0x2aab   :  { %2889 = vrot.lane.b32.xlu0 %v2887_v7, %s4820_s23 }
0x2b1d   :  { %v5992_v32 = vpop.permute.xlu0 %2889 }
0x2b1e   :  { %3927 = vmatmul.msk.bf16.vlgmr.msrb.gmra.mxu1 %vm6228_vm0, %v5992_v32 }
0x2b1f   :  { %3171 = vmatpush.bf16.msrb.mxu1 %v5784_v10 }
0x2b23   :  { %3172 = vmatpush.bf16.msrb.mxu1 %v5787_v45 }
0x2b9b   :  { %v2903_v42 = vpop.f32.mrf.mxu1 }
0x2b9c   :  { %v2904_v28 = vadd.f32 %v2903_v42, %v5809_v41 }
0x2b9e   :  { %v2920_v47 = vadd.f32 %v2917_v24, %v2904_v28  ;;  %v4223_v24 = vld [vmem:[%s6202_s29 + $0x18] sm:$0xff] }
0x2ba0   :  { %v2921_v27 = vmul.f32 0.5, %v2920_v47 }
0x2ba2   :  { %4186 = vtanh.f32 %v2921_v27 }
0x2ba3   :  { %v2905_v8 = vpop.f32.mrf.mxu1 }
0x2ba8   :  { %v4187_v20 = vpop.eup %4186 }
0x2ba9   :  { %v2923_v26 = vadd.f32 1.0, %v4187_v20 }
0x2bab   :  { %v2924_v48 = vmul.f32 0.5, %v2923_v26 }
0x2bad   :  { %v2929_v16 = vmul.f32 %v2927_v11, %v2924_v48  ;;  %v2936_v45 = vsub.f32 1.0, %v2924_v48  ;;  %v2942_v63 = vmul.f32 %v2924_v48, %v5910_v23 }
0x2baf   :  { %2931 = vrot.lane.b32.xlu0 %v2929_v16, %s4799_s26 }
0x2c21   :  { %v2932_v52 = vpop.permute.xlu0 %2931 }
0x2c22   :  { %v2934_v59 = vadd.f32 %v2932_v52, %v2904_v28 }
0x2c24   :  { %4188 = vtanh.f32 %v2934_v59 }
0x2c2a   :  { %v4189_v10 = vpop.eup %4188 }
0x2c2b   :  { %2938 = vrot.lane.b32.xlu2 %v4189_v10, %s4820_s23 }
0x2c85   :  { %v2939_v34 = vpop.permute.xlu2 %2938 }
0x2c86   :  { %v2941_v33 = vmul.f32 %v2939_v34, %v2936_v45 }
0x2c88   :  { %v6002_v9 = vadd.f32 %v2942_v63, %v2941_v33 }
0x2c8a   :  { %v2944_v25 = vpack.c.bf16 %v6002_v9, %v6002_v9 }
0x2c8c   :  { %2959 = vrot.lane.b32.xlu1 %v2944_v25, %s4820_s23 }
0x2cfe   :  { %v6007_v0 = vpop.permute.xlu1 %2959 }
0x2cff   :  { %3930 = vmatmul.msk.bf16.vlgmr.msrb.gmra.mxu0 %vm6229_vm2, %v6007_v0  ;;  %3935 = vmatmul.msk.bf16.vlgmr.msrb.gmra.mxu2 %vm6230_vm3, %v6007_v0  ;;  %vm6234_vm2 = vmmov %vm6231_vm1 }
0x2d00   :  { %3127 = vmatpush.bf16.msrb.mxu0 %v5717_v31  ;;  %3184 = vmatpush.bf16.msrb.mxu2 %v5753_v22  ;;  %vm6235_vm3 = vmmov %vm6231_vm1 }
0x2d04   :  { %3128 = vmatpush.bf16.msrb.mxu0 %v5720_v58  ;;  %3185 = vmatpush.bf16.msrb.mxu2 %v5756_v62 }
0x2d7c   :  { %v2973_v23 = vpop.f32.mrf.mxu0 }
0x2d7d   :  { %v2974_v35 = vadd.f32 %v2973_v23, %v5979_v12 }
0x2d7f   :  { %v2977_v17 = vadd.f32 %v2974_v35, %v5831_v51 }
0x2d81   :  { %v2979_v21 = vmul.f32 %v2978_v15, %v2977_v17  ;;  %v2983_v43 = vsel %vm2440_vm7, %v2977_v17, -inf  ;;  %v6027_v15 = vld [vmem:[#allocation33] sm:$0x1] }
0x2d82   :  { %v3021_v19 = vpop.f32.mrf.mxu2  ;;  %2984 = vmax.xlane.f32.xlu2 %v2983_v43 }
0x2d83   :  { %2980 = vst [vmem:[%s4971_s20 + $0x2] sm:$0x1] %v2979_v21  ;;  %v3025_v31 = vperm.slane %v3021_v19, 0 }
0x2d84   :  { %v2975_v13 = vpop.f32.mrf.mxu0 }
0x2d85   :  { %v3026_v22 = vadd.f32 %v3025_v31, %v5669_v1  ;;  %v4229_v13 = vld [vmem:[#allocation32 + $0x8] sm:$0xff] }
0x2d87   :  { %4190 = vtanh.f32 %v3026_v22 }
0x2d8a   :  { %v3023_v58 = vpop.f32.mrf.mxu2 }
0x2d8b   :  { %v4230_v58 = vld [vmem:[#allocation32] sm:$0xff] }
0x2d8d   :  { %v4191_v62 = vpop.eup %4190 }
0x2d8e   :  { %v3028_v18 = vpack.c.bf16 %v4191_v62, %v4191_v62 }
0x2d90   :  { %v3030_v12 = vsel %vm6231_vm1, %v3028_v18, 0  ;;  %v6069_v18 = vld [vmem:[#allocation23] sm:$0x1] }
0x2d91   :  { %3039 = vmatpush.bf16.xpose.msrb.mxu3 %v3030_v12 }
0x2d98   :  { %3936 = vmatmul.msk.bf16.vlgmr.msrb.gmra.mxu3 %vm6232_vm4, %v6027_v15  ;;  %vm6236_vm4 = vmmov %vm6231_vm1 }
0x2d99   :  { %3113 = vmatpush.bf16.msra.mxu3 %v5723_v46 }
0x2d9d   :  { %3114 = vmatpush.bf16.msra.mxu3 %v5737_v39 }
0x2da1   :  { %3222 = vmatpush.bf16.msrb.mxu3 %v5742_v44 }
0x2da5   :  { %3223 = vmatpush.bf16.msrb.mxu3 %v5749_v61  ;;  %v4219_v61 = vld [vmem:[%s6202_s29 + $0x38] sm:$0xff] }
0x2df5   :  { %v2985_v37 = vpop.xlane.xlu2 %2984 }
0x2df6   :  { %vm2986_vm5 = vcmp.ge.f32.partialorder %v2977_v17, %v2985_v37  ;;  %v6061_v17 = vld [vmem:[#allocation35] sm:$0xff]  ;;  %v4233_v37 = vld [vmem:[#allocation18] sm:$0xff] }
0x2df7   :  { %v2987_v38 = vsel %vm2986_vm5, %v5710_v29, 128.0  ;;  %vm6237_vm5 = vmmov %vm6231_vm1 }
0x2df8   :  { %v2988_v46 = vsel %vm2440_vm7, %v2987_v38, inf }
0x2df9   :  { %2989 = vmin.xlane.f32.xlu2 %v2988_v46 }
0x2e1b   :  { %v3041_v39 = vpop.f32.mrf.mxu3 }
0x2e1c   :  { %v3045_v4 = vsel %vm2133_vm6, %v3041_v39, -inf }
0x2e1d   :  { %3046 = vmax.xlane.f32.xlu0 %v3045_v4  ;;  %v6077_v4 = vld [vmem:[#allocation21] sm:$0x1] }
0x2e23   :  { %v3043_v60 = vpop.f32.mrf.mxu3 }
0x2e6c   :  { %v2990_v44 = vpop.xlane.xlu2 %2989 }
0x2e6d   :  { %vm2991_vm8 = vcmp.eq.f32.partialorder %v5710_v29, %v2990_v44  ;;  %vm3008_vm11 = vcmp.eq.f32.partialorder %v2990_v44, 2.0 }
0x2e6e   :  { %vm3932_vm9 = vmpackc.low %vm2991_vm8, %vm2991_vm8  ;;  %v3934_v48 = vsel %vm3008_vm11, 1.0, %v4822_v30 }
0x2e6f   :  { %3933 = vmatmul.msk.bf16.vlgmr.msra.gmra.mxu1 %vm3932_vm9, %v4821_v5  ;;  %v6050_v59 = vmax.f32 %v5956_v56, %v3934_v48  ;;  %v6058_v56 = vld [vmem:[#allocation35 + $0x8] sm:$0xff]  ;;  %vm6238_vm8 = vmmov %vm6231_vm1 }
0x2e70   :  { %3266 = vmatpush.bf16.msra.mxu1 %v4219_v61  ;;  %vm6239_vm9 = vmmov %vm6231_vm1 }
0x2e71   :  { %v3249_v33 = vsub.f32 1.0, %v6050_v59  ;;  %vm6241_vm11 = vmmov %vm6231_vm1 }
0x2e74   :  { %3267 = vmatpush.bf16.msra.mxu1 %v4220_v36 }
0x2e78   :  { %3268 = vmatpush.bf16.msra.mxu1 %v4221_v40 }
0x2e7c   :  { %3269 = vmatpush.bf16.msra.mxu1 %v4222_v50 }
0x2e80   :  { %3270 = vmatpush.bf16.msra.mxu1 %v4223_v24 }
0x2e84   :  { %3271 = vmatpush.bf16.msra.mxu1 %v4224_v54 }
0x2e88   :  { %3272 = vmatpush.bf16.msra.mxu1 %v4225_v53 }
0x2e8c   :  { %3273 = vmatpush.bf16.msra.mxu1 %v4226_v49 }
0x2e90   :  { %v3047_v3 = vpop.xlane.xlu0 %3046 }
0x2e91   :  { %v3048_v2 = vsub.f32 %v3041_v39, %v3047_v3 }
0x2e93   :  { %v3049_v55 = vmul.f32 1.442695, %v3048_v2 }
0x2e95   :  { %4192 = vpow2.f32 %v3049_v55 }
0x2e9b   :  { %v4193_v6 = vpop.eup %4192 }
0x2e9c   :  { %v3051_v7 = vsel %vm2133_vm6, %v4193_v6, 0.0 }
0x2e9d   :  { %3052 = vadd.xlane.f32.xlu1 %v3051_v7 }
0x2eec   :  { %v3004_v42 = vpop.f32.mrf.mxu1 }
0x2eed   :  { %v3086_v28 = vpack.c.bf16 %v3004_v42, %v3004_v42 }
0x2eef   :  { %3939 = vmatmul.msk.bf16.vlgmr.msra.gmra.mxu3 %vm6233_vm10, %v3086_v28  ;;  %vm6240_vm10 = vmmov %vm6231_vm1 }
0x2ef4   :  { %v3006_v47 = vpop.f32.mrf.mxu1 }
0x2f10   :  { %v3053_v27 = vpop.xlane.xlu1 %3052 }
0x2f11   :  { %4194 = vrcp.f32 %v3053_v27  ;;  %v3065_v11 = vand.u32 2147483648, %v3053_v27  ;;  %v3063_v52 = vand.u32 2147483647, %v3053_v27  ;;  %vm3059_vm14 = vweird.f32 %v3053_v27 }
0x2f13   :  { %v3066_v45 = vor.u32 1.1754944e-38, %v3065_v11  ;;  %vm3064_vm0 = vcmp.eq.f32.partialorder %v3063_v52, 8.507059e+37  ;;  %v4237_v11 = vld [vmem:[#allocation24] sm:$0xff] }
0x2f17   :  { %v4195_v8 = vpop.eup %4194 }
0x2f18   :  { %v3055_v20 = vmul.f32 %v4195_v8, %v3053_v27  ;;  %vm3060_vm12 = vweird.f32 %v4195_v8 }
0x2f19   :  { %vm3061_vm15 = vmor %vm3059_vm14, %vm3060_vm12 }
0x2f1a   :  { %v3056_v26 = vsub.f32 1.0, %v3055_v20  ;;  %v6088_v20 = vld [vmem:[#allocation29] sm:$0x1] }
0x2f1c   :  { %v3057_v16 = vmul.f32 %v4195_v8, %v3056_v26 }
0x2f1e   :  { %v3058_v10 = vadd.f32 %v4195_v8, %v3057_v16 }
0x2f20   :  { %v3062_v34 = vsel %vm3061_vm15, %v4195_v8, %v3058_v10 }
0x2f21   :  { %v3067_v63 = vsel %vm3064_vm0, %v3066_v45, %v3062_v34 }
0x2f22   :  { %v3068_v25 = vmul.f32 %v4193_v6, %v3067_v63 }
0x2f24   :  { %v3069_v23 = vpack.c.bf16 %v3068_v25, %v3068_v25  ;;  %v3252_v35 = vmul.f32 %v3249_v33, %v3068_v25 }
0x2f26   :  { %3253 = vst.msk [vmem:[%s4976_s9 + $0x3] sm:$0x1] %vm2133_vm6, %v3252_v35  ;;  %3937 = vmatmul.msk.bf16.vlgmr.msra.gmra.mxu0 %vm2159_vm13, %v3069_v23 }
0x2f27   :  { %3241 = vmatpush.bf16.msra.mxu0 %v6058_v56 }
0x2f2b   :  { %3242 = vmatpush.bf16.msra.mxu0 %v6061_v17 }
0x2f36   :  { %3940 = vmatmul.msk.bf16.vlgmr.msrb.gmra.mxu0 %vm6234_vm2, %v5992_v32 }
0x2f37   :  { %3351 = vmatpush.bf16.msrb.mxu0 %v5665_v57  ;;  %v4232_v57 = vld [vmem:[#allocation18 + $0x8] sm:$0xff] }
0x2f72   :  { %v3116_v21 = vpop.f32.mrf.mxu3 }
0x2f7a   :  { %v3118_v43 = vpop.f32.mrf.mxu3 }
0x2fa3   :  { %v3082_v19 = vpop.f32.mrf.mxu0 }
0x2fa4   :  { %v3087_v31 = vpack.c.bf16 %v3082_v19, %v3082_v19 }
0x2fa6   :  { %3938 = vmatmul.msk.bf16.vlgmr.msra.gmra.mxu2 %vm6235_vm3, %v3087_v31  ;;  %3943 = vmatmul.msk.bf16.vlgmr.msrb.gmra.mxu3 %vm6231_vm1, %v3087_v31 }
0x2fa7   :  { %3289 = vmatpush.bf16.msra.mxu2 %v4229_v13 }
0x2fab   :  { %v3084_v22 = vpop.f32.mrf.mxu0  ;;  %3290 = vmatpush.bf16.msra.mxu2 %v4230_v58 }
0x2fb3   :  { %v3130_v62 = vpop.f32.mrf.mxu0 }
0x2fb4   :  { %v3131_v32 = vadd.f32 %v6069_v18, %v3130_v62 }
0x2fb6   :  { %3942 = vmatmul.msk.bf16.vlgmr.msrb.gmra.mxu2 %vm6236_vm4, %v6007_v0  ;;  %3140 = vrot.lane.b32.xlu0 %v3131_v32, %s4799_s26 }
0x2fb7   :  { %3368 = vmatpush.bf16.msrb.mxu2 %v4232_v57 }
0x2fbb   :  { %v3132_v12 = vpop.f32.mrf.mxu0  ;;  %3369 = vmatpush.bf16.msrb.mxu2 %v4233_v37  ;;  %v4240_v37 = vld [vmem:[#allocation20] sm:$0xff] }
0x2fbc   :  { %v4238_v12 = vld [vmem:[#allocation20 + $0x8] sm:$0xff] }
0x3028   :  { %v3141_v53 = vpop.permute.xlu0 %3140 }
0x3029   :  { %v3100_v38 = vpop.f32.mrf.mxu2  ;;  %v6075_v46 = vpop.f32.mrf.mxu3 }
0x302a   :  { %v3117_v39 = vadd.f32 %v3116_v21, %v3100_v38  ;;  %v4241_v38 = vld [vmem:[#allocation26] sm:$0xff] }
0x302c   :  { %v3120_v60 = vadd.f32 %v6077_v4, %v3117_v39 }
0x302e   :  { %v3134_v44 = vadd.f32 %v3131_v32, %v3120_v60 }
0x3030   :  { %v3135_v61 = vmul.f32 0.5, %v3134_v44 }
0x3031   :  { %v3102_v36 = vpop.f32.mrf.mxu2  ;;  %v3227_v40 = vpop.f32.mrf.mxu3 }
0x3032   :  { %4196 = vtanh.f32 %v3135_v61 }
0x3038   :  { %v4197_v0 = vpop.eup %4196 }
0x3039   :  { %v3187_v50 = vpop.f32.mrf.mxu2  ;;  %v3137_v24 = vadd.f32 1.0, %v4197_v0 }
0x303a   :  { %v3188_v26 = vadd.f32 %v6088_v20, %v3187_v50 }
0x303b   :  { %v3138_v54 = vmul.f32 0.5, %v3137_v24 }
0x303d   :  { %v3143_v49 = vmul.f32 %v3141_v53, %v3138_v54  ;;  %v3150_v7 = vsub.f32 1.0, %v3138_v54  ;;  %v3156_v28 = vmul.f32 %v3138_v54, %v5987_v14  ;;  %v4236_v14 = vld [vmem:[#allocation24 + $0x8] sm:$0xff] }
0x303f   :  { %3145 = vrot.lane.b32.xlu1 %v3143_v49, %s4799_s26 }
0x3041   :  { %v3189_v3 = vpop.f32.mrf.mxu2 }
0x3042   :  { %v4243_v3 = vld [vmem:[#allocation17] sm:$0xff] }
0x30b1   :  { %v3146_v2 = vpop.permute.xlu1 %3145 }
0x30b2   :  { %v3148_v55 = vadd.f32 %v3146_v2, %v3120_v60  ;;  %v4245_v2 = vld [vmem:[#allocation36] sm:$0xff] }
0x30b4   :  { %4198 = vtanh.f32 %v3148_v55 }
0x30ba   :  { %v4199_v6 = vpop.eup %4198 }
0x30bb   :  { %3152 = vrot.lane.b32.xlu2 %v4199_v6, %s4820_s23 }
0x3115   :  { %v3153_v42 = vpop.permute.xlu2 %3152 }
0x3116   :  { %v3155_v47 = vmul.f32 %v3153_v42, %v3150_v7 }
0x3118   :  { %v6083_v27 = vadd.f32 %v3156_v28, %v3155_v47 }
0x311a   :  { %v3158_v8 = vpack.c.bf16 %v6083_v27, %v6083_v27 }
0x311c   :  { %3160 = vrot.lane.b32.xlu0 %v3158_v8, %s4820_s23 }
0x3124   :  { %3197 = vrot.lane.b32.xlu0 %v3188_v26, %s4799_s26 }
0x318e   :  { %v6092_v48 = vpop.permute.xlu0 %3160 }
0x318f   :  { %3941 = vmatmul.msk.bf16.vlgmr.msrb.gmra.mxu1 %vm6237_vm5, %v6092_v48 }
0x3190   :  { %3442 = vmatpush.bf16.msrb.mxu1 %v4236_v14 }
0x3194   :  { %3443 = vmatpush.bf16.msrb.mxu1 %v4237_v11 }
0x3196   :  { %v3198_v35 = vpop.permute.xlu0 %3197 }
0x320c   :  { %v3174_v16 = vpop.f32.mrf.mxu1 }
0x320d   :  { %v3175_v52 = vadd.f32 %v3174_v16, %v5809_v41 }
0x320f   :  { %v3191_v10 = vadd.f32 %v3188_v26, %v3175_v52 }
0x3211   :  { %v3192_v45 = vmul.f32 0.5, %v3191_v10 }
0x3213   :  { %4200 = vtanh.f32 %v3192_v45 }
0x3214   :  { %v3176_v34 = vpop.f32.mrf.mxu1 }
0x3219   :  { %v4201_v63 = vpop.eup %4200 }
0x321a   :  { %v3194_v25 = vadd.f32 1.0, %v4201_v63 }
0x321c   :  { %v3195_v23 = vmul.f32 0.5, %v3194_v25 }
0x321e   :  { %v3200_v21 = vmul.f32 %v3198_v35, %v3195_v23  ;;  %v3207_v13 = vsub.f32 1.0, %v3195_v23  ;;  %v3213_v41 = vmul.f32 %v3195_v23, %v6002_v9  ;;  %v4239_v9 = vld [vmem:[#allocation26 + $0x8] sm:$0xff] }
0x3220   :  { %3202 = vrot.lane.b32.xlu2 %v3200_v21, %s4799_s26 }
0x327a   :  { %v3203_v43 = vpop.permute.xlu2 %3202 }
0x327b   :  { %v3205_v19 = vadd.f32 %v3203_v43, %v3175_v52 }
0x327d   :  { %4202 = vtanh.f32 %v3205_v19 }
0x3283   :  { %v4203_v31 = vpop.eup %4202 }
0x3284   :  { %3209 = vrot.lane.b32.xlu1 %v4203_v31, %s4820_s23 }
0x32f6   :  { %v3210_v22 = vpop.permute.xlu1 %3209 }
0x32f7   :  { %v3212_v58 = vmul.f32 %v3210_v22, %v3207_v13 }
0x32f9   :  { %v6100_v62 = vadd.f32 %v3213_v41, %v3212_v58 }
0x32fb   :  { %v3215_v32 = vpack.c.bf16 %v6100_v62, %v6100_v62 }
0x32fd   :  { %3230 = vrot.lane.b32.xlu0 %v3215_v32, %s4820_s23 }
0x336f   :  { %v6105_v57 = vpop.permute.xlu0 %3230 }
0x3370   :  { %3944 = vmatmul.msk.bf16.vlgmr.msra.gmra.mxu0 %vm6238_vm8, %v6105_v57  ;;  %3949 = vmatmul.msk.bf16.vlgmr.msra.gmra.mxu2 %vm6239_vm9, %v6105_v57  ;;  %vm6243_vm8 = vmmov %vm6237_vm5 }
0x3371   :  { %3398 = vmatpush.bf16.msra.mxu0 %v4238_v12  ;;  %3455 = vmatpush.bf16.msra.mxu2 %v4239_v9  ;;  %vm6244_vm9 = vmmov %vm6237_vm5 }
0x3375   :  { %3399 = vmatpush.bf16.msra.mxu0 %v4240_v37  ;;  %3456 = vmatpush.bf16.msra.mxu2 %v4241_v38 }
0x33ed   :  { %v3244_v39 = vpop.f32.mrf.mxu0 }
0x33ee   :  { %v3245_v60 = vadd.f32 %v3244_v39, %v6075_v46 }
0x33f0   :  { %v3248_v44 = vadd.f32 %v3245_v60, %v5831_v51  ;;  %v4242_v51 = vld [vmem:[#allocation17 + $0x8] sm:$0xff] }
0x33f2   :  { %v3250_v61 = vmul.f32 %v3249_v33, %v3248_v44  ;;  %v3254_v36 = vsel %vm2440_vm7, %v3248_v44, -inf  ;;  %v4244_v33 = vld [vmem:[#allocation36 + $0x8] sm:$0xff] }
0x33f3   :  { %v3292_v40 = vpop.f32.mrf.mxu2  ;;  %3255 = vmax.xlane.f32.xlu1 %v3254_v36 }
0x33f4   :  { %3251 = vst [vmem:[%s4971_s20 + $0x3] sm:$0x1] %v3250_v61  ;;  %v3296_v0 = vperm.slane %v3292_v40, 0 }
0x33f5   :  { %v3246_v50 = vpop.f32.mrf.mxu0 }
0x33f6   :  { %v3297_v24 = vadd.f32 %v3296_v0, %v5669_v1 }
0x33f8   :  { %4204 = vtanh.f32 %v3297_v24 }
0x33fb   :  { %v3294_v54 = vpop.f32.mrf.mxu2 }
0x33fe   :  { %v4205_v53 = vpop.eup %4204 }
0x33ff   :  { %v3299_v49 = vpack.c.bf16 %v4205_v53, %v4205_v53 }
0x3401   :  { %v3301_v46 = vsel %vm6240_vm10, %v3299_v49, 0  ;;  %vm6247_vm10 = vmmov %vm6237_vm5 }
0x3402   :  { %3310 = vmatpush.bf16.xpose.msra.mxu3 %v3301_v46 }
0x3409   :  { %3950 = vmatmul.msk.bf16.vlgmr.msra.gmra.mxu3 %vm6241_vm11, %v6027_v15 }
0x340a   :  { %3384 = vmatpush.bf16.msrb.mxu3 %v4242_v51 }
0x340e   :  { %3385 = vmatpush.bf16.msrb.mxu3 %v4243_v3 }
0x3412   :  { %3493 = vmatpush.bf16.msra.mxu3 %v4244_v33 }
0x3416   :  { %3494 = vmatpush.bf16.msra.mxu3 %v4245_v2 }
0x3466   :  { %v3256_v55 = vpop.xlane.xlu1 %3255 }
0x3467   :  { %vm3257_vm12 = vcmp.ge.f32.partialorder %v3248_v44, %v3256_v55 }
0x3468   :  { %v3258_v7 = vsel %vm3257_vm12, %v5710_v29, 128.0 }
0x3469   :  { %v3259_v28 = vsel %vm2440_vm7, %v3258_v7, inf  ;;  %vm6242_vm7 = vmmov %vm6231_vm1 }
0x348c   :  { %v3312_v1 = vpop.f32.mrf.mxu3 }
0x348d   :  { %v3316_v6 = vsel %vm2133_vm6, %v3312_v1, -inf }
0x348e   :  { %3317 = vmax.xlane.f32.xlu2 %v3316_v6 }
0x3494   :  { %v3314_v42 = vpop.f32.mrf.mxu3 }
0x3496   :  { %3260 = vmin.xlane.f32.xlu2 %v3259_v28  ;;  %v4246_v28 = vld [vmem:[#allocation27] sm:$0x1] }
0x3501   :  { %v3318_v47 = vpop.xlane.xlu2 %3317 }
0x3502   :  { %v3319_v8 = vsub.f32 %v3312_v1, %v3318_v47 }
0x3504   :  { %v3320_v26 = vmul.f32 1.442695, %v3319_v8 }
0x3506   :  { %4206 = vpow2.f32 %v3320_v26 }
0x3509   :  { %v3261_v15 = vpop.xlane.xlu2 %3260 }
0x350a   :  { %vm3262_vm14 = vcmp.eq.f32.partialorder %v5710_v29, %v3261_v15  ;;  %vm3279_vm0 = vcmp.eq.f32.partialorder %v3261_v15, 2.0 }
0x350b   :  { %vm3946_vm15 = vmpackc.low %vm3262_vm14, %vm3262_vm14  ;;  %v3948_v25 = vsel %vm3279_vm0, 1.0, %v4822_v30 }
0x350c   :  { %v4207_v14 = vpop.eup %4206  ;;  %3947 = vmatmul.msk.bf16.vlgmr.msra.gmra.mxu1 %vm3946_vm15, %v4821_v5  ;;  %v3282_v35 = vmax.f32 %v6050_v59, %v3948_v25 }
0x350d   :  { %v3322_v11 = vsel %vm2133_vm6, %v4207_v14, 0.0 }
0x350e   :  { %3323 = vadd.xlane.f32.xlu0 %v3322_v11  ;;  %v6130_v22 = vsub.f32 1.0, %v3282_v35 }
0x3581   :  { %v3324_v16 = vpop.xlane.xlu0 %3323 }
0x3582   :  { %4208 = vrcp.f32 %v3324_v16  ;;  %v3336_v23 = vand.u32 2147483648, %v3324_v16  ;;  %v3334_v5 = vand.u32 2147483647, %v3324_v16  ;;  %vm3330_vm3 = vweird.f32 %v3324_v16 }
0x3584   :  { %v3337_v43 = vor.u32 1.1754944e-38, %v3336_v23  ;;  %vm3335_vm4 = vcmp.eq.f32.partialorder %v3334_v5, 8.507059e+37 }
0x3588   :  { %v4209_v52 = vpop.eup %4208 }
0x3589   :  { %v3326_v10 = vmul.f32 %v4209_v52, %v3324_v16  ;;  %v3275_v45 = vpop.f32.mrf.mxu1  ;;  %vm3331_vm2 = vweird.f32 %v4209_v52 }
0x358a   :  { %v3357_v34 = vpack.c.bf16 %v3275_v45, %v3275_v45  ;;  %vm3332_vm1 = vmor %vm3330_vm3, %vm3331_vm2 }
0x358b   :  { %v3327_v63 = vsub.f32 1.0, %v3326_v10 }
0x358c   :  { %3953 = vmatmul.msk.bf16.vlgmr.msrb.gmra.mxu3 %vm6242_vm7, %v3357_v34 }
0x358d   :  { %v3328_v29 = vmul.f32 %v4209_v52, %v3327_v63 }
0x358f   :  { %v3329_v21 = vadd.f32 %v4209_v52, %v3328_v29 }
0x3591   :  { %v3333_v19 = vsel %vm3332_vm1, %v4209_v52, %v3329_v21  ;;  %v3277_v31 = vpop.f32.mrf.mxu1 }
0x3592   :  { %v3338_v13 = vsel %vm3335_vm4, %v3337_v43, %v3333_v19  ;;  %v4247_v31 = vld [vmem:[%s4966_s13] sm:$0x1] }
0x3593   :  { %v3339_v30 = vmul.f32 %v4207_v14, %v3338_v13 }
0x3595   :  { %v3340_v41 = vpack.c.bf16 %v3339_v30, %v3339_v30  ;;  %v3523_v58 = vmul.f32 %v6130_v22, %v3339_v30 }
0x3597   :  { %3524 = vst.msk [vmem:[%s4976_s9 + $0x4] sm:$0x1] %vm2133_vm6, %v3523_v58  ;;  %3951 = vmatmul.msk.bf16.vlgmr.msrb.gmra.mxu0 %vm2159_vm13, %v3340_v41  ;;  %vm6245_vm6 = vmmov %vm6237_vm5 }
0x3598   :  { %3512 = vmatpush.bf16.msrb.mxu0 %v6058_v56  ;;  %vm6246_vm13 = vmmov %vm6237_vm5 }
0x359c   :  { %3513 = vmatpush.bf16.msrb.mxu0 %v6061_v17 }
0x35a7   :  { %3954 = vmatmul.msk.bf16.vlgmr.msra.gmra.mxu0 %vm6237_vm5, %v6092_v48 }
0x360f   :  { %v3387_v59 = vpop.f32.mrf.mxu3 }
0x3614   :  { %v3353_v32 = vpop.f32.mrf.mxu0 }
0x3615   :  { %v3358_v12 = vpack.c.bf16 %v3353_v32, %v3353_v32 }
0x3617   :  { %3952 = vmatmul.msk.bf16.vlgmr.msrb.gmra.mxu2 %vm6243_vm8, %v3358_v12  ;;  %v3389_v9 = vpop.f32.mrf.mxu3  ;;  %3957 = vmatmul.msk.bf16.vlgmr.msra.gmra.mxu3 %vm6244_vm9, %v3358_v12 }
0x361c   :  { %v3355_v37 = vpop.f32.mrf.mxu0 }
0x3624   :  { %v3401_v38 = vpop.f32.mrf.mxu0 }
0x3625   :  { %v3402_v39 = vadd.f32 %v6069_v18, %v3401_v38 }
0x3627   :  { %3956 = vmatmul.msk.bf16.vlgmr.msra.gmra.mxu2 %vm6245_vm6, %v6105_v57  ;;  %3411 = vrot.lane.b32.xlu1 %v3402_v39, %s4799_s26 }
0x362c   :  { %v3403_v56 = vpop.f32.mrf.mxu0 }
0x3699   :  { %v3412_v57 = vpop.permute.xlu1 %3411 }
0x369a   :  { %v3371_v17 = vpop.f32.mrf.mxu2  ;;  %v3496_v48 = vpop.f32.mrf.mxu3 }
0x369b   :  { %v3388_v60 = vadd.f32 %v3387_v59, %v3371_v17 }
0x369d   :  { %v3391_v44 = vadd.f32 %v6077_v4, %v3388_v60 }
0x369f   :  { %v3405_v61 = vadd.f32 %v3402_v39, %v3391_v44 }
0x36a1   :  { %v3406_v36 = vmul.f32 0.5, %v3405_v61 }
0x36a2   :  { %v3373_v40 = vpop.f32.mrf.mxu2  ;;  %v3498_v0 = vpop.f32.mrf.mxu3 }
0x36a3   :  { %4210 = vtanh.f32 %v3406_v36 }
0x36a9   :  { %v4211_v50 = vpop.eup %4210 }
0x36aa   :  { %v3458_v24 = vpop.f32.mrf.mxu2  ;;  %v3408_v54 = vadd.f32 1.0, %v4211_v50 }
0x36ab   :  { %v3459_v18 = vadd.f32 %v6088_v20, %v3458_v24 }
0x36ac   :  { %v3409_v53 = vmul.f32 0.5, %v3408_v54 }
0x36ad   :  { %3468 = vrot.lane.b32.xlu1 %v3459_v18, %s4799_s26 }
0x36ae   :  { %v3414_v49 = vmul.f32 %v3412_v57, %v3409_v53  ;;  %v3421_v33 = vsub.f32 1.0, %v3409_v53  ;;  %v3427_v55 = vmul.f32 %v3409_v53, %v6083_v27 }
0x36b0   :  { %3416 = vrot.lane.b32.xlu0 %v3414_v49, %s4799_s26 }
0x36b2   :  { %v3460_v46 = vpop.f32.mrf.mxu2 }
0x371f   :  { %v3469_v52 = vpop.permute.xlu1 %3468 }
0x3722   :  { %v3417_v51 = vpop.permute.xlu0 %3416 }
0x3723   :  { %v3419_v4 = vadd.f32 %v3417_v51, %v3391_v44 }
0x3725   :  { %4212 = vtanh.f32 %v3419_v4 }
0x372b   :  { %v4213_v3 = vpop.eup %4212 }
0x372c   :  { %3423 = vrot.lane.b32.xlu2 %v4213_v3, %s4820_s23 }
0x3786   :  { %v3424_v2 = vpop.permute.xlu2 %3423 }
0x3787   :  { %v3426_v1 = vmul.f32 %v3424_v2, %v3421_v33 }
0x3789   :  { %v3428_v20 = vadd.f32 %v3427_v55, %v3426_v1 }
0x378b   :  { %v3429_v6 = vpack.c.bf16 %v3428_v20, %v3428_v20 }
0x378d   :  { %3431 = vrot.lane.b32.xlu0 %v3429_v6, %s4820_s23 }
0x37ff   :  { %v3432_v7 = vpop.permute.xlu0 %3431 }
0x3800   :  { %3955 = vmatmul.msk.bf16.vlgmr.msrb.gmra.mxu1 %vm6246_vm13, %v3432_v7 }
0x387d   :  { %v3445_v42 = vpop.f32.mrf.mxu1 }
0x387e   :  { %v3446_v47 = vadd.f32 %v4246_v28, %v3445_v42 }
0x3880   :  { %v3462_v8 = vadd.f32 %v3459_v18, %v3446_v47 }
0x3882   :  { %v3463_v26 = vmul.f32 0.5, %v3462_v8 }
0x3884   :  { %4214 = vtanh.f32 %v3463_v26 }
0x3885   :  { %v3447_v15 = vpop.f32.mrf.mxu1 }
0x388a   :  { %v4215_v14 = vpop.eup %4214 }
0x388b   :  { %v3465_v11 = vadd.f32 1.0, %v4215_v14 }
0x388d   :  { %v3466_v16 = vmul.f32 0.5, %v3465_v11 }
0x388f   :  { %v3471_v27 = vmul.f32 %v3469_v52, %v3466_v16  ;;  %v3478_v63 = vsub.f32 1.0, %v3466_v16  ;;  %v3484_v23 = vmul.f32 %v3466_v16, %v6100_v62 }
0x3891   :  { %3473 = vrot.lane.b32.xlu2 %v3471_v27, %s4799_s26 }
0x38eb   :  { %v3474_v10 = vpop.permute.xlu2 %3473 }
0x38ec   :  { %v3476_v45 = vadd.f32 %v3474_v10, %v3446_v47 }
0x38ee   :  { %4216 = vtanh.f32 %v3476_v45 }
0x38f4   :  { %v4217_v34 = vpop.eup %4216 }
0x38f5   :  { %3480 = vrot.lane.b32.xlu0 %v4217_v34, %s4820_s23 }
0x3967   :  { %v3481_v25 = vpop.permute.xlu0 %3480 }
0x3968   :  { %v3483_v29 = vmul.f32 %v3481_v25, %v3478_v63 }
0x396a   :  { %v3485_v5 = vadd.f32 %v3484_v23, %v3483_v29 }
0x396c   :  { %v3486_v35 = vpack.c.bf16 %v3485_v5, %v3485_v5 }
0x396e   :  { %3501 = vrot.lane.b32.xlu1 %v3486_v35, %s4820_s23 }
0x39e0   :  { %v3502_v21 = vpop.permute.xlu1 %3501 }
0x39e1   :  { %3958 = vmatmul.msk.bf16.vlgmr.msrb.gmra.mxu0 %vm6247_vm10, %v3502_v21 }
0x3a5e   :  { %v3515_v43 = vpop.f32.mrf.mxu0 }
0x3a5f   :  { %v3516_v19 = vadd.f32 %v3515_v43, %v3496_v48 }
0x3a61   :  { %v3519_v13 = vadd.f32 %v4247_v31, %v3516_v19 }
0x3a63   :  { %v3521_v30 = vmul.f32 %v6130_v22, %v3519_v13 }
0x3a65   :  { %3522 = vst [vmem:[%s4971_s20 + $0x4] sm:$0x1] %v3521_v30 }
0x3a66   :  { %v3517_v41 = vpop.f32.mrf.mxu0 }
0x3a67   :  { %3533 = vsyncpa [#allocation6], 1 }
0x3a68   :  { %3534 = vsyncpa [#allocation10], 1 }
0x3a69   :  { %3535 = vsyncpa [#allocation13], 1 }
0x3a6a   :  { %3536 = vsyncpa [#allocation16], 1 }
0x3a6b   :  { %3537 = vsyncpa [#allocation19], 1 }
0x3a6c   :  { %3538 = vsyncpa [#allocation22], 1 }
0x3a6d   :  { %3539 = vsyncpa [#allocation25], 1 }
0x3a6e   :  { %3540 = vsyncpa [#allocation28], 1 }
0x3a6f   :  { %3541 = vsyncpa [#allocation31], 1 }
0x3a70   :  { %3542 = vsyncpa [#allocation34], 1 }
0x3a71   :  { %3543 = vsyncpa [#allocation37], 1 }
0x3a72   :  { %3544 = vsyncpa [#allocation7], 1 }

</bundles_post_ra>
